<compile_context>
chip_gen: v7x
topology: tpu7x:2x2x1
jax: 0.10.0
libtpu: 0.0.40
codegen_flags: <defaults>
</compile_context>

<pallas_src>
import numpy as np
import jax
import jax.numpy as jnp
from jax.experimental import pallas as pl
from jax.experimental.pallas import tpu as pltpu

# Keep the pure-JAX reference matmuls at f32 accuracy so it matches the MXU
# f32 path used inside the kernel.
jax.config.update("jax_default_matmul_precision", "highest")


# ----------------------------------------------------------------------------
# NeRF positional embedding constants (get_embedder(multires=10): out_dim = 63)
# ----------------------------------------------------------------------------
_NUM_FREQS = 10
_FREQ_BANDS = tuple(float(2.0 ** i) for i in range(_NUM_FREQS))  # log sampling
EMBED_DIM = 3 + 3 * 2 * _NUM_FREQS                               # 63
_DPAD = 64                                                       # lane-padded width


def _round_up(v, m):
    return -(-v // m) * m


def positional_embed(x):
    """Reference embedding: (..., 3) -> (..., 63) = [x, sin(f0 x), cos(f0 x), ...]."""
    x = x.astype(jnp.float32)
    parts = [x]
    for f in _FREQ_BANDS:
        parts.append(jnp.sin(x * f))
        parts.append(jnp.cos(x * f))
    return jnp.concatenate(parts, axis=-1)


def _embed_consts():
    """(8, _DPAD) table for the fused in-kernel embedding.

    rows 0-2 : per-x-component frequency multiplier for each embedding column
    row  3   : identity-column mask
    row  4   : sin-column mask
    row  5   : cos-column mask
    rows 6-7 : zero padding (sublane alignment); column 63 is all-zero padding.
    """
    e = np.zeros((8, _DPAD), np.float32)
    for d in range(3):                       # include_input columns
        e[d, d] = 1.0
        e[3, d] = 1.0
    col = 3
    for f in _FREQ_BANDS:
        for d in range(3):                   # sin(f * x_d) columns
            e[d, col + d] = f
            e[4, col + d] = 1.0
        col += 3
        for d in range(3):                   # cos(f * x_d) columns
            e[d, col + d] = f
            e[5, col + d] = 1.0
        col += 3
    assert col == EMBED_DIM
    return jnp.asarray(e)


def _vmem_capacity_bytes():
    """Per-core VMEM capacity; conservative (v7x) fallback if the query fails."""
    try:
        info = pltpu.get_tpu_info()
        cap = getattr(info, "vmem_capacity_bytes", None)
        if cap:
            return int(cap)
    except Exception:
        pass
    return 64 * 1024 * 1024


# ----------------------------------------------------------------------------
# Fused MFN kernel
# ----------------------------------------------------------------------------
def _make_mfn_kernel(hp, fhp, n_linear, output_act, chain_dtype):
    """hp = lane-padded hidden, fhp = num_filters * hp (multiple of 128)."""
    x_sq_shift = float(3 * _NUM_FREQS)       # sum of sin^2 + cos^2 over freqs/dims

    def kernel(*refs):
        x_ref, emb_ref, rhs_ref, b_ref, gh_ref, c_ref = refs[:6]
        wl_refs = refs[6:6 + n_linear]
        bl_refs = refs[6 + n_linear:6 + 2 * n_linear]
        wo_ref = refs[6 + 2 * n_linear]
        bo_ref = refs[7 + 2 * n_linear]
        o_ref = refs[8 + 2 * n_linear]

        x = x_ref[...].astype(jnp.float32)                       # (T, 3)
        x0, x1, x2 = x[:, 0:1], x[:, 1:2], x[:, 2:3]

        # --- fused NeRF positional embedding ---------------------------------
        # pre[:, c] = x_{src(c)} * freq(c)  (exact: freqs are powers of two)
        pre = (x0 * emb_ref[0:1, :]
               + x1 * emb_ref[1:2, :]
               + x2 * emb_ref[2:3, :])                            # (T, _DPAD)
        xe = (emb_ref[3:4, :] * pre
              + emb_ref[4:5, :] * jnp.sin(pre)
              + emb_ref[5:6, :] * jnp.cos(pre))                   # (T, _DPAD)
        # ||embed(x)||^2 = ||x||^2 + 3 * num_freqs   (sin^2 + cos^2 = 1)
        x_sq = x0 * x0 + x1 * x1 + x2 * x2 + x_sq_shift           # (T, 1)

        # --- all Gabor filters in one fused MXU matmul ------------------------
        #   rhs columns = [W_0^T .. W_{F-1}^T | (g_0 mu_0)^T .. (g_{F-1} mu_{F-1})^T]
        big = jnp.dot(xe, rhs_ref[...],
                      preferred_element_type=jnp.float32)         # (T, 2*FHP)
        lin = big[:, :fhp] + b_ref[...]                           # (T, FHP)
        expo = gh_ref[...] * x_sq + big[:, fhp:] + c_ref[...]     # (T, FHP)
        filt = (jnp.sin(lin) * jnp.exp(expo)).astype(chain_dtype)

        # --- MFN recurrence over lane-aligned per-filter slices (hp % 128 == 0)
        out = filt[:, :hp]
        for i in range(n_linear):
            hid = (jnp.dot(out, wl_refs[i][...],
                           preferred_element_type=jnp.float32)
                   + bl_refs[i][...]).astype(chain_dtype)
            out = filt[:, (i + 1) * hp:(i + 2) * hp] * hid
        y = (jnp.dot(out, wo_ref[...],
                     preferred_element_type=jnp.float32) + bo_ref[...])
        if output_act:
            y = jnp.sin(y)
        o_ref[...] = y.astype(o_ref.dtype)

    return kernel


def gabornet_pe_forward(x, params, *, tile_n=None, output_act=False,
                        chain_dtype=jnp.float32):
    """Full GaborNetPE forward. x: (..., 3) -> (..., out_size)."""
    filters, linears, (wo, bo) = params
    num_filters = len(filters)
    n_linear = len(linears)
    hidden = filters[0][0].shape[0]
    out_size = wo.shape[0]
    assert x.shape[-1] == 3, "GaborNetPE embeds 3-D coordinates"

    hp = _round_up(hidden, 128)               # lane-aligned padded hidden
    fhp = num_filters * hp                    # fused filter width (mult. of 128)

    lead = x.shape[:-1]
    x2d = x.reshape(-1, 3).astype(jnp.float32)
    n = x2d.shape[0]

    # ---- one-time parameter folding (layout plumbing stays in the wrapper) ----
    emb_c = _embed_consts()
    w_cols, g_cols, b_cols, gh_cols, c_cols = [], [], [], [], []
    for (w, b, mu, gamma) in filters:
        w = jnp.asarray(w, jnp.float32)
        mu = jnp.asarray(mu, jnp.float32)
        gamma = jnp.asarray(gamma, jnp.float32)
        b = jnp.asarray(b, jnp.float32)
        # Padded hidden lanes keep W = b = gamma = mu = 0  ->  filt = 0 there.
        w_cols.append(jnp.zeros((_DPAD, hp), jnp.float32)
                      .at[:EMBED_DIM, :hidden].set(w.T))
        g_cols.append(jnp.zeros((_DPAD, hp), jnp.float32)
                      .at[:EMBED_DIM, :hidden].set((gamma[:, None] * mu).T))
        b_cols.append(jnp.zeros((1, hp), jnp.float32).at[0, :hidden].set(b))
        gh_cols.append(jnp.zeros((1, hp), jnp.float32)
                       .at[0, :hidden].set(-0.5 * gamma))
        c_cols.append(jnp.zeros((1, hp), jnp.float32)
                      .at[0, :hidden].set(-0.5 * gamma * jnp.sum(mu * mu, -1)))
    rhs = jnp.concatenate(w_cols + g_cols, axis=1)                # (_DPAD, 2*FHP)
    b_all = jnp.concatenate(b_cols, axis=1)                       # (1, FHP)
    gh_all = jnp.concatenate(gh_cols, axis=1)                     # (1, FHP)
    c_all = jnp.concatenate(c_cols, axis=1)                       # (1, FHP)

    wl_args, bl_args = [], []
    for (wl, bl) in linears:
        wl_args.append(jnp.zeros((hp, hp), jnp.float32)
                       .at[:hidden, :hidden].set(jnp.asarray(wl, jnp.float32).T)
                       .astype(chain_dtype))
        bl_args.append(jnp.zeros((1, hp), jnp.float32)
                       .at[0, :hidden].set(jnp.asarray(bl, jnp.float32)))
    wo_arg = (jnp.zeros((hp, out_size), jnp.float32)
              .at[:hidden, :].set(jnp.asarray(wo, jnp.float32).T)
              .astype(chain_dtype))
    bo_arg = jnp.asarray(bo, jnp.float32).reshape(1, out_size)

    # ---- generation-aware row tiling ------------------------------------------
    vmem_cap = _vmem_capacity_bytes()
    vmem_limit = int(min(vmem_cap * 3 // 4, 100 * 1024 * 1024))   # ~48MiB on v7x
    chain_bytes = jnp.dtype(chain_dtype).itemsize
    if tile_n is None:
        # ~peak live f32 intermediates per row (big, lin/expo/filt, chain) + IO
        row_bytes = 4 * (6 * fhp + 4 * hp + 4 * _DPAD + out_size + 32)
        param_bytes = (4 * (8 * _DPAD + _DPAD * 2 * fhp + 3 * fhp
                            + n_linear * hp + out_size)
                       + chain_bytes * (n_linear * hp * hp + hp * out_size))
        avail = max(4 << 20, vmem_limit - 2 * param_bytes - (2 << 20))
        tile_n = int(np.clip(avail // row_bytes, 256, 2048))
        tile_n = max(256, (tile_n // 256) * 256)                  # MXU M tile
    tile_n = max(8, (int(tile_n) // 8) * 8)

    n_round8 = _round_up(max(n, 1), 8)
    if n_round8 <= tile_n:
        if n_round8 >= 512:
            # >= 2 grid steps so the "parallel" axis shards across v7x's 2 TCs.
            tile = _round_up(n_round8 // 2, 128)
        else:
            tile = n_round8                                       # tiny inputs
    else:
        tile = tile_n
    n_pad = (-n) % tile
    if n_pad:
        x2d = jnp.pad(x2d, ((0, n_pad), (0, 0)))
    n_total = x2d.shape[0]
    grid = (n_total // tile,)

    kernel = _make_mfn_kernel(hp, fhp, n_linear, output_act, chain_dtype)

    flops = n_total * (2 * _DPAD * 2 * fhp                        # fused filter matmul
                       + n_linear * 2 * hp * hp                   # hidden linears
                       + 2 * hp * out_size                        # output linear
                       + 12 * fhp + 10 * _DPAD)                   # VPU elementwise
    transcendentals = n_total * (2 * fhp + 2 * _DPAD)             # sin/exp (+embed)
    bytes_accessed = (4 * n_total * (3 + out_size)
                      + 4 * (8 * _DPAD + _DPAD * 2 * fhp + 3 * fhp
                             + n_linear * hp + out_size)
                      + chain_bytes * (n_linear * hp * hp + hp * out_size))
    cost = pl.CostEstimate(flops=int(flops),
                           transcendentals=int(transcendentals),
                           bytes_accessed=int(bytes_accessed))

    def _call(single_buffer_params):
        def _const(shape):
            # Constant index_map -> never re-DMA'd; single-buffer to save VMEM.
            if single_buffer_params:
                return pl.BlockSpec(shape, lambda i: (0, 0),
                                    pipeline_mode=pl.Buffered(1))
            return pl.BlockSpec(shape, lambda i: (0, 0))

        in_specs = [pl.BlockSpec((tile, 3), lambda i: (i, 0)),    # raw coords
                    _const((8, _DPAD)),                           # embed table
                    _const((_DPAD, 2 * fhp)),                     # stacked RHS
                    _const((1, fhp)), _const((1, fhp)), _const((1, fhp))]
        in_specs += [_const((hp, hp)) for _ in range(n_linear)]
        in_specs += [_const((1, hp)) for _ in range(n_linear)]
        in_specs += [_const((hp, out_size)), _const((1, out_size))]
        out_specs = pl.BlockSpec((tile, out_size), lambda i: (i, 0))

        fn = pl.pallas_call(
            kernel,
            out_shape=jax.ShapeDtypeStruct((n_total, out_size), jnp.float32),
            grid_spec=pltpu.PrefetchScalarGridSpec(
                num_scalar_prefetch=0,
                grid=grid,
                in_specs=in_specs,
                out_specs=out_specs),
            compiler_params=pltpu.CompilerParams(
                dimension_semantics=("parallel",),
                vmem_limit_bytes=int(vmem_limit)),
            cost_estimate=cost,
        )
        return fn(x2d, emb_c, rhs, b_all, gh_all, c_all,
                  *wl_args, *bl_args, wo_arg, bo_arg)

    try:
        out = jax.block_until_ready(_call(True))
    except Exception:
        # pl.Buffered(1) not supported by this JAX/Mosaic build -> fall back to
        # default double-buffered constant operands (correctness identical).
        out = _call(False)

    out = out[:n]
    return out.reshape(*lead, out_size)


# ----------------------------------------------------------------------------
# Parameter init (mirrors GaborNetPE.__init__ distributions, JAX RNG)
# ----------------------------------------------------------------------------
def init_gabornet_pe_params(key, hidden_size, out_size, n_layers=3,
                            input_scale=256.0, weight_scale=1.0,
                            alpha=6.0, beta=1.0):
    in_features = EMBED_DIM
    num_filters = n_layers + 1
    filt_scale = input_scale / np.sqrt(num_filters)
    filt_alpha = alpha / num_filters
    keys = jax.random.split(key, num_filters + n_layers + 1)

    filters = []
    bound_in = 1.0 / np.sqrt(in_features)
    for f in range(num_filters):
        kw, kb, km, kg = jax.random.split(keys[f], 4)
        w = jax.random.uniform(kw, (hidden_size, in_features),
                               minval=-bound_in, maxval=bound_in,
                               dtype=jnp.float32)
        mu = jax.random.uniform(km, (hidden_size, in_features),
                                minval=-1.0, maxval=1.0, dtype=jnp.float32)
        gamma = jax.random.gamma(kg, filt_alpha, (hidden_size,),
                                 dtype=jnp.float32) / beta
        w = w * (filt_scale * jnp.sqrt(gamma)[:, None])
        b = jax.random.uniform(kb, (hidden_size,), minval=-np.pi,
                               maxval=np.pi, dtype=jnp.float32)
        filters.append((w, b, mu, gamma))

    linears = []
    bound_h = 1.0 / np.sqrt(hidden_size)
    wbound = np.sqrt(weight_scale / hidden_size)
    for l in range(n_layers):
        kw, kb = jax.random.split(keys[num_filters + l], 2)
        wl = jax.random.uniform(kw, (hidden_size, hidden_size),
                                minval=-wbound, maxval=wbound, dtype=jnp.float32)
        bl = jax.random.uniform(kb, (hidden_size,), minval=-bound_h,
                                maxval=bound_h, dtype=jnp.float32)
        linears.append((wl, bl))

    kw, kb = jax.random.split(keys[num_filters + n_layers], 2)
    wo = jax.random.uniform(kw, (out_size, hidden_size), minval=-bound_h,
                            maxval=bound_h, dtype=jnp.float32)
    bo = jax.random.uniform(kb, (out_size,), minval=-bound_h, maxval=bound_h,
                            dtype=jnp.float32)
    return filters, linears, (wo, bo)


# ----------------------------------------------------------------------------
# Pure-JAX reference (mirrors the PyTorch forward)
# ----------------------------------------------------------------------------
def _reference_forward(x, params, output_act=False):
    filters, linears, (wo, bo) = params
    xe = positional_embed(x)

    def gabor(w, b, mu, gamma):
        lin = xe @ w.T + b
        D = (jnp.sum(xe ** 2, -1)[..., None]
             + jnp.sum(mu ** 2, -1)
             - 2.0 * (xe @ mu.T))
        return jnp.sin(lin) * jnp.exp(-0.5 * D * gamma)

    out = gabor(*filters[0])
    for i in range(1, len(filters)):
        out = gabor(*filters[i]) * (out @ linears[i - 1][0].T + linears[i - 1][1])
    y = out @ wo.T + bo
    if output_act:
        y = jnp.sin(y)
    return y


if __name__ == "__main__":
    key = jax.random.PRNGKey(0)
    k_x, k_p = jax.random.split(key)

    # Small shapes consistent with the module: batch=2, seq=8 3-D coordinates,
    # hidden=32, out_size=4, n_layers=3 (-> 4 Gabor filters, embed dim 63).
    batch, seq, hidden, out_size, n_layers = 2, 8, 32, 4, 3
    x = jax.random.uniform(k_x, (batch, seq, 3), minval=-1.0, maxval=1.0,
                           dtype=jnp.float32)
    # beta=40 keeps the Gaussian envelopes non-degenerate at random init so the
    # numerical check is meaningful (module default beta=1 makes exp() ~ 0).
    params = init_gabornet_pe_params(
        k_p, hidden_size=hidden, out_size=out_size, n_layers=n_layers,
        input_scale=256.0, weight_scale=1.0, alpha=6.0, beta=40.0)

    out = gabornet_pe_forward(x, params)
    out = jax.block_until_ready(out)

    ref = _reference_forward(x, params)
    # The fused in-kernel sin/cos at the highest NeRF frequency (|arg| <= 512)
    # may use a slightly different range reduction than the XLA-evaluated
    # reference embedding; the tolerance covers a few argument-ULPs there while
    # still catching any real math/layout bug (those would be O(1) errors).
    np.testing.assert_allclose(np.asarray(out), np.asarray(ref),
                               rtol=5e-3, atol=5e-4)
    print("KERNEL_OK")
</pallas_src>

<mosaic_0001>
module attributes {stable_mosaic.version = 11 : i64} {
  func.func @kernel(%arg0: i32, %arg1: memref<16x3xf32, #tpu.memory_space<vmem>>, %arg2: memref<8x64xf32, #tpu.memory_space<vmem>>, %arg3: memref<64x1024xf32, #tpu.memory_space<vmem>>, %arg4: memref<1x512xf32, #tpu.memory_space<vmem>>, %arg5: memref<1x512xf32, #tpu.memory_space<vmem>>, %arg6: memref<1x512xf32, #tpu.memory_space<vmem>>, %arg7: memref<128x128xf32, #tpu.memory_space<vmem>>, %arg8: memref<128x128xf32, #tpu.memory_space<vmem>>, %arg9: memref<128x128xf32, #tpu.memory_space<vmem>>, %arg10: memref<1x128xf32, #tpu.memory_space<vmem>>, %arg11: memref<1x128xf32, #tpu.memory_space<vmem>>, %arg12: memref<1x128xf32, #tpu.memory_space<vmem>>, %arg13: memref<128x4xf32, #tpu.memory_space<vmem>>, %arg14: memref<1x4xf32, #tpu.memory_space<vmem>>, %arg15: memref<16x4xf32, #tpu.memory_space<vmem>>) attributes {dimension_semantics = [#tpu.dimension_semantics<parallel>], iteration_bounds = array<i64: 1>, scalar_prefetch = 0 : i64, scratch_operands = 0 : i64, tpu.core_type = #tpu.core_type<tc>, window_params = [{transform_indices = @transform_0, window_bounds = array<i64: 16, 3>}, {pipeline_mode = #tpu.pipeline_mode<synchronous>, transform_indices = @transform_1, window_bounds = array<i64: 8, 64>}, {pipeline_mode = #tpu.pipeline_mode<synchronous>, transform_indices = @transform_2, window_bounds = array<i64: 64, 1024>}, {pipeline_mode = #tpu.pipeline_mode<synchronous>, transform_indices = @transform_3, window_bounds = array<i64: 1, 512>}, {pipeline_mode = #tpu.pipeline_mode<synchronous>, transform_indices = @transform_4, window_bounds = array<i64: 1, 512>}, {pipeline_mode = #tpu.pipeline_mode<synchronous>, transform_indices = @transform_5, window_bounds = array<i64: 1, 512>}, {pipeline_mode = #tpu.pipeline_mode<synchronous>, transform_indices = @transform_6, window_bounds = array<i64: 128, 128>}, {pipeline_mode = #tpu.pipeline_mode<synchronous>, transform_indices = @transform_7, window_bounds = array<i64: 128, 128>}, {pipeline_mode = #tpu.pipeline_mode<synchronous>, transform_indices = @transform_8, window_bounds = array<i64: 128, 128>}, {pipeline_mode = #tpu.pipeline_mode<synchronous>, transform_indices = @transform_9, window_bounds = array<i64: 1, 128>}, {pipeline_mode = #tpu.pipeline_mode<synchronous>, transform_indices = @transform_10, window_bounds = array<i64: 1, 128>}, {pipeline_mode = #tpu.pipeline_mode<synchronous>, transform_indices = @transform_11, window_bounds = array<i64: 1, 128>}, {pipeline_mode = #tpu.pipeline_mode<synchronous>, transform_indices = @transform_12, window_bounds = array<i64: 128, 4>}, {pipeline_mode = #tpu.pipeline_mode<synchronous>, transform_indices = @transform_13, window_bounds = array<i64: 1, 4>}, {transform_indices = @transform_14, window_bounds = array<i64: 16, 4>}]} {
    %c0 = arith.constant 0 : index
    %c0_0 = arith.constant 0 : index
    %0 = vector.load %arg1[%c0, %c0_0] : memref<16x3xf32, #tpu.memory_space<vmem>>, vector<16x3xf32>
    %1 = vector.extract_strided_slice %0 {offsets = [0, 0], sizes = [16, 1], strides = [1, 1]} : vector<16x3xf32> to vector<16x1xf32>
    %2 = vector.extract_strided_slice %0 {offsets = [0, 1], sizes = [16, 1], strides = [1, 1]} : vector<16x3xf32> to vector<16x1xf32>
    %3 = vector.extract_strided_slice %0 {offsets = [0, 2], sizes = [16, 1], strides = [1, 1]} : vector<16x3xf32> to vector<16x1xf32>
    %c0_1 = arith.constant 0 : index
    %c0_2 = arith.constant 0 : index
    %4 = vector.load %arg2[%c0_1, %c0_2] : memref<8x64xf32, #tpu.memory_space<vmem>>, vector<1x64xf32>
    %5 = vector.broadcast %1 : vector<16x1xf32> to vector<16x64xf32>
    %6 = vector.broadcast %4 : vector<1x64xf32> to vector<16x64xf32>
    %7 = arith.mulf %5, %6 : vector<16x64xf32>
    %c1 = arith.constant 1 : index
    %c0_3 = arith.constant 0 : index
    %8 = vector.load %arg2[%c1, %c0_3] : memref<8x64xf32, #tpu.memory_space<vmem>>, vector<1x64xf32>
    %9 = vector.broadcast %2 : vector<16x1xf32> to vector<16x64xf32>
    %10 = vector.broadcast %8 : vector<1x64xf32> to vector<16x64xf32>
    %11 = arith.mulf %9, %10 : vector<16x64xf32>
    %12 = arith.addf %7, %11 : vector<16x64xf32>
    %c2 = arith.constant 2 : index
    %c0_4 = arith.constant 0 : index
    %13 = vector.load %arg2[%c2, %c0_4] : memref<8x64xf32, #tpu.memory_space<vmem>>, vector<1x64xf32>
    %14 = vector.broadcast %3 : vector<16x1xf32> to vector<16x64xf32>
    %15 = vector.broadcast %13 : vector<1x64xf32> to vector<16x64xf32>
    %16 = arith.mulf %14, %15 : vector<16x64xf32>
    %17 = arith.addf %12, %16 : vector<16x64xf32>
    %c3 = arith.constant 3 : index
    %c0_5 = arith.constant 0 : index
    %18 = vector.load %arg2[%c3, %c0_5] : memref<8x64xf32, #tpu.memory_space<vmem>>, vector<1x64xf32>
    %19 = vector.broadcast %18 : vector<1x64xf32> to vector<16x64xf32>
    %20 = arith.mulf %19, %17 : vector<16x64xf32>
    %c4 = arith.constant 4 : index
    %c0_6 = arith.constant 0 : index
    %21 = vector.load %arg2[%c4, %c0_6] : memref<8x64xf32, #tpu.memory_space<vmem>>, vector<1x64xf32>
    %22 = math.sin %17 : vector<16x64xf32>
    %23 = vector.broadcast %21 : vector<1x64xf32> to vector<16x64xf32>
    %24 = arith.mulf %23, %22 : vector<16x64xf32>
    %25 = arith.addf %20, %24 : vector<16x64xf32>
    %c5 = arith.constant 5 : index
    %c0_7 = arith.constant 0 : index
    %26 = vector.load %arg2[%c5, %c0_7] : memref<8x64xf32, #tpu.memory_space<vmem>>, vector<1x64xf32>
    %27 = math.cos %17 : vector<16x64xf32>
    %28 = vector.broadcast %26 : vector<1x64xf32> to vector<16x64xf32>
    %29 = arith.mulf %28, %27 : vector<16x64xf32>
    %30 = arith.addf %25, %29 : vector<16x64xf32>
    %31 = arith.mulf %1, %1 : vector<16x1xf32>
    %32 = arith.mulf %2, %2 : vector<16x1xf32>
    %33 = arith.addf %31, %32 : vector<16x1xf32>
    %34 = arith.mulf %3, %3 : vector<16x1xf32>
    %35 = arith.addf %33, %34 : vector<16x1xf32>
    %cst = arith.constant 3.000000e+01 : f32
    %36 = vector.broadcast %cst : f32 to vector<16x1xf32>
    %37 = arith.addf %35, %36 : vector<16x1xf32>
    %c0_8 = arith.constant 0 : index
    %c0_9 = arith.constant 0 : index
    %38 = vector.load %arg3[%c0_8, %c0_9] : memref<64x1024xf32, #tpu.memory_space<vmem>>, vector<64x1024xf32>
    %cst_10 = arith.constant dense<0.000000e+00> : vector<16x1024xf32>
    %39 = tpu.matmul %30, %38, %cst_10 {dimension_numbers = #tpu.dot_dimension_numbers<[1], [0], [0], [1], [0, 0, 1, 1], [], []>, precision = #tpu.contract_precision<fp32>} : vector<16x64xf32>, vector<64x1024xf32>, vector<16x1024xf32> -> vector<16x1024xf32>
    %40 = vector.extract_strided_slice %39 {offsets = [0, 0], sizes = [16, 512], strides = [1, 1]} : vector<16x1024xf32> to vector<16x512xf32>
    %c0_11 = arith.constant 0 : index
    %c0_12 = arith.constant 0 : index
    %41 = vector.load %arg4[%c0_11, %c0_12] : memref<1x512xf32, #tpu.memory_space<vmem>>, vector<1x512xf32>
    %42 = vector.broadcast %41 : vector<1x512xf32> to vector<16x512xf32>
    %43 = arith.addf %40, %42 : vector<16x512xf32>
    %c0_13 = arith.constant 0 : index
    %c0_14 = arith.constant 0 : index
    %44 = vector.load %arg5[%c0_13, %c0_14] : memref<1x512xf32, #tpu.memory_space<vmem>>, vector<1x512xf32>
    %45 = vector.broadcast %44 : vector<1x512xf32> to vector<16x512xf32>
    %46 = vector.broadcast %37 : vector<16x1xf32> to vector<16x512xf32>
    %47 = arith.mulf %45, %46 : vector<16x512xf32>
    %48 = vector.extract_strided_slice %39 {offsets = [0, 512], sizes = [16, 512], strides = [1, 1]} : vector<16x1024xf32> to vector<16x512xf32>
    %49 = arith.addf %47, %48 : vector<16x512xf32>
    %c0_15 = arith.constant 0 : index
    %c0_16 = arith.constant 0 : index
    %50 = vector.load %arg6[%c0_15, %c0_16] : memref<1x512xf32, #tpu.memory_space<vmem>>, vector<1x512xf32>
    %51 = vector.broadcast %50 : vector<1x512xf32> to vector<16x512xf32>
    %52 = arith.addf %49, %51 : vector<16x512xf32>
    %53 = math.sin %43 : vector<16x512xf32>
    %54 = math.exp %52 : vector<16x512xf32>
    %55 = arith.mulf %53, %54 : vector<16x512xf32>
    %56 = vector.extract_strided_slice %55 {offsets = [0, 0], sizes = [16, 128], strides = [1, 1]} : vector<16x512xf32> to vector<16x128xf32>
    %c0_17 = arith.constant 0 : index
    %c0_18 = arith.constant 0 : index
    %57 = vector.load %arg7[%c0_17, %c0_18] : memref<128x128xf32, #tpu.memory_space<vmem>>, vector<128x128xf32>
    %cst_19 = arith.constant dense<0.000000e+00> : vector<16x128xf32>
    %58 = tpu.matmul %56, %57, %cst_19 {dimension_numbers = #tpu.dot_dimension_numbers<[1], [0], [0], [1], [0, 0, 1, 1], [], []>, precision = #tpu.contract_precision<fp32>} : vector<16x128xf32>, vector<128x128xf32>, vector<16x128xf32> -> vector<16x128xf32>
    %c0_20 = arith.constant 0 : index
    %c0_21 = arith.constant 0 : index
    %59 = vector.load %arg10[%c0_20, %c0_21] : memref<1x128xf32, #tpu.memory_space<vmem>>, vector<1x128xf32>
    %60 = vector.broadcast %59 : vector<1x128xf32> to vector<16x128xf32>
    %61 = arith.addf %58, %60 : vector<16x128xf32>
    %62 = vector.extract_strided_slice %55 {offsets = [0, 128], sizes = [16, 128], strides = [1, 1]} : vector<16x512xf32> to vector<16x128xf32>
    %63 = arith.mulf %62, %61 : vector<16x128xf32>
    %c0_22 = arith.constant 0 : index
    %c0_23 = arith.constant 0 : index
    %64 = vector.load %arg8[%c0_22, %c0_23] : memref<128x128xf32, #tpu.memory_space<vmem>>, vector<128x128xf32>
    %cst_24 = arith.constant dense<0.000000e+00> : vector<16x128xf32>
    %65 = tpu.matmul %63, %64, %cst_24 {dimension_numbers = #tpu.dot_dimension_numbers<[1], [0], [0], [1], [0, 0, 1, 1], [], []>, precision = #tpu.contract_precision<fp32>} : vector<16x128xf32>, vector<128x128xf32>, vector<16x128xf32> -> vector<16x128xf32>
    %c0_25 = arith.constant 0 : index
    %c0_26 = arith.constant 0 : index
    %66 = vector.load %arg11[%c0_25, %c0_26] : memref<1x128xf32, #tpu.memory_space<vmem>>, vector<1x128xf32>
    %67 = vector.broadcast %66 : vector<1x128xf32> to vector<16x128xf32>
    %68 = arith.addf %65, %67 : vector<16x128xf32>
    %69 = vector.extract_strided_slice %55 {offsets = [0, 256], sizes = [16, 128], strides = [1, 1]} : vector<16x512xf32> to vector<16x128xf32>
    %70 = arith.mulf %69, %68 : vector<16x128xf32>
    %c0_27 = arith.constant 0 : index
    %c0_28 = arith.constant 0 : index
    %71 = vector.load %arg9[%c0_27, %c0_28] : memref<128x128xf32, #tpu.memory_space<vmem>>, vector<128x128xf32>
    %cst_29 = arith.constant dense<0.000000e+00> : vector<16x128xf32>
    %72 = tpu.matmul %70, %71, %cst_29 {dimension_numbers = #tpu.dot_dimension_numbers<[1], [0], [0], [1], [0, 0, 1, 1], [], []>, precision = #tpu.contract_precision<fp32>} : vector<16x128xf32>, vector<128x128xf32>, vector<16x128xf32> -> vector<16x128xf32>
    %c0_30 = arith.constant 0 : index
    %c0_31 = arith.constant 0 : index
    %73 = vector.load %arg12[%c0_30, %c0_31] : memref<1x128xf32, #tpu.memory_space<vmem>>, vector<1x128xf32>
    %74 = vector.broadcast %73 : vector<1x128xf32> to vector<16x128xf32>
    %75 = arith.addf %72, %74 : vector<16x128xf32>
    %76 = vector.extract_strided_slice %55 {offsets = [0, 384], sizes = [16, 128], strides = [1, 1]} : vector<16x512xf32> to vector<16x128xf32>
    %77 = arith.mulf %76, %75 : vector<16x128xf32>
    %c0_32 = arith.constant 0 : index
    %c0_33 = arith.constant 0 : index
    %78 = vector.load %arg13[%c0_32, %c0_33] : memref<128x4xf32, #tpu.memory_space<vmem>>, vector<128x4xf32>
    %cst_34 = arith.constant dense<0.000000e+00> : vector<16x4xf32>
    %79 = tpu.matmul %77, %78, %cst_34 {dimension_numbers = #tpu.dot_dimension_numbers<[1], [0], [0], [1], [0, 0, 1, 1], [], []>, precision = #tpu.contract_precision<fp32>} : vector<16x128xf32>, vector<128x4xf32>, vector<16x4xf32> -> vector<16x4xf32>
    %c0_35 = arith.constant 0 : index
    %c0_36 = arith.constant 0 : index
    %80 = vector.load %arg14[%c0_35, %c0_36] : memref<1x4xf32, #tpu.memory_space<vmem>>, vector<1x4xf32>
    %81 = vector.broadcast %80 : vector<1x4xf32> to vector<16x4xf32>
    %82 = arith.addf %79, %81 : vector<16x4xf32>
    %c0_37 = arith.constant 0 : index
    %c0_38 = arith.constant 0 : index
    %83 = vector.load %arg15[%c0_37, %c0_38] : memref<16x4xf32, #tpu.memory_space<vmem>>, vector<16x4xf32>
    tpu.vector_store %arg15[%c0_37, %c0_38], %82 {strides = array<i32>} : memref<16x4xf32, #tpu.memory_space<vmem>>, vector<16x4xf32>,
    return
  }
  func.func @transform_0(%arg0: i32) -> (i32, i32) {
    %c0_i32 = arith.constant 0 : i32
    %c0_i32_0 = arith.constant 0 : i32
    return %arg0, %c0_i32 : i32, i32
  }
  func.func @transform_1(%arg0: i32) -> (i32, i32) {
    %c0_i32 = arith.constant 0 : i32
    %c0_i32_0 = arith.constant 0 : i32
    %c0_i32_1 = arith.constant 0 : i32
    return %c0_i32, %c0_i32_0 : i32, i32
  }
  func.func @transform_2(%arg0: i32) -> (i32, i32) {
    %c0_i32 = arith.constant 0 : i32
    %c0_i32_0 = arith.constant 0 : i32
    %c0_i32_1 = arith.constant 0 : i32
    return %c0_i32, %c0_i32_0 : i32, i32
  }
  func.func @transform_3(%arg0: i32) -> (i32, i32) {
    %c0_i32 = arith.constant 0 : i32
    %c0_i32_0 = arith.constant 0 : i32
    %c0_i32_1 = arith.constant 0 : i32
    return %c0_i32, %c0_i32_0 : i32, i32
  }
  func.func @transform_4(%arg0: i32) -> (i32, i32) {
    %c0_i32 = arith.constant 0 : i32
    %c0_i32_0 = arith.constant 0 : i32
    %c0_i32_1 = arith.constant 0 : i32
    return %c0_i32, %c0_i32_0 : i32, i32
  }
  func.func @transform_5(%arg0: i32) -> (i32, i32) {
    %c0_i32 = arith.constant 0 : i32
    %c0_i32_0 = arith.constant 0 : i32
    %c0_i32_1 = arith.constant 0 : i32
    return %c0_i32, %c0_i32_0 : i32, i32
  }
  func.func @transform_6(%arg0: i32) -> (i32, i32) {
    %c0_i32 = arith.constant 0 : i32
    %c0_i32_0 = arith.constant 0 : i32
    %c0_i32_1 = arith.constant 0 : i32
    return %c0_i32, %c0_i32_0 : i32, i32
  }
  func.func @transform_7(%arg0: i32) -> (i32, i32) {
    %c0_i32 = arith.constant 0 : i32
    %c0_i32_0 = arith.constant 0 : i32
    %c0_i32_1 = arith.constant 0 : i32
    return %c0_i32, %c0_i32_0 : i32, i32
  }
  func.func @transform_8(%arg0: i32) -> (i32, i32) {
    %c0_i32 = arith.constant 0 : i32
    %c0_i32_0 = arith.constant 0 : i32
    %c0_i32_1 = arith.constant 0 : i32
    return %c0_i32, %c0_i32_0 : i32, i32
  }
  func.func @transform_9(%arg0: i32) -> (i32, i32) {
    %c0_i32 = arith.constant 0 : i32
    %c0_i32_0 = arith.constant 0 : i32
    %c0_i32_1 = arith.constant 0 : i32
    return %c0_i32, %c0_i32_0 : i32, i32
  }
  func.func @transform_10(%arg0: i32) -> (i32, i32) {
    %c0_i32 = arith.constant 0 : i32
    %c0_i32_0 = arith.constant 0 : i32
    %c0_i32_1 = arith.constant 0 : i32
    return %c0_i32, %c0_i32_0 : i32, i32
  }
  func.func @transform_11(%arg0: i32) -> (i32, i32) {
    %c0_i32 = arith.constant 0 : i32
    %c0_i32_0 = arith.constant 0 : i32
    %c0_i32_1 = arith.constant 0 : i32
    return %c0_i32, %c0_i32_0 : i32, i32
  }
  func.func @transform_12(%arg0: i32) -> (i32, i32) {
    %c0_i32 = arith.constant 0 : i32
    %c0_i32_0 = arith.constant 0 : i32
    %c0_i32_1 = arith.constant 0 : i32
    return %c0_i32, %c0_i32_0 : i32, i32
  }
  func.func @transform_13(%arg0: i32) -> (i32, i32) {
    %c0_i32 = arith.constant 0 : i32
    %c0_i32_0 = arith.constant 0 : i32
    %c0_i32_1 = arith.constant 0 : i32
    return %c0_i32, %c0_i32_0 : i32, i32
  }
  func.func @transform_14(%arg0: i32) -> (i32, i32) {
    %c0_i32 = arith.constant 0 : i32
    %c0_i32_0 = arith.constant 0 : i32
    return %arg0, %c0_i32 : i32, i32
  }
}

module attributes {stable_mosaic.version = 11 : i64} {
  func.func @kernel(%arg0: i32, %arg1: memref<16x3xf32, #tpu.memory_space<vmem>>, %arg2: memref<8x64xf32, #tpu.memory_space<vmem>>, %arg3: memref<64x1024xf32, #tpu.memory_space<vmem>>, %arg4: memref<1x512xf32, #tpu.memory_space<vmem>>, %arg5: memref<1x512xf32, #tpu.memory_space<vmem>>, %arg6: memref<1x512xf32, #tpu.memory_space<vmem>>, %arg7: memref<128x128xf32, #tpu.memory_space<vmem>>, %arg8: memref<128x128xf32, #tpu.memory_space<vmem>>, %arg9: memref<128x128xf32, #tpu.memory_space<vmem>>, %arg10: memref<1x128xf32, #tpu.memory_space<vmem>>, %arg11: memref<1x128xf32, #tpu.memory_space<vmem>>, %arg12: memref<1x128xf32, #tpu.memory_space<vmem>>, %arg13: memref<128x4xf32, #tpu.memory_space<vmem>>, %arg14: memref<1x4xf32, #tpu.memory_space<vmem>>, %arg15: memref<16x4xf32, #tpu.memory_space<vmem>>) attributes {dimension_semantics = [#tpu.dimension_semantics<parallel>], iteration_bounds = array<i64: 1>, scalar_prefetch = 0 : i64, scratch_operands = 0 : i64, tpu.core_type = #tpu.core_type<tc>, window_params = [{transform_indices = @transform_0, window_bounds = array<i64: 16, 3>}, {pipeline_mode = #tpu.pipeline_mode<synchronous>, transform_indices = @transform_1, window_bounds = array<i64: 8, 64>}, {pipeline_mode = #tpu.pipeline_mode<synchronous>, transform_indices = @transform_2, window_bounds = array<i64: 64, 1024>}, {pipeline_mode = #tpu.pipeline_mode<synchronous>, transform_indices = @transform_3, window_bounds = array<i64: 1, 512>}, {pipeline_mode = #tpu.pipeline_mode<synchronous>, transform_indices = @transform_4, window_bounds = array<i64: 1, 512>}, {pipeline_mode = #tpu.pipeline_mode<synchronous>, transform_indices = @transform_5, window_bounds = array<i64: 1, 512>}, {pipeline_mode = #tpu.pipeline_mode<synchronous>, transform_indices = @transform_6, window_bounds = array<i64: 128, 128>}, {pipeline_mode = #tpu.pipeline_mode<synchronous>, transform_indices = @transform_7, window_bounds = array<i64: 128, 128>}, {pipeline_mode = #tpu.pipeline_mode<synchronous>, transform_indices = @transform_8, window_bounds = array<i64: 128, 128>}, {pipeline_mode = #tpu.pipeline_mode<synchronous>, transform_indices = @transform_9, window_bounds = array<i64: 1, 128>}, {pipeline_mode = #tpu.pipeline_mode<synchronous>, transform_indices = @transform_10, window_bounds = array<i64: 1, 128>}, {pipeline_mode = #tpu.pipeline_mode<synchronous>, transform_indices = @transform_11, window_bounds = array<i64: 1, 128>}, {pipeline_mode = #tpu.pipeline_mode<synchronous>, transform_indices = @transform_12, window_bounds = array<i64: 128, 4>}, {pipeline_mode = #tpu.pipeline_mode<synchronous>, transform_indices = @transform_13, window_bounds = array<i64: 1, 4>}, {transform_indices = @transform_14, window_bounds = array<i64: 16, 4>}]} {
    %c0 = arith.constant 0 : index
    %c0_0 = arith.constant 0 : index
    %0 = vector.load %arg1[%c0, %c0_0] : memref<16x3xf32, #tpu.memory_space<vmem>>, vector<16x3xf32>
    %1 = vector.extract_strided_slice %0 {offsets = [0, 0], sizes = [16, 1], strides = [1, 1]} : vector<16x3xf32> to vector<16x1xf32>
    %2 = vector.extract_strided_slice %0 {offsets = [0, 1], sizes = [16, 1], strides = [1, 1]} : vector<16x3xf32> to vector<16x1xf32>
    %3 = vector.extract_strided_slice %0 {offsets = [0, 2], sizes = [16, 1], strides = [1, 1]} : vector<16x3xf32> to vector<16x1xf32>
    %c0_1 = arith.constant 0 : index
    %c0_2 = arith.constant 0 : index
    %4 = vector.load %arg2[%c0_1, %c0_2] : memref<8x64xf32, #tpu.memory_space<vmem>>, vector<1x64xf32>
    %5 = vector.broadcast %1 : vector<16x1xf32> to vector<16x64xf32>
    %6 = vector.broadcast %4 : vector<1x64xf32> to vector<16x64xf32>
    %7 = arith.mulf %5, %6 : vector<16x64xf32>
    %c1 = arith.constant 1 : index
    %c0_3 = arith.constant 0 : index
    %8 = vector.load %arg2[%c1, %c0_3] : memref<8x64xf32, #tpu.memory_space<vmem>>, vector<1x64xf32>
    %9 = vector.broadcast %2 : vector<16x1xf32> to vector<16x64xf32>
    %10 = vector.broadcast %8 : vector<1x64xf32> to vector<16x64xf32>
    %11 = arith.mulf %9, %10 : vector<16x64xf32>
    %12 = arith.addf %7, %11 : vector<16x64xf32>
    %c2 = arith.constant 2 : index
    %c0_4 = arith.constant 0 : index
    %13 = vector.load %arg2[%c2, %c0_4] : memref<8x64xf32, #tpu.memory_space<vmem>>, vector<1x64xf32>
    %14 = vector.broadcast %3 : vector<16x1xf32> to vector<16x64xf32>
    %15 = vector.broadcast %13 : vector<1x64xf32> to vector<16x64xf32>
    %16 = arith.mulf %14, %15 : vector<16x64xf32>
    %17 = arith.addf %12, %16 : vector<16x64xf32>
    %c3 = arith.constant 3 : index
    %c0_5 = arith.constant 0 : index
    %18 = vector.load %arg2[%c3, %c0_5] : memref<8x64xf32, #tpu.memory_space<vmem>>, vector<1x64xf32>
    %19 = vector.broadcast %18 : vector<1x64xf32> to vector<16x64xf32>
    %20 = arith.mulf %19, %17 : vector<16x64xf32>
    %c4 = arith.constant 4 : index
    %c0_6 = arith.constant 0 : index
    %21 = vector.load %arg2[%c4, %c0_6] : memref<8x64xf32, #tpu.memory_space<vmem>>, vector<1x64xf32>
    %22 = math.sin %17 : vector<16x64xf32>
    %23 = vector.broadcast %21 : vector<1x64xf32> to vector<16x64xf32>
    %24 = arith.mulf %23, %22 : vector<16x64xf32>
    %25 = arith.addf %20, %24 : vector<16x64xf32>
    %c5 = arith.constant 5 : index
    %c0_7 = arith.constant 0 : index
    %26 = vector.load %arg2[%c5, %c0_7] : memref<8x64xf32, #tpu.memory_space<vmem>>, vector<1x64xf32>
    %27 = math.cos %17 : vector<16x64xf32>
    %28 = vector.broadcast %26 : vector<1x64xf32> to vector<16x64xf32>
    %29 = arith.mulf %28, %27 : vector<16x64xf32>
    %30 = arith.addf %25, %29 : vector<16x64xf32>
    %31 = arith.mulf %1, %1 : vector<16x1xf32>
    %32 = arith.mulf %2, %2 : vector<16x1xf32>
    %33 = arith.addf %31, %32 : vector<16x1xf32>
    %34 = arith.mulf %3, %3 : vector<16x1xf32>
    %35 = arith.addf %33, %34 : vector<16x1xf32>
    %cst = arith.constant 3.000000e+01 : f32
    %36 = vector.broadcast %cst : f32 to vector<16x1xf32>
    %37 = arith.addf %35, %36 : vector<16x1xf32>
    %c0_8 = arith.constant 0 : index
    %c0_9 = arith.constant 0 : index
    %38 = vector.load %arg3[%c0_8, %c0_9] : memref<64x1024xf32, #tpu.memory_space<vmem>>, vector<64x1024xf32>
    %cst_10 = arith.constant dense<0.000000e+00> : vector<16x1024xf32>
    %39 = tpu.matmul %30, %38, %cst_10 {dimension_numbers = #tpu.dot_dimension_numbers<[1], [0], [0], [1], [0, 0, 1, 1], [], []>, precision = #tpu.contract_precision<fp32>} : vector<16x64xf32>, vector<64x1024xf32>, vector<16x1024xf32> -> vector<16x1024xf32>
    %40 = vector.extract_strided_slice %39 {offsets = [0, 0], sizes = [16, 512], strides = [1, 1]} : vector<16x1024xf32> to vector<16x512xf32>
    %c0_11 = arith.constant 0 : index
    %c0_12 = arith.constant 0 : index
    %41 = vector.load %arg4[%c0_11, %c0_12] : memref<1x512xf32, #tpu.memory_space<vmem>>, vector<1x512xf32>
    %42 = vector.broadcast %41 : vector<1x512xf32> to vector<16x512xf32>
    %43 = arith.addf %40, %42 : vector<16x512xf32>
    %c0_13 = arith.constant 0 : index
    %c0_14 = arith.constant 0 : index
    %44 = vector.load %arg5[%c0_13, %c0_14] : memref<1x512xf32, #tpu.memory_space<vmem>>, vector<1x512xf32>
    %45 = vector.broadcast %44 : vector<1x512xf32> to vector<16x512xf32>
    %46 = vector.broadcast %37 : vector<16x1xf32> to vector<16x512xf32>
    %47 = arith.mulf %45, %46 : vector<16x512xf32>
    %48 = vector.extract_strided_slice %39 {offsets = [0, 512], sizes = [16, 512], strides = [1, 1]} : vector<16x1024xf32> to vector<16x512xf32>
    %49 = arith.addf %47, %48 : vector<16x512xf32>
    %c0_15 = arith.constant 0 : index
    %c0_16 = arith.constant 0 : index
    %50 = vector.load %arg6[%c0_15, %c0_16] : memref<1x512xf32, #tpu.memory_space<vmem>>, vector<1x512xf32>
    %51 = vector.broadcast %50 : vector<1x512xf32> to vector<16x512xf32>
    %52 = arith.addf %49, %51 : vector<16x512xf32>
    %53 = math.sin %43 : vector<16x512xf32>
    %54 = math.exp %52 : vector<16x512xf32>
    %55 = arith.mulf %53, %54 : vector<16x512xf32>
    %56 = vector.extract_strided_slice %55 {offsets = [0, 0], sizes = [16, 128], strides = [1, 1]} : vector<16x512xf32> to vector<16x128xf32>
    %c0_17 = arith.constant 0 : index
    %c0_18 = arith.constant 0 : index
    %57 = vector.load %arg7[%c0_17, %c0_18] : memref<128x128xf32, #tpu.memory_space<vmem>>, vector<128x128xf32>
    %cst_19 = arith.constant dense<0.000000e+00> : vector<16x128xf32>
    %58 = tpu.matmul %56, %57, %cst_19 {dimension_numbers = #tpu.dot_dimension_numbers<[1], [0], [0], [1], [0, 0, 1, 1], [], []>, precision = #tpu.contract_precision<fp32>} : vector<16x128xf32>, vector<128x128xf32>, vector<16x128xf32> -> vector<16x128xf32>
    %c0_20 = arith.constant 0 : index
    %c0_21 = arith.constant 0 : index
    %59 = vector.load %arg10[%c0_20, %c0_21] : memref<1x128xf32, #tpu.memory_space<vmem>>, vector<1x128xf32>
    %60 = vector.broadcast %59 : vector<1x128xf32> to vector<16x128xf32>
    %61 = arith.addf %58, %60 : vector<16x128xf32>
    %62 = vector.extract_strided_slice %55 {offsets = [0, 128], sizes = [16, 128], strides = [1, 1]} : vector<16x512xf32> to vector<16x128xf32>
    %63 = arith.mulf %62, %61 : vector<16x128xf32>
    %c0_22 = arith.constant 0 : index
    %c0_23 = arith.constant 0 : index
    %64 = vector.load %arg8[%c0_22, %c0_23] : memref<128x128xf32, #tpu.memory_space<vmem>>, vector<128x128xf32>
    %cst_24 = arith.constant dense<0.000000e+00> : vector<16x128xf32>
    %65 = tpu.matmul %63, %64, %cst_24 {dimension_numbers = #tpu.dot_dimension_numbers<[1], [0], [0], [1], [0, 0, 1, 1], [], []>, precision = #tpu.contract_precision<fp32>} : vector<16x128xf32>, vector<128x128xf32>, vector<16x128xf32> -> vector<16x128xf32>
    %c0_25 = arith.constant 0 : index
    %c0_26 = arith.constant 0 : index
    %66 = vector.load %arg11[%c0_25, %c0_26] : memref<1x128xf32, #tpu.memory_space<vmem>>, vector<1x128xf32>
    %67 = vector.broadcast %66 : vector<1x128xf32> to vector<16x128xf32>
    %68 = arith.addf %65, %67 : vector<16x128xf32>
    %69 = vector.extract_strided_slice %55 {offsets = [0, 256], sizes = [16, 128], strides = [1, 1]} : vector<16x512xf32> to vector<16x128xf32>
    %70 = arith.mulf %69, %68 : vector<16x128xf32>
    %c0_27 = arith.constant 0 : index
    %c0_28 = arith.constant 0 : index
    %71 = vector.load %arg9[%c0_27, %c0_28] : memref<128x128xf32, #tpu.memory_space<vmem>>, vector<128x128xf32>
    %cst_29 = arith.constant dense<0.000000e+00> : vector<16x128xf32>
    %72 = tpu.matmul %70, %71, %cst_29 {dimension_numbers = #tpu.dot_dimension_numbers<[1], [0], [0], [1], [0, 0, 1, 1], [], []>, precision = #tpu.contract_precision<fp32>} : vector<16x128xf32>, vector<128x128xf32>, vector<16x128xf32> -> vector<16x128xf32>
    %c0_30 = arith.constant 0 : index
    %c0_31 = arith.constant 0 : index
    %73 = vector.load %arg12[%c0_30, %c0_31] : memref<1x128xf32, #tpu.memory_space<vmem>>, vector<1x128xf32>
    %74 = vector.broadcast %73 : vector<1x128xf32> to vector<16x128xf32>
    %75 = arith.addf %72, %74 : vector<16x128xf32>
    %76 = vector.extract_strided_slice %55 {offsets = [0, 384], sizes = [16, 128], strides = [1, 1]} : vector<16x512xf32> to vector<16x128xf32>
    %77 = arith.mulf %76, %75 : vector<16x128xf32>
    %c0_32 = arith.constant 0 : index
    %c0_33 = arith.constant 0 : index
    %78 = vector.load %arg13[%c0_32, %c0_33] : memref<128x4xf32, #tpu.memory_space<vmem>>, vector<128x4xf32>
    %cst_34 = arith.constant dense<0.000000e+00> : vector<16x4xf32>
    %79 = tpu.matmul %77, %78, %cst_34 {dimension_numbers = #tpu.dot_dimension_numbers<[1], [0], [0], [1], [0, 0, 1, 1], [], []>, precision = #tpu.contract_precision<fp32>} : vector<16x128xf32>, vector<128x4xf32>, vector<16x4xf32> -> vector<16x4xf32>
    %c0_35 = arith.constant 0 : index
    %c0_36 = arith.constant 0 : index
    %80 = vector.load %arg14[%c0_35, %c0_36] : memref<1x4xf32, #tpu.memory_space<vmem>>, vector<1x4xf32>
    %81 = vector.broadcast %80 : vector<1x4xf32> to vector<16x4xf32>
    %82 = arith.addf %79, %81 : vector<16x4xf32>
    %c0_37 = arith.constant 0 : index
    %c0_38 = arith.constant 0 : index
    %83 = vector.load %arg15[%c0_37, %c0_38] : memref<16x4xf32, #tpu.memory_space<vmem>>, vector<16x4xf32>
    tpu.vector_store %arg15[%c0_37, %c0_38], %82 {strides = array<i32>} : memref<16x4xf32, #tpu.memory_space<vmem>>, vector<16x4xf32>,
    return
  }
  func.func @transform_0(%arg0: i32) -> (i32, i32) {
    %c0_i32 = arith.constant 0 : i32
    %c0_i32_0 = arith.constant 0 : i32
    return %arg0, %c0_i32 : i32, i32
  }
  func.func @transform_1(%arg0: i32) -> (i32, i32) {
    %c0_i32 = arith.constant 0 : i32
    %c0_i32_0 = arith.constant 0 : i32
    %c0_i32_1 = arith.constant 0 : i32
    return %c0_i32, %c0_i32_0 : i32, i32
  }
  func.func @transform_2(%arg0: i32) -> (i32, i32) {
    %c0_i32 = arith.constant 0 : i32
    %c0_i32_0 = arith.constant 0 : i32
    %c0_i32_1 = arith.constant 0 : i32
    return %c0_i32, %c0_i32_0 : i32, i32
  }
  func.func @transform_3(%arg0: i32) -> (i32, i32) {
    %c0_i32 = arith.constant 0 : i32
    %c0_i32_0 = arith.constant 0 : i32
    %c0_i32_1 = arith.constant 0 : i32
    return %c0_i32, %c0_i32_0 : i32, i32
  }
  func.func @transform_4(%arg0: i32) -> (i32, i32) {
    %c0_i32 = arith.constant 0 : i32
    %c0_i32_0 = arith.constant 0 : i32
    %c0_i32_1 = arith.constant 0 : i32
    return %c0_i32, %c0_i32_0 : i32, i32
  }
  func.func @transform_5(%arg0: i32) -> (i32, i32) {
    %c0_i32 = arith.constant 0 : i32
    %c0_i32_0 = arith.constant 0 : i32
    %c0_i32_1 = arith.constant 0 : i32
    return %c0_i32, %c0_i32_0 : i32, i32
  }
  func.func @transform_6(%arg0: i32) -> (i32, i32) {
    %c0_i32 = arith.constant 0 : i32
    %c0_i32_0 = arith.constant 0 : i32
    %c0_i32_1 = arith.constant 0 : i32
    return %c0_i32, %c0_i32_0 : i32, i32
  }
  func.func @transform_7(%arg0: i32) -> (i32, i32) {
    %c0_i32 = arith.constant 0 : i32
    %c0_i32_0 = arith.constant 0 : i32
    %c0_i32_1 = arith.constant 0 : i32
    return %c0_i32, %c0_i32_0 : i32, i32
  }
  func.func @transform_8(%arg0: i32) -> (i32, i32) {
    %c0_i32 = arith.constant 0 : i32
    %c0_i32_0 = arith.constant 0 : i32
    %c0_i32_1 = arith.constant 0 : i32
    return %c0_i32, %c0_i32_0 : i32, i32
  }
  func.func @transform_9(%arg0: i32) -> (i32, i32) {
    %c0_i32 = arith.constant 0 : i32
    %c0_i32_0 = arith.constant 0 : i32
    %c0_i32_1 = arith.constant 0 : i32
    return %c0_i32, %c0_i32_0 : i32, i32
  }
  func.func @transform_10(%arg0: i32) -> (i32, i32) {
    %c0_i32 = arith.constant 0 : i32
    %c0_i32_0 = arith.constant 0 : i32
    %c0_i32_1 = arith.constant 0 : i32
    return %c0_i32, %c0_i32_0 : i32, i32
  }
  func.func @transform_11(%arg0: i32) -> (i32, i32) {
    %c0_i32 = arith.constant 0 : i32
    %c0_i32_0 = arith.constant 0 : i32
    %c0_i32_1 = arith.constant 0 : i32
    return %c0_i32, %c0_i32_0 : i32, i32
  }
  func.func @transform_12(%arg0: i32) -> (i32, i32) {
    %c0_i32 = arith.constant 0 : i32
    %c0_i32_0 = arith.constant 0 : i32
    %c0_i32_1 = arith.constant 0 : i32
    return %c0_i32, %c0_i32_0 : i32, i32
  }
  func.func @transform_13(%arg0: i32) -> (i32, i32) {
    %c0_i32 = arith.constant 0 : i32
    %c0_i32_0 = arith.constant 0 : i32
    %c0_i32_1 = arith.constant 0 : i32
    return %c0_i32, %c0_i32_0 : i32, i32
  }
  func.func @transform_14(%arg0: i32) -> (i32, i32) {
    %c0_i32 = arith.constant 0 : i32
    %c0_i32_0 = arith.constant 0 : i32
    return %arg0, %c0_i32 : i32, i32
  }
}

</mosaic_0001>

<bundles_post_ra>
// kernel: tpu_custom_call.1
= control target key start
LH: loop header
LB: loop body
LE: loop exit
PB: predicated region body
PF: predicated region fallthrough
CT: control target
= control target key end

     0   :  { %19 = vsyncpa [#allocation3], 0  ;;  %s13787_s0 = inlined_call_operand.vmem [shape: f32[16,3], index: 0, kind: input, shape index: {}]   ;;  %s13788_s1 = inlined_call_operand.vmem [shape: f32[8,64], index: 1, kind: input, shape index: {}]   ;;  %s13789_s2 = inlined_call_operand.hbm [shape: f32[64,1024], index: 2, kind: input, shape index: {}]   ;;  %s13790_s3 = inlined_call_operand.vmem [shape: f32[1,512], index: 3, kind: input, shape index: {}]   ;;  %s13791_s4 = inlined_call_operand.vmem [shape: f32[1,512], index: 4, kind: input, shape index: {}]   ;;  %s13792_s5 = inlined_call_operand.vmem [shape: f32[1,512], index: 5, kind: input, shape index: {}]   ;;  %s13793_s6 = inlined_call_operand.vmem [shape: f32[128,128], index: 6, kind: input, shape index: {}]   ;;  %s13794_s7 = inlined_call_operand.hbm [shape: f32[128,128], index: 7, kind: input, shape index: {}]   ;;  %s13795_s8 = inlined_call_operand.hbm [shape: f32[128,128], index: 8, kind: input, shape index: {}]   ;;  %s13796_s9 = inlined_call_operand.vmem [shape: f32[1,128], index: 9, kind: input, shape index: {}]   ;;  %s13797_s10 = inlined_call_operand.vmem [shape: f32[1,128], index: 10, kind: input, shape index: {}]   ;;  %s13798_s11 = inlined_call_operand.vmem [shape: f32[1,128], index: 11, kind: input, shape index: {}]   ;;  %s13799_s12 = inlined_call_operand.vmem [shape: f32[128,4], index: 12, kind: input, shape index: {}]   ;;  %s13800_s13 = inlined_call_operand.vmem [shape: f32[1,4], index: 13, kind: input, shape index: {}]   ;;  %s13801_s14 = inlined_call_operand.vmem [shape: f32[16,4], index: 14, kind: output, shape index: {}]  }
   0x1   :  { %20 = vsyncpa [#allocation5], 0  ;;  %s10069_s29 = smov [#allocation4]   ;;  %s9999_s17 = scalar_lea.hbm %s13794_s7, 2048 }
   0x2   :  { %s50_s30 = sshll.u32 %s10069_s29, 4  ;;  %p10000_p0 = scmp.ne.s32.totalorder %s13794_s7, %s9999_s17  ;;  %s51_s30 = int_to_ptr.vmem [resolvable:$true] %s50_s30 }
   0x3   :  { %p10003_p1 = scmp.lt.u32.totalorder %s9999_s17, %s13794_s7 }
   0x5   :  { %p10005_p2 = pnand %p10003_p1, %p10000_p0 }
   0x7   :  { %10008 = shalt.err (!%p10005_p2)
}
   0x8   :  { %s10009_s22 = scalar_lea.vmem %s51_s30, 2048  ;;  %p10014_p4 = scmp.lt.s32.totalorder %s51_s30, %s51_s30 }
   0x9   :  { %p10010_p3 = scmp.ne.s32.totalorder %s51_s30, %s10009_s22  ;;  %p10015_p5 = scmp.lt.s32.totalorder %s10009_s22, %s10009_s22 }
   0xb   :  { %p10016_p6 = por %p10015_p5, %p10014_p4 }
   0xd   :  { %p10017_p7 = pnand %p10016_p6, %p10010_p3 }
   0xf   :  { %10020 = shalt.err (!%p10017_p7)
}
  0x10   :  { %s10070_s23 = smov 128   ;;  %s10071_s24 = smov 8  }
  0x11   :  { %56 = dma.hbm_to_vmem [thread:$0]  %s13794_s7, 2048, %s51_s30, [#allocation5], %s10070_s23, %s10070_s23, %s10071_s24  }
  0x12   :  { %s10072_s27 = smov [#allocation2]   ;;  %s10021_s16 = scalar_lea.hbm %s13789_s2, 8192 }
  0x13   :  { %s30_s28 = sshll.u32 %s10072_s27, 4  ;;  %p10022_p8 = scmp.ne.s32.totalorder %s13789_s2, %s10021_s16  ;;  %s31_s28 = int_to_ptr.vmem [resolvable:$true] %s30_s28 }
  0x14   :  { %p10025_p9 = scmp.lt.u32.totalorder %s10021_s16, %s13789_s2 }
  0x16   :  { %p10027_p10 = pnand %p10025_p9, %p10022_p8 }
  0x18   :  { %10030 = shalt.err (!%p10027_p10)
}
  0x19   :  { %s10031_s21 = scalar_lea.vmem %s31_s28, 8192  ;;  %p10036_p12 = scmp.lt.s32.totalorder %s31_s28, %s31_s28 }
  0x1a   :  { %p10032_p11 = scmp.ne.s32.totalorder %s31_s28, %s10031_s21  ;;  %p10037_p13 = scmp.lt.s32.totalorder %s10031_s21, %s10031_s21 }
  0x1c   :  { %p10038_p0 = por %p10037_p13, %p10036_p12 }
  0x1e   :  { %p10039_p1 = pnand %p10038_p0, %p10032_p11 }
  0x20   :  { %10042 = shalt.err (!%p10039_p1)
}
  0x21   :  { %s10073_s7 = smov 1024   ;;  %s10074_s30 = smov 64  }
  0x22   :  { %36 = dma.hbm_to_vmem [thread:$0]  %s13789_s2, 8192, %s31_s28, [#allocation3], %s10073_s7, %s10073_s7, %s10074_s30  }
  0x23   :  { %s10075_s26 = smov [#allocation6]   ;;  %s10043_s16 = scalar_lea.hbm %s13795_s8, 2048 }
  0x24   :  { %s62_s27 = sshll.u32 %s10075_s26, 4  ;;  %p10044_p2 = scmp.ne.s32.totalorder %s13795_s8, %s10043_s16  ;;  %s63_s27 = int_to_ptr.vmem [resolvable:$true] %s62_s27 }
  0x25   :  { %p10047_p3 = scmp.lt.u32.totalorder %s10043_s16, %s13795_s8 }
  0x27   :  { %p10049_p4 = pnand %p10047_p3, %p10044_p2 }
  0x29   :  { %10052 = shalt.err (!%p10049_p4)
}
  0x2a   :  { %s10053_s21 = scalar_lea.vmem %s63_s27, 2048  ;;  %p10058_p6 = scmp.lt.s32.totalorder %s63_s27, %s63_s27 }
  0x2b   :  { %p10054_p5 = scmp.ne.s32.totalorder %s63_s27, %s10053_s21  ;;  %p10059_p7 = scmp.lt.s32.totalorder %s10053_s21, %s10053_s21 }
  0x2d   :  { %p10060_p8 = por %p10059_p7, %p10058_p6 }
  0x2f   :  { %p10061_p9 = pnand %p10060_p8, %p10054_p5 }
  0x31   :  { %10064 = shalt.err (!%p10061_p9)
}
  0x32   :  { %68 = dma.hbm_to_vmem [thread:$0]  %s13795_s8, 2048, %s63_s27, [#allocation5], %s10070_s23, %s10070_s23, %s10071_s24  }
  0x33   :  { %10065 = dma.done.wait [#allocation3], 8192  }
  0x34   :  { %10066 = vsyncadd [#allocation3], 4294959104 }
  0x35   :  { %10067 = dma.done.wait [#allocation5], 4096  }
  0x36   :  { %10068 = vsyncadd [#allocation5], 4294963200  ;;  %v10076_v0 = vmov 2   ;;  %v10077_v1 = vmov 0   ;;  %v88_v2 = vld [vmem:[%s13787_s0] sm:$0xff]  ;;  %v89_v3 = vld [vmem:[%s13787_s0 + $0x8] sm:$0xff] }
  0x37   :  { %9935 = vset.pattern.permute.xlu1 %v10076_v0  ;;  %9933 = vset.pattern.permute.xlu0 %v10077_v1  ;;  %v10078_v4 = vmov 1   ;;  %v603_v5 = vld [vmem:[#allocation2 + $0x8] sm:$0xff]  ;;  %v605_v7 = vld [vmem:[#allocation2 + $0x18] sm:$0xff]  ;;  %v602_v12 = vld [vmem:[#allocation2] sm:$0xff]  ;;  %s10086_s2 = smov 127   ;;  %s10087_s28 = smov 126  }
  0x38   :  { %126 = vperm.xlu1 %9935, %v88_v2   ;;  %93 = vperm.xlu0 %9933, %v88_v2   ;;  %v611_v6 = vld [vmem:[#allocation2 + $0x48] sm:$0xff]  ;;  %v673_v8 = vand.u32 4294901760, %v603_v5  ;;  %v613_v10 = vld [vmem:[#allocation2 + $0x58] sm:$0xff]  ;;  %v1369_v11 = vand.u32 4294901760, %v605_v7  ;;  %v610_v14 = vld [vmem:[#allocation2 + $0x40] sm:$0xff]  ;;  %v675_v15 = vand.u32 4294901760, %v602_v12 }
  0x39   :  { %v677_v9 = vand.u32 4294901760, %v611_v6  ;;  %v1373_v13 = vand.u32 4294901760, %v613_v10  ;;  %v604_v16 = vld [vmem:[#allocation2 + $0x10] sm:$0xff]  ;;  %v679_v19 = vand.u32 4294901760, %v610_v14  ;;  %v10215_v23 = vld [vmem:[#allocation2 + $0x88] sm:$0xff]  ;;  %v10219_v25 = vld [vmem:[#allocation2 + $0x98] sm:$0xff] }
  0x3a   :  { %v612_v17 = vld [vmem:[#allocation2 + $0x50] sm:$0xff]  ;;  %v1371_v20 = vand.u32 4294901760, %v604_v16  ;;  %v10217_v24 = vld [vmem:[#allocation2 + $0xc8] sm:$0xff]  ;;  %v681_v28 = vand.u32 4294901760, %v10215_v23  ;;  %v629_v30 = vld [vmem:[#allocation2 + $0xd8] sm:$0xff]  ;;  %v1377_v33 = vand.u32 4294901760, %v10219_v25  ;;  %v10242_v58 = vsub.f32 %v603_v5, %v673_v8 }
  0x3b   :  { %v10211_v18 = vpack.c.bf16 %v677_v9, %v673_v8  ;;  %v1375_v21 = vand.u32 4294901760, %v612_v17  ;;  %v10213_v22 = vpack.c.bf16 %v1373_v13, %v1369_v11  ;;  %v10222_v26 = vpack.c.bf16 %v679_v19, %v675_v15  ;;  %v618_v31 = vld [vmem:[#allocation2 + $0x80] sm:$0xff]  ;;  %v620_v37 = vld [vmem:[#allocation2 + $0x90] sm:$0xff]  ;;  %v635_v44 = vld [vmem:[#allocation2 + $0x108] sm:$0xff] }
  0x3c   :  { %9936 = vset.pattern.permute.xlu1 %v10077_v1  ;;  %9934 = vset.pattern.permute.xlu0 %v10078_v4  ;;  %v685_v29 = vand.u32 4294901760, %v10217_v24  ;;  %v626_v32 = vld [vmem:[#allocation2 + $0xc0] sm:$0xff]  ;;  %v1381_v34 = vand.u32 4294901760, %v629_v30  ;;  %v683_v35 = vand.u32 4294901760, %v618_v31  ;;  %v628_v38 = vld [vmem:[#allocation2 + $0xd0] sm:$0xff]  ;;  %v1379_v40 = vand.u32 4294901760, %v620_v37 }
  0x3d   :  { %98 = vperm.xlu1 %9936, %v89_v3   ;;  %109 = vperm.xlu0 %9934, %v88_v2   ;;  %14053 = vst [vmem:[#allocation9_spill] sm:$0xff] %v10211_v18  ;;  %14054 = vst [vmem:[#allocation10_spill] sm:$0xff] %v10213_v22  ;;  %v10224_v27 = vpack.c.bf16 %v1375_v21, %v1371_v20  ;;  %v687_v36 = vand.u32 4294901760, %v626_v32  ;;  %v1383_v41 = vand.u32 4294901760, %v628_v38  ;;  %v643_v45 = vld [vmem:[#allocation2 + $0x148] sm:$0xff]  ;;  %v637_v46 = vld [vmem:[#allocation2 + $0x118] sm:$0xff] }
  0x3e   :  { %8595 = vmatprep.subr.bf16.mxu0 %v10211_v18  ;;  %14055 = vst [vmem:[#allocation11_spill] sm:$0xff] %v10222_v26  ;;  %8691 = vmatprep.subr.bf16.mxu1 %v10213_v22  ;;  %v10232_v39 = vpack.c.bf16 %v685_v29, %v681_v28  ;;  %v10234_v42 = vpack.c.bf16 %v1381_v34, %v1377_v33  ;;  %v689_v48 = vand.u32 4294901760, %v635_v44  ;;  %v693_v49 = vand.u32 4294901760, %v643_v45  ;;  %v645_v50 = vld [vmem:[#allocation2 + $0x158] sm:$0xff]  ;;  %v634_v52 = vld [vmem:[#allocation2 + $0x100] sm:$0xff]  ;;  %v636_v57 = vld [vmem:[#allocation2 + $0x110] sm:$0xff] }
  0x3f   :  { %14056 = vst [vmem:[#allocation12_spill] sm:$0xff] %v10224_v27  ;;  %8597 = vmatpush1.bf16.msra.mxu0 %v10222_v26  ;;  %8693 = vmatpush1.bf16.msra.mxu1 %v10224_v27  ;;  %v10236_v43 = vpack.c.bf16 %v687_v36, %v683_v35  ;;  %v10239_v47 = vpack.c.bf16 %v1383_v41, %v1379_v40  ;;  %v1385_v51 = vand.u32 4294901760, %v637_v46  ;;  %v642_v53 = vld [vmem:[#allocation2 + $0x140] sm:$0xff]  ;;  %v1389_v54 = vand.u32 4294901760, %v645_v50  ;;  %v644_v62 = vld [vmem:[#allocation2 + $0x150] sm:$0xff]  ;;  %v653_v5 = vld [vmem:[#allocation2 + $0x198] sm:$0xff] }
  0x40   :  { %14057 = vst [vmem:[#allocation13_spill] sm:$0xff] %v10232_v39  ;;  %14058 = vst [vmem:[#allocation14_spill] sm:$0xff] %v10234_v42  ;;  %8599 = vmatprep.subr.bf16.mxu0 %v10232_v39  ;;  %8695 = vmatprep.subr.bf16.mxu1 %v10234_v42  ;;  %v691_v55 = vand.u32 4294901760, %v634_v52  ;;  %v695_v56 = vand.u32 4294901760, %v642_v53  ;;  %v10244_v59 = vsub.f32 %v611_v6, %v677_v9  ;;  %v1387_v9 = vand.u32 4294901760, %v636_v57 }
  0x41   :  { %9937 = vset.pattern.permute.xlu1 %v10078_v4  ;;  %9938 = vset.pattern.permute.xlu0 %v10076_v0  ;;  %14059 = vst [vmem:[#allocation15_spill] sm:$0xff] %v10236_v43  ;;  %14060 = vst [vmem:[#allocation16_spill] sm:$0xff] %v10239_v47  ;;  %v10246_v60 = vsub.f32 %v605_v7, %v1369_v11  ;;  %v10248_v61 = vsub.f32 %v613_v10, %v1373_v13  ;;  %v659_v4 = vld [vmem:[#allocation2 + $0x1c8] sm:$0xff]  ;;  %v1391_v10 = vand.u32 4294901760, %v644_v62 }
  0x42   :  { %113 = vperm.xlu1 %9937, %v89_v3   ;;  %130 = vperm.xlu0 %9938, %v89_v3   ;;  %14061 = vst [vmem:[#allocation17_spill] sm:$0xff] %v10242_v58  ;;  %14062 = vst [vmem:[#allocation18_spill] sm:$0xff] %v10244_v59  ;;  %v10251_v63 = vsub.f32 %v602_v12, %v675_v15  ;;  %v10253_v0 = vsub.f32 %v610_v14, %v679_v19  ;;  %v651_v3 = vld [vmem:[#allocation2 + $0x188] sm:$0xff]  ;;  %v701_v12 = vand.u32 4294901760, %v659_v4 }
  0x43   :  { %8601 = vmatpush1.bf16.msra.mxu0 %v10236_v43  ;;  %v10257_v2 = vsub.f32 %v612_v17, %v1375_v21  ;;  %8697 = vmatpush1.bf16.msra.mxu1 %v10239_v47  ;;  %v10260_v6 = vpack.c.bf16 %v693_v49, %v689_v48  ;;  %v10262_v7 = vpack.c.bf16 %v1389_v54, %v1385_v51  ;;  %v697_v11 = vand.u32 4294901760, %v651_v3 }
  0x44   :  { %v10264_v8 = vpack.c.bf16 %v695_v56, %v691_v55  ;;  %v1393_v13 = vand.u32 4294901760, %v653_v5  ;;  %v10267_v14 = vsub.f32 %v10215_v23, %v681_v28  ;;  %v10270_v15 = vsub.f32 %v10217_v24, %v685_v29  ;;  %v661_v29 = vld [vmem:[#allocation2 + $0x1d8] sm:$0xff] }
  0x45   :  { %14063 = vst [vmem:[#allocation19_spill] sm:$0xff] %v10260_v6  ;;  %14064 = vst [vmem:[#allocation20_spill] sm:$0xff] %v10262_v7  ;;  %v10275_v17 = vsub.f32 %v629_v30, %v1381_v34  ;;  %8603 = vmatprep.subr.bf16.mxu0 %v10260_v6  ;;  %v10278_v19 = vsub.f32 %v618_v31, %v683_v35  ;;  %v10282_v21 = vsub.f32 %v620_v37, %v1379_v40  ;;  %v650_v30 = vld [vmem:[#allocation2 + $0x180] sm:$0xff]  ;;  %v660_v37 = vld [vmem:[#allocation2 + $0x1d0] sm:$0xff] }
  0x46   :  { %9939 = vset.pattern.permute.xlu0 %v10077_v1  ;;  %9940 = vset.pattern.permute.xlu1 %v10077_v1  ;;  %v10255_v1 = vsub.f32 %v604_v16, %v1371_v20  ;;  %14065 = vst [vmem:[#allocation21_spill] sm:$0xff] %v10264_v8  ;;  %v10273_v16 = vsub.f32 %v10219_v25, %v1377_v33  ;;  %v658_v31 = vld [vmem:[#allocation2 + $0x1c0] sm:$0xff] }
  0x47   :  { %v10280_v20 = vsub.f32 %v626_v32, %v687_v36  ;;  %v10284_v47 = vsub.f32 %v628_v38, %v1383_v41  ;;  %8699 = vmatprep.subr.bf16.mxu1 %v10262_v7  ;;  %v10287_v23 = vsub.f32 %v635_v44, %v689_v48  ;;  %v10289_v24 = vsub.f32 %v643_v45, %v693_v49  ;;  %v652_v36 = vld [vmem:[#allocation2 + $0x190] sm:$0xff] }
  0x48   :  { %v10291_v25 = vsub.f32 %v637_v46, %v1385_v51  ;;  %v10293_v28 = vsub.f32 %v645_v50, %v1389_v54  ;;  %8605 = vmatpush1.bf16.msra.mxu0 %v10264_v8  ;;  %v10296_v32 = vsub.f32 %v634_v52, %v691_v55  ;;  %v10298_v33 = vsub.f32 %v642_v53, %v695_v56 }
  0x49   :  { %v10300_v34 = vpack.c.bf16 %v1391_v10, %v1387_v9  ;;  %v10302_v35 = vsub.f32 %v636_v57, %v1387_v9  ;;  %v10304_v38 = vsub.f32 %v644_v62, %v1391_v10  ;;  %v10306_v40 = vpack.c.bf16 %v701_v12, %v697_v11 }
  0x4a   :  { %v10308_v41 = vsub.f32 %v651_v3, %v697_v11  ;;  %v10310_v44 = vsub.f32 %v659_v4, %v701_v12  ;;  %v1397_v45 = vand.u32 4294901760, %v661_v29  ;;  %v10313_v46 = vsub.f32 %v653_v5, %v1393_v13 }
  0x4b   :  { %14066 = vst [vmem:[#allocation22_spill] sm:$0xff] %v10300_v34  ;;  %14067 = vst [vmem:[#allocation23_spill] sm:$0xff] %v10304_v38  ;;  %8701 = vmatpush1.bf16.msra.mxu1 %v10300_v34  ;;  %v699_v48 = vand.u32 4294901760, %v650_v30  ;;  %v703_v49 = vand.u32 4294901760, %v658_v31  ;;  %8607 = vmatprep.subr.bf16.mxu0 %v10306_v40  ;;  %v1395_v50 = vand.u32 4294901760, %v652_v36  ;;  %v1399_v51 = vand.u32 4294901760, %v660_v37 }
  0x4c   :  { %14068 = vst [vmem:[#allocation24_spill] sm:$0xff] %v10306_v40  ;;  %14069 = vst [vmem:[#allocation25_spill] sm:$0xff] %v10308_v41  ;;  %v13807_v52 = vand.u32 4294901760, %v10242_v58  ;;  %v10317_v53 = vpack.c.bf16 %v1397_v45, %v1393_v13  ;;  %v10319_v54 = vsub.f32 %v661_v29, %v1397_v45  ;;  %v13808_v57 = vmov 0.0  }
  0x4d   :  { %14070 = vst [vmem:[#allocation26_spill] sm:$0xff] %v10310_v44  ;;  %v10321_v55 = vpack.c.bf16 %v703_v49, %v699_v48  ;;  %v10323_v56 = vsub.f32 %v650_v30, %v699_v48  ;;  %753 = vmatprep.mubr.f32.mxu0 %v13808_v57  ;;  %v10326_v62 = vsub.f32 %v658_v31, %v703_v49  ;;  %v13806_v10 = vand.u32 4294901760, %v10244_v59 }
  0x4e   :  { %14071 = vst [vmem:[#allocation27_spill] sm:$0xff] %v10317_v53  ;;  %v10328_v3 = vpack.c.bf16 %v1399_v51, %v1395_v50  ;;  %v10330_v4 = vsub.f32 %v652_v36, %v1395_v50  ;;  %v10332_v5 = vsub.f32 %v660_v37, %v1399_v51  ;;  %1449 = vmatprep.mubr.f32.mxu1 %v13808_v57  ;;  %v13805_v11 = vand.u32 4294901760, %v10246_v60 }
  0x4f   :  { %14072 = vst [vmem:[#allocation28_spill] sm:$0xff] %v10321_v55  ;;  %8703 = vmatprep.subr.bf16.mxu1 %v10317_v53  ;;  %8609 = vmatpush1.bf16.msra.mxu0 %v10321_v55  ;;  %v779_v9 = vsub.f32 %v10242_v58, %v13807_v52  ;;  %v13804_v12 = vand.u32 4294901760, %v10248_v61  ;;  %v13811_v13 = vand.u32 4294901760, %v10251_v63  ;;  %v13810_v29 = vand.u32 4294901760, %v10253_v0 }
  0x50   :  { %14073 = vst [vmem:[#allocation29_spill] sm:$0xff] %v10328_v3  ;;  %8705 = vmatpush1.bf16.msra.mxu1 %v10328_v3  ;;  %v13812_v30 = vand.u32 4294901760, %v10255_v1  ;;  %v13819_v31 = vand.u32 4294901760, %v10257_v2  ;;  %v791_v37 = vsub.f32 %v10244_v59, %v13806_v10  ;;  %v1475_v45 = vsub.f32 %v10246_v60, %v13805_v11 }
  0x51   :  { %v780_v36 = vand.u32 4294901760, %v779_v9  ;;  %v1487_v48 = vsub.f32 %v10248_v61, %v13804_v12  ;;  %v785_v49 = vsub.f32 %v10251_v63, %v13811_v13  ;;  %v797_v50 = vsub.f32 %v10253_v0, %v13810_v29  ;;  %v7264_v12 = vld [vmem:[%s13788_s1] ss:$0 sm:$0xff]  ;;  %v10376_v29 = vld [vmem:[%s13788_s1 + $0x2] ss:$0 sm:$0xff] }
  0x52   :  { %v1481_v51 = vsub.f32 %v10255_v1, %v13812_v30  ;;  %v1493_v9 = vsub.f32 %v10257_v2, %v13819_v31  ;;  %v792_v11 = vand.u32 4294901760, %v791_v37  ;;  %v1476_v10 = vand.u32 4294901760, %v1475_v45 }
  0x53   :  { %v1488_v52 = vand.u32 4294901760, %v1487_v48  ;;  %v13831_v57 = vand.u32 4294901760, %v10267_v14  ;;  %v786_v13 = vand.u32 4294901760, %v785_v49  ;;  %v798_v30 = vand.u32 4294901760, %v797_v50 }
  0x54   :  { %v1482_v3 = vand.u32 4294901760, %v1481_v51  ;;  %v1494_v55 = vand.u32 4294901760, %v1493_v9  ;;  %v8610_v53 = vpack.c.bf16 %v792_v11, %v780_v36  ;;  %v13830_v37 = vand.u32 4294901760, %v10270_v15 }
  0x55   :  { %v8706_v31 = vpack.c.bf16 %v1488_v52, %v1476_v10  ;;  %v803_v40 = vsub.f32 %v10267_v14, %v13831_v57  ;;  %v10382_v34 = vpack.c.bf16 %v798_v30, %v786_v13  ;;  %v13829_v7 = vand.u32 4294901760, %v10273_v16 }
  0x56   :  { %v10384_v8 = vpack.c.bf16 %v1494_v55, %v1482_v3  ;;  %v13828_v49 = vand.u32 4294901760, %v10275_v17  ;;  %8611 = vmatprep.subr.bf16.mxu0 %v8610_v53  ;;  %v815_v10 = vsub.f32 %v10270_v15, %v13830_v37  ;;  %v13832_v3 = vand.u32 4294901760, %v10278_v19 }
  0x57   :  { %14074 = vst [vmem:[#allocation30_spill] sm:$0xff] %v10382_v34  ;;  %8707 = vmatprep.subr.bf16.mxu1 %v8706_v31  ;;  %v804_v52 = vand.u32 4294901760, %v803_v40  ;;  %v1499_v13 = vsub.f32 %v10273_v16, %v13829_v7  ;;  %v13837_v30 = vand.u32 4294901760, %v10280_v20  ;;  %v7265_v40 = vld [vmem:[%s13788_s1 + $0x1] ss:$0 sm:$0xff]  ;;  %v13844_v31 = vand.u32 4294901760, %v10282_v21 }
  0x58   :  { %14075 = vst [vmem:[#allocation31_spill] sm:$0xff] %v10384_v8  ;;  %v1511_v55 = vsub.f32 %v10275_v17, %v13828_v49  ;;  %v816_v53 = vand.u32 4294901760, %v815_v10  ;;  %v13847_v36 = vand.u32 4294901760, %v10284_v47  ;;  %v13860_v51 = vand.u32 4294901760, %v10287_v23 }
  0x59   :  { %v1500_v9 = vand.u32 4294901760, %v1499_v13  ;;  %v821_v49 = vsub.f32 %v10280_v20, %v13837_v30  ;;  %v1505_v10 = vsub.f32 %v10282_v21, %v13844_v31  ;;  %v13856_v31 = vand.u32 4294901760, %v10289_v24 }
  0x5a   :  { %v10412_v57 = vpack.c.bf16 %v816_v53, %v804_v52  ;;  %v1517_v13 = vsub.f32 %v10284_v47, %v13847_v36  ;;  %v13854_v26 = vand.u32 4294901760, %v10291_v25  ;;  %v13853_v36 = vand.u32 4294901760, %v10293_v28 }
  0x5b   :  { %v822_v42 = vand.u32 4294901760, %v821_v49  ;;  %v1506_v52 = vand.u32 4294901760, %v1505_v10 }
  0x5c   :  { %14076 = vst [vmem:[#allocation32_spill] sm:$0xff] %v10412_v57  ;;  %v1518_v53 = vand.u32 4294901760, %v1517_v13 }
  0x5e   :  { %v10430_v18 = vpack.c.bf16 %v1518_v53, %v1506_v52 }
  0x60   :  { %14079 = vst [vmem:[#allocation35_spill] sm:$0xff] %v10430_v18 }
  0xb7   :  { %v94_v45 = vpop.permute.xlu0 %93  ;;  %v127_v48 = vpop.permute.xlu1 %126 }
  0xb8   :  { %v105_v50 = vmul.f32 %v7264_v12, %v94_v45  ;;  %v137_v11 = vmul.f32 %v10376_v29, %v127_v48  ;;  %v1512_v45 = vand.u32 4294901760, %v1511_v55  ;;  %v809_v48 = vsub.f32 %v10278_v19, %v13832_v3 }
  0xb9   :  { %v827_v55 = vsub.f32 %v10287_v23, %v13860_v51 }
  0xba   :  { %v10423_v43 = vpack.c.bf16 %v1512_v45, %v1500_v9  ;;  %v810_v30 = vand.u32 4294901760, %v809_v48 }
  0xbb   :  { %v828_v39 = vand.u32 4294901760, %v827_v55 }
  0xbc   :  { %v110_v7 = vpop.permute.xlu0 %109  ;;  %v99_v37 = vpop.permute.xlu1 %98  ;;  %14077 = vst [vmem:[#allocation33_spill] sm:$0xff] %v10423_v43  ;;  %v10428_v22 = vpack.c.bf16 %v822_v42, %v810_v30  ;;  %v1535_v42 = vsub.f32 %v10293_v28, %v13853_v36 }
  0xbd   :  { %v120_v3 = vmul.f32 %v7265_v40, %v110_v7  ;;  %v106_v6 = vmul.f32 %v7264_v12, %v99_v37  ;;  %v13852_v7 = vand.u32 4294901760, %v10296_v32  ;;  %v13855_v12 = vand.u32 4294901760, %v10298_v33 }
  0xbe   :  { %14078 = vst [vmem:[#allocation34_spill] sm:$0xff] %v10428_v22 }
  0xbf   :  { %v122_v27 = vadd.f32 %v120_v3, %v105_v50  ;;  %v839_v50 = vsub.f32 %v10289_v24, %v13856_v31  ;;  %v1523_v3 = vsub.f32 %v10291_v25, %v13854_v26  ;;  %v13859_v31 = vand.u32 4294901760, %v10302_v35 }
  0xc1   :  { %v10434_v37 = vadd.f32 %v137_v11, %v122_v27  ;;  %v114_v49 = vpop.permute.xlu1 %113  ;;  %v131_v9 = vpop.permute.xlu0 %130  ;;  %v833_v27 = vsub.f32 %v10296_v32, %v13852_v7  ;;  %v845_v11 = vsub.f32 %v10298_v33, %v13855_v12  ;;  %v840_v55 = vand.u32 4294901760, %v839_v50 }
  0xc2   :  { %v121_v30 = vmul.f32 %v7265_v40, %v114_v49  ;;  %v138_v45 = vmul.f32 %v10376_v29, %v131_v9  ;;  %v1524_v52 = vand.u32 4294901760, %v1523_v3  ;;  %v1536_v29 = vand.u32 4294901760, %v1535_v42 }
  0xc3   :  { %v13861_v48 = vand.u32 2147483647, %v10434_v37  ;;  %v152_v10 = vand.u32 2139095040, %v10434_v37  ;;  %v10458_v9 = vpack.c.bf16 %v840_v55, %v828_v39  ;;  %v834_v7 = vand.u32 4294901760, %v833_v27 }
  0xc4   :  { %v123_v13 = vadd.f32 %v121_v30, %v106_v6  ;;  %v846_v36 = vand.u32 4294901760, %v845_v11  ;;  %v10460_v12 = vpack.c.bf16 %v1536_v29, %v1524_v52  ;;  %v13858_v27 = vand.u32 4294901760, %v10304_v38 }
  0xc5   :  { %v153_v53 = vshrl.u32 %v152_v10, 23  ;;  %v156_v40 = vand.u32 8388607, %v13861_v48  ;;  %14081 = vst [vmem:[#allocation37_spill] sm:$0xff] %v10458_v9  ;;  %v13862_v11 = vand.u32 4294901760, %v10308_v41  ;;  %vm151_vm13 = vcmp.lt.s32.totalorder %v10434_v37, 0 }
  0xc6   :  { %v10456_v49 = vadd.f32 %v138_v45, %v123_v13  ;;  %14082 = vst [vmem:[#allocation38_spill] sm:$0xff] %v10460_v12  ;;  %v10465_v10 = vpack.c.bf16 %v846_v36, %v834_v7  ;;  %v10472_v45 = vsub.f32 %v10302_v35, %v13859_v31  ;;  %v13869_v13 = vand.u32 4294901760, %v10310_v44 }
  0xc7   :  { %v7268_v26 = vadd.s32 4294967169, %v153_v53  ;;  %v157_v3 = vor.u32 8388608, %v156_v40  ;;  %v13872_v31 = vmov 2131351028   ;;  %v13874_v48 = vmov 2102212464  }
  0xc8   :  { %14080 = vst [vmem:[#allocation36_spill] sm:$0xff] %v10456_v49  ;;  %v13857_v6 = vand.u32 2147483647, %v10456_v49  ;;  %v256_v50 = vand.u32 2139095040, %v10456_v49  ;;  %14083 = vst [vmem:[#allocation39_spill] sm:$0xff] %v10465_v10 }
  0xc9   :  { %v159_v30 = vadd.s32 1, %v7268_v26  ;;  %v10477_v53 = vshll.u32 %v157_v3, 8  ;;  %v10496_v3 = vsub.f32 %v10310_v44, %v13869_v13  ;;  %v13878_v29 = vmov 920167782  }
  0xca   :  { %v257_v42 = vshrl.u32 %v256_v50, 23  ;;  %v260_v39 = vand.u32 8388607, %v13857_v6  ;;  %v10483_v50 = vsub.f32 %v10304_v38, %v13858_v27  ;;  %v10488_v6 = vsub.f32 %v10308_v41, %v13862_v11 }
  0xcb   :  { %vm160_vm0 = vcmp.gt.s32.totalorder %v159_v30, 0  ;;  %v14084_v13 = vmov 683565275   ;;  %v13880_v9 = vmov 1326507024  }
  0xcc   :  { %v161_v55 = vsel %vm160_vm0, %v159_v30, 0  ;;  %v7272_v26 = vadd.s32 4294967169, %v257_v42  ;;  %v261_v36 = vor.u32 8388608, %v260_v39  ;;  %v13865_v42 = vmov 683565275  }
  0xcd   :  { %v162_v7 = vshrl.u32 %v161_v55, 5  ;;  %v163_v52 = vand.u32 31, %v161_v55 }
  0xce   :  { %v263_v40 = vadd.s32 1, %v7272_v26  ;;  %v10491_v55 = vshll.u32 %v261_v36, 8  ;;  %v13870_v26 = vmov 2475754826  }
  0xcf   :  { %v164_v30 = vsub.s32 32, %v163_v52  ;;  %v166_v39 = vshll.u32 %v13865_v42, %v163_v52  ;;  %v169_v27 = vshll.u32 %v13870_v26, %v163_v52  ;;  %v172_v51 = vshll.u32 %v13872_v31, %v163_v52 }
  0xd0   :  { %v175_v11 = vshll.u32 %v13874_v48, %v163_v52  ;;  %v178_v59 = vshll.u32 %v13878_v29, %v163_v52  ;;  %vm181_vm1 = vcmp.lt.s32.totalorder %v162_v7, 1  ;;  %vm183_vm2 = vcmp.lt.s32.totalorder %v162_v7, 3 }
  0xd1   :  { %v167_v36 = vshrl.u32 %v13870_v26, %v164_v30  ;;  %v170_v42 = vshrl.u32 %v13872_v31, %v164_v30  ;;  %v173_v58 = vshrl.u32 %v13874_v48, %v164_v30  ;;  %v165_v10 = vshrl.u32 %v14084_v13, %v164_v30 }
  0xd2   :  { %v176_v12 = vshrl.u32 %v13878_v29, %v164_v30  ;;  %v179_v18 = vshrl.u32 %v13880_v9, %v164_v30  ;;  %vm264_vm3 = vcmp.gt.s32.totalorder %v263_v40, 0  ;;  %vm184_vm4 = vcmp.lt.s32.totalorder %v162_v7, 4 }
  0xd3   :  { %v168_v22 = vor.u32 %v167_v36, %v166_v39  ;;  %v171_v43 = vor.u32 %v170_v42, %v169_v27  ;;  %v174_v57 = vor.u32 %v173_v58, %v172_v51  ;;  %v265_v26 = vsel %vm264_vm3, %v263_v40, 0 }
  0xd4   :  { %v177_v52 = vor.u32 %v176_v12, %v175_v11  ;;  %v180_v8 = vor.u32 %v179_v18, %v178_v59  ;;  %vm182_vm5 = vcmp.lt.s32.totalorder %v162_v7, 2  ;;  %v266_v51 = vshrl.u32 %v265_v26, 5 }
  0xd5   :  { %v185_v31 = vsel %vm181_vm1, %v165_v10, %v168_v22  ;;  %v186_v48 = vsel %vm184_vm4, %v174_v57, 2102212464  ;;  %v189_v34 = vsel %vm181_vm1, %v168_v22, %v171_v43  ;;  %v193_v49 = vsel %vm181_vm1, %v171_v43, %v174_v57 }
  0xd6   :  { %v187_v29 = vsel %vm183_vm2, %v171_v43, %v186_v48  ;;  %v190_v30 = vsel %vm184_vm4, %v177_v52, 920167782  ;;  %v194_v9 = vsel %vm184_vm4, %v180_v8, 1326507024  ;;  %v267_v18 = vand.u32 31, %v265_v26 }
  0xd7   :  { %v191_v27 = vsel %vm183_vm2, %v174_v57, %v190_v30  ;;  %v195_v58 = vsel %vm183_vm2, %v177_v52, %v194_v9  ;;  %v188_v59 = vsel %vm182_vm5, %v185_v31, %v187_v29  ;;  %v14085_v48 = vmov 2475754826  }
  0xd8   :  { %v192_v12 = vsel %vm182_vm5, %v189_v34, %v191_v27  ;;  %v196_v11 = vsel %vm182_vm5, %v193_v49, %v195_v58  ;;  %v268_v8 = vsub.s32 32, %v267_v18  ;;  %v270_v57 = vshll.u32 %v14084_v13, %v267_v18 }
  0xd9   :  { %v10516_v22 = vmul.u32.u64.low %v10477_v53, %v196_v11  ;;  %v10517_v40 = vmul.u32.u64.high %v10477_v53, %v196_v11, %v10516_v22  ;;  %v10520_v42 = vmul.u32.u64.low %v10477_v53, %v192_v12  ;;  %v10521_v43 = vmul.u32.u64.high %v10477_v53, %v192_v12, %v10520_v42 }
  0xda   :  { %v273_v9 = vshll.u32 %v14085_v48, %v267_v18  ;;  %v14086_v7 = vmov 2131351028   ;;  %v204_v34 = vmul.u32 %v10477_v53, %v188_v59  ;;  %v14087_v49 = vmov 2102212464  }
  0xdb   :  { %v276_v31 = vshll.u32 %v14086_v7, %v267_v18  ;;  %v279_v29 = vshll.u32 %v14087_v49, %v267_v18  ;;  %vm285_vm6 = vcmp.lt.s32.totalorder %v266_v51, 1  ;;  %v1542_v39 = vand.u32 4294901760, %v10483_v50 }
  0xdc   :  { %v271_v26 = vshrl.u32 %v14085_v48, %v268_v8  ;;  %v274_v36 = vshrl.u32 %v14086_v7, %v268_v8  ;;  %v277_v52 = vshrl.u32 %v14087_v49, %v268_v8  ;;  %v14088_v30 = vmov 920167782  }
  0xdd   :  { %v282_v27 = vshll.u32 %v14088_v30, %v267_v18  ;;  %vm206_vm7 = vc.u32 %v10517_v40, %v10520_v42  ;;  %v207_v58 = vadd.s32 1, %v10521_v43  ;;  %v269_v53 = vshrl.u32 %v14084_v13, %v268_v8 }
  0xde   :  { %v280_v59 = vshrl.u32 %v14088_v30, %v268_v8  ;;  %v272_v12 = vor.u32 %v271_v26, %v270_v57  ;;  %v275_v11 = vor.u32 %v274_v36, %v273_v9  ;;  %v278_v50 = vor.u32 %v277_v52, %v276_v31 }
  0xdf   :  { %v14089_v22 = vmov 1326507024   ;;  %v208_v7 = vsel %vm206_vm7, %v207_v58, %v10521_v43  ;;  %vm288_vm8 = vcmp.lt.s32.totalorder %v266_v51, 4  ;;  %v14090_v18 = vand.u32 4294901760, %v10472_v45 }
  0xe0   :  { %v283_v10 = vshrl.u32 %v14089_v22, %v268_v8  ;;  %v281_v48 = vor.u32 %v280_v59, %v279_v29  ;;  %v209_v44 = vadd.s32 %v208_v7, %v204_v34  ;;  %vm286_vm9 = vcmp.lt.s32.totalorder %v266_v51, 2 }
  0xe1   :  { %v10543_v49 = vpack.c.bf16 %v1542_v39, %v14090_v18  ;;  %v290_v38 = vsel %vm288_vm8, %v278_v50, 2102212464  ;;  %vm287_vm10 = vcmp.lt.s32.totalorder %v266_v51, 3  ;;  %v293_v13 = vsel %vm285_vm6, %v272_v12, %v275_v11 }
  0xe2   :  { %v284_v41 = vor.u32 %v283_v10, %v282_v27  ;;  %v294_v57 = vsel %vm288_vm8, %v281_v48, 920167782  ;;  %v297_v9 = vsel %vm285_vm6, %v275_v11, %v278_v50  ;;  %v210_v31 = vadd.s32 536870912, %v209_v44 }
  0xe3   :  { %v289_v8 = vsel %vm285_vm6, %v269_v53, %v272_v12  ;;  %v295_v43 = vsel %vm287_vm10, %v278_v50, %v294_v57  ;;  %v291_v26 = vsel %vm287_vm10, %v275_v11, %v290_v38  ;;  %v852_v7 = vand.u32 4294901760, %v10488_v6 }
  0xe4   :  { %v298_v29 = vsel %vm288_vm8, %v284_v41, 1326507024  ;;  %v296_v45 = vsel %vm286_vm9, %v293_v13, %v295_v43  ;;  %v10550_v10 = vshrl.u32 %v210_v31, 30  ;;  %v864_v38 = vand.u32 4294901760, %v10496_v3 }
  0xe5   :  { %v299_v39 = vsel %vm287_vm10, %v281_v48, %v298_v29  ;;  %v10554_v36 = vmul.u32.u64.low %v10491_v55, %v296_v45  ;;  %v10555_v52 = vmul.u32.u64.high %v10491_v55, %v296_v45, %v10554_v36  ;;  %v14091_v41 = vand.u32 4294901760, %v10313_v46 }
  0xe6   :  { %v300_v34 = vsel %vm286_vm9, %v297_v9, %v299_v39  ;;  %v212_v6 = vshll.u32 %v10550_v10, 30  ;;  %v292_v48 = vsel %vm286_vm9, %v289_v8, %v291_v26  ;;  %v13896_v53 = vand.u32 4294901760, %v10319_v54 }
  0xe7   :  { %v10559_v27 = vmul.u32.u64.low %v10491_v55, %v300_v34  ;;  %v10560_v58 = vmul.u32.u64.high %v10491_v55, %v300_v34, %v10559_v27  ;;  %v1547_v13 = vsub.f32 %v10313_v46, %v14091_v41  ;;  %v13895_v59 = vand.u32 4294901760, %v10323_v56 }
  0xe8   :  { %v10570_v12 = vpack.c.bf16 %v864_v38, %v852_v7  ;;  %v13894_v11 = vand.u32 4294901760, %v10326_v62  ;;  %v213_v50 = vsub.s32 %v209_v44, %v212_v6  ;;  %v311_v18 = vadd.s32 1, %v10555_v52 }
  0xe9   :  { %v1559_v3 = vsub.f32 %v10319_v54, %v13896_v53  ;;  %v308_v57 = vmul.u32 %v10491_v55, %v292_v48  ;;  %vm310_vm11 = vc.u32 %v10560_v58, %v10554_v36  ;;  %v1548_v51 = vand.u32 4294901760, %v1547_v13 }
  0xea   :  { %v857_v9 = vsub.f32 %v10323_v56, %v13895_v59  ;;  %v215_v31 = vsub.s32 0, %v213_v50  ;;  %v312_v8 = vsel %vm310_vm11, %v311_v18, %v10555_v52  ;;  %v13893_v44 = vand.u32 4294901760, %v10330_v4 }
  0xeb   :  { %v313_v43 = vadd.s32 %v312_v8, %v308_v57  ;;  %v1560_v29 = vand.u32 4294901760, %v1559_v3  ;;  %v869_v55 = vsub.f32 %v10326_v62, %v13894_v11  ;;  %v13892_v13 = vand.u32 4294901760, %v10332_v5 }
  0xec   :  { %v858_v26 = vand.u32 4294901760, %v857_v9  ;;  %v7269_v45 = vmin.u32 %v215_v31, %v213_v50  ;;  %v1553_v52 = vsub.f32 %v10330_v4, %v13893_v44  ;;  %v14105_v31 = vand.u32 4294901760, %v10275_v17 }
  0xed   :  { %v314_v39 = vadd.s32 536870912, %v313_v43  ;;  %v10588_v7 = vpack.c.bf16 %v1560_v29, %v1548_v51  ;;  %v870_v34 = vand.u32 4294901760, %v869_v55  ;;  %v1565_v51 = vsub.f32 %v10332_v5, %v13892_v13 }
  0xee   :  { %v217_v27 = vclz %v7269_v45  ;;  %v1554_v57 = vand.u32 4294901760, %v1553_v52  ;;  %v205_v45 = vadd.s32 %v10520_v42, %v10517_v40  ;;  %v235_v52 = vsub.s32 4, %v10550_v10 }
  0xef   :  { %v10590_v38 = vshrl.u32 %v314_v39, 30  ;;  %v10592_v41 = vpack.c.bf16 %v870_v34, %v858_v26  ;;  %v1566_v55 = vand.u32 4294901760, %v1565_v51  ;;  %v14111_v11 = vand.u32 4294901760, %v10287_v23 }
  0xf0   :  { %v7270_v6 = vadd.s32 4294967294, %v217_v27  ;;  %v14117_v53 = vand.u32 4294901760, %v10296_v32  ;;  %v14118_v22 = vand.u32 4294901760, %v10298_v33  ;;  %vm241_vm8 = vweird.f32 %v10434_v37 }
  0xf1   :  { %v316_v3 = vshll.u32 %v10590_v38, 30  ;;  %v10615_v48 = vpack.c.bf16 %v1566_v55, %v1554_v57  ;;  %v236_v55 = vsel %vm151_vm13, %v235_v52, %v10550_v10  ;;  %v14102_v52 = vand.u32 4294901760, %v10267_v14 }
  0xf2   :  { %vm7271_vm12 = vcmp.lt.s32.totalorder %v7270_v6, 0  ;;  %vm666_vm9 = vcmask 523264  }
  0xf3   :  { %v220_v29 = vsel %vm7271_vm12, 0, %v7270_v6  ;;  %v317_v26 = vsub.s32 %v313_v43, %v316_v3  ;;  %v14103_v43 = vand.u32 4294901760, %v10270_v15 }
  0xf4   :  { %v221_v39 = vsub.s32 32, %v220_v29  ;;  %v225_v34 = vsub.s32 4294967266, %v220_v29  ;;  %v222_v27 = vshll.u32 %v213_v50, %v220_v29  ;;  %v14092_v50 = vand.u32 2147483647, %v10434_v37 }
  0xf5   :  { %v319_v18 = vsub.s32 0, %v317_v26 }
  0xf6   :  { %v223_v9 = vshrl.u32 %v205_v45, %v221_v39  ;;  %v226_v13 = vadd.s32 127, %v225_v34  ;;  %vm10626_vm14 = vcmp.le.f32.partialorder %v14092_v50, 0.7853982  ;;  %v14095_v45 = vld [vmem:[#allocation23_spill] sm:$0xff]  ;;  %v14096_v34 = vld [vmem:[#allocation25_spill] sm:$0xff]  ;;  %v14098_v39 = vand.u32 4294901760, %v10251_v63 }
  0xf7   :  { %v7273_v6 = vmin.u32 %v319_v18, %v317_v26  ;;  %v14099_v18 = vand.u32 4294901760, %v10253_v0  ;;  %v14121_v30 = vand.u32 4294901760, %v14095_v45 }
  0xf8   :  { %v224_v3 = vor.u32 %v223_v9, %v222_v27  ;;  %v227_v51 = vshll.u32 %v226_v13, 23  ;;  %v14097_v27 = vld [vmem:[#allocation26_spill] sm:$0xff] }
  0xf9   :  { %v321_v42 = vclz %v7273_v6  ;;  %v10653_v6 = vpack.c.bf16 %v14099_v18, %v14098_v39 }
  0xfa   :  { %v228_v29 = vor.u32 4788187, %v227_v51  ;;  %v231_v40 = vcvt.s32.f32 %v224_v3  ;;  %v14100_v51 = vand.u32 4294901760, %v10255_v1  ;;  %v14101_v3 = vand.u32 4294901760, %v10257_v2 }
  0xfb   :  { %v7274_v9 = vadd.s32 4294967294, %v321_v42  ;;  %v309_v42 = vadd.s32 %v10554_v36, %v10560_v58  ;;  %v10665_v36 = vpack.c.bf16 %v14103_v43, %v14102_v52  ;;  %v14104_v58 = vand.u32 4294901760, %v10273_v16 }
  0xfc   :  { %v229_v50 = vand.u32 2147483647, %v228_v29  ;;  %v10659_v29 = vpack.c.bf16 %v14101_v3, %v14100_v51  ;;  %v14106_v51 = vand.u32 4294901760, %v10278_v19  ;;  %v14108_v3 = vand.u32 4294901760, %v10282_v21 }
  0xfd   :  { %vm7275_vm15 = vcmp.lt.s32.totalorder %v7274_v9, 0  ;;  %v10671_v18 = vpack.c.bf16 %v14105_v31, %v14104_v58  ;;  %v14109_v43 = vand.u32 4294901760, %v10284_v47  ;;  %v14112_v31 = vand.u32 4294901760, %v10289_v24 }
  0xfe   :  { %v232_v10 = vmul.f32 %v231_v40, %v229_v50  ;;  %v324_v13 = vsel %vm7275_vm15, 0, %v7274_v9  ;;  %v14107_v40 = vand.u32 4294901760, %v10280_v20 }
  0xff   :  { %v325_v39 = vsub.s32 32, %v324_v13  ;;  %v326_v8 = vshll.u32 %v317_v26, %v324_v13  ;;  %v329_v44 = vsub.s32 4294967266, %v324_v13  ;;  %v10683_v52 = vpack.c.bf16 %v14109_v43, %v14108_v3 }
 0x100   :  { %v10677_v9 = vpack.c.bf16 %v14107_v40, %v14106_v51  ;;  %v233_v50 = vxor.u32 2147483648, %v232_v10  ;;  %v10689_v58 = vpack.c.bf16 %v14112_v31, %v14111_v11  ;;  %v14114_v26 = vand.u32 4294901760, %v10291_v25 }
 0x101   :  { %14110 = vst [vmem:[#allocation23_spill] sm:$0xff] %v10683_v52  ;;  %v14115_v13 = vand.u32 4294901760, %v10293_v28  ;;  %v327_v51 = vshrl.u32 %v309_v42, %v325_v39  ;;  %v330_v40 = vadd.s32 127, %v329_v44  ;;  %v10701_v3 = vpack.c.bf16 %v14118_v22, %v14117_v53 }
 0x102   :  { %14113 = vst [vmem:[#allocation25_spill] sm:$0xff] %v10689_v58  ;;  %v14120_v43 = vand.u32 4294901760, %v10302_v35  ;;  %v234_v31 = vsel %vm151_vm13, %v233_v50, %v232_v10  ;;  %v14124_v42 = vand.u32 4294901760, %v14097_v27  ;;  %v14126_v39 = vand.u32 4294901760, %v10313_v46 }
 0x103   :  { %v10695_v59 = vpack.c.bf16 %v14115_v13, %v14114_v26  ;;  %14119 = vst [vmem:[#allocation40_spill] sm:$0xff] %v10701_v3  ;;  %v14123_v26 = vand.u32 4294901760, %v14096_v34  ;;  %v14127_v22 = vand.u32 4294901760, %v10319_v54  ;;  %v14129_v13 = vand.u32 4294901760, %v10323_v56  ;;  %v14135_v3 = vld [vmem:[#allocation36_spill] sm:$0xff] }
 0x104   :  { %v10707_v11 = vpack.c.bf16 %v14121_v30, %v14120_v43  ;;  %v14130_v30 = vand.u32 4294901760, %v10326_v62  ;;  %v237_v10 = vsel %vm10626_vm14, %v10434_v37, %v234_v31  ;;  %v328_v50 = vor.u32 %v327_v51, %v326_v8 }
 0x105   :  { %14116 = vst [vmem:[#allocation26_spill] sm:$0xff] %v10695_v59  ;;  %v10715_v44 = vpack.c.bf16 %v14124_v42, %v14123_v26  ;;  %v10721_v53 = vpack.c.bf16 %v14127_v22, %v14126_v39  ;;  %v14132_v26 = vand.u32 4294901760, %v10330_v4  ;;  %v14133_v42 = vand.u32 4294901760, %v10332_v5 }
 0x106   :  { %14122 = vst [vmem:[#allocation41_spill] sm:$0xff] %v10707_v11  ;;  %v10727_v43 = vpack.c.bf16 %v14130_v30, %v14129_v13  ;;  %v331_v11 = vshll.u32 %v330_v40, 23  ;;  %9941 = vcosq.f32 %v237_v10  ;;  %v238_v39 = vsel %vm10626_vm14, 0, %v236_v55 }
 0x107   :  { %14125 = vst [vmem:[#allocation42_spill] sm:$0xff] %v10715_v44  ;;  %14128 = vst [vmem:[#allocation43_spill] sm:$0xff] %v10721_v53  ;;  %v10736_v44 = vpack.c.bf16 %v14133_v42, %v14132_v26  ;;  %9943 = vsinq.f32 %v237_v10  ;;  %v335_v30 = vcvt.s32.f32 %v328_v50  ;;  %v339_v31 = vsub.s32 4, %v10590_v38 }
 0x108   :  { %14131 = vst [vmem:[#allocation44_spill] sm:$0xff] %v10727_v43  ;;  %v332_v22 = vor.u32 4788187, %v331_v11  ;;  %v242_v43 = vadd.s32 3, %v238_v39  ;;  %v459_v8 = vand.u32 3, %v238_v39  ;;  %vm255_vm0 = vcmp.lt.s32.totalorder %v14135_v3, 0 }
 0x109   :  { %14134 = vst [vmem:[#allocation45_spill] sm:$0xff] %v10736_v44  ;;  %v14136_v26 = vand.u32 2147483647, %v14135_v3  ;;  %v340_v57 = vsel %vm255_vm0, %v339_v31, %v10590_v38  ;;  %v7267_v38 = vld [vmem:[%s13788_s1 + $0x3] ss:$0 sm:$0xff] }
 0x10a   :  { %v333_v13 = vand.u32 2147483647, %v332_v22  ;;  %v243_v40 = vand.u32 3, %v242_v43  ;;  %vm464_vm2 = vcmp.eq.s32.totalorder %v459_v8, 2  ;;  %vm461_vm5 = vcmp.eq.s32.totalorder %v459_v8, 0 }
 0x10b   :  { %vm254_vm1 = vcmp.le.f32.partialorder %v14136_v26, 0.7853982  ;;  %vm460_vm7 = vcmp.lt.s32.totalorder %v459_v8, 2  ;;  %v7276_v31 = vld [vmem:[%s13788_s1 + $0x4] ss:$0 sm:$0xff] }
 0x10c   :  { %v336_v53 = vmul.f32 %v335_v30, %v333_v13  ;;  %vm248_vm3 = vcmp.eq.s32.totalorder %v243_v40, 2  ;;  %v342_v39 = vsel %vm254_vm1, 0, %v340_v57  ;;  %vm245_vm4 = vcmp.eq.s32.totalorder %v243_v40, 0  ;;  %v7285_v8 = vld [vmem:[%s13788_s1 + $0x5] ss:$0 sm:$0xff] }
 0x10d   :  { %vm244_vm6 = vcmp.lt.s32.totalorder %v243_v40, 2  ;;  %v146_v40 = vmul.f32 %v7267_v38, %v10434_v37 }
 0x10e   :  { %v337_v51 = vxor.u32 2147483648, %v336_v53 }
 0x110   :  { %v338_v42 = vsel %vm255_vm0, %v337_v51, %v336_v53  ;;  %v9942_v55 = vpop.eup %9941  ;;  %vm345_vm0 = vweird.f32 %v14135_v3 }
 0x111   :  { %v341_v11 = vsel %vm254_vm1, %v14135_v3, %v338_v42  ;;  %v9944_v10 = vpop.eup %9943  ;;  %v249_v50 = vxor.u32 2147483648, %v9942_v55  ;;  %v346_v42 = vadd.s32 3, %v342_v39 }
 0x112   :  { %9945 = vcosq.f32 %v341_v11  ;;  %v246_v22 = vxor.u32 2147483648, %v9944_v10 }
 0x113   :  { %9947 = vsinq.f32 %v341_v11  ;;  %v250_v43 = vsel %vm248_vm3, %v249_v50, %v9944_v10  ;;  %v466_v13 = vsel %vm464_vm2, %v249_v50, %v9944_v10  ;;  %v562_v10 = vand.u32 3, %v342_v39 }
 0x114   :  { %v247_v30 = vsel %vm245_vm4, %v9942_v55, %v246_v22  ;;  %v463_v53 = vsel %vm461_vm5, %v9942_v55, %v246_v22  ;;  %v347_v44 = vand.u32 3, %v346_v42 }
 0x115   :  { %v251_v51 = vsel %vm244_vm6, %v247_v30, %v250_v43  ;;  %v467_v26 = vsel %vm460_vm7, %v463_v53, %v466_v13  ;;  %vm564_vm10 = vcmp.eq.s32.totalorder %v562_v10, 0  ;;  %vm567_vm12 = vcmp.eq.s32.totalorder %v562_v10, 2 }
 0x116   :  { %v252_v57 = vsel %vm241_vm8, nan, %v251_v51  ;;  %v468_v11 = vsel %vm241_vm8, nan, %v467_v26  ;;  %vm352_vm11 = vcmp.eq.s32.totalorder %v347_v44, 2  ;;  %vm349_vm13 = vcmp.eq.s32.totalorder %v347_v44, 0 }
 0x117   :  { %v361_v55 = vmul.f32 %v7276_v31, %v252_v57  ;;  %v576_v22 = vmul.f32 %v7285_v8, %v468_v11  ;;  %vm348_vm14 = vcmp.lt.s32.totalorder %v347_v44, 2  ;;  %vm563_vm15 = vcmp.lt.s32.totalorder %v562_v10, 2 }
 0x119   :  { %v363_v50 = vadd.f32 %v361_v55, %v146_v40 }
 0x11b   :  { %v578_v58 = vadd.f32 %v576_v22, %v363_v50 }
 0x11c   :  { %v9946_v59 = vpop.eup %9945 }
 0x11d   :  { %v9948_v52 = vpop.eup %9947  ;;  %v353_v43 = vxor.u32 2147483648, %v9946_v59  ;;  %v668_v30 = vsel %vm666_vm9, %v578_v58, 0  ;;  %v147_v58 = vmul.f32 %v7267_v38, %v14135_v3  ;;  %v14142_v3 = vld [vmem:[#allocation30_spill] sm:$0xff]  ;;  %v14143_v38 = vld [vmem:[#allocation31_spill] sm:$0xff] }
 0x11e   :  { %v350_v13 = vxor.u32 2147483648, %v9948_v52  ;;  %v10758_v37 = vand.u32 4294901760, %v668_v30 }
 0x11f   :  { %v354_v53 = vsel %vm352_vm11, %v353_v43, %v9948_v52  ;;  %v569_v51 = vsel %vm567_vm12, %v353_v43, %v9948_v52 }
 0x120   :  { %14137 = vst [vmem:[#allocation36_spill] sm:$0xff] %v10758_v37  ;;  %v351_v39 = vsel %vm349_vm13, %v9946_v59, %v350_v13  ;;  %v566_v26 = vsel %vm564_vm10, %v9946_v59, %v350_v13  ;;  %v10762_v11 = vsub.f32 %v668_v30, %v10758_v37 }
 0x121   :  { %v355_v42 = vsel %vm348_vm14, %v351_v39, %v354_v53  ;;  %v570_v57 = vsel %vm563_vm15, %v566_v26, %v569_v51  ;;  %v14146_v53 = vmov 0.0   ;;  %v14148_v39 = vld [vmem:[#allocation34_spill] sm:$0xff]  ;;  %v14149_v26 = vld [vmem:[#allocation35_spill] sm:$0xff] }
 0x122   :  { %14138 = vst [vmem:[#allocation46_spill] sm:$0xff] %v10762_v11  ;;  %v356_v40 = vsel %vm345_vm0, nan, %v355_v42  ;;  %v571_v55 = vsel %vm345_vm0, nan, %v570_v57  ;;  %v10766_v52 = vand.u32 4294901760, %v10762_v11  ;;  %v14151_v57 = vld [vmem:[#allocation37_spill] sm:$0xff] }
 0x123   :  { %v362_v50 = vmul.f32 %v7276_v31, %v356_v40  ;;  %v577_v44 = vmul.f32 %v7285_v8, %v571_v55  ;;  %v14144_v31 = vld [vmem:[#allocation32_spill] sm:$0xff]  ;;  %v14145_v8 = vld [vmem:[#allocation33_spill] sm:$0xff]  ;;  %v14152_v40 = vld [vmem:[#allocation38_spill] sm:$0xff] }
 0x124   :  { %14139 = vst [vmem:[#allocation47_spill] sm:$0xff] %v10766_v52  ;;  %v757_v59 = vsub.f32 %v10762_v11, %v10766_v52 }
 0x125   :  { %v364_v22 = vadd.f32 %v362_v50, %v147_v58  ;;  %v14154_v50 = vld [vmem:[#allocation39_spill] sm:$0xff] }
 0x126   :  { %v10770_v43 = vand.u32 4294901760, %v757_v59 }
 0x127   :  { %v579_v10 = vadd.f32 %v577_v44, %v364_v22  ;;  %v14155_v22 = vld [vmem:[#allocation17_spill] sm:$0xff]  ;;  %v14156_v44 = vld [vmem:[#allocation18_spill] sm:$0xff] }
 0x128   :  { %14140 = vst [vmem:[#allocation48_spill] sm:$0xff] %v10770_v43  ;;  %759 = vmatmul.mubr.f32.vlgmr.msra.gmra.mrb[0].mxu0 %v10770_v43  ;;  %1455 = vmatmul.mubr.f32.vlgmr.msra.gmra.mrb[0].mxu1 %v10770_v43  ;;  %v8626_v59 = vpack.c.bf16 %v14156_v44, %v14155_v22 }
 0x129   :  { %v671_v13 = vsel %vm666_vm9, %v579_v10, 0  ;;  %8613 = vmatpush1.bf16.msra.mxu0 %v14142_v3  ;;  %8709 = vmatpush1.bf16.msra.mxu1 %v14143_v38  ;;  %v14188_v10 = vand.u32 4294901760, %v14155_v22  ;;  %v14190_v38 = vand.u32 4294901760, %v10246_v60  ;;  %v606_v22 = vld [vmem:[#allocation2 + $0x20] sm:$0xff] }
 0x12a   :  { %v10775_v30 = vand.u32 4294901760, %v671_v13  ;;  %8615 = vmatprep.subr.bf16.mxu0 %v14144_v31  ;;  %8711 = vmatprep.subr.bf16.mxu1 %v14145_v8  ;;  %v14191_v31 = vand.u32 4294901760, %v10248_v61 }
 0x12b   :  { %764 = vmatprep.mubr.f32.mxu0 %v14146_v53  ;;  %1460 = vmatprep.mubr.f32.mxu1 %v14146_v53 }
 0x12c   :  { %14141 = vst [vmem:[#allocation49_spill] sm:$0xff] %v10775_v30  ;;  %v10784_v51 = vsub.f32 %v671_v13, %v10775_v30  ;;  %v14189_v13 = vand.u32 4294901760, %v14156_v44  ;;  %v8754_v8 = vpack.c.bf16 %v14191_v31, %v14190_v38  ;;  %v614_v44 = vld [vmem:[#allocation2 + $0x60] sm:$0xff]  ;;  %v632_v38 = vld [vmem:[#allocation2 + $0xf0] sm:$0xff] }
 0x12d   :  { %8617 = vmatpush1.bf16.msra.mxu0 %v14148_v39  ;;  %8713 = vmatpush1.bf16.msra.mxu1 %v14149_v26  ;;  %v14192_v39 = vld [vmem:[#allocation28_spill] sm:$0xff]  ;;  %v14193_v26 = vld [vmem:[#allocation29_spill] sm:$0xff] }
 0x12e   :  { %14147 = vst [vmem:[#allocation30_spill] sm:$0xff] %v10784_v51  ;;  %v10789_v42 = vand.u32 4294901760, %v10784_v51  ;;  %8619 = vmatprep.subr.bf16.mxu0 %v14151_v57  ;;  %8715 = vmatprep.subr.bf16.mxu1 %v14152_v40  ;;  %v8658_v3 = vpack.c.bf16 %v14189_v13, %v14188_v10  ;;  %v607_v57 = vld [vmem:[#allocation2 + $0x28] sm:$0xff] }
 0x12f   :  { %v615_v40 = vld [vmem:[#allocation2 + $0x68] sm:$0xff] }
 0x130   :  { %14150 = vst [vmem:[#allocation31_spill] sm:$0xff] %v10789_v42  ;;  %v768_v55 = vsub.f32 %v10784_v51, %v10789_v42 }
 0x131   :  { %8621 = vmatpush1.bf16.msra.mxu0 %v14154_v50  ;;  %8717 = vmatpush1.bf16.msra.mxu1 %v10543_v49  ;;  %v14157_v49 = vpack.c.bf16 %v10248_v61, %v10246_v60  ;;  %v617_v50 = vld [vmem:[#allocation2 + $0x78] sm:$0xff]  ;;  %v2065_v60 = vand.u32 4294901760, %v607_v57  ;;  %v2069_v61 = vand.u32 4294901760, %v615_v40 }
 0x132   :  { %v10795_v58 = vand.u32 4294901760, %v768_v55  ;;  %8623 = vmatprep.subr.bf16.mxu0 %v10570_v12  ;;  %8719 = vmatprep.subr.bf16.mxu1 %v10588_v7  ;;  %v14158_v12 = vpack.c.bf16 %v10253_v0, %v10251_v63  ;;  %v14159_v7 = vpack.c.bf16 %v10257_v2, %v10255_v1  ;;  %v14162_v63 = vpack.c.bf16 %v10280_v20, %v10278_v19  ;;  %v14172_v20 = vld [vmem:[#allocation9_spill] sm:$0xff]  ;;  %v609_v55 = vld [vmem:[#allocation2 + $0x38] sm:$0xff] }
 0x133   :  { %v14163_v0 = vpack.c.bf16 %v10284_v47, %v10282_v21  ;;  %v14164_v1 = vpack.c.bf16 %v10289_v24, %v10287_v23  ;;  %v14165_v2 = vpack.c.bf16 %v10293_v28, %v10291_v25  ;;  %v14167_v47 = vpack.c.bf16 %v14095_v45, %v10302_v35  ;;  %v14173_v21 = vld [vmem:[#allocation10_spill] sm:$0xff]  ;;  %v14174_v23 = vld [vmem:[#allocation11_spill] sm:$0xff]  ;;  %v14175_v24 = vld [vmem:[#allocation12_spill] sm:$0xff] }
 0x134   :  { %14153 = vst [vmem:[#allocation32_spill] sm:$0xff] %v10795_v58  ;;  %770 = vmatmul.mubr.f32.gmra.mrb[2].mxu0 %v10795_v58  ;;  %1466 = vmatmul.mubr.f32.gmra.mrb[2].mxu1 %v10795_v58  ;;  %v14171_v19 = vpack.c.bf16 %v10332_v5, %v10330_v4  ;;  %v14176_v25 = vld [vmem:[#allocation13_spill] sm:$0xff]  ;;  %v14177_v28 = vld [vmem:[#allocation14_spill] sm:$0xff]  ;;  %v14179_v35 = vld [vmem:[#allocation15_spill] sm:$0xff] }
 0x135   :  { %920 = vmatprep.mubr.f32.mxu0 %v14146_v53  ;;  %1616 = vmatprep.mubr.f32.mxu1 %v14146_v53  ;;  %v14184_v5 = vld [vmem:[#allocation21_spill] sm:$0xff]  ;;  %v14185_v45 = vld [vmem:[#allocation22_spill] sm:$0xff] }
 0x136   :  { %8625 = vmatpush1.bf16.msra.mxu0 %v10592_v41  ;;  %8721 = vmatpush1.bf16.msra.mxu1 %v10615_v48  ;;  %v14160_v41 = vpack.c.bf16 %v10270_v15, %v10267_v14  ;;  %v14161_v48 = vpack.c.bf16 %v10275_v17, %v10273_v16  ;;  %v14166_v14 = vpack.c.bf16 %v10298_v33, %v10296_v32  ;;  %v9997_v32 = vld [vmem:[%s13787_s0] sm:$0xff] }
 0x137   :  { %8627 = vmatprep.subr.bf16.mxu0 %v8626_v59  ;;  %8723 = vmatprep.subr.bf16.mxu1 %v14157_v49  ;;  %v14168_v15 = vpack.c.bf16 %v14097_v27, %v14096_v34  ;;  %v14169_v16 = vpack.c.bf16 %v10319_v54, %v10313_v46  ;;  %v14170_v17 = vpack.c.bf16 %v10326_v62, %v10323_v56  ;;  %v14180_v46 = vld [vmem:[#allocation16_spill] sm:$0xff]  ;;  %v14181_v54 = vld [vmem:[#allocation19_spill] sm:$0xff]  ;;  %v9998_v62 = vld [vmem:[%s13787_s0 + $0x8] sm:$0xff] }
 0x138   :  { %v10877_v33 = vmul.f32 %v9997_v32, %v9997_v32  ;;  %v14182_v56 = vld [vmem:[#allocation20_spill] sm:$0xff]  ;;  %v10891_v4 = vmul.f32 %v9998_v62, %v9998_v62  ;;  %v14187_v27 = vld [vmem:[#allocation27_spill] sm:$0xff]  ;;  %v646_v58 = vld [vmem:[#allocation2 + $0x160] sm:$0xff] }
 0x139   :  { %922 = vmatmul.mubr.f32.vlgmr.msra.gmra.mrb[0].mxu0 %v10758_v37  ;;  %1618 = vmatmul.mubr.f32.vlgmr.msra.gmra.mrb[0].mxu1 %v10758_v37  ;;  %v14186_v34 = vld [vmem:[#allocation24_spill] sm:$0xff]  ;;  %v608_v59 = vld [vmem:[#allocation2 + $0x30] sm:$0xff] }
 0x13a   :  { %8629 = vmatpush1.bf16.msra.mxu0 %v14158_v12  ;;  %8725 = vmatpush1.bf16.msra.mxu1 %v14159_v7  ;;  %14178 = vst [vmem:[#allocation33_spill] sm:$0xff] %v10877_v33  ;;  %14183 = vst [vmem:[#allocation34_spill] sm:$0xff] %v10891_v4  ;;  %v616_v49 = vld [vmem:[#allocation2 + $0x70] sm:$0xff]  ;;  %v2761_v12 = vand.u32 4294901760, %v609_v55  ;;  %v2765_v7 = vand.u32 4294901760, %v617_v50 }
 0x13b   :  { %927 = vmatprep.mubr.f32.mxu0 %v14146_v53  ;;  %1623 = vmatprep.mubr.f32.mxu1 %v14146_v53 }
 0x13c   :  { %8631 = vmatprep.subr.bf16.mxu0 %v14160_v41  ;;  %8727 = vmatprep.subr.bf16.mxu1 %v14161_v48  ;;  %v623_v41 = vld [vmem:[#allocation2 + $0xa8] sm:$0xff]  ;;  %v10932_v32 = vpack.c.bf16 %v2765_v7, %v2761_v12  ;;  %v10934_v62 = vsub.f32 %v617_v50, %v2765_v7 }
 0x13d   :  { %929 = vmatmul.mubr.f32.gmra.mrb[2].mxu0 %v10775_v30  ;;  %1625 = vmatmul.mubr.f32.gmra.mrb[2].mxu1 %v10775_v30  ;;  %v631_v48 = vld [vmem:[#allocation2 + $0xe8] sm:$0xff]  ;;  %v2073_v10 = vand.u32 4294901760, %v623_v41 }
 0x13e   :  { %8633 = vmatpush1.bf16.msra.mxu0 %v14162_v63  ;;  %8729 = vmatpush1.bf16.msra.mxu1 %v14163_v0  ;;  %v14194_v63 = vld [vmem:[#allocation23_spill] sm:$0xff]  ;;  %v10920_v0 = vpack.c.bf16 %v2069_v61, %v2065_v60  ;;  %14198 = vst [vmem:[#allocation37_spill] sm:$0xff] %v10932_v32  ;;  %v2077_v13 = vand.u32 4294901760, %v631_v48 }
 0x13f   :  { %8635 = vmatprep.subr.bf16.mxu0 %v14164_v1  ;;  %8731 = vmatprep.subr.bf16.mxu1 %v14165_v2  ;;  %v2763_v1 = vand.u32 4294901760, %v608_v59  ;;  %v625_v2 = vld [vmem:[#allocation2 + $0xb8] sm:$0xff] }
 0x140   :  { %1031 = vmatprep.mubr.f32.mxu0 %v14146_v53  ;;  %1727 = vmatprep.mubr.f32.mxu1 %v14146_v53  ;;  %14195 = vst [vmem:[#allocation35_spill] sm:$0xff] %v10920_v0  ;;  %v10958_v43 = vsub.f32 %v631_v48, %v2077_v13  ;;  %v655_v48 = vld [vmem:[#allocation2 + $0x1a8] sm:$0xff] }
 0x141   :  { %584 = vrot.lane.b32.xlu1 %v10877_v33, %s10086_s2  ;;  %592 = vrot.lane.b32.xlu0 %v10877_v33, %s10087_s28 }
 0x142   :  { %8637 = vmatpush1.bf16.msra.mxu0 %v14166_v14  ;;  %8733 = vmatpush1.bf16.msra.mxu1 %v14167_v47  ;;  %v14196_v14 = vld [vmem:[#allocation25_spill] sm:$0xff]  ;;  %v14197_v47 = vld [vmem:[#allocation26_spill] sm:$0xff] }
 0x143   :  { %8639 = vmatprep.subr.bf16.mxu0 %v14168_v15  ;;  %8735 = vmatprep.subr.bf16.mxu1 %v14169_v16  ;;  %v10924_v15 = vsub.f32 %v607_v57, %v2065_v60  ;;  %v10926_v16 = vsub.f32 %v615_v40, %v2069_v61  ;;  %v2769_v57 = vand.u32 4294901760, %v625_v2  ;;  %v647_v60 = vld [vmem:[#allocation2 + $0x168] sm:$0xff]  ;;  %v14200_v61 = vld [vmem:[#allocation40_spill] sm:$0xff] }
 0x145   :  { %586 = vrot.lane.b32.xlu1 %v10891_v4, %s10086_s2 }
 0x146   :  { %8641 = vmatpush1.bf16.msra.mxu0 %v14170_v17  ;;  %8737 = vmatpush1.bf16.msra.mxu1 %v14171_v19  ;;  %v10928_v17 = vsub.f32 %v609_v55, %v2761_v12  ;;  %v622_v19 = vld [vmem:[#allocation2 + $0xa0] sm:$0xff]  ;;  %v639_v55 = vld [vmem:[#allocation2 + $0x128] sm:$0xff] }
 0x147   :  { %8643 = vmatprep.subr.bf16.mxu0 %v14172_v20  ;;  %8739 = vmatprep.subr.bf16.mxu1 %v14173_v21  ;;  %v14201_v12 = vld [vmem:[#allocation41_spill] sm:$0xff] }
 0x149   :  { %1034 = vmatmul.mubr.f32.vlgmr.msra.gmra.mrb[0].mxu0 %v10762_v11  ;;  %1730 = vmatmul.mubr.f32.vlgmr.msra.gmra.mrb[0].mxu1 %v10762_v11  ;;  %v638_v11 = vld [vmem:[#allocation2 + $0x120] sm:$0xff] }
 0x14a   :  { %8645 = vmatpush1.bf16.msra.mxu0 %v14174_v23  ;;  %8741 = vmatpush1.bf16.msra.mxu1 %v14175_v24 }
 0x14b   :  { %1039 = vmatprep.mubr.f32.mxu0 %v14146_v53  ;;  %1735 = vmatprep.mubr.f32.mxu1 %v14146_v53 }
 0x14c   :  { %8647 = vmatprep.subr.bf16.mxu0 %v14176_v25  ;;  %8743 = vmatprep.subr.bf16.mxu1 %v14177_v28 }
 0x14d   :  { %1042 = vmatmul.mubr.f32.gmra.mrb[2].mxu0 %v10784_v51  ;;  %1738 = vmatmul.mubr.f32.gmra.mrb[2].mxu1 %v10784_v51  ;;  %v10954_v51 = vpack.c.bf16 %v2077_v13, %v2073_v10  ;;  %v663_v13 = vld [vmem:[#allocation2 + $0x1e8] sm:$0xff] }
 0x14e   :  { %8649 = vmatpush1.bf16.msra.mxu0 %v14179_v35  ;;  %8745 = vmatpush1.bf16.msra.mxu1 %v14180_v46 }
 0x14f   :  { %8651 = vmatprep.subr.bf16.mxu0 %v14181_v54  ;;  %8747 = vmatprep.subr.bf16.mxu1 %v14182_v56  ;;  %14205 = vst [vmem:[#allocation17_spill] sm:$0xff] %v10954_v51 }
 0x150   :  { %1128 = vmatprep.mubr.f32.mxu0 %v14146_v53  ;;  %1824 = vmatprep.mubr.f32.mxu1 %v14146_v53 }
 0x151   :  { %594 = vrot.lane.b32.xlu1 %v10891_v4, %s10087_s28  ;;  %v2775_v4 = vand.u32 4294901760, %v632_v38 }
 0x152   :  { %8653 = vmatpush1.bf16.msra.mxu0 %v14184_v5  ;;  %8749 = vmatpush1.bf16.msra.mxu1 %v14185_v45 }
 0x153   :  { %8655 = vmatprep.subr.bf16.mxu0 %v14186_v34  ;;  %8751 = vmatprep.subr.bf16.mxu1 %v14187_v27 }
 0x156   :  { %8657 = vmatpush1.bf16.msra.mxu0 %v14192_v39  ;;  %8753 = vmatpush1.bf16.msra.mxu1 %v14193_v26 }
 0x157   :  { %8659 = vmatprep.subr.bf16.mxu0 %v8658_v3  ;;  %8755 = vmatprep.subr.bf16.mxu1 %v8754_v8  ;;  %v624_v3 = vld [vmem:[#allocation2 + $0xb0] sm:$0xff] }
 0x159   :  { %1132 = vmatmul.mubr.f32.vlgmr.msra.gmra.mrb[0].mxu0 %v10766_v52  ;;  %1828 = vmatmul.mubr.f32.vlgmr.msra.gmra.mrb[0].mxu1 %v10766_v52  ;;  %v641_v52 = vld [vmem:[#allocation2 + $0x138] sm:$0xff] }
 0x15a   :  { %8661 = vmatpush1.bf16.msra.mxu0 %v10653_v6  ;;  %8757 = vmatpush1.bf16.msra.mxu1 %v10659_v29  ;;  %v2067_v6 = vand.u32 4294901760, %v606_v22  ;;  %v2071_v29 = vand.u32 4294901760, %v614_v44 }
 0x15b   :  { %1137 = vmatprep.mubr.f32.mxu0 %v14146_v53  ;;  %1833 = vmatprep.mubr.f32.mxu1 %v14146_v53 }
 0x15c   :  { %8663 = vmatprep.subr.bf16.mxu0 %v10665_v36  ;;  %8759 = vmatprep.subr.bf16.mxu1 %v10671_v18  ;;  %v2767_v36 = vand.u32 4294901760, %v616_v49  ;;  %v633_v18 = vld [vmem:[#allocation2 + $0xf8] sm:$0xff]  ;;  %v10936_v31 = vpack.c.bf16 %v2071_v29, %v2067_v6  ;;  %v10938_v8 = vsub.f32 %v606_v22, %v2067_v6  ;;  %v10944_v50 = vsub.f32 %v614_v44, %v2071_v29  ;;  %v14204_v22 = vld [vmem:[#allocation43_spill] sm:$0xff] }
 0x15d   :  { %1141 = vmatmul.mubr.f32.gmra.mrb[2].mxu0 %v10789_v42  ;;  %1837 = vmatmul.mubr.f32.gmra.mrb[2].mxu1 %v10789_v42  ;;  %v2773_v40 = vand.u32 4294901760, %v633_v18  ;;  %v10950_v6 = vsub.f32 %v608_v59, %v2763_v1  ;;  %v2771_v42 = vand.u32 4294901760, %v624_v3  ;;  %v10956_v44 = vsub.f32 %v623_v41, %v2073_v10 }
 0x15e   :  { %8665 = vmatpush1.bf16.msra.mxu0 %v10677_v9  ;;  %8761 = vmatpush1.bf16.msra.mxu1 %v14194_v63  ;;  %v630_v9 = vld [vmem:[#allocation2 + $0xe0] sm:$0xff]  ;;  %14199 = vst [vmem:[#allocation38_spill] sm:$0xff] %v10936_v31  ;;  %v10946_v7 = vpack.c.bf16 %v2767_v36, %v2763_v1  ;;  %v2075_v63 = vand.u32 4294901760, %v622_v19  ;;  %v10952_v33 = vsub.f32 %v616_v49, %v2767_v36  ;;  %v2081_v29 = vand.u32 4294901760, %v639_v55  ;;  %v640_v1 = vld [vmem:[#allocation2 + $0x130] sm:$0xff]  ;;  %v14207_v36 = vld [vmem:[#allocation44_spill] sm:$0xff] }
 0x15f   :  { %8667 = vmatprep.subr.bf16.mxu0 %v14196_v14  ;;  %8763 = vmatprep.subr.bf16.mxu1 %v14197_v47  ;;  %v2079_v14 = vand.u32 4294901760, %v630_v9  ;;  %v14203_v47 = vld [vmem:[#allocation42_spill] sm:$0xff]  ;;  %v10962_v59 = vsub.f32 %v625_v2, %v2769_v57  ;;  %v10964_v49 = vsub.f32 %v633_v18, %v2773_v40  ;;  %v2777_v10 = vand.u32 4294901760, %v641_v52  ;;  %v648_v31 = vld [vmem:[#allocation2 + $0x170] sm:$0xff] }
 0x160   :  { %1259 = vmatprep.mubr.f32.mxu0 %v14146_v53  ;;  %1955 = vmatprep.mubr.f32.mxu1 %v14146_v53  ;;  %14202 = vst [vmem:[#allocation39_spill] sm:$0xff] %v10946_v7  ;;  %v10970_v41 = vsub.f32 %v622_v19, %v2075_v63  ;;  %v10976_v18 = vpack.c.bf16 %v2775_v4, %v2771_v42 }
 0x161   :  { %v10968_v51 = vpack.c.bf16 %v2079_v14, %v2075_v63  ;;  %v10974_v2 = vsub.f32 %v630_v9, %v2079_v14  ;;  %v10984_v63 = vsub.f32 %v639_v55, %v2081_v29  ;;  %v2089_v9 = vand.u32 4294901760, %v655_v48 }
 0x162   :  { %8669 = vmatpush1.bf16.msra.mxu0 %v14200_v61  ;;  %8765 = vmatpush1.bf16.msra.mxu1 %v14201_v12  ;;  %v649_v61 = vld [vmem:[#allocation2 + $0x178] sm:$0xff]  ;;  %v2085_v12 = vand.u32 4294901760, %v647_v60  ;;  %14210 = vst [vmem:[#allocation10_spill] sm:$0xff] %v10970_v41  ;;  %14212 = vst [vmem:[#allocation12_spill] sm:$0xff] %v10976_v18  ;;  %v2093_v14 = vand.u32 4294901760, %v663_v13  ;;  %v654_v18 = vld [vmem:[#allocation2 + $0x1a0] sm:$0xff] }
 0x163   :  { %8671 = vmatprep.subr.bf16.mxu0 %v14203_v47  ;;  %8767 = vmatprep.subr.bf16.mxu1 %v14204_v22  ;;  %v10960_v47 = vpack.c.bf16 %v2773_v40, %v2769_v57  ;;  %v14208_v22 = vld [vmem:[#allocation45_spill] sm:$0xff]  ;;  %14209 = vst [vmem:[#allocation9_spill] sm:$0xff] %v10968_v51  ;;  %v2781_v7 = vand.u32 4294901760, %v649_v61  ;;  %14211 = vst [vmem:[#allocation11_spill] sm:$0xff] %v10974_v2  ;;  %v2083_v57 = vand.u32 4294901760, %v638_v11  ;;  %v2087_v40 = vand.u32 4294901760, %v646_v58 }
 0x164   :  { %v10982_v19 = vpack.c.bf16 %v2085_v12, %v2081_v29  ;;  %v657_v51 = vld [vmem:[#allocation2 + $0x1b8] sm:$0xff] }
 0x165   :  { %14206 = vst [vmem:[#allocation18_spill] sm:$0xff] %v10960_v47  ;;  %v665_v47 = vld [vmem:[#allocation2 + $0x1f8] sm:$0xff]  ;;  %v11000_v55 = vpack.c.bf16 %v2087_v40, %v2083_v57  ;;  %v2785_v29 = vand.u32 4294901760, %v657_v51 }
 0x166   :  { %8673 = vmatpush1.bf16.msra.mxu0 %v14207_v36  ;;  %8769 = vmatpush1.bf16.msra.mxu1 %v14208_v22  ;;  %v10978_v36 = vsub.f32 %v624_v3, %v2771_v42  ;;  %v10980_v22 = vsub.f32 %v632_v38, %v2775_v4  ;;  %14213 = vst [vmem:[#allocation13_spill] sm:$0xff] %v10982_v19  ;;  %v2789_v19 = vand.u32 4294901760, %v665_v47 }
 0x167   :  { %8675 = vmatprep.subr.bf16.mxu0 %v14172_v20  ;;  %8771 = vmatprep.subr.bf16.mxu1 %v14173_v21  ;;  %v2779_v20 = vand.u32 4294901760, %v640_v1  ;;  %v2783_v21 = vand.u32 4294901760, %v648_v31  ;;  %v10990_v42 = vsub.f32 %v647_v60, %v2085_v12  ;;  %v10992_v4 = vpack.c.bf16 %v2781_v7, %v2777_v10  ;;  %14215 = vst [vmem:[#allocation15_spill] sm:$0xff] %v11000_v55  ;;  %v656_v12 = vld [vmem:[#allocation2 + $0x1b0] sm:$0xff] }
 0x168   :  { %v10994_v3 = vsub.f32 %v641_v52, %v2777_v10  ;;  %v10998_v38 = vsub.f32 %v649_v61, %v2781_v7  ;;  %v11006_v52 = vsub.f32 %v646_v58, %v2087_v40  ;;  %v11016_v10 = vpack.c.bf16 %v2093_v14, %v2089_v9 }
 0x169   :  { %1261 = vmatmul.mubr.f32.vlgmr.msra.gmra.mrb[0].mxu0 %v10758_v37  ;;  %1957 = vmatmul.mubr.f32.vlgmr.msra.gmra.mrb[0].mxu1 %v10758_v37  ;;  %14214 = vst [vmem:[#allocation14_spill] sm:$0xff] %v10992_v4  ;;  %v11008_v60 = vsub.f32 %v640_v1, %v2779_v20  ;;  %v11012_v7 = vpack.c.bf16 %v2783_v21, %v2779_v20  ;;  %v2787_v40 = vand.u32 4294901760, %v656_v12  ;;  %v13923_v20 = vand.u32 4294901760, %v10944_v50 }
 0x16a   :  { %8677 = vmatpush1.bf16.msra.mxu0 %v14174_v23  ;;  %8773 = vmatpush1.bf16.msra.mxu1 %v14175_v24  ;;  %v662_v23 = vld [vmem:[#allocation2 + $0x1e0] sm:$0xff]  ;;  %v11004_v24 = vsub.f32 %v638_v11, %v2083_v57  ;;  %v11014_v61 = vsub.f32 %v648_v31, %v2783_v21  ;;  %14217 = vst [vmem:[#allocation19_spill] sm:$0xff] %v11016_v10  ;;  %v664_v57 = vld [vmem:[#allocation2 + $0x1f0] sm:$0xff]  ;;  %v13924_v21 = vand.u32 4294901760, %v10950_v6 }
 0x16b   :  { %1266 = vmatprep.mubr.f32.mxu0 %v14146_v53  ;;  %1962 = vmatprep.mubr.f32.mxu1 %v14146_v53  ;;  %14216 = vst [vmem:[#allocation16_spill] sm:$0xff] %v11012_v7  ;;  %v11020_v11 = vsub.f32 %v655_v48, %v2089_v9  ;;  %v11022_v58 = vsub.f32 %v663_v13, %v2093_v14  ;;  %v13920_v48 = vand.u32 4294901760, %v10928_v17 }
 0x16c   :  { %8679 = vmatprep.subr.bf16.mxu0 %v14176_v25  ;;  %8775 = vmatprep.subr.bf16.mxu1 %v14177_v28  ;;  %v2091_v25 = vand.u32 4294901760, %v654_v18  ;;  %v2095_v28 = vand.u32 4294901760, %v662_v23  ;;  %v11026_v1 = vpack.c.bf16 %v2789_v19, %v2785_v29  ;;  %v11028_v31 = vsub.f32 %v657_v51, %v2785_v29 }
 0x16d   :  { %1268 = vmatmul.mubr.f32.gmra.mrb[2].mxu0 %v10775_v30  ;;  %1964 = vmatmul.mubr.f32.gmra.mrb[2].mxu1 %v10775_v30  ;;  %v11037_v13 = vsub.f32 %v665_v47, %v2789_v19  ;;  %v2791_v29 = vand.u32 4294901760, %v664_v57 }
 0x16e   :  { %8681 = vmatpush1.bf16.msra.mxu0 %v14179_v35  ;;  %8777 = vmatpush1.bf16.msra.mxu1 %v14180_v46  ;;  %14218 = vst [vmem:[#allocation20_spill] sm:$0xff] %v11026_v1  ;;  %v13921_v35 = vand.u32 4294901760, %v10924_v15  ;;  %v13919_v46 = vand.u32 4294901760, %v10926_v16  ;;  %v11039_v51 = vsub.f32 %v654_v18, %v2091_v25  ;;  %v11045_v9 = vpack.c.bf16 %v2095_v28, %v2091_v25 }
 0x16f   :  { %8683 = vmatprep.subr.bf16.mxu0 %v14181_v54  ;;  %8779 = vmatprep.subr.bf16.mxu1 %v14182_v56  ;;  %v13922_v56 = vand.u32 4294901760, %v10938_v8  ;;  %v11047_v14 = vsub.f32 %v662_v23, %v2095_v28  ;;  %v11049_v54 = vsub.f32 %v656_v12, %v2787_v40  ;;  %v13925_v18 = vand.u32 4294901760, %v10952_v33 }
 0x170   :  { %1354 = vmatprep.mubr.f32.mxu0 %v14146_v53  ;;  %2050 = vmatprep.mubr.f32.mxu1 %v14146_v53  ;;  %14219 = vst [vmem:[#allocation21_spill] sm:$0xff] %v11045_v9  ;;  %v2171_v47 = vsub.f32 %v10924_v15, %v13921_v35  ;;  %v2183_v19 = vsub.f32 %v10926_v16, %v13919_v46  ;;  %v13931_v46 = vand.u32 4294901760, %v10962_v59 }
 0x171   :  { %v2177_v12 = vsub.f32 %v10938_v8, %v13922_v56  ;;  %v2189_v25 = vsub.f32 %v10944_v50, %v13923_v20  ;;  %v2873_v28 = vsub.f32 %v10950_v6, %v13924_v21  ;;  %v11083_v35 = vsub.f32 %v664_v57, %v2791_v29 }
 0x172   :  { %8685 = vmatpush1.bf16.msra.mxu0 %v14184_v5  ;;  %8781 = vmatpush1.bf16.msra.mxu1 %v14185_v45  ;;  %v13926_v5 = vand.u32 4294901760, %v10956_v44  ;;  %v13932_v45 = vand.u32 4294901760, %v10958_v43  ;;  %v2172_v21 = vand.u32 4294901760, %v2171_v47  ;;  %v2184_v57 = vand.u32 4294901760, %v2183_v19  ;;  %v14224_v19 = vld [vmem:[#allocation39_spill] sm:$0xff] }
 0x173   :  { %8687 = vmatprep.subr.bf16.mxu0 %v14186_v34  ;;  %8783 = vmatprep.subr.bf16.mxu1 %v14187_v27  ;;  %v2867_v34 = vsub.f32 %v10928_v17, %v13920_v48  ;;  %v14220_v27 = vand.u32 4294901760, %v10934_v62  ;;  %v2885_v48 = vsub.f32 %v10952_v33, %v13925_v18  ;;  %v2178_v20 = vand.u32 4294901760, %v2177_v12 }
 0x174   :  { %v2190_v47 = vand.u32 4294901760, %v2189_v25  ;;  %v2874_v56 = vand.u32 4294901760, %v2873_v28  ;;  %v2891_v18 = vsub.f32 %v10962_v59, %v13931_v46  ;;  %v14226_v12 = vand.u32 4294901760, %v10974_v2 }
 0x175   :  { %v2879_v23 = vsub.f32 %v10934_v62, %v14220_v27  ;;  %v11081_v27 = vpack.c.bf16 %v2791_v29, %v2787_v40  ;;  %v2868_v40 = vand.u32 4294901760, %v2867_v34  ;;  %v14225_v34 = vand.u32 4294901760, %v10970_v41 }
 0x176   :  { %8689 = vmatpush1.bf16.msra.mxu0 %v14192_v39  ;;  %8785 = vmatpush1.bf16.msra.mxu1 %v14193_v26  ;;  %v2195_v39 = vsub.f32 %v10956_v44, %v13926_v5  ;;  %v2207_v26 = vsub.f32 %v10958_v43, %v13932_v45  ;;  %v14222_v5 = vand.u32 4294901760, %v10964_v49  ;;  %v2213_v25 = vsub.f32 %v10974_v2, %v14226_v12  ;;  %v14229_v2 = vld [vmem:[#allocation9_spill] sm:$0xff] }
 0x177   :  { %14221 = vst [vmem:[#allocation22_spill] sm:$0xff] %v11081_v27  ;;  %8787 = vmatprep.subr.bf16.mxu0 %v10920_v0  ;;  %8883 = vmatprep.subr.bf16.mxu1 %v10932_v32  ;;  %v2880_v29 = vand.u32 4294901760, %v2879_v23  ;;  %v14223_v0 = vld [vmem:[#allocation38_spill] sm:$0xff]  ;;  %v2201_v23 = vsub.f32 %v10970_v41, %v14225_v34  ;;  %v8802_v41 = vpack.c.bf16 %v2184_v57, %v2172_v21  ;;  %v14231_v12 = vand.u32 4294901760, %v10978_v36 }
 0x178   :  { %v2903_v32 = vsub.f32 %v10964_v49, %v14222_v5  ;;  %v2886_v5 = vand.u32 4294901760, %v2885_v48  ;;  %v2196_v45 = vand.u32 4294901760, %v2195_v39  ;;  %v14228_v34 = vld [vmem:[#allocation18_spill] sm:$0xff]  ;;  %v11126_v39 = vpack.c.bf16 %v2190_v47, %v2178_v20 }
 0x179   :  { %1356 = vmatmul.mubr.f32.vlgmr.msra.gmra.mrb[0].mxu0 %v10758_v37  ;;  %2052 = vmatmul.mubr.f32.vlgmr.msra.gmra.mrb[0].mxu1 %v10758_v37  ;;  %v14227_v37 = vld [vmem:[#allocation17_spill] sm:$0xff]  ;;  %v8898_v48 = vpack.c.bf16 %v2880_v29, %v2868_v40  ;;  %v2202_v21 = vand.u32 4294901760, %v2201_v23  ;;  %v2214_v57 = vand.u32 4294901760, %v2213_v25  ;;  %v2897_v28 = vsub.f32 %v10978_v36, %v14231_v12 }
 0x17a   :  { %8789 = vmatpush1.bf16.msra.mxu0 %v14223_v0  ;;  %8885 = vmatpush1.bf16.msra.mxu1 %v14224_v19  ;;  %v2208_v0 = vand.u32 4294901760, %v2207_v26  ;;  %v2892_v26 = vand.u32 4294901760, %v2891_v18  ;;  %v2904_v19 = vand.u32 4294901760, %v2903_v32  ;;  %v14232_v46 = vand.u32 4294901760, %v10980_v22 }
 0x17b   :  { %1361 = vmatprep.mubr.f32.mxu0 %v14146_v53  ;;  %2057 = vmatprep.mubr.f32.mxu1 %v14146_v53  ;;  %v8900_v20 = vpack.c.bf16 %v2886_v5, %v2874_v56  ;;  %v14234_v18 = vand.u32 4294901760, %v10984_v63  ;;  %v14235_v29 = vand.u32 4294901760, %v10990_v42  ;;  %v14237_v56 = vand.u32 4294901760, %v10998_v38 }
 0x17c   :  { %8791 = vmatprep.subr.bf16.mxu0 %v14227_v37  ;;  %8887 = vmatprep.subr.bf16.mxu1 %v14228_v34  ;;  %v14230_v37 = vld [vmem:[#allocation12_spill] sm:$0xff]  ;;  %v2909_v34 = vsub.f32 %v10980_v22, %v14232_v46  ;;  %v11138_v32 = vpack.c.bf16 %v2208_v0, %v2196_v45  ;;  %v14236_v46 = vand.u32 4294901760, %v10994_v3  ;;  %v8902_v25 = vpack.c.bf16 %v2904_v19, %v2892_v26 }
 0x17d   :  { %1363 = vmatmul.mubr.f32.gmra.mrb[2].mxu0 %v10775_v30  ;;  %2059 = vmatmul.mubr.f32.gmra.mrb[2].mxu1 %v10775_v30  ;;  %v14233_v30 = vld [vmem:[#allocation13_spill] sm:$0xff]  ;;  %v2219_v40 = vsub.f32 %v10984_v63, %v14234_v18  ;;  %v2231_v47 = vsub.f32 %v10990_v42, %v14235_v29  ;;  %v2927_v0 = vsub.f32 %v10998_v38, %v14237_v56  ;;  %v14241_v26 = vand.u32 4294901760, %v11014_v61 }
 0x17e   :  { %8793 = vmatpush1.bf16.msra.mxu0 %v14229_v2  ;;  %8889 = vmatpush1.bf16.msra.mxu1 %v14230_v37  ;;  %v2915_v23 = vsub.f32 %v10994_v3, %v14236_v46  ;;  %v8808_v29 = vpack.c.bf16 %v2214_v57, %v2202_v21  ;;  %v2910_v46 = vand.u32 4294901760, %v2909_v34  ;;  %v14238_v21 = vand.u32 4294901760, %v11004_v24 }
 0x17f   :  { %8795 = vmatprep.subr.bf16.mxu0 %v14233_v30  ;;  %8891 = vmatprep.subr.bf16.mxu1 %v10992_v4  ;;  %v2898_v4 = vand.u32 4294901760, %v2897_v28  ;;  %v2220_v19 = vand.u32 4294901760, %v2219_v40  ;;  %v2232_v12 = vand.u32 4294901760, %v2231_v47  ;;  %v2928_v45 = vand.u32 4294901760, %v2927_v0 }
 0x180   :  { %2145 = vmatprep.mubr.f32.mxu0 %v14146_v53  ;;  %2841 = vmatprep.mubr.f32.mxu1 %v14146_v53  ;;  %v2916_v5 = vand.u32 4294901760, %v2915_v23  ;;  %v2225_v28 = vsub.f32 %v11004_v24, %v14238_v21  ;;  %v14239_v34 = vand.u32 4294901760, %v11006_v52  ;;  %v14240_v30 = vand.u32 4294901760, %v11008_v60 }
 0x181   :  { %v2933_v56 = vsub.f32 %v11014_v61, %v14241_v26  ;;  %v14242_v23 = vand.u32 4294901760, %v11020_v11  ;;  %v14243_v26 = vand.u32 4294901760, %v11022_v58  ;;  %v14244_v18 = vand.u32 4294901760, %v11028_v31 }
 0x182   :  { %8797 = vmatpush1.bf16.msra.mxu0 %v11000_v55  ;;  %8893 = vmatpush1.bf16.msra.mxu1 %v11012_v7  ;;  %v2237_v57 = vsub.f32 %v11006_v52, %v14239_v34  ;;  %v2921_v40 = vsub.f32 %v11008_v60, %v14240_v30  ;;  %v8810_v21 = vpack.c.bf16 %v2232_v12, %v2220_v19  ;;  %v2226_v34 = vand.u32 4294901760, %v2225_v28  ;;  %v14246_v7 = vld [vmem:[#allocation48_spill] sm:$0xff] }
 0x183   :  { %8799 = vmatprep.subr.bf16.mxu0 %v11016_v10  ;;  %8895 = vmatprep.subr.bf16.mxu1 %v11026_v1  ;;  %v2243_v0 = vsub.f32 %v11020_v11, %v14242_v23  ;;  %v2255_v47 = vsub.f32 %v11022_v58, %v14243_v26  ;;  %v8904_v1 = vpack.c.bf16 %v2910_v46, %v2898_v4  ;;  %v2934_v30 = vand.u32 4294901760, %v2933_v56  ;;  %v14251_v19 = vld [vmem:[#allocation32_spill] sm:$0xff] }
 0x184   :  { %v8906_v10 = vpack.c.bf16 %v2928_v45, %v2916_v5  ;;  %v14247_v26 = vand.u32 4294901760, %v11039_v51  ;;  %v14249_v45 = vand.u32 4294901760, %v11049_v54 }
 0x185   :  { %v2256_v46 = vand.u32 4294901760, %v2255_v47 }
 0x186   :  { %8801 = vmatpush1.bf16.msra.mxu0 %v11045_v9  ;;  %8897 = vmatpush1.bf16.msra.mxu1 %v11081_v27  ;;  %v2939_v27 = vsub.f32 %v11028_v31, %v14244_v18  ;;  %v14245_v9 = vand.u32 4294901760, %v11037_v13  ;;  %v2249_v55 = vsub.f32 %v11039_v51, %v14247_v26  ;;  %v2945_v5 = vsub.f32 %v11049_v54, %v14249_v45 }
 0x187   :  { %8803 = vmatprep.subr.bf16.mxu0 %v8802_v41  ;;  %8899 = vmatprep.subr.bf16.mxu1 %v8898_v48  ;;  %v2238_v41 = vand.u32 4294901760, %v2237_v57  ;;  %v2922_v48 = vand.u32 4294901760, %v2921_v40  ;;  %v2244_v18 = vand.u32 4294901760, %v2243_v0  ;;  %v8822_v0 = vpack.c.bf16 %v10958_v43, %v10956_v44 }
 0x188   :  { %v2951_v23 = vsub.f32 %v11037_v13, %v14245_v9  ;;  %v14248_v9 = vand.u32 4294901760, %v11047_v14  ;;  %v2250_v57 = vand.u32 4294901760, %v2249_v55  ;;  %v2946_v26 = vand.u32 4294901760, %v2945_v5  ;;  %v14255_v5 = vld [vmem:[#allocation49_spill] sm:$0xff] }
 0x189   :  { %2151 = vmatmul.mubr.f32.vlgmr.msra.gmra.mrb[4].mxu0 %v14246_v7  ;;  %2847 = vmatmul.mubr.f32.vlgmr.msra.gmra.mrb[4].mxu1 %v14246_v7  ;;  %v14250_v7 = vand.u32 4294901760, %v11083_v35  ;;  %v8812_v56 = vpack.c.bf16 %v2238_v41, %v2226_v34  ;;  %v8908_v28 = vpack.c.bf16 %v2934_v30, %v2922_v48  ;;  %v8814_v47 = vpack.c.bf16 %v2256_v46, %v2244_v18  ;;  %v14252_v34 = vld [vmem:[#allocation36_spill] sm:$0xff]  ;;  %v14253_v30 = vld [vmem:[#allocation10_spill] sm:$0xff] }
 0x18a   :  { %8805 = vmatpush1.bf16.msra.mxu0 %v11126_v39  ;;  %8901 = vmatpush1.bf16.msra.mxu1 %v8900_v20  ;;  %v2261_v4 = vsub.f32 %v11047_v14, %v14248_v9  ;;  %v2940_v39 = vand.u32 4294901760, %v2939_v27  ;;  %v2952_v20 = vand.u32 4294901760, %v2951_v23  ;;  %v8818_v55 = vpack.c.bf16 %v10926_v16, %v10924_v15  ;;  %v14254_v23 = vld [vmem:[#allocation11_spill] sm:$0xff] }
 0x18b   :  { %v2957_v12 = vsub.f32 %v11083_v35, %v14250_v7  ;;  %2156 = vmatprep.mubr.f32.mxu0 %v14146_v53  ;;  %2852 = vmatprep.mubr.f32.mxu1 %v14146_v53  ;;  %v8824_v41 = vpack.c.bf16 %v14254_v23, %v14253_v30  ;;  %v8920_v48 = vpack.c.bf16 %v10980_v22, %v10978_v36 }
 0x18c   :  { %8807 = vmatprep.subr.bf16.mxu0 %v11138_v32  ;;  %8903 = vmatprep.subr.bf16.mxu1 %v8902_v25  ;;  %v2262_v40 = vand.u32 4294901760, %v2261_v4  ;;  %v8910_v27 = vpack.c.bf16 %v2952_v20, %v2940_v39  ;;  %v8826_v4 = vpack.c.bf16 %v10990_v42, %v10984_v63  ;;  %v8922_v45 = vpack.c.bf16 %v10998_v38, %v10994_v3 }
 0x18d   :  { %2162 = vmatmul.mubr.f32.gmra.mrb[6].mxu0 %v14251_v19  ;;  %2858 = vmatmul.mubr.f32.gmra.mrb[6].mxu1 %v14251_v19  ;;  %v2958_v9 = vand.u32 4294901760, %v2957_v12  ;;  %v8828_v7 = vpack.c.bf16 %v11006_v52, %v11004_v24  ;;  %v8924_v12 = vpack.c.bf16 %v11014_v61, %v11008_v60  ;;  %v8830_v18 = vpack.c.bf16 %v11022_v58, %v11020_v11  ;;  %v14256_v19 = vld [vmem:[#allocation35_spill] sm:$0xff] }
 0x18e   :  { %8809 = vmatpush1.bf16.msra.mxu0 %v8808_v29  ;;  %8905 = vmatpush1.bf16.msra.mxu1 %v8904_v1  ;;  %v8816_v32 = vpack.c.bf16 %v2262_v40, %v2250_v57  ;;  %v8914_v1 = vpack.c.bf16 %v10934_v62, %v10928_v17  ;;  %v8916_v29 = vpack.c.bf16 %v10952_v33, %v10950_v6  ;;  %v14259_v57 = vld [vmem:[#allocation38_spill] sm:$0xff]  ;;  %v14260_v40 = vld [vmem:[#allocation39_spill] sm:$0xff] }
 0x18f   :  { %8811 = vmatprep.subr.bf16.mxu0 %v8810_v21  ;;  %8907 = vmatprep.subr.bf16.mxu1 %v8906_v10  ;;  %v8912_v25 = vpack.c.bf16 %v2958_v9, %v2946_v26  ;;  %v8820_v10 = vpack.c.bf16 %v10944_v50, %v10938_v8  ;;  %v8918_v21 = vpack.c.bf16 %v10964_v49, %v10962_v59  ;;  %v14261_v26 = vld [vmem:[#allocation17_spill] sm:$0xff]  ;;  %v14262_v9 = vld [vmem:[#allocation18_spill] sm:$0xff] }
 0x190   :  { %2312 = vmatprep.mubr.f32.mxu0 %v14146_v53  ;;  %3008 = vmatprep.mubr.f32.mxu1 %v14146_v53  ;;  %v8926_v46 = vpack.c.bf16 %v11037_v13, %v11028_v31  ;;  %v8832_v39 = vpack.c.bf16 %v11047_v14, %v11039_v51  ;;  %v8928_v20 = vpack.c.bf16 %v11083_v35, %v11049_v54 }
 0x192   :  { %8813 = vmatpush1.bf16.msra.mxu0 %v8812_v56  ;;  %8909 = vmatpush1.bf16.msra.mxu1 %v8908_v28  ;;  %v14257_v56 = vld [vmem:[#allocation37_spill] sm:$0xff]  ;;  %v14258_v28 = vld [vmem:[#allocation46_spill] sm:$0xff] }
 0x193   :  { %8815 = vmatprep.subr.bf16.mxu0 %v8814_v47  ;;  %8911 = vmatprep.subr.bf16.mxu1 %v8910_v27  ;;  %v14263_v47 = vld [vmem:[#allocation30_spill] sm:$0xff]  ;;  %v14264_v27 = vld [vmem:[#allocation13_spill] sm:$0xff] }
 0x196   :  { %8817 = vmatpush1.bf16.msra.mxu0 %v8816_v32  ;;  %8913 = vmatpush1.bf16.msra.mxu1 %v8912_v25  ;;  %v14265_v32 = vld [vmem:[#allocation14_spill] sm:$0xff]  ;;  %v14266_v25 = vld [vmem:[#allocation15_spill] sm:$0xff] }
 0x197   :  { %8819 = vmatprep.subr.bf16.mxu0 %v8818_v55  ;;  %8915 = vmatprep.subr.bf16.mxu1 %v8914_v1  ;;  %v14267_v55 = vld [vmem:[#allocation16_spill] sm:$0xff]  ;;  %v14268_v1 = vld [vmem:[#allocation19_spill] sm:$0xff] }
 0x199   :  { %2314 = vmatmul.mubr.f32.vlgmr.msra.gmra.mrb[4].mxu0 %v14252_v34  ;;  %3010 = vmatmul.mubr.f32.vlgmr.msra.gmra.mrb[4].mxu1 %v14252_v34 }
 0x19a   :  { %8821 = vmatpush1.bf16.msra.mxu0 %v8820_v10  ;;  %8917 = vmatpush1.bf16.msra.mxu1 %v8916_v29  ;;  %v14269_v10 = vld [vmem:[#allocation20_spill] sm:$0xff]  ;;  %v14270_v29 = vand.u32 4294901760, %v10924_v15  ;;  %v14279_v15 = vand.u32 4294901760, %v10952_v33  ;;  %v14285_v33 = vand.u32 4294901760, %v14253_v30  ;;  %v14292_v30 = vand.u32 4294901760, %v10998_v38 }
 0x19b   :  { %2319 = vmatprep.mubr.f32.mxu0 %v14146_v53  ;;  %3015 = vmatprep.mubr.f32.mxu1 %v14146_v53  ;;  %v14298_v38 = vand.u32 4294901760, %v11020_v11  ;;  %v14304_v11 = vand.u32 4294901760, %v11049_v54 }
 0x19c   :  { %8823 = vmatprep.subr.bf16.mxu0 %v8822_v0  ;;  %8919 = vmatprep.subr.bf16.mxu1 %v8918_v21  ;;  %v14271_v0 = vand.u32 4294901760, %v10926_v16 }
 0x19d   :  { %2321 = vmatmul.mubr.f32.gmra.mrb[6].mxu0 %v14255_v5  ;;  %3017 = vmatmul.mubr.f32.gmra.mrb[6].mxu1 %v14255_v5 }
 0x19e   :  { %8825 = vmatpush1.bf16.msra.mxu0 %v8824_v41  ;;  %8921 = vmatpush1.bf16.msra.mxu1 %v8920_v48  ;;  %v8850_v21 = vpack.c.bf16 %v14271_v0, %v14270_v29  ;;  %v14272_v41 = vand.u32 4294901760, %v10928_v17  ;;  %v14273_v48 = vand.u32 4294901760, %v10934_v62  ;;  %v14280_v17 = vand.u32 4294901760, %v10956_v44  ;;  %v14284_v29 = vld [vmem:[#allocation47_spill] sm:$0xff] }
 0x19f   :  { %8827 = vmatprep.subr.bf16.mxu0 %v8826_v4  ;;  %8923 = vmatprep.subr.bf16.mxu1 %v8922_v45  ;;  %v14274_v45 = vld [vmem:[#allocation21_spill] sm:$0xff]  ;;  %v14281_v62 = vand.u32 4294901760, %v10958_v43  ;;  %v14287_v44 = vand.u32 4294901760, %v10978_v36  ;;  %v14288_v43 = vand.u32 4294901760, %v10980_v22  ;;  %v14293_v36 = vld [vmem:[#allocation31_spill] sm:$0xff]  ;;  %v14294_v22 = vand.u32 4294901760, %v11004_v24 }
 0x1a0   :  { %2423 = vmatprep.mubr.f32.mxu0 %v14146_v53  ;;  %3119 = vmatprep.mubr.f32.mxu1 %v14146_v53  ;;  %v8946_v4 = vpack.c.bf16 %v14273_v48, %v14272_v41  ;;  %v14291_v41 = vand.u32 4294901760, %v10994_v3  ;;  %v14297_v3 = vand.u32 4294901760, %v11014_v61 }
 0x1a1   :  { %v8952_v0 = vpack.c.bf16 %v14288_v43, %v14287_v44 }
 0x1a2   :  { %8829 = vmatpush1.bf16.msra.mxu0 %v8828_v7  ;;  %8925 = vmatpush1.bf16.msra.mxu1 %v8924_v12  ;;  %v14275_v7 = vld [vmem:[#allocation22_spill] sm:$0xff]  ;;  %v14276_v12 = vand.u32 4294901760, %v10938_v8 }
 0x1a3   :  { %8831 = vmatprep.subr.bf16.mxu0 %v8830_v18  ;;  %8927 = vmatprep.subr.bf16.mxu1 %v8926_v46  ;;  %v14277_v18 = vand.u32 4294901760, %v10944_v50  ;;  %v14286_v50 = vand.u32 4294901760, %v14254_v23  ;;  %v8954_v23 = vpack.c.bf16 %v14292_v30, %v14291_v41  ;;  %v14310_v41 = vmov 920167782  }
 0x1a5   :  { %v8852_v46 = vpack.c.bf16 %v14277_v18, %v14276_v12  ;;  %v14299_v12 = vand.u32 4294901760, %v11022_v58  ;;  %v14305_v58 = vand.u32 4294901760, %v11083_v35 }
 0x1a6   :  { %8833 = vmatpush1.bf16.msra.mxu0 %v8832_v39  ;;  %8929 = vmatpush1.bf16.msra.mxu1 %v8928_v20  ;;  %v14278_v39 = vand.u32 4294901760, %v10950_v6  ;;  %v8854_v20 = vpack.c.bf16 %v14281_v62, %v14280_v17  ;;  %v8856_v6 = vpack.c.bf16 %v14286_v50, %v14285_v33 }
 0x1a7   :  { %8835 = vmatprep.subr.bf16.mxu0 %v14256_v19  ;;  %8931 = vmatprep.subr.bf16.mxu1 %v14257_v56  ;;  %v8862_v18 = vpack.c.bf16 %v14299_v12, %v14298_v38  ;;  %v14314_v12 = vmov 1326507024  }
 0x1a8   :  { %v8948_v16 = vpack.c.bf16 %v14279_v15, %v14278_v39  ;;  %v14301_v39 = vand.u32 4294901760, %v11037_v13  ;;  %v8960_v15 = vpack.c.bf16 %v14305_v58, %v14304_v11  ;;  %v14306_v13 = vld [vmem:[#allocation33_spill] sm:$0xff] }
 0x1a9   :  { %2426 = vmatmul.mubr.f32.vlgmr.msra.gmra.mrb[4].mxu0 %v14258_v28  ;;  %3122 = vmatmul.mubr.f32.vlgmr.msra.gmra.mrb[4].mxu1 %v14258_v28  ;;  %v14282_v28 = vand.u32 4294901760, %v10962_v59  ;;  %v14289_v59 = vand.u32 4294901760, %v10984_v63  ;;  %v14295_v63 = vand.u32 4294901760, %v11006_v52  ;;  %v14302_v52 = vand.u32 4294901760, %v11039_v51 }
 0x1aa   :  { %8837 = vmatpush1.bf16.msra.mxu0 %v14259_v57  ;;  %8933 = vmatpush1.bf16.msra.mxu1 %v14260_v40 }
 0x1ab   :  { %2431 = vmatprep.mubr.f32.mxu0 %v14146_v53  ;;  %3127 = vmatprep.mubr.f32.mxu1 %v14146_v53  ;;  %v8860_v48 = vpack.c.bf16 %v14295_v63, %v14294_v22  ;;  %v14311_v22 = vmov 2102212464  }
 0x1ac   :  { %8839 = vmatprep.subr.bf16.mxu0 %v14261_v26  ;;  %8935 = vmatprep.subr.bf16.mxu1 %v14262_v9 }
 0x1ad   :  { %2434 = vmatmul.mubr.f32.gmra.mrb[6].mxu0 %v14263_v47  ;;  %3130 = vmatmul.mubr.f32.gmra.mrb[6].mxu1 %v14263_v47  ;;  %v14283_v47 = vand.u32 4294901760, %v10964_v49  ;;  %v14290_v49 = vand.u32 4294901760, %v10990_v42  ;;  %v14296_v42 = vand.u32 4294901760, %v11008_v60  ;;  %v14303_v60 = vand.u32 4294901760, %v11047_v14  ;;  %v14307_v14 = vld [vmem:[#allocation34_spill] sm:$0xff] }
 0x1ae   :  { %8841 = vmatpush1.bf16.msra.mxu0 %v14229_v2  ;;  %8937 = vmatpush1.bf16.msra.mxu1 %v14230_v37 }
 0x1af   :  { %8843 = vmatprep.subr.bf16.mxu0 %v14264_v27  ;;  %8939 = vmatprep.subr.bf16.mxu1 %v14265_v32  ;;  %v8950_v8 = vpack.c.bf16 %v14283_v47, %v14282_v28  ;;  %v8864_v61 = vpack.c.bf16 %v14303_v60, %v14302_v52 }
 0x1b0   :  { %2520 = vmatprep.mubr.f32.mxu0 %v14146_v53  ;;  %3216 = vmatprep.mubr.f32.mxu1 %v14146_v53 }
 0x1b2   :  { %8845 = vmatpush1.bf16.msra.mxu0 %v14266_v25  ;;  %8941 = vmatpush1.bf16.msra.mxu1 %v14267_v55 }
 0x1b3   :  { %8847 = vmatprep.subr.bf16.mxu0 %v14268_v1  ;;  %8943 = vmatprep.subr.bf16.mxu1 %v14269_v10  ;;  %v593_v17 = vpop.permute.xlu0 %592 }
 0x1b6   :  { %8849 = vmatpush1.bf16.msra.mxu0 %v14274_v45  ;;  %8945 = vmatpush1.bf16.msra.mxu1 %v14275_v7 }
 0x1b7   :  { %8851 = vmatprep.subr.bf16.mxu0 %v8850_v21  ;;  %8947 = vmatprep.subr.bf16.mxu1 %v8946_v4  ;;  %v8858_v21 = vpack.c.bf16 %v14290_v49, %v14289_v59  ;;  %v8956_v4 = vpack.c.bf16 %v14297_v3, %v14296_v42  ;;  %v14313_v3 = vmov 2131351028  }
 0x1b9   :  { %2524 = vmatmul.mubr.f32.vlgmr.msra.gmra.mrb[4].mxu0 %v14284_v29  ;;  %3220 = vmatmul.mubr.f32.vlgmr.msra.gmra.mrb[4].mxu1 %v14284_v29 }
 0x1ba   :  { %8853 = vmatpush1.bf16.msra.mxu0 %v8852_v46  ;;  %8949 = vmatpush1.bf16.msra.mxu1 %v8948_v16  ;;  %v14300_v46 = vand.u32 4294901760, %v11028_v31  ;;  %v585_v31 = vpop.permute.xlu1 %584 }
 0x1bb   :  { %2529 = vmatprep.mubr.f32.mxu0 %v14146_v53  ;;  %3225 = vmatprep.mubr.f32.mxu1 %v14146_v53  ;;  %v590_v16 = vadd.f32 %v585_v31, %v14306_v13 }
 0x1bc   :  { %8855 = vmatprep.subr.bf16.mxu0 %v8854_v20  ;;  %8951 = vmatprep.subr.bf16.mxu1 %v8950_v8  ;;  %v8958_v24 = vpack.c.bf16 %v14301_v39, %v14300_v46  ;;  %v14315_v39 = vmov 683565275  }
 0x1bd   :  { %2533 = vmatmul.mubr.f32.gmra.mrb[6].mxu0 %v14293_v36  ;;  %3229 = vmatmul.mubr.f32.gmra.mrb[6].mxu1 %v14293_v36  ;;  %v598_v54 = vadd.f32 %v593_v17, %v590_v16 }
 0x1be   :  { %8857 = vmatpush1.bf16.msra.mxu0 %v8856_v6  ;;  %8953 = vmatpush1.bf16.msra.mxu1 %v8952_v0  ;;  %v587_v51 = vpop.permute.xlu1 %586 }
 0x1bf   :  { %8859 = vmatprep.subr.bf16.mxu0 %v8858_v21  ;;  %8955 = vmatprep.subr.bf16.mxu1 %v8954_v23  ;;  %v600_v35 = vadd.f32 30.0, %v598_v54 }
 0x1c0   :  { %2651 = vmatprep.mubr.f32.mxu0 %v14146_v53  ;;  %3347 = vmatprep.mubr.f32.mxu1 %v14146_v53 }
 0x1c1   :  { %3511 = vperm.xlu0 %9939, %v600_v35  }
 0x1c2   :  { %8861 = vmatpush1.bf16.msra.mxu0 %v8860_v48  ;;  %8957 = vmatpush1.bf16.msra.mxu1 %v8956_v4  ;;  %v14312_v48 = vmov 2475754826  }
 0x1c3   :  { %8863 = vmatprep.subr.bf16.mxu0 %v8862_v18  ;;  %8959 = vmatprep.subr.bf16.mxu1 %v8958_v24 }
 0x1c6   :  { %8865 = vmatpush1.bf16.msra.mxu0 %v8864_v61  ;;  %8961 = vmatpush1.bf16.msra.mxu1 %v8960_v15 }
 0x1c7   :  { %8867 = vmatprep.subr.bf16.mxu0 %v14256_v19  ;;  %8963 = vmatprep.subr.bf16.mxu1 %v14257_v56  ;;  %v591_v19 = vadd.f32 %v587_v51, %v14307_v14 }
 0x1c9   :  { %2653 = vmatmul.mubr.f32.vlgmr.msra.gmra.mrb[4].mxu0 %v14252_v34  ;;  %3349 = vmatmul.mubr.f32.vlgmr.msra.gmra.mrb[4].mxu1 %v14252_v34 }
 0x1ca   :  { %8869 = vmatpush1.bf16.msra.mxu0 %v14259_v57  ;;  %8965 = vmatpush1.bf16.msra.mxu1 %v14260_v40  ;;  %v3459_v57 = vlaneseq }
 0x1cb   :  { %2658 = vmatprep.mubr.f32.mxu0 %v14146_v53  ;;  %3354 = vmatprep.mubr.f32.mxu1 %v14146_v53 }
 0x1cc   :  { %8871 = vmatprep.subr.bf16.mxu0 %v14261_v26  ;;  %8967 = vmatprep.subr.bf16.mxu1 %v14262_v9  ;;  %v3460_v40 = vshrl.u32 %v3459_v57, 7  ;;  %v3457_v9 = vld [vmem:[%s13790_s3] sm:$0xf] }
 0x1cd   :  { %2660 = vmatmul.mubr.f32.gmra.mrb[6].mxu0 %v14255_v5  ;;  %3356 = vmatmul.mubr.f32.gmra.mrb[6].mxu1 %v14255_v5 }
 0x1ce   :  { %8873 = vmatpush1.bf16.msra.mxu0 %v14229_v2  ;;  %8969 = vmatpush1.bf16.msra.mxu1 %v14230_v37  ;;  %v595_v37 = vpop.permute.xlu1 %594  ;;  %v11386_v26 = vsub.s32 2, %v3460_v40  ;;  %v11410_v29 = vsub.s32 0, %v3460_v40 }
 0x1cf   :  { %8875 = vmatprep.subr.bf16.mxu0 %v14264_v27  ;;  %8971 = vmatprep.subr.bf16.mxu1 %v14265_v32  ;;  %v599_v2 = vadd.f32 %v595_v37, %v591_v19  ;;  %v11391_v27 = vsub.s32 1, %v3460_v40  ;;  %v11393_v32 = vsub.s32 3, %v3460_v40 }
 0x1d0   :  { %2746 = vmatprep.mubr.f32.mxu0 %v14146_v53  ;;  %3442 = vmatprep.mubr.f32.mxu1 %v14146_v53  ;;  %v3462_v33 = vrot.slane %v3457_v9, %v11410_v29 }
 0x1d1   :  { %v601_v56 = vadd.f32 30.0, %v599_v2 }
 0x1d2   :  { %8877 = vmatpush1.bf16.msra.mxu0 %v14266_v25  ;;  %8973 = vmatpush1.bf16.msra.mxu1 %v14267_v55  ;;  %v11400_v25 = vrot.slane %v3457_v9, %v11393_v32 }
 0x1d3   :  { %8879 = vmatprep.subr.bf16.mxu0 %v14268_v1  ;;  %8975 = vmatprep.subr.bf16.mxu1 %v14269_v10 }
 0x1d4   :  { %3516 = vperm.xlu1 %9940, %v601_v56  }
 0x1d6   :  { %8881 = vmatpush1.bf16.msra.mxu0 %v14274_v45  ;;  %8977 = vmatpush1.bf16.msra.mxu1 %v14275_v7 }
 0x1d9   :  { %2748 = vmatmul.mubr.f32.vlgmr.msra.gmra.mrb[4].mxu0 %v14252_v34  ;;  %3444 = vmatmul.mubr.f32.vlgmr.msra.gmra.mrb[4].mxu1 %v14252_v34  ;;  %v3470_v34 = vrot.slane %v3457_v9, %v11386_v26 }
 0x1da   :  { %2753 = vmatprep.mubr.f32.mxu0 %v14146_v53  ;;  %3449 = vmatprep.mubr.f32.mxu1 %v14146_v53  ;;  %v11397_v53 = vrot.slane %v3457_v9, %v11391_v27 }
 0x1dd   :  { %2755 = vmatmul.mubr.f32.gmra.mrb[6].mxu0 %v14255_v5  ;;  %3451 = vmatmul.mubr.f32.gmra.mrb[6].mxu1 %v14255_v5 }
 0x24c   :  { %v1357_v5 = vpop.f32.mrb[0].mxu0  ;;  %v2053_v55 = vpop.f32.mrb[0].mxu1 }
 0x24d   :  { %v11402_v1 = vadd.f32 %v3470_v34, %v2053_v55  ;;  %v1359_v10 = vpop.f32.mrb[1].mxu0  ;;  %v2055_v45 = vpop.f32.mrb[1].mxu1  ;;  %v11413_v50 = vadd.f32 %v3462_v33, %v1357_v5 }
 0x24e   :  { %v11405_v7 = vadd.f32 %v11397_v53, %v1359_v10  ;;  %v11408_v62 = vadd.f32 %v11400_v25, %v2055_v45 }
 0x24f   :  { %14308 = vst [vmem:[#allocation24_spill] sm:$0xff] %v11402_v1  ;;  %v3568_v6 = vand.u32 2139095040, %v11413_v50  ;;  %v3565_v23 = vand.u32 2147483647, %v11413_v50 }
 0x250   :  { %14309 = vst [vmem:[#allocation27_spill] sm:$0xff] %v11408_v62  ;;  %v1364_v20 = vpop.f32.mrb[2].mxu0  ;;  %v2060_v28 = vpop.f32.mrb[2].mxu1 }
 0x251   :  { %v1366_v47 = vpop.f32.mrb[3].mxu0  ;;  %v2062_v8 = vpop.f32.mrb[3].mxu1  ;;  %v3569_v44 = vshrl.u32 %v3568_v6, 23  ;;  %v3572_v11 = vand.u32 8388607, %v3565_v23  ;;  %v11429_v58 = vadd.f32 %v3462_v33, %v1364_v20  ;;  %v11436_v37 = vadd.f32 %v3470_v34, %v2060_v28 }
 0x252   :  { %v11448_v28 = vadd.f32 %v11397_v53, %v1366_v47  ;;  %v11451_v33 = vadd.f32 %v11400_v25, %v2062_v8 }
 0x253   :  { %v7286_v43 = vadd.s32 4294967169, %v3569_v44  ;;  %v3573_v54 = vor.u32 8388608, %v3572_v11  ;;  %v3984_v35 = vand.u32 2139095040, %v11429_v58  ;;  %14316 = vst [vmem:[#allocation28_spill] sm:$0xff] %v11436_v37  ;;  %vm3983_vm15 = vcmp.lt.s32.totalorder %v11429_v58, 0 }
 0x254   :  { %14317 = vst [vmem:[#allocation29_spill] sm:$0xff] %v11451_v33 }
 0x255   :  { %v3575_v0 = vadd.s32 1, %v7286_v43  ;;  %v3985_v40 = vshrl.u32 %v3984_v35, 23  ;;  %v3613_v9 = vshll.u32 %v3573_v54, 8 }
 0x257   :  { %vm3576_vm1 = vcmp.gt.s32.totalorder %v3575_v0, 0  ;;  %v7302_v5 = vadd.s32 4294967169, %v3985_v40 }
 0x258   :  { %v3577_v59 = vsel %vm3576_vm1, %v3575_v0, 0  ;;  %v3981_v0 = vand.u32 2147483647, %v11429_v58  ;;  %vm3567_vm1 = vcmp.lt.s32.totalorder %v11413_v50, 0 }
 0x259   :  { %v3579_v49 = vand.u32 31, %v3577_v59  ;;  %v3578_v36 = vshrl.u32 %v3577_v59, 5  ;;  %v3991_v20 = vadd.s32 1, %v7302_v5 }
 0x25a   :  { %v3988_v47 = vand.u32 8388607, %v3981_v0  ;;  %vm11528_vm0 = vcmp.le.f32.partialorder %v3981_v0, 0.7853982  ;;  %v11541_v0 = vld [vmem:[%s13793_s6] sm:$0xff] }
 0x25b   :  { %v3580_v21 = vsub.s32 32, %v3579_v49  ;;  %v3591_v63 = vshll.u32 %v14311_v22, %v3579_v49  ;;  %v3582_v24 = vshll.u32 %v14315_v39, %v3579_v49  ;;  %v3585_v52 = vshll.u32 %v14312_v48, %v3579_v49 }
 0x25c   :  { %v3588_v60 = vshll.u32 %v14313_v3, %v3579_v49  ;;  %v3594_v61 = vshll.u32 %v14310_v41, %v3579_v49  ;;  %vm3600_vm2 = vcmp.lt.s32.totalorder %v3578_v36, 4  ;;  %vm3597_vm3 = vcmp.lt.s32.totalorder %v3578_v36, 1 }
 0x25d   :  { %v3592_v30 = vshrl.u32 %v14310_v41, %v3580_v21  ;;  %v3583_v42 = vshrl.u32 %v14312_v48, %v3580_v21  ;;  %v3586_v4 = vshrl.u32 %v14313_v3, %v3580_v21  ;;  %v3589_v38 = vshrl.u32 %v14311_v22, %v3580_v21 }
 0x25e   :  { %v3595_v18 = vshrl.u32 %v14314_v12, %v3580_v21  ;;  %vm3599_vm4 = vcmp.lt.s32.totalorder %v3578_v36, 3  ;;  %vm3598_vm5 = vcmp.lt.s32.totalorder %v3578_v36, 2  ;;  %v3581_v6 = vshrl.u32 %v14315_v39, %v3580_v21 }
 0x25f   :  { %v3593_v46 = vor.u32 %v3592_v30, %v3591_v63  ;;  %v3584_v15 = vor.u32 %v3583_v42, %v3582_v24  ;;  %v3587_v31 = vor.u32 %v3586_v4, %v3585_v52  ;;  %v3590_v13 = vor.u32 %v3589_v38, %v3588_v60 }
 0x260   :  { %v3596_v16 = vor.u32 %v3595_v18, %v3594_v61  ;;  %vm3992_vm6 = vcmp.gt.s32.totalorder %v3991_v20, 0 }
 0x261   :  { %v3606_v17 = vsel %vm3600_vm2, %v3593_v46, 920167782  ;;  %v3605_v51 = vsel %vm3597_vm3, %v3584_v15, %v3587_v31  ;;  %v3609_v56 = vsel %vm3597_vm3, %v3587_v31, %v3590_v13  ;;  %v3602_v34 = vsel %vm3600_vm2, %v3590_v13, 2102212464 }
 0x262   :  { %v3607_v14 = vsel %vm3599_vm4, %v3590_v13, %v3606_v17  ;;  %v3610_v19 = vsel %vm3600_vm2, %v3596_v16, 1326507024  ;;  %v3993_v59 = vsel %vm3992_vm6, %v3991_v20, 0  ;;  %v3601_v49 = vsel %vm3597_vm3, %v3581_v6, %v3584_v15 }
 0x263   :  { %v3608_v2 = vsel %vm3598_vm5, %v3605_v51, %v3607_v14  ;;  %v3611_v57 = vsel %vm3599_vm4, %v3593_v46, %v3610_v19  ;;  %v3603_v30 = vsel %vm3599_vm4, %v3587_v31, %v3602_v34  ;;  %v3995_v63 = vand.u32 31, %v3993_v59 }
 0x264   :  { %v3612_v55 = vsel %vm3598_vm5, %v3609_v56, %v3611_v57  ;;  %v11442_v10 = vmul.u32.u64.low %v3613_v9, %v3608_v2  ;;  %v11443_v45 = vmul.u32.u64.high %v3613_v9, %v3608_v2, %v11442_v10  ;;  %v3604_v53 = vsel %vm3598_vm5, %v3601_v49, %v3603_v30 }
 0x265   :  { %v11454_v44 = vmul.u32.u64.low %v3613_v9, %v3612_v55  ;;  %v11455_v43 = vmul.u32.u64.high %v3613_v9, %v3612_v55, %v11454_v44  ;;  %v3996_v42 = vsub.s32 32, %v3995_v63  ;;  %v3994_v8 = vshrl.u32 %v3993_v59, 5 }
 0x266   :  { %v3623_v25 = vadd.s32 1, %v11443_v45  ;;  %v3998_v21 = vshll.u32 %v14315_v39, %v3995_v63  ;;  %v4001_v38 = vshll.u32 %v14312_v48, %v3995_v63  ;;  %v4004_v18 = vshll.u32 %v14313_v3, %v3995_v63 }
 0x267   :  { %v3999_v4 = vshrl.u32 %v14312_v48, %v3996_v42  ;;  %v4002_v46 = vshrl.u32 %v14313_v3, %v3996_v42  ;;  %v4005_v24 = vshrl.u32 %v14311_v22, %v3996_v42  ;;  %v4007_v36 = vshll.u32 %v14311_v22, %v3995_v63 }
 0x268   :  { %v4008_v52 = vshrl.u32 %v14310_v41, %v3996_v42  ;;  %vm3622_vm7 = vc.u32 %v11455_v43, %v11442_v10  ;;  %v4010_v61 = vshll.u32 %v14310_v41, %v3995_v63  ;;  %v4011_v11 = vshrl.u32 %v14314_v12, %v3996_v42 }
 0x269   :  { %v4000_v60 = vor.u32 %v3999_v4, %v3998_v21  ;;  %v3989_v15 = vor.u32 8388608, %v3988_v47  ;;  %v4003_v31 = vor.u32 %v4002_v46, %v4001_v38  ;;  %v4006_v13 = vor.u32 %v4005_v24, %v4004_v18 }
 0x26a   :  { %v4009_v16 = vor.u32 %v4008_v52, %v4007_v36  ;;  %v3620_v17 = vmul.u32 %v3613_v9, %v3604_v53  ;;  %v4012_v54 = vor.u32 %v4011_v11, %v4010_v61  ;;  %vm4013_vm8 = vcmp.lt.s32.totalorder %v3994_v8, 1 }
 0x26b   :  { %v3624_v35 = vsel %vm3622_vm7, %v3623_v25, %v11443_v45  ;;  %v3997_v51 = vshrl.u32 %v14315_v39, %v3996_v42  ;;  %vm4016_vm9 = vcmp.lt.s32.totalorder %v3994_v8, 4  ;;  %v4021_v14 = vsel %vm4013_vm8, %v4000_v60, %v4003_v31 }
 0x26c   :  { %vm4015_vm10 = vcmp.lt.s32.totalorder %v3994_v8, 3  ;;  %v4018_v56 = vsel %vm4016_vm9, %v4006_v13, 2102212464  ;;  %v4022_v57 = vsel %vm4016_vm9, %v4009_v16, 920167782  ;;  %v4025_v40 = vsel %vm4013_vm8, %v4003_v31, %v4006_v13 }
 0x26d   :  { %vm4014_vm11 = vcmp.lt.s32.totalorder %v3994_v8, 2  ;;  %v4023_v9 = vsel %vm4015_vm10, %v4006_v13, %v4022_v57  ;;  %v4026_v55 = vsel %vm4016_vm9, %v4012_v54, 1326507024  ;;  %v4029_v45 = vshll.u32 %v3989_v15, 8 }
 0x26e   :  { %v3625_v34 = vadd.s32 %v3624_v35, %v3620_v17  ;;  %v4017_v6 = vsel %vm4013_vm8, %v3997_v51, %v4000_v60  ;;  %v4024_v44 = vsel %vm4014_vm11, %v4021_v14, %v4023_v9  ;;  %v4027_v59 = vsel %vm4015_vm10, %v4009_v16, %v4026_v55 }
 0x26f   :  { %v4019_v49 = vsel %vm4015_vm10, %v4003_v31, %v4018_v56  ;;  %v4028_v30 = vsel %vm4014_vm11, %v4025_v40, %v4027_v59  ;;  %v11491_v63 = vmul.u32.u64.low %v4029_v45, %v4024_v44  ;;  %v11492_v42 = vmul.u32.u64.high %v4029_v45, %v4024_v44, %v11491_v63 }
 0x270   :  { %v11502_v4 = vmul.u32.u64.low %v4029_v45, %v4028_v30  ;;  %v11503_v38 = vmul.u32.u64.high %v4029_v45, %v4028_v30, %v11502_v4  ;;  %v3626_v18 = vadd.s32 536870912, %v3625_v34  ;;  %v4020_v46 = vsel %vm4014_vm11, %v4017_v6, %v4019_v49  ;;  %v3487_v30 = vld [vmem:[%s13791_s4] sm:$0xf] }
 0x271   :  { %v4039_v24 = vadd.s32 1, %v11492_v42  ;;  %v4036_v36 = vmul.u32 %v4029_v45, %v4020_v46  ;;  %v3500_v46 = vrot.slane %v3487_v30, %v11386_v26  ;;  %vm11568_vm2 = vcmp.le.f32.partialorder %v3565_v23, 0.7853982 }
 0x272   :  { %vm4038_vm12 = vc.u32 %v11503_v38, %v11491_v63  ;;  %v11508_v52 = vshrl.u32 %v3626_v18, 30  ;;  %v4037_v59 = vadd.s32 %v11491_v63, %v11503_v38  ;;  %v3621_v63 = vadd.s32 %v11442_v10, %v11455_v43  ;;  %v3535_v10 = vld [vmem:[%s13792_s5] sm:$0xf] }
 0x273   :  { %v4040_v60 = vsel %vm4038_vm12, %v4039_v24, %v11492_v42  ;;  %vm4073_vm6 = vweird.f32 %v11429_v58  ;;  %vm3657_vm10 = vweird.f32 %v11413_v50 }
 0x274   :  { %v4041_v61 = vadd.s32 %v4040_v60, %v4036_v36  ;;  %v3628_v15 = vshll.u32 %v11508_v52, 30  ;;  %v3512_v36 = vpop.permute.xlu0 %3511 }
 0x276   :  { %v4042_v11 = vadd.s32 536870912, %v4041_v61  ;;  %v3629_v16 = vsub.s32 %v3625_v34, %v3628_v15  ;;  %v3521_v15 = vmul.f32 %v3512_v36, %v3500_v46 }
 0x278   :  { %v4043_v31 = vshrl.u32 %v4042_v11, 30  ;;  %v3631_v8 = vsub.s32 0, %v3629_v16 }
 0x27a   :  { %v4044_v13 = vshll.u32 %v4043_v31, 30  ;;  %v7287_v14 = vmin.u32 %v3631_v8, %v3629_v16 }
 0x27c   :  { %v4045_v17 = vsub.s32 %v4041_v61, %v4044_v13  ;;  %v3633_v57 = vclz %v7287_v14 }
 0x27e   :  { %v4047_v54 = vsub.s32 0, %v4045_v17  ;;  %v7288_v55 = vadd.s32 4294967294, %v3633_v57 }
 0x280   :  { %v7303_v35 = vmin.u32 %v4047_v54, %v4045_v17  ;;  %vm7289_vm14 = vcmp.lt.s32.totalorder %v7288_v55, 0 }
 0x281   :  { %v3636_v44 = vsel %vm7289_vm14, 0, %v7288_v55  ;;  %v4067_v55 = vsub.s32 4, %v4043_v31 }
 0x282   :  { %v4049_v51 = vclz %v7303_v35  ;;  %v3641_v42 = vsub.s32 4294967266, %v3636_v44  ;;  %v3637_v11 = vsub.s32 32, %v3636_v44 }
 0x284   :  { %v7304_v56 = vadd.s32 4294967294, %v4049_v51  ;;  %v3642_v60 = vadd.s32 127, %v3641_v42  ;;  %v3639_v35 = vshrl.u32 %v3621_v63, %v3637_v11  ;;  %v3638_v51 = vshll.u32 %v3629_v16, %v3636_v44 }
 0x285   :  { %v3492_v44 = vrot.slane %v3487_v30, %v11410_v29  ;;  %v4068_v42 = vsel %vm3983_vm15, %v4067_v55, %v4043_v31  ;;  %v4445_v11 = vand.u32 4294901760, %v11541_v0  ;;  %v11601_v55 = vld [vmem:[%s13793_s6 + $0x18] sm:$0xff] }
 0x286   :  { %vm7305_vm13 = vcmp.lt.s32.totalorder %v7304_v56, 0  ;;  %v3643_v38 = vshll.u32 %v3642_v60, 23  ;;  %v3651_v60 = vsub.s32 4, %v11508_v52  ;;  %v4070_v63 = vsel %vm11528_vm0, 0, %v4068_v42 }
 0x287   :  { %v4052_v40 = vsel %vm7305_vm13, 0, %v7304_v56  ;;  %v3640_v56 = vor.u32 %v3639_v35, %v3638_v51 }
 0x288   :  { %v4057_v9 = vsub.s32 4294967266, %v4052_v40  ;;  %v4053_v6 = vsub.s32 32, %v4052_v40  ;;  %v4054_v4 = vshll.u32 %v4045_v17, %v4052_v40  ;;  %v3644_v17 = vor.u32 4788187, %v3643_v38 }
 0x289   :  { %v3652_v35 = vsel %vm3567_vm1, %v3651_v60, %v11508_v52  ;;  %v11629_v60 = vld [vmem:[%s13793_s6 + $0x38] sm:$0xff] }
 0x28a   :  { %v4058_v45 = vadd.s32 127, %v4057_v9  ;;  %v4055_v34 = vshrl.u32 %v4037_v59, %v4053_v6  ;;  %v3645_v57 = vand.u32 2147483647, %v3644_v17  ;;  %v3647_v9 = vcvt.s32.f32 %v3640_v56 }
 0x28b   :  { %v3548_v6 = vrot.slane %v3535_v10, %v11386_v26 }
 0x28c   :  { %v4059_v49 = vshll.u32 %v4058_v45, 23  ;;  %v4056_v24 = vor.u32 %v4055_v34, %v4054_v4  ;;  %v3648_v16 = vmul.f32 %v3647_v9, %v3645_v57  ;;  %v11591_v9 = vld [vmem:[%s13793_s6 + $0x10] sm:$0xff] }
 0x28e   :  { %v4060_v18 = vor.u32 4788187, %v4059_v49  ;;  %v4063_v13 = vcvt.s32.f32 %v4056_v24  ;;  %v11546_v49 = vld [vmem:[%s13793_s6 + $0x8] sm:$0xff]  ;;  %v3649_v34 = vxor.u32 2147483648, %v3648_v16  ;;  %v3504_v24 = vrot.slane %v3487_v30, %v11393_v32 }
 0x290   :  { %v4061_v61 = vand.u32 2147483647, %v4060_v18  ;;  %v3544_v18 = vrot.slane %v3535_v10, %v11391_v27  ;;  %v3650_v31 = vsel %vm3567_vm1, %v3649_v34, %v3648_v16  ;;  %v3522_v38 = vmul.f32 %v3512_v36, %v3504_v24 }
 0x291   :  { %v4451_v34 = vand.u32 4294901760, %v11591_v9 }
 0x292   :  { %v4064_v8 = vmul.f32 %v4063_v13, %v4061_v61  ;;  %v3519_v61 = vmul.f32 %v3512_v36, %v3492_v44 }
 0x294   :  { %v4065_v14 = vxor.u32 2147483648, %v4064_v8 }
 0x296   :  { %v4066_v40 = vsel %vm3983_vm15, %v4065_v14, %v4064_v8  ;;  %v11642_v8 = vld [vmem:[%s13793_s6 + $0x40] sm:$0xff] }
 0x297   :  { %v4069_v45 = vsel %vm11528_vm0, %v11429_v58, %v4066_v40  ;;  %v11696_v58 = vld [vmem:[%s13793_s6 + $0x68] sm:$0xff] }
 0x298   :  { %9949 = vcosq.f32 %v4069_v45 }
 0x299   :  { %9951 = vsinq.f32 %v4069_v45 }
 0x2a2   :  { %v9950_v52 = vpop.eup %9949 }
 0x2a3   :  { %v4081_v42 = vxor.u32 2147483648, %v9950_v52 }
 0x2ac   :  { %v11479_v19 = vpop.f32.mrb[4].mxu0  ;;  %v11481_v2 = vpop.f32.mrb[4].mxu1 }
 0x2ad   :  { %v11484_v5 = vpop.f32.mrb[5].mxu0  ;;  %v11486_v20 = vpop.f32.mrb[5].mxu1  ;;  %v3529_v54 = vadd.f32 %v3521_v15, %v11481_v2  ;;  %v3496_v2 = vrot.slane %v3487_v30, %v11391_v27  ;;  %v4448_v15 = vand.u32 4294901760, %v11546_v49  ;;  %v3540_v27 = vrot.slane %v3535_v10, %v11410_v29 }
 0x2ae   :  { %v3517_v30 = vpop.permute.xlu1 %3516  ;;  %v3653_v29 = vsel %vm11568_vm2, %v11413_v50, %v3650_v31 }
 0x2af   :  { %v3520_v59 = vmul.f32 %v3512_v36, %v3496_v2  ;;  %v11550_v26 = vadd.f32 %v3548_v6, %v3529_v54  ;;  %v3552_v54 = vrot.slane %v3535_v10, %v11393_v32  ;;  %v11577_v51 = vpack.c.bf16 %v4448_v15, %v4445_v11 }
 0x2b0   :  { %v11494_v53 = vpop.f32.mrb[6].mxu0  ;;  %v11496_v25 = vpop.f32.mrb[6].mxu1  ;;  %v3530_v32 = vadd.f32 %v3522_v38, %v11486_v20  ;;  %v3523_v36 = vmul.f32 %v3517_v30, %v3492_v44  ;;  %v3525_v17 = vmul.f32 %v3517_v30, %v3500_v46  ;;  %v3524_v14 = vmul.f32 %v3517_v30, %v3496_v2 }
 0x2b1   :  { %v11498_v47 = vpop.f32.mrb[7].mxu0  ;;  %v11500_v21 = vpop.f32.mrb[7].mxu1  ;;  %14320 = vst [vmem:[#allocation23_spill] sm:$0xff] %v11550_v26  ;;  %v3528_v4 = vadd.f32 %v3520_v59, %v11484_v5  ;;  %v3527_v5 = vadd.f32 %v3519_v61, %v11479_v19  ;;  %v4074_v19 = vadd.s32 3, %v4070_v63  ;;  %8979 = vmatprep.subr.bf16.mxu0 %v11577_v51  ;;  %v3526_v40 = vmul.f32 %v3517_v30, %v3504_v24  ;;  %v11618_v24 = vld [vmem:[%s13793_s6 + $0x28] sm:$0xff] }
 0x2b2   :  { %v11584_v56 = vadd.f32 %v3552_v54, %v3530_v32  ;;  %8981 = vmatpush3.bf16.msra.mxu0 %v11577_v51  ;;  %v3531_v57 = vadd.f32 %v3523_v36, %v11494_v53  ;;  %v9952_v20 = vpop.eup %9951  ;;  %v3654_v10 = vsel %vm11568_vm2, 0, %v3652_v35  ;;  %9953 = vcosq.f32 %v3653_v29  ;;  %v11647_v35 = vld [vmem:[%s13793_s6 + $0x48] sm:$0xff] }
 0x2b3   :  { %v11559_v13 = vadd.f32 %v3544_v18, %v3528_v4  ;;  %v3557_v23 = vadd.f32 %v3540_v27, %v3527_v5  ;;  %v3533_v46 = vadd.f32 %v3525_v17, %v11496_v25  ;;  %v3532_v43 = vadd.f32 %v3524_v14, %v11498_v47  ;;  %v11611_v25 = vld [vmem:[%s13793_s6 + $0x20] sm:$0xff] }
 0x2b4   :  { %14324 = vst [vmem:[#allocation26_spill] sm:$0xff] %v11584_v56  ;;  %9955 = vsinq.f32 %v3653_v29  ;;  %v4075_v2 = vand.u32 3, %v4074_v19  ;;  %v3561_v16 = vadd.f32 %v3540_v27, %v3531_v57  ;;  %v3534_v53 = vadd.f32 %v3526_v40, %v11500_v21  ;;  %v11674_v57 = vld [vmem:[%s13793_s6 + $0x58] sm:$0xff]  ;;  %v11679_v40 = vld [vmem:[%s13793_s6 + $0x60] sm:$0xff] }
 0x2b5   :  { %14321 = vst [vmem:[#allocation25_spill] sm:$0xff] %v11559_v13  ;;  %v4397_v45 = vmul.f32 1.442695, %v3557_v23  ;;  %v11603_v44 = vadd.f32 %v3548_v6, %v3533_v46  ;;  %v11605_v59 = vadd.f32 %v3544_v18, %v3532_v43  ;;  %v4078_v47 = vxor.u32 2147483648, %v9952_v20  ;;  %v11624_v18 = vld [vmem:[%s13793_s6 + $0x30] sm:$0xff] }
 0x2b6   :  { %v4405_v21 = vmul.f32 1.442695, %v3561_v16  ;;  %v11613_v4 = vadd.f32 %v3552_v54, %v3534_v53  ;;  %v4454_v6 = vand.u32 4294901760, %v11601_v55  ;;  %v3658_v61 = vadd.s32 3, %v3654_v10 }
 0x2b7   :  { %14325 = vst [vmem:[#allocation40_spill] sm:$0xff] %v11603_v44  ;;  %14326 = vst [vmem:[#allocation41_spill] sm:$0xff] %v11605_v59  ;;  %vm4077_vm3 = vcmp.eq.s32.totalorder %v4075_v2, 0  ;;  %v4457_v31 = vand.u32 4294901760, %v11611_v25  ;;  %vm4080_vm4 = vcmp.eq.s32.totalorder %v4075_v2, 2  ;;  %v4460_v5 = vand.u32 4294901760, %v11618_v24 }
 0x2b8   :  { %14327 = vst [vmem:[#allocation42_spill] sm:$0xff] %v11613_v4  ;;  %9957 = vpow2.f32 %v4405_v21  ;;  %v11634_v63 = vpack.c.bf16 %v4454_v6, %v4451_v34  ;;  %v4079_v27 = vsel %vm4077_vm3, %v9950_v52, %v4078_v47  ;;  %v4082_v30 = vsel %vm4080_vm4, %v4081_v42, %v9952_v20  ;;  %v11669_v52 = vld [vmem:[%s13793_s6 + $0x50] sm:$0xff] }
 0x2b9   :  { %9959 = vpow2.f32 %v4397_v45  ;;  %v4463_v38 = vand.u32 4294901760, %v11624_v18  ;;  %v4466_v54 = vand.u32 4294901760, %v11629_v60  ;;  %v11654_v29 = vpack.c.bf16 %v4460_v5, %v4457_v31 }
 0x2ba   :  { %8983 = vmatprep.subr.bf16.mxu0 %v11634_v63  ;;  %v3659_v19 = vand.u32 3, %v3658_v61  ;;  %vm4076_vm5 = vcmp.lt.s32.totalorder %v4075_v2, 2  ;;  %v13956_v17 = vand.u32 4294901760, %v11642_v8  ;;  %v13955_v14 = vand.u32 4294901760, %v11647_v35 }
 0x2bb   :  { %8985 = vmatpush3.bf16.msra.mxu0 %v11634_v63  ;;  %v4083_v36 = vsel %vm4076_vm5, %v4079_v27, %v4082_v30  ;;  %v11662_v23 = vpack.c.bf16 %v4466_v54, %v4463_v38  ;;  %v13968_v46 = vand.u32 4294901760, %v11669_v52  ;;  %v13966_v43 = vand.u32 4294901760, %v11674_v57  ;;  %v11711_v30 = vld [vmem:[%s13793_s6 + $0x70] sm:$0xff] }
 0x2bc   :  { %v9954_v32 = vpop.eup %9953  ;;  %8987 = vmatprep.subr.bf16.mxu0 %v11654_v29  ;;  %v4084_v10 = vsel %vm4073_vm6, nan, %v4083_v36  ;;  %v13964_v2 = vand.u32 4294901760, %v11679_v40  ;;  %v11691_v16 = vpack.c.bf16 %v13955_v14, %v13956_v17  ;;  %vm3660_vm7 = vcmp.lt.s32.totalorder %v3659_v19, 2 }
 0x2bd   :  { %v3665_v45 = vxor.u32 2147483648, %v9954_v32  ;;  %vm3661_vm8 = vcmp.eq.s32.totalorder %v3659_v19, 0  ;;  %vm3664_vm9 = vcmp.eq.s32.totalorder %v3659_v19, 2  ;;  %v11701_v42 = vsub.f32 %v11541_v0, %v4445_v11  ;;  %v11727_v11 = vld [vmem:[%s13793_s6 + $0x78] sm:$0xff] }
 0x2be   :  { %v9956_v20 = vpop.eup %9955  ;;  %v11706_v21 = vsub.f32 %v11546_v49, %v4448_v15  ;;  %v11714_v17 = vsub.f32 %v11591_v9, %v4451_v34  ;;  %v11721_v0 = vpack.c.bf16 %v13966_v43, %v13968_v46  ;;  %v13959_v49 = vand.u32 4294901760, %v11696_v58 }
 0x2bf   :  { %8989 = vmatpush3.bf16.msra.mxu0 %v11654_v29  ;;  %v3662_v53 = vxor.u32 2147483648, %v9956_v20  ;;  %v3666_v14 = vsel %vm3664_vm9, %v3665_v45, %v9956_v20  ;;  %v11745_v19 = vsub.f32 %v11601_v55, %v4454_v6  ;;  %v14329_v4 = vand.u32 4294901760, %v11647_v35 }
 0x2c0   :  { %8991 = vmatprep.subr.bf16.mxu0 %v11662_v23  ;;  %v13958_v20 = vand.u32 4294901760, %v11706_v21  ;;  %v13962_v50 = vand.u32 4294901760, %v11714_v17  ;;  %vm3671_vm9 = vcmp.lt.s32.totalorder %v11405_v7, 0 }
 0x2c1   :  { %v3663_v36 = vsel %vm3661_vm8, %v9954_v32, %v3662_v53  ;;  %v13957_v32 = vand.u32 4294901760, %v11701_v42  ;;  %v13963_v6 = vand.u32 4294901760, %v11745_v19  ;;  %v11825_v56 = vsub.f32 %v11647_v35, %v14329_v4 }
 0x2c2   :  { %v9958_v47 = vpop.eup %9957  ;;  %v3667_v15 = vsel %vm3660_vm7, %v3663_v36, %v3666_v14  ;;  %v4556_v55 = vsub.f32 %v11706_v21, %v13958_v20  ;;  %v11780_v20 = vsub.f32 %v11611_v25, %v4457_v31  ;;  %v14331_v35 = vand.u32 4294901760, %v11674_v57 }
 0x2c3   :  { %v9960_v61 = vpop.eup %9959  ;;  %v4417_v27 = vmul.f32 %v9958_v47, %v4084_v10  ;;  %8993 = vmatpush3.bf16.msra.mxu0 %v11662_v23  ;;  %v3668_v34 = vsel %vm3657_vm10, nan, %v3667_v15  ;;  %v13961_v10 = vand.u32 4294901760, %v11711_v30  ;;  %v13960_v47 = vand.u32 4294901760, %v11727_v11 }
 0x2c4   :  { %8995 = vmatprep.subr.bf16.mxu0 %v11691_v16  ;;  %v4413_v53 = vmul.f32 %v9960_v61, %v3668_v34  ;;  %v4549_v61 = vsub.f32 %v11701_v42, %v13957_v32  ;;  %v4563_v32 = vsub.f32 %v11714_v17, %v13962_v50  ;;  %v4557_v50 = vand.u32 4294901760, %v4556_v55 }
 0x2c5   :  { %v11731_v9 = vand.u32 4294901760, %v4417_v27  ;;  %v11771_v15 = vpack.c.bf16 %v13960_v47, %v13961_v10  ;;  %v11787_v47 = vsub.f32 %v11618_v24, %v4460_v5  ;;  %v11792_v10 = vsub.f32 %v11624_v18, %v4463_v38 }
 0x2c6   :  { %v11748_v14 = vand.u32 4294901760, %v4413_v53  ;;  %v4570_v25 = vsub.f32 %v11745_v19, %v13963_v6  ;;  %v4576_v31 = vand.u32 4294901760, %v11780_v20  ;;  %vm4087_vm10 = vcmp.lt.s32.totalorder %v11448_v28, 0 }
 0x2c7   :  { %v11738_v45 = vsub.f32 %v4417_v27, %v11731_v9  ;;  %8997 = vmatpush3.bf16.msra.mxu0 %v11691_v16  ;;  %v11758_v27 = vpack.c.bf16 %v13959_v49, %v13964_v2  ;;  %v4550_v49 = vand.u32 4294901760, %v4549_v61  ;;  %v11802_v61 = vsub.f32 %v11629_v60, %v4466_v54 }
 0x2c8   :  { %8999 = vmatprep.subr.bf16.mxu0 %v11721_v0  ;;  %v11765_v36 = vsub.f32 %v4413_v53, %v11748_v14  ;;  %v4583_v18 = vand.u32 4294901760, %v11787_v47  ;;  %v4577_v38 = vsub.f32 %v11780_v20, %v4576_v31  ;;  %v4590_v55 = vand.u32 4294901760, %v11792_v10 }
 0x2c9   :  { %v13967_v34 = vand.u32 4294901760, %v11738_v45  ;;  %v4597_v6 = vand.u32 4294901760, %v11802_v61  ;;  %v14328_v2 = vand.u32 4294901760, %v11642_v8  ;;  %v9010_v43 = vpack.c.bf16 %v4557_v50, %v4550_v49 }
 0x2ca   :  { %v13965_v53 = vand.u32 4294901760, %v11765_v36  ;;  %v4584_v54 = vsub.f32 %v11787_v47, %v4583_v18  ;;  %v4571_v46 = vand.u32 4294901760, %v4570_v25  ;;  %v4591_v62 = vsub.f32 %v11792_v10, %v4590_v55 }
 0x2cb   :  { %9001 = vmatpush3.bf16.msra.mxu0 %v11721_v0  ;;  %v4538_v5 = vsub.f32 %v11738_v45, %v13967_v34  ;;  %v4564_v34 = vand.u32 4294901760, %v4563_v32  ;;  %v4598_v44 = vsub.f32 %v11802_v61, %v4597_v6  ;;  %v4611_v49 = vand.u32 4294901760, %v11825_v56 }
 0x2cc   :  { %9003 = vmatprep.subr.bf16.mxu0 %v11758_v27  ;;  %v4528_v24 = vsub.f32 %v11765_v36, %v13965_v53  ;;  %v11819_v53 = vsub.f32 %v11642_v8, %v14328_v2  ;;  %v4585_v8 = vand.u32 4294901760, %v4584_v54  ;;  %v14330_v32 = vand.u32 4294901760, %v11669_v52 }
 0x2cd   :  { %v4539_v33 = vand.u32 4294901760, %v4538_v5  ;;  %v9014_v4 = vpack.c.bf16 %v4571_v46, %v4564_v34  ;;  %v11840_v25 = vsub.f32 %v11674_v57, %v14331_v35  ;;  %v4592_v5 = vand.u32 4294901760, %v4591_v62 }
 0x2ce   :  { %v4529_v60 = vand.u32 4294901760, %v4528_v24  ;;  %v4578_v24 = vand.u32 4294901760, %v4577_v38  ;;  %v4604_v2 = vand.u32 4294901760, %v11819_v53  ;;  %v11835_v50 = vsub.f32 %v11669_v52, %v14330_v32 }
 0x2cf   :  { %9005 = vmatpush3.bf16.msra.mxu0 %v11758_v27  ;;  %v4599_v38 = vand.u32 4294901760, %v4598_v44  ;;  %v4612_v26 = vsub.f32 %v11825_v56, %v4611_v49  ;;  %v4625_v46 = vand.u32 4294901760, %v11840_v25  ;;  %v14332_v34 = vand.u32 4294901760, %v11679_v40 }
 0x2d0   :  { %9007 = vmatprep.subr.bf16.mxu0 %v11771_v15  ;;  %7786 = vmatprep.mubr.f32.mxu0 %v4529_v60  ;;  %v9018_v60 = vpack.c.bf16 %v4585_v8, %v4578_v24  ;;  %v4605_v54 = vsub.f32 %v11819_v53, %v4604_v2  ;;  %v4618_v52 = vand.u32 4294901760, %v11835_v50  ;;  %v14333_v62 = vand.u32 4294901760, %v11696_v58 }
 0x2d1   :  { %v11850_v57 = vsub.f32 %v11679_v40, %v14332_v34  ;;  %v14334_v44 = vand.u32 4294901760, %v11711_v30  ;;  %v14335_v24 = vand.u32 4294901760, %v11727_v11  ;;  %v9022_v32 = vpack.c.bf16 %v4599_v38, %v4592_v5 }
 0x2d2   :  { %v4606_v35 = vand.u32 4294901760, %v4605_v54  ;;  %v4613_v40 = vand.u32 4294901760, %v4612_v26  ;;  %v4619_v34 = vsub.f32 %v11835_v50, %v4618_v52  ;;  %v14338_v26 = vand.u32 4294901760, %v11714_v17 }
 0x2d3   :  { %9009 = vmatpush3.bf16.msra.mxu0 %v11771_v15  ;;  %v11865_v8 = vsub.f32 %v11727_v11, %v14335_v24  ;;  %v14336_v11 = vand.u32 4294901760, %v11701_v42  ;;  %v14339_v38 = vand.u32 4294901760, %v11745_v19  ;;  %v11885_v24 = vpack.c.bf16 %v4583_v18, %v4576_v31 }
 0x2d4   :  { %9011 = vmatprep.subr.bf16.mxu0 %v9010_v43  ;;  %v11887_v1 = vpack.c.bf16 %v4597_v6, %v4590_v55  ;;  %v11889_v59 = vpack.c.bf16 %v4611_v49, %v4604_v2  ;;  %v11891_v13 = vpack.c.bf16 %v4625_v46, %v4618_v52  ;;  %v4620_v3 = vand.u32 4294901760, %v4619_v34 }
 0x2d5   :  { %v11883_v54 = vpack.c.bf16 %v14339_v38, %v14338_v26 }
 0x2d6   :  { %7787 = vmatmul.mubr.f32.vlgmr.msra.gmra.mrb[8].mxu0 %v4539_v33  ;;  %v11855_v33 = vsub.f32 %v11696_v58, %v14333_v62  ;;  %v4626_v58 = vsub.f32 %v11840_v25, %v4625_v46  ;;  %v4632_v62 = vand.u32 4294901760, %v11850_v57 }
 0x2d7   :  { %9013 = vmatpush3.bf16.msra.mxu0 %v9010_v43  ;;  %7821 = vmatprep.mubr.f32.mxu0 %v11748_v14  ;;  %v11860_v43 = vsub.f32 %v11711_v30, %v14334_v44  ;;  %v4653_v44 = vand.u32 4294901760, %v11865_v8 }
 0x2d8   :  { %9015 = vmatprep.subr.bf16.mxu0 %v9014_v4  ;;  %v4639_v37 = vand.u32 4294901760, %v11855_v33  ;;  %v4627_v39 = vand.u32 4294901760, %v4626_v58  ;;  %v4633_v26 = vsub.f32 %v11850_v57, %v4632_v62 }
 0x2d9   :  { %v4646_v30 = vand.u32 4294901760, %v11860_v43  ;;  %v4654_v49 = vsub.f32 %v11865_v8, %v4653_v44 }
 0x2da   :  { %v11893_v22 = vpack.c.bf16 %v4639_v37, %v4632_v62  ;;  %v4640_v31 = vsub.f32 %v11855_v33, %v4639_v37  ;;  %v9030_v18 = vpack.c.bf16 %v4627_v39, %v4620_v3  ;;  %v4634_v55 = vand.u32 4294901760, %v4633_v26  ;;  %v11906_v39 = vld [vmem:[#allocation4] sm:$0xff] }
 0x2db   :  { %9017 = vmatpush3.bf16.msra.mxu0 %v9014_v4  ;;  %v14337_v4 = vand.u32 4294901760, %v11706_v21  ;;  %v4647_v6 = vsub.f32 %v11860_v43, %v4646_v30  ;;  %v4655_v46 = vand.u32 4294901760, %v4654_v49  ;;  %v9042_v37 = vpack.c.bf16 %v11706_v21, %v11701_v42  ;;  %v11915_v21 = vld [vmem:[#allocation4 + $0x18] sm:$0xff] }
 0x2dc   :  { %9019 = vmatprep.subr.bf16.mxu0 %v9018_v60  ;;  %v4641_v2 = vand.u32 4294901760, %v4640_v31  ;;  %v9046_v3 = vpack.c.bf16 %v11745_v19, %v11714_v17  ;;  %v5154_v34 = vand.u32 4294901760, %v11906_v39  ;;  %v11918_v17 = vld [vmem:[#allocation4 + $0x20] sm:$0xff]  ;;  %v11920_v19 = vld [vmem:[#allocation4 + $0x28] sm:$0xff]  ;;  %v9050_v62 = vpack.c.bf16 %v11787_v47, %v11780_v20  ;;  %v11939_v31 = vld [vmem:[#allocation4 + $0x30] sm:$0xff] }
 0x2dd   :  { %v11877_v5 = vpack.c.bf16 %v14337_v4, %v14336_v11  ;;  %v11895_v11 = vpack.c.bf16 %v4653_v44, %v4646_v30  ;;  %v9026_v4 = vpack.c.bf16 %v4613_v40, %v4606_v35  ;;  %v4648_v52 = vand.u32 4294901760, %v4647_v6  ;;  %v11910_v40 = vld [vmem:[#allocation4 + $0x10] sm:$0xff]  ;;  %v11941_v20 = vld [vmem:[#allocation4 + $0x38] sm:$0xff] }
 0x2de   :  { %v13982_v58 = vand.u32 4294901760, %v11910_v40  ;;  %v13981_v30 = vand.u32 4294901760, %v11915_v21  ;;  %v13979_v38 = vand.u32 4294901760, %v11918_v17  ;;  %v9054_v47 = vpack.c.bf16 %v11802_v61, %v11792_v10 }
 0x2df   :  { %9021 = vmatpush3.bf16.msra.mxu0 %v9018_v60  ;;  %v9034_v60 = vpack.c.bf16 %v4641_v2, %v4634_v55  ;;  %v9038_v35 = vpack.c.bf16 %v4655_v46, %v4648_v52  ;;  %v13976_v55 = vand.u32 4294901760, %v11941_v20  ;;  %v9058_v2 = vpack.c.bf16 %v11825_v56, %v11819_v53 }
 0x2e0   :  { %9023 = vmatprep.subr.bf16.mxu0 %v9022_v32  ;;  %v11937_v26 = vpack.c.bf16 %v13981_v30, %v13982_v58  ;;  %v9062_v61 = vpack.c.bf16 %v11840_v25, %v11835_v50  ;;  %v9066_v56 = vpack.c.bf16 %v11855_v33, %v11850_v57  ;;  %v9070_v53 = vpack.c.bf16 %v11865_v8, %v11860_v43 }
 0x2e1   :  { %v14340_v50 = vand.u32 4294901760, %v11765_v36  ;;  %v14344_v49 = vmov 2131351028  }
 0x2e3   :  { %9025 = vmatpush3.bf16.msra.mxu0 %v9022_v32  ;;  %v11908_v32 = vld [vmem:[#allocation4 + $0x8] sm:$0xff] }
 0x2e4   :  { %9027 = vmatprep.subr.bf16.mxu0 %v9026_v4  ;;  %v5157_v42 = vand.u32 4294901760, %v11908_v32 }
 0x2e6   :  { %v11929_v44 = vpack.c.bf16 %v5157_v42, %v5154_v34 }
 0x2e7   :  { %9029 = vmatpush3.bf16.msra.mxu0 %v9026_v4  ;;  %v13978_v4 = vand.u32 4294901760, %v11920_v19 }
 0x2e8   :  { %9031 = vmatprep.subr.bf16.mxu0 %v9030_v18  ;;  %9171 = vmatprep.subr.bf16.mxu1 %v11929_v44 }
 0x2e9   :  { %9173 = vmatpush3.bf16.msra.mxu1 %v11929_v44  ;;  %v11952_v6 = vpack.c.bf16 %v13978_v4, %v13979_v38 }
 0x2ea   :  { %9175 = vmatprep.subr.bf16.mxu1 %v11937_v26 }
 0x2eb   :  { %9033 = vmatpush3.bf16.msra.mxu0 %v9030_v18  ;;  %v13977_v18 = vand.u32 4294901760, %v11939_v31 }
 0x2ec   :  { %9035 = vmatprep.subr.bf16.mxu0 %v9034_v60 }
 0x2ed   :  { %9177 = vmatpush3.bf16.msra.mxu1 %v11937_v26  ;;  %v11964_v10 = vpack.c.bf16 %v13976_v55, %v13977_v18  ;;  %v12174_v55 = vsub.f32 %v11906_v39, %v5154_v34 }
 0x2ee   :  { %9179 = vmatprep.subr.bf16.mxu1 %v11952_v6 }
 0x2ef   :  { %9037 = vmatpush3.bf16.msra.mxu0 %v9034_v60  ;;  %v13980_v34 = vand.u32 4294901760, %v12174_v55 }
 0x2f0   :  { %9039 = vmatprep.subr.bf16.mxu0 %v9038_v35 }
 0x2f1   :  { %9181 = vmatpush3.bf16.msra.mxu1 %v11952_v6 }
 0x2f2   :  { %9183 = vmatprep.subr.bf16.mxu1 %v11964_v10 }
 0x2f3   :  { %9041 = vmatpush3.bf16.msra.mxu0 %v9038_v35 }
 0x2f4   :  { %9043 = vmatprep.subr.bf16.mxu0 %v9042_v37 }
 0x2f5   :  { %9185 = vmatpush3.bf16.msra.mxu1 %v11964_v10 }
 0x2f6   :  { %7822 = vmatmul.mubr.f32.vlgmr.msra.gmra.mrb[8].mxu0 %v11731_v9 }
 0x2f7   :  { %9045 = vmatpush3.bf16.msra.mxu0 %v9042_v37  ;;  %7856 = vmatprep.mubr.f32.mxu0 %v11765_v36  ;;  %v14341_v36 = vand.u32 4294901760, %v11738_v45 }
 0x2f8   :  { %9047 = vmatprep.subr.bf16.mxu0 %v9046_v3 }
 0x2fb   :  { %9049 = vmatpush3.bf16.msra.mxu0 %v9046_v3 }
 0x2fc   :  { %9051 = vmatprep.subr.bf16.mxu0 %v9050_v62 }
 0x2ff   :  { %9053 = vmatpush3.bf16.msra.mxu0 %v9050_v62 }
 0x300   :  { %9055 = vmatprep.subr.bf16.mxu0 %v9054_v47 }
 0x303   :  { %9057 = vmatpush3.bf16.msra.mxu0 %v9054_v47 }
 0x304   :  { %9059 = vmatprep.subr.bf16.mxu0 %v9058_v2 }
 0x307   :  { %9061 = vmatpush3.bf16.msra.mxu0 %v9058_v2 }
 0x308   :  { %9063 = vmatprep.subr.bf16.mxu0 %v9062_v61 }
 0x30b   :  { %9065 = vmatpush3.bf16.msra.mxu0 %v9062_v61  ;;  %v13984_v61 = vand.u32 2147483647, %v11448_v28 }
 0x30c   :  { %9067 = vmatprep.subr.bf16.mxu0 %v9066_v56 }
 0x30f   :  { %9069 = vmatpush3.bf16.msra.mxu0 %v9066_v56 }
 0x310   :  { %9071 = vmatprep.subr.bf16.mxu0 %v9070_v53 }
 0x313   :  { %9073 = vmatpush3.bf16.msra.mxu0 %v9070_v53 }
 0x314   :  { %9075 = vmatprep.subr.bf16.mxu0 %v11577_v51 }
 0x316   :  { %7857 = vmatmul.mubr.f32.vlgmr.msra.gmra.mrb[8].mxu0 %v11738_v45 }
 0x317   :  { %9077 = vmatpush3.bf16.msra.mxu0 %v11577_v51  ;;  %7891 = vmatprep.mubr.f32.mxu0 %v14340_v50 }
 0x318   :  { %9079 = vmatprep.subr.bf16.mxu0 %v11634_v63 }
 0x31b   :  { %9081 = vmatpush3.bf16.msra.mxu0 %v11634_v63 }
 0x31c   :  { %9083 = vmatprep.subr.bf16.mxu0 %v11654_v29 }
 0x31f   :  { %9085 = vmatpush3.bf16.msra.mxu0 %v11654_v29 }
 0x320   :  { %9087 = vmatprep.subr.bf16.mxu0 %v11662_v23 }
 0x323   :  { %9089 = vmatpush3.bf16.msra.mxu0 %v11662_v23 }
 0x324   :  { %9091 = vmatprep.subr.bf16.mxu0 %v11691_v16 }
 0x327   :  { %9093 = vmatpush3.bf16.msra.mxu0 %v11691_v16 }
 0x328   :  { %9095 = vmatprep.subr.bf16.mxu0 %v11721_v0 }
 0x32b   :  { %9097 = vmatpush3.bf16.msra.mxu0 %v11721_v0 }
 0x32c   :  { %9099 = vmatprep.subr.bf16.mxu0 %v11758_v27 }
 0x32f   :  { %9101 = vmatpush3.bf16.msra.mxu0 %v11758_v27 }
 0x330   :  { %9103 = vmatprep.subr.bf16.mxu0 %v11771_v15 }
 0x333   :  { %9105 = vmatpush3.bf16.msra.mxu0 %v11771_v15 }
 0x334   :  { %9107 = vmatprep.subr.bf16.mxu0 %v11877_v5 }
 0x336   :  { %7892 = vmatmul.mubr.f32.vlgmr.msra.gmra.mrb[8].mxu0 %v14341_v36 }
 0x337   :  { %9109 = vmatpush3.bf16.msra.mxu0 %v11877_v5  ;;  %7926 = vmatprep.mubr.f32.mxu0 %v11748_v14  ;;  %v14342_v5 = vmov 683565275  }
 0x338   :  { %9111 = vmatprep.subr.bf16.mxu0 %v11883_v54 }
 0x33b   :  { %9113 = vmatpush3.bf16.msra.mxu0 %v11883_v54 }
 0x33c   :  { %9115 = vmatprep.subr.bf16.mxu0 %v11885_v24 }
 0x33f   :  { %9117 = vmatpush3.bf16.msra.mxu0 %v11885_v24  ;;  %v14343_v24 = vmov 2102212464  }
 0x340   :  { %9119 = vmatprep.subr.bf16.mxu0 %v11887_v1 }
 0x343   :  { %9121 = vmatpush3.bf16.msra.mxu0 %v11887_v1  ;;  %v3672_v1 = vand.u32 2139095040, %v11405_v7 }
 0x344   :  { %9123 = vmatprep.subr.bf16.mxu0 %v11889_v59 }
 0x347   :  { %9125 = vmatpush3.bf16.msra.mxu0 %v11889_v59 }
 0x348   :  { %9127 = vmatprep.subr.bf16.mxu0 %v11891_v13 }
 0x34b   :  { %9129 = vmatpush3.bf16.msra.mxu0 %v11891_v13  ;;  %v3673_v13 = vshrl.u32 %v3672_v1, 23 }
 0x34c   :  { %9131 = vmatprep.subr.bf16.mxu0 %v11893_v22 }
 0x34d   :  { %v7290_v59 = vadd.s32 4294967169, %v3673_v13 }
 0x34f   :  { %9133 = vmatpush3.bf16.msra.mxu0 %v11893_v22  ;;  %v4088_v22 = vand.u32 2139095040, %v11448_v28 }
 0x350   :  { %9135 = vmatprep.subr.bf16.mxu0 %v11895_v11 }
 0x353   :  { %9137 = vmatpush3.bf16.msra.mxu0 %v11895_v11 }
 0x354   :  { %9139 = vmatprep.subr.bf16.mxu0 %v11577_v51 }
 0x356   :  { %7927 = vmatmul.mubr.f32.vlgmr.msra.gmra.mrb[8].mxu0 %v11731_v9 }
 0x357   :  { %9141 = vmatpush3.bf16.msra.mxu0 %v11577_v51  ;;  %7961 = vmatprep.mubr.f32.mxu0 %v11748_v14  ;;  %v4089_v51 = vshrl.u32 %v4088_v22, 23 }
 0x358   :  { %9143 = vmatprep.subr.bf16.mxu0 %v11634_v63 }
 0x35b   :  { %9145 = vmatpush3.bf16.msra.mxu0 %v11634_v63  ;;  %v7306_v63 = vadd.s32 4294967169, %v4089_v51 }
 0x35c   :  { %9147 = vmatprep.subr.bf16.mxu0 %v11654_v29 }
 0x35f   :  { %9149 = vmatpush3.bf16.msra.mxu0 %v11654_v29  ;;  %v3679_v29 = vadd.s32 1, %v7290_v59 }
 0x360   :  { %9151 = vmatprep.subr.bf16.mxu0 %v11662_v23 }
 0x361   :  { %vm3680_vm11 = vcmp.gt.s32.totalorder %v3679_v29, 0 }
 0x363   :  { %9153 = vmatpush3.bf16.msra.mxu0 %v11662_v23  ;;  %v4095_v23 = vadd.s32 1, %v7306_v63 }
 0x364   :  { %9155 = vmatprep.subr.bf16.mxu0 %v11691_v16 }
 0x365   :  { %vm4096_vm12 = vcmp.gt.s32.totalorder %v4095_v23, 0 }
 0x366   :  { %v4097_v45 = vsel %vm4096_vm12, %v4095_v23, 0 }
 0x367   :  { %9157 = vmatpush3.bf16.msra.mxu0 %v11691_v16  ;;  %v3681_v16 = vsel %vm3680_vm11, %v3679_v29, 0  ;;  %v4099_v14 = vand.u32 31, %v4097_v45  ;;  %v12066_v50 = vshrl.u32 %v4097_v45, 5 }
 0x368   :  { %9159 = vmatprep.subr.bf16.mxu0 %v11721_v0  ;;  %v12047_v8 = vshrl.u32 %v3681_v16, 5 }
 0x369   :  { %v4111_v56 = vshll.u32 %v14343_v24, %v4099_v14  ;;  %v4114_v63 = vshll.u32 %v14310_v41, %v4099_v14  ;;  %v4102_v29 = vshll.u32 %v14342_v5, %v4099_v14  ;;  %v4105_v23 = vshll.u32 %v14312_v48, %v4099_v14 }
 0x36a   :  { %vm3704_vm13 = vcmp.lt.s32.totalorder %v12047_v8, 4  ;;  %vm4120_vm14 = vcmp.lt.s32.totalorder %v12066_v50, 4  ;;  %vm3701_vm15 = vcmp.lt.s32.totalorder %v12047_v8, 1  ;;  %vm3703_vm0 = vcmp.lt.s32.totalorder %v12047_v8, 3 }
 0x36b   :  { %9161 = vmatpush3.bf16.msra.mxu0 %v11721_v0  ;;  %v3683_v0 = vand.u32 31, %v3681_v16  ;;  %v4108_v16 = vshll.u32 %v14344_v49, %v4099_v14  ;;  %vm4117_vm1 = vcmp.lt.s32.totalorder %v12066_v50, 1  ;;  %vm4119_vm2 = vcmp.lt.s32.totalorder %v12066_v50, 3 }
 0x36c   :  { %9163 = vmatprep.subr.bf16.mxu0 %v11758_v27  ;;  %vm3702_vm3 = vcmp.lt.s32.totalorder %v12047_v8, 2  ;;  %vm4118_vm4 = vcmp.lt.s32.totalorder %v12066_v50, 2 }
 0x36d   :  { %v3686_v54 = vshll.u32 %v14342_v5, %v3683_v0  ;;  %v3695_v11 = vshll.u32 %v14343_v24, %v3683_v0  ;;  %v3698_v46 = vshll.u32 %v14310_v41, %v3683_v0  ;;  %v3689_v3 = vshll.u32 %v14312_v48, %v3683_v0 }
 0x36e   :  { %v3692_v62 = vshll.u32 %v14344_v49, %v3683_v0 }
 0x36f   :  { %9165 = vmatpush3.bf16.msra.mxu0 %v11758_v27  ;;  %v12034_v27 = vsub.s32 32, %v3683_v0 }
 0x370   :  { %9167 = vmatprep.subr.bf16.mxu0 %v11771_v15 }
 0x371   :  { %v3687_v25 = vshrl.u32 %v14312_v48, %v12034_v27  ;;  %v3696_v57 = vshrl.u32 %v14310_v41, %v12034_v27  ;;  %v3699_v33 = vshrl.u32 %v14314_v12, %v12034_v27  ;;  %v3690_v60 = vshrl.u32 %v14344_v49, %v12034_v27 }
 0x372   :  { %v3693_v52 = vshrl.u32 %v14343_v24, %v12034_v27 }
 0x373   :  { %9169 = vmatpush3.bf16.msra.mxu0 %v11771_v15  ;;  %v12037_v15 = vsub.s32 32, %v4099_v14  ;;  %v12058_v37 = vor.u32 %v3687_v25, %v3686_v54  ;;  %v3697_v47 = vor.u32 %v3696_v57, %v3695_v11  ;;  %v3700_v2 = vor.u32 %v3699_v33, %v3698_v46 }
 0x374   :  { %v3691_v13 = vor.u32 %v3690_v60, %v3689_v3  ;;  %v3694_v51 = vor.u32 %v3693_v52, %v3692_v62  ;;  %v4092_v25 = vand.u32 8388607, %v13984_v61 }
 0x375   :  { %v4112_v35 = vshrl.u32 %v14310_v41, %v12037_v15  ;;  %v4115_v53 = vshrl.u32 %v14314_v12, %v12037_v15  ;;  %v4103_v36 = vshrl.u32 %v14312_v48, %v12037_v15  ;;  %v4106_v1 = vshrl.u32 %v14344_v49, %v12037_v15 }
 0x376   :  { %7962 = vmatmul.mubr.f32.vlgmr.msra.gmra.mrb[8].mxu0 %v11731_v9  ;;  %v13985_v9 = vand.u32 2147483647, %v11405_v7  ;;  %v4109_v22 = vshrl.u32 %v14343_v24, %v12037_v15  ;;  %v3710_v0 = vsel %vm3704_vm13, %v3697_v47, 920167782  ;;  %v3714_v45 = vsel %vm3704_vm13, %v3700_v2, 1326507024 }
 0x377   :  { %v4113_v59 = vor.u32 %v4112_v35, %v4111_v56  ;;  %v4116_v57 = vor.u32 %v4115_v53, %v4114_v63  ;;  %v12085_v33 = vor.u32 %v4103_v36, %v4102_v29  ;;  %v12087_v54 = vor.u32 %v4106_v1, %v4105_v23 }
 0x378   :  { %v3676_v43 = vand.u32 8388607, %v13985_v9  ;;  %v4110_v11 = vor.u32 %v4109_v22, %v4108_v16  ;;  %v3709_v52 = vsel %vm3701_vm15, %v12058_v37, %v3691_v13  ;;  %v3711_v46 = vsel %vm3703_vm0, %v3694_v51, %v3710_v0 }
 0x379   :  { %v4126_v14 = vsel %vm4120_vm14, %v4113_v59, 920167782  ;;  %v3713_v35 = vsel %vm3701_vm15, %v3691_v13, %v3694_v51  ;;  %v4130_v3 = vsel %vm4120_vm14, %v4116_v57, 1326507024  ;;  %v4093_v62 = vor.u32 8388608, %v4092_v25 }
 0x37a   :  { %v3677_v60 = vor.u32 8388608, %v3676_v43  ;;  %v3715_v43 = vsel %vm3703_vm0, %v3697_v47, %v3714_v45  ;;  %v4125_v2 = vsel %vm4117_vm1, %v12085_v33, %v12087_v54  ;;  %v4127_v56 = vsel %vm4119_vm2, %v4110_v11, %v4126_v14 }
 0x37b   :  { %v3712_v47 = vsel %vm3702_vm3, %v3709_v52, %v3711_v46  ;;  %v3716_v36 = vsel %vm3702_vm3, %v3713_v35, %v3715_v43  ;;  %v4129_v1 = vsel %vm4117_vm1, %v12087_v54, %v4110_v11  ;;  %v4131_v22 = vsel %vm4119_vm2, %v4113_v59, %v4130_v3  ;;  %v5138_v35 = vld [vmem:[#allocation4 + $0x40] sm:$0xff]  ;;  %v5139_v43 = vld [vmem:[#allocation4 + $0x48] sm:$0xff]  ;;  %v12150_v3 = vld [vmem:[#allocation4 + $0x50] sm:$0xff] }
 0x37c   :  { %v12116_v53 = vshll.u32 %v3677_v60, 8  ;;  %v4128_v63 = vsel %vm4118_vm4, %v4125_v2, %v4127_v56  ;;  %v4133_v16 = vshll.u32 %v4093_v62, 8  ;;  %v4132_v25 = vsel %vm4118_vm4, %v4129_v1, %v4131_v22  ;;  %v12152_v56 = vld [vmem:[#allocation4 + $0x58] sm:$0xff]  ;;  %v12157_v1 = vld [vmem:[#allocation4 + $0x68] sm:$0xff] }
 0x37d   :  { %v3706_v59 = vsel %vm3704_vm13, %v3694_v51, 2102212464  ;;  %v3685_v14 = vshrl.u32 %v14342_v5, %v12034_v27  ;;  %v5178_v62 = vand.u32 4294901760, %v5138_v35  ;;  %v5181_v2 = vand.u32 4294901760, %v5139_v43 }
 0x37e   :  { %v12129_v29 = vmul.u32.u64.low %v12116_v53, %v3712_v47  ;;  %v12130_v23 = vmul.u32.u64.high %v12116_v53, %v3712_v47, %v12129_v29  ;;  %v12134_v0 = vmul.u32.u64.low %v12116_v53, %v3716_v36  ;;  %v12135_v45 = vmul.u32.u64.high %v12116_v53, %v3716_v36, %v12134_v0  ;;  %v12155_v36 = vld [vmem:[#allocation4 + $0x60] sm:$0xff] }
 0x37f   :  { %v12139_v57 = vmul.u32.u64.low %v4133_v16, %v4128_v63  ;;  %v12140_v60 = vmul.u32.u64.high %v4133_v16, %v4128_v63, %v12139_v57  ;;  %v12147_v52 = vmul.u32.u64.low %v4133_v16, %v4132_v25  ;;  %v12148_v46 = vmul.u32.u64.high %v4133_v16, %v4132_v25, %v12147_v52 }
 0x380   :  { %v5184_v47 = vand.u32 4294901760, %v12150_v3  ;;  %v3705_v27 = vsel %vm3701_vm15, %v3685_v14, %v12058_v37  ;;  %v3707_v51 = vsel %vm3703_vm0, %v3691_v13, %v3706_v59  ;;  %v4122_v22 = vsel %vm4120_vm14, %v4110_v11, 2102212464  ;;  %v12180_v59 = vld [vmem:[#allocation4 + $0x70] sm:$0xff]  ;;  %v12182_v11 = vld [vmem:[#allocation4 + $0x78] sm:$0xff] }
 0x381   :  { %v5187_v63 = vand.u32 4294901760, %v12152_v56  ;;  %v12167_v0 = vpack.c.bf16 %v5181_v2, %v5178_v62  ;;  %v5190_v25 = vand.u32 4294901760, %v12155_v36  ;;  %v5193_v52 = vand.u32 4294901760, %v12157_v1 }
 0x382   :  { %v4101_v37 = vshrl.u32 %v14342_v5, %v12037_v15  ;;  %v12187_v14 = vsub.f32 %v11908_v32, %v5157_v42  ;;  %v3708_v18 = vsel %vm3702_vm3, %v3705_v27, %v3707_v51  ;;  %vm3726_vm5 = vc.u32 %v12135_v45, %v12129_v29 }
 0x383   :  { %v12178_v13 = vpack.c.bf16 %v5187_v63, %v5184_v47  ;;  %v3727_v39 = vadd.s32 1, %v12130_v23  ;;  %9187 = vmatprep.subr.bf16.mxu1 %v12167_v0  ;;  %v4123_v32 = vsel %vm4119_vm2, %v12087_v54, %v4122_v22  ;;  %v4143_v42 = vadd.s32 1, %v12140_v60 }
 0x384   :  { %v4121_v15 = vsel %vm4117_vm1, %v4101_v37, %v12085_v33  ;;  %9189 = vmatpush3.bf16.msra.mxu1 %v12167_v0  ;;  %v13983_v8 = vand.u32 4294901760, %v12187_v14  ;;  %v12206_v27 = vpack.c.bf16 %v5193_v52, %v5190_v25  ;;  %v5196_v51 = vand.u32 4294901760, %v12180_v59 }
 0x385   :  { %9191 = vmatprep.subr.bf16.mxu1 %v12178_v13  ;;  %v5199_v4 = vand.u32 4294901760, %v12182_v11  ;;  %v5258_v33 = vsub.f32 %v12174_v55, %v13980_v34  ;;  %vm4142_vm6 = vc.u32 %v12148_v46, %v12139_v57  ;;  %v3728_v22 = vsel %vm3726_vm5, %v3727_v39, %v12130_v23 }
 0x386   :  { %v5265_v54 = vsub.f32 %v12187_v14, %v13983_v8  ;;  %v4124_v37 = vsel %vm4118_vm4, %v4121_v15, %v4123_v32  ;;  %v3724_v38 = vmul.u32 %v12116_v53, %v3708_v18  ;;  %v4144_v34 = vsel %vm4142_vm6, %v4143_v42, %v12140_v60 }
 0x387   :  { %v12228_v30 = vpack.c.bf16 %v5199_v4, %v5196_v51  ;;  %v5259_v58 = vand.u32 4294901760, %v5258_v33  ;;  %v4140_v9 = vmul.u32 %v4133_v16, %v4124_v37  ;;  %v12234_v53 = vsub.f32 %v5138_v35, %v5178_v62 }
 0x388   :  { %9193 = vmatpush3.bf16.msra.mxu1 %v12178_v13  ;;  %v5266_v8 = vand.u32 4294901760, %v5265_v54  ;;  %v3729_v61 = vadd.s32 %v3728_v22, %v3724_v38  ;;  %v12236_v23 = vsub.f32 %v5139_v43, %v5181_v2  ;;  %v12251_v43 = vsub.f32 %v12150_v3, %v5184_v47 }
 0x389   :  { %9195 = vmatprep.subr.bf16.mxu1 %v12206_v27  ;;  %v4145_v5 = vadd.s32 %v4144_v34, %v4140_v9  ;;  %v13994_v38 = vand.u32 4294901760, %v12234_v53  ;;  %v12256_v2 = vsub.f32 %v12152_v56, %v5187_v63  ;;  %v12267_v47 = vsub.f32 %v12155_v36, %v5190_v25 }
 0x38a   :  { %v12232_v50 = vpack.c.bf16 %v5266_v8, %v5259_v58  ;;  %v3730_v18 = vadd.s32 536870912, %v3729_v61  ;;  %v13993_v9 = vand.u32 4294901760, %v12236_v23  ;;  %v13992_v15 = vand.u32 4294901760, %v12251_v43 }
 0x38b   :  { %v4146_v60 = vadd.s32 536870912, %v4145_v5  ;;  %v5314_v58 = vsub.f32 %v12234_v53, %v13994_v38  ;;  %v13991_v42 = vand.u32 4294901760, %v12256_v2  ;;  %v12270_v56 = vsub.f32 %v12157_v1, %v5193_v52 }
 0x38c   :  { %9197 = vmatpush3.bf16.msra.mxu1 %v12206_v27  ;;  %v12242_v16 = vshrl.u32 %v3730_v18, 30  ;;  %v5321_v35 = vsub.f32 %v12236_v23, %v13993_v9  ;;  %v5328_v3 = vsub.f32 %v12251_v43, %v13992_v15  ;;  %v13990_v22 = vand.u32 4294901760, %v12267_v47 }
 0x38d   :  { %9199 = vmatprep.subr.bf16.mxu1 %v12228_v30  ;;  %v12253_v62 = vshrl.u32 %v4146_v60, 30  ;;  %v5315_v39 = vand.u32 4294901760, %v5314_v58  ;;  %14345 = vst [vmem:[#allocation43_spill] sm:$0xff] %v12270_v56  ;;  %v5335_v33 = vsub.f32 %v12256_v2, %v13991_v42  ;;  %v13987_v37 = vand.u32 4294901760, %v12270_v56 }
 0x38e   :  { %v5322_v34 = vand.u32 4294901760, %v5321_v35  ;;  %v3732_v32 = vshll.u32 %v12242_v16, 30  ;;  %v5329_v54 = vand.u32 4294901760, %v5328_v3  ;;  %v5342_v36 = vsub.f32 %v12267_v47, %v13990_v22 }
 0x38f   :  { %v4148_v63 = vshll.u32 %v12253_v62, 30  ;;  %v5336_v60 = vand.u32 4294901760, %v5335_v33  ;;  %v5349_v1 = vsub.f32 %v12270_v56, %v13987_v37  ;;  %v12285_v25 = vsub.f32 %v12180_v59, %v5196_v51 }
 0x390   :  { %9201 = vmatpush3.bf16.msra.mxu1 %v12228_v30  ;;  %v12261_v8 = vpack.c.bf16 %v5322_v34, %v5315_v39  ;;  %v3733_v18 = vsub.s32 %v3729_v61, %v3732_v32  ;;  %v12288_v52 = vsub.f32 %v12182_v11, %v5199_v4  ;;  %v5343_v39 = vand.u32 4294901760, %v5342_v36 }
 0x391   :  { %9203 = vmatprep.subr.bf16.mxu1 %v12232_v50  ;;  %14346 = vst [vmem:[#allocation44_spill] sm:$0xff] %v12285_v25  ;;  %v4149_v58 = vsub.s32 %v4145_v5, %v4148_v63  ;;  %v12290_v35 = vpack.c.bf16 %v5336_v60, %v5329_v54  ;;  %v5350_v61 = vand.u32 4294901760, %v5349_v1  ;;  %v13988_v34 = vand.u32 4294901760, %v12285_v25 }
 0x392   :  { %14347 = vst [vmem:[#allocation45_spill] sm:$0xff] %v12288_v52  ;;  %v13989_v32 = vand.u32 4294901760, %v12288_v52  ;;  %v3735_v3 = vsub.s32 0, %v3733_v18  ;;  %v12304_v63 = vpack.c.bf16 %v12187_v14, %v12174_v55  ;;  %vm4177_vm3 = vweird.f32 %v11448_v28 }
 0x393   :  { %v12294_v33 = vpack.c.bf16 %v5350_v61, %v5343_v39  ;;  %v5356_v59 = vsub.f32 %v12285_v25, %v13988_v34  ;;  %v4151_v5 = vsub.s32 0, %v4149_v58  ;;  %v12310_v34 = vpack.c.bf16 %v12236_v23, %v12234_v53 }
 0x394   :  { %v5363_v4 = vsub.f32 %v12288_v52, %v13989_v32  ;;  %v7291_v54 = vmin.u32 %v3735_v3, %v3733_v18  ;;  %vm3761_vm4 = vweird.f32 %v11405_v7 }
 0x395   :  { %v5357_v11 = vand.u32 4294901760, %v5356_v59  ;;  %v7307_v36 = vmin.u32 %v4151_v5, %v4149_v58  ;;  %v12318_v5 = vpack.c.bf16 %v12270_v56, %v12267_v47 }
 0x396   :  { %v5364_v51 = vand.u32 4294901760, %v5363_v4  ;;  %v3737_v1 = vclz %v7291_v54  ;;  %v12314_v4 = vpack.c.bf16 %v12256_v2, %v12251_v43 }
 0x397   :  { %v4153_v39 = vclz %v7307_v36 }
 0x398   :  { %v12306_v60 = vpack.c.bf16 %v5364_v51, %v5357_v11  ;;  %v7292_v61 = vadd.s32 4294967294, %v3737_v1  ;;  %v12322_v1 = vpack.c.bf16 %v12288_v52, %v12285_v25 }
 0x399   :  { %v7308_v37 = vadd.s32 4294967294, %v4153_v39  ;;  %v3725_v39 = vadd.s32 %v12129_v29, %v12135_v45 }
 0x39a   :  { %vm7293_vm7 = vcmp.lt.s32.totalorder %v7292_v61, 0 }
 0x39b   :  { %vm7309_vm8 = vcmp.lt.s32.totalorder %v7308_v37, 0  ;;  %v3740_v59 = vsel %vm7293_vm7, 0, %v7292_v61 }
 0x39c   :  { %v4156_v32 = vsel %vm7309_vm8, 0, %v7308_v37  ;;  %v3745_v3 = vsub.s32 4294967266, %v3740_v59  ;;  %v3741_v54 = vsub.s32 32, %v3740_v59  ;;  %v4141_v37 = vadd.s32 %v12139_v57, %v12148_v46 }
 0x39d   :  { %v4161_v11 = vsub.s32 4294967266, %v4156_v32  ;;  %v4157_v22 = vsub.s32 32, %v4156_v32  ;;  %v3742_v9 = vshll.u32 %v3733_v18, %v3740_v59  ;;  %v4158_v41 = vshll.u32 %v4149_v58, %v4156_v32  ;;  %v14354_v18 = vld [vmem:[#allocation25_spill] sm:$0xff] }
 0x39e   :  { %v3746_v51 = vadd.s32 127, %v3745_v3  ;;  %v3743_v42 = vshrl.u32 %v3725_v39, %v3741_v54  ;;  %v14348_v57 = vand.u32 2147483647, %v11405_v7  ;;  %v14355_v58 = vld [vmem:[#allocation41_spill] sm:$0xff] }
 0x39f   :  { %v4162_v36 = vadd.s32 127, %v4161_v11  ;;  %v4159_v12 = vshrl.u32 %v4141_v37, %v4157_v22  ;;  %v4407_v32 = vmul.f32 1.442695, %v14355_v58 }
 0x3a0   :  { %v3747_v61 = vshll.u32 %v3746_v51, 23  ;;  %v3744_v3 = vor.u32 %v3743_v42, %v3742_v9  ;;  %vm12332_vm11 = vcmp.le.f32.partialorder %v14348_v57, 0.7853982  ;;  %v3755_v9 = vsub.s32 4, %v12242_v16 }
 0x3a1   :  { %v4163_v15 = vshll.u32 %v4162_v36, 23  ;;  %v4160_v49 = vor.u32 %v4159_v12, %v4158_v41 }
 0x3a2   :  { %v3748_v38 = vor.u32 4788187, %v3747_v61  ;;  %v3751_v48 = vcvt.s32.f32 %v3744_v3  ;;  %v3756_v42 = vsel %vm3671_vm9, %v3755_v9, %v12242_v16 }
 0x3a3   :  { %v4164_v11 = vor.u32 4788187, %v4163_v15  ;;  %v4167_v56 = vcvt.s32.f32 %v4160_v49  ;;  %v4171_v49 = vsub.s32 4, %v12253_v62  ;;  %v3758_v22 = vsel %vm12332_vm11, 0, %v3756_v42 }
 0x3a4   :  { %v3749_v24 = vand.u32 2147483647, %v3748_v38  ;;  %v3762_v39 = vadd.s32 3, %v3758_v22 }
 0x3a5   :  { %v4165_v52 = vand.u32 2147483647, %v4164_v11  ;;  %v4172_v15 = vsel %vm4087_vm10, %v4171_v49, %v12253_v62  ;;  %v14356_v49 = vand.u32 4294901760, %v11910_v40 }
 0x3a6   :  { %v3752_v25 = vmul.f32 %v3751_v48, %v3749_v24  ;;  %v14351_v48 = vand.u32 2147483647, %v11448_v28  ;;  %v3763_v16 = vand.u32 3, %v3762_v39  ;;  %v14358_v39 = vand.u32 4294901760, %v11918_v17 }
 0x3a7   :  { %v4168_v29 = vmul.f32 %v4167_v56, %v4165_v52  ;;  %v12364_v9 = vsub.f32 %v11910_v40, %v14356_v49 }
 0x3a8   :  { %v3753_v45 = vxor.u32 2147483648, %v3752_v25  ;;  %vm12341_vm12 = vcmp.le.f32.partialorder %v14351_v48, 0.7853982  ;;  %vm3765_vm15 = vcmp.eq.s32.totalorder %v3763_v16, 0  ;;  %vm3768_vm0 = vcmp.eq.s32.totalorder %v3763_v16, 2 }
 0x3a9   :  { %v4169_v51 = vxor.u32 2147483648, %v4168_v29  ;;  %v4174_v56 = vsel %vm12341_vm12, 0, %v4172_v15  ;;  %vm3764_vm2 = vcmp.lt.s32.totalorder %v3763_v16, 2  ;;  %v14357_v15 = vand.u32 4294901760, %v11915_v21 }
 0x3aa   :  { %v3754_v54 = vsel %vm3671_vm9, %v3753_v45, %v3752_v25  ;;  %v4399_v25 = vmul.f32 1.442695, %v14354_v18  ;;  %v4178_v36 = vadd.s32 3, %v4174_v56  ;;  %v5271_v40 = vand.u32 4294901760, %v12364_v9 }
 0x3ab   :  { %v4170_v38 = vsel %vm4087_vm10, %v4169_v51, %v4168_v29  ;;  %v3757_v41 = vsel %vm12332_vm11, %v11405_v7, %v3754_v54  ;;  %v12369_v42 = vsub.f32 %v11915_v21, %v14357_v15  ;;  %v12378_v21 = vsub.f32 %v11918_v17, %v14358_v39 }
 0x3ac   :  { %v4173_v24 = vsel %vm12341_vm12, %v11448_v28, %v4170_v38  ;;  %9961 = vcosq.f32 %v3757_v41  ;;  %v4179_v62 = vand.u32 3, %v4178_v36  ;;  %v14359_v7 = vand.u32 4294901760, %v11920_v19 }
 0x3ad   :  { %9963 = vsinq.f32 %v3757_v41  ;;  %v5278_v36 = vand.u32 4294901760, %v12369_v42 }
 0x3ae   :  { %9965 = vcosq.f32 %v4173_v24  ;;  %vm4181_vm13 = vcmp.eq.s32.totalorder %v4179_v62, 0  ;;  %vm4184_vm14 = vcmp.eq.s32.totalorder %v4179_v62, 2  ;;  %vm4180_vm1 = vcmp.lt.s32.totalorder %v4179_v62, 2 }
 0x3af   :  { %9967 = vsinq.f32 %v4173_v24  ;;  %v7318_v24 = vld [vmem:[%s13796_s9] ss:$0 sm:$0xff]  ;;  %v5279_v17 = vsub.f32 %v12369_v42, %v5278_v36 }
 0x3b0   :  { %9969 = vpow2.f32 %v4399_v25 }
 0x3b1   :  { %9971 = vpow2.f32 %v4407_v32 }
 0x3b6   :  { %v9962_v52 = vpop.eup %9961 }
 0x3b7   :  { %v9964_v59 = vpop.eup %9963  ;;  %v3769_v45 = vxor.u32 2147483648, %v9962_v52 }
 0x3b8   :  { %v9966_v61 = vpop.eup %9965  ;;  %v3766_v29 = vxor.u32 2147483648, %v9964_v59 }
 0x3b9   :  { %v9968_v37 = vpop.eup %9967  ;;  %v4185_v11 = vxor.u32 2147483648, %v9966_v61  ;;  %v3770_v46 = vsel %vm3768_vm0, %v3769_v45, %v9964_v59  ;;  %v14360_v45 = vand.u32 4294901760, %v11939_v31 }
 0x3ba   :  { %v4182_v3 = vxor.u32 2147483648, %v9968_v37  ;;  %v3767_v57 = vsel %vm3765_vm15, %v9962_v52, %v3766_v29  ;;  %v9970_v38 = vpop.eup %9969 }
 0x3bb   :  { %v4186_v54 = vsel %vm4184_vm14, %v4185_v11, %v9968_v37  ;;  %v3771_v48 = vsel %vm3764_vm2, %v3767_v57, %v3770_v46  ;;  %v9972_v12 = vpop.eup %9971  ;;  %v5285_v11 = vand.u32 4294901760, %v12378_v21 }
 0x3bc   :  { %v4183_v51 = vsel %vm4181_vm13, %v9966_v61, %v4182_v3  ;;  %v3772_v18 = vsel %vm3761_vm4, nan, %v3771_v48  ;;  %v12383_v61 = vsub.f32 %v11920_v19, %v14359_v7  ;;  %v5272_v3 = vsub.f32 %v12364_v9, %v5271_v40 }
 0x3bd   :  { %v4187_v41 = vsel %vm4180_vm1, %v4183_v51, %v4186_v54  ;;  %v4414_v58 = vmul.f32 %v9970_v38, %v3772_v18  ;;  %v12403_v51 = vsub.f32 %v11939_v31, %v14360_v45  ;;  %v14361_v54 = vand.u32 4294901760, %v11941_v20 }
 0x3be   :  { %v4188_v56 = vsel %vm4177_vm3, nan, %v4187_v41  ;;  %v5292_v19 = vand.u32 4294901760, %v12383_v61  ;;  %v5273_v48 = vand.u32 4294901760, %v5272_v3  ;;  %v12451_v3 = vld [vmem:[#allocation6 + $0x8] sm:$0xff] }
 0x3bf   :  { %v4418_v25 = vmul.f32 %v9972_v12, %v4188_v56  ;;  %v12408_v57 = vsub.f32 %v11941_v20, %v14361_v54  ;;  %v5280_v12 = vand.u32 4294901760, %v5279_v17  ;;  %v5299_v49 = vand.u32 4294901760, %v12403_v51  ;;  %v12459_v17 = vld [vmem:[#allocation6 + $0x18] sm:$0xff]  ;;  %v12462_v54 = vld [vmem:[#allocation6 + $0x20] sm:$0xff] }
 0x3c0   :  { %v5293_v20 = vsub.f32 %v12383_v61, %v5292_v19 }
 0x3c1   :  { %v5306_v15 = vand.u32 4294901760, %v12408_v57  ;;  %v9206_v18 = vpack.c.bf16 %v5280_v12, %v5273_v48  ;;  %v12464_v48 = vld [vmem:[#allocation6 + $0x28] sm:$0xff]  ;;  %v9242_v12 = vpack.c.bf16 %v12383_v61, %v12378_v21 }
 0x449   :  { %v7963_v22 = vpop.f32.mrb[8].mxu0 }
 0x44a   :  { %v9746_v52 = vadd.f32 %v7963_v22, %v7318_v24  ;;  %v5118_v32 = vpop.f32.mrb[9].mxu0 }
 0x44b   :  { %v9747_v59 = vadd.f32 %v7318_v24, %v5118_v32  ;;  %v5286_v24 = vsub.f32 %v12378_v21, %v5285_v11  ;;  %v5300_v32 = vsub.f32 %v12403_v51, %v5299_v49  ;;  %v14367_v21 = vand.u32 4294901760, %v12256_v2 }
 0x44c   :  { %v5129_v28 = vmul.f32 %v9746_v52, %v4418_v25 }
 0x44d   :  { %v5128_v37 = vmul.f32 %v9747_v59, %v4414_v58  ;;  %v5287_v25 = vand.u32 4294901760, %v5286_v24  ;;  %v5294_v58 = vand.u32 4294901760, %v5293_v20  ;;  %v5307_v59 = vsub.f32 %v12408_v57, %v5306_v15 }
 0x44e   :  { %v12385_v62 = vand.u32 4294901760, %v5129_v28  ;;  %v14005_v20 = vand.u32 4294901760, %v12464_v48 }
 0x44f   :  { %v12387_v16 = vand.u32 4294901760, %v5128_v37  ;;  %v9210_v39 = vpack.c.bf16 %v5294_v58, %v5287_v25  ;;  %v5308_v7 = vand.u32 4294901760, %v5307_v59  ;;  %v9246_v25 = vpack.c.bf16 %v12408_v57, %v12403_v51 }
 0x450   :  { %v12397_v29 = vsub.f32 %v5129_v28, %v12385_v62  ;;  %v5301_v28 = vand.u32 4294901760, %v5300_v32 }
 0x451   :  { %v12411_v46 = vsub.f32 %v5128_v37, %v12387_v16 }
 0x452   :  { %v5246_v38 = vand.u32 4294901760, %v12397_v29  ;;  %v9214_v37 = vpack.c.bf16 %v5308_v7, %v5301_v28  ;;  %v14377_v28 = vmov 2475754826  }
 0x453   :  { %v5236_v41 = vand.u32 4294901760, %v12411_v46 }
 0x454   :  { %v5247_v31 = vsub.f32 %v12397_v29, %v5246_v38 }
 0x455   :  { %v5237_v56 = vsub.f32 %v12411_v46, %v5236_v41 }
 0x456   :  { %v5248_v52 = vand.u32 4294901760, %v5247_v31  ;;  %v14006_v31 = vand.u32 4294901760, %v12462_v54 }
 0x457   :  { %v5238_v22 = vand.u32 4294901760, %v5237_v56 }
 0x459   :  { %7996 = vmatprep.mubr.f32.mxu1 %v5238_v22  ;;  %v12483_v22 = vld [vmem:[#allocation6 + $0x30] sm:$0xff] }
 0x45a   :  { %7997 = vmatmul.mubr.f32.vlgmr.msra.gmra.mrb[8].mxu1 %v5248_v52  ;;  %v12496_v52 = vpack.c.bf16 %v14005_v20, %v14006_v31  ;;  %v14004_v58 = vand.u32 4294901760, %v12483_v22  ;;  %v12746_v20 = vld [vmem:[#allocation6 + $0x78] sm:$0xff] }
 0x45b   :  { %9205 = vmatpush3.bf16.msra.mxu1 %v12232_v50  ;;  %8031 = vmatprep.mubr.f32.mxu1 %v12387_v16  ;;  %v9238_v50 = vpack.c.bf16 %v12369_v42, %v12364_v9  ;;  %v14364_v9 = vand.u32 4294901760, %v12234_v53  ;;  %v14365_v42 = vand.u32 4294901760, %v12236_v23  ;;  %v14371_v53 = vld [vmem:[#allocation44_spill] sm:$0xff]  ;;  %v14373_v23 = vld [vmem:[#allocation45_spill] sm:$0xff] }
 0x45c   :  { %9207 = vmatprep.subr.bf16.mxu1 %v9206_v18  ;;  %v14372_v57 = vand.u32 4294901760, %v14371_v53 }
 0x45f   :  { %9209 = vmatpush3.bf16.msra.mxu1 %v9206_v18  ;;  %v12485_v18 = vld [vmem:[#allocation6 + $0x38] sm:$0xff] }
 0x460   :  { %9211 = vmatprep.subr.bf16.mxu1 %v9210_v39  ;;  %v14003_v32 = vand.u32 4294901760, %v12485_v18 }
 0x462   :  { %v12506_v59 = vpack.c.bf16 %v14003_v32, %v14004_v58 }
 0x463   :  { %9213 = vmatpush3.bf16.msra.mxu1 %v9210_v39 }
 0x464   :  { %9215 = vmatprep.subr.bf16.mxu1 %v9214_v37 }
 0x467   :  { %9217 = vmatpush3.bf16.msra.mxu1 %v9214_v37  ;;  %v14378_v37 = vmov 2131351028  }
 0x468   :  { %9219 = vmatprep.subr.bf16.mxu1 %v12261_v8 }
 0x46b   :  { %9221 = vmatpush3.bf16.msra.mxu1 %v12261_v8  ;;  %v12449_v8 = vld [vmem:[#allocation6] sm:$0xff] }
 0x46c   :  { %9223 = vmatprep.subr.bf16.mxu1 %v12290_v35 }
 0x46f   :  { %9225 = vmatpush3.bf16.msra.mxu1 %v12290_v35  ;;  %v12453_v35 = vld [vmem:[#allocation6 + $0x10] sm:$0xff] }
 0x470   :  { %9227 = vmatprep.subr.bf16.mxu1 %v12294_v33  ;;  %v14008_v45 = vand.u32 4294901760, %v12453_v35 }
 0x473   :  { %9229 = vmatpush3.bf16.msra.mxu1 %v12294_v33  ;;  %v5863_v33 = vand.u32 4294901760, %v12449_v8 }
 0x474   :  { %9231 = vmatprep.subr.bf16.mxu1 %v12306_v60 }
 0x477   :  { %9233 = vmatpush3.bf16.msra.mxu1 %v12306_v60  ;;  %v5866_v60 = vand.u32 4294901760, %v12451_v3 }
 0x478   :  { %9235 = vmatprep.subr.bf16.mxu1 %v12304_v63 }
 0x479   :  { %v12473_v24 = vpack.c.bf16 %v5866_v60, %v5863_v33 }
 0x47a   :  { %8032 = vmatmul.mubr.f32.vlgmr.msra.gmra.mrb[8].mxu1 %v12385_v62 }
 0x47b   :  { %9237 = vmatpush3.bf16.msra.mxu1 %v12304_v63  ;;  %8066 = vmatprep.mubr.f32.mxu1 %v12411_v46  ;;  %v14007_v63 = vand.u32 4294901760, %v12459_v17  ;;  %v14374_v46 = vand.u32 4294901760, %v14373_v23 }
 0x47c   :  { %9239 = vmatprep.subr.bf16.mxu1 %v9238_v50  ;;  %9363 = vmatprep.subr.bf16.mxu0 %v12473_v24 }
 0x47d   :  { %v12481_v56 = vpack.c.bf16 %v14007_v63, %v14008_v45  ;;  %9365 = vmatpush3.bf16.msra.mxu0 %v12473_v24 }
 0x47f   :  { %9241 = vmatpush3.bf16.msra.mxu1 %v9238_v50  ;;  %9367 = vmatprep.subr.bf16.mxu0 %v12481_v56 }
 0x480   :  { %9243 = vmatprep.subr.bf16.mxu1 %v9242_v12 }
 0x481   :  { %9369 = vmatpush3.bf16.msra.mxu0 %v12481_v56 }
 0x482   :  { %9371 = vmatprep.subr.bf16.mxu0 %v12496_v52 }
 0x483   :  { %9245 = vmatpush3.bf16.msra.mxu1 %v9242_v12  ;;  %v14379_v12 = vmov 2102212464  }
 0x484   :  { %9247 = vmatprep.subr.bf16.mxu1 %v9246_v25 }
 0x485   :  { %9373 = vmatpush3.bf16.msra.mxu0 %v12496_v52 }
 0x486   :  { %9375 = vmatprep.subr.bf16.mxu0 %v12506_v59 }
 0x487   :  { %9249 = vmatpush3.bf16.msra.mxu1 %v9246_v25 }
 0x488   :  { %9251 = vmatprep.subr.bf16.mxu1 %v12310_v34 }
 0x489   :  { %9377 = vmatpush3.bf16.msra.mxu0 %v12506_v59 }
 0x48b   :  { %9253 = vmatpush3.bf16.msra.mxu1 %v12310_v34  ;;  %v14362_v34 = vand.u32 4294901760, %v12174_v55  ;;  %v9306_v55 = vpack.c.bf16 %v5292_v19, %v5285_v11  ;;  %v14368_v11 = vand.u32 4294901760, %v12267_v47 }
 0x48c   :  { %9255 = vmatprep.subr.bf16.mxu1 %v12314_v4 }
 0x48f   :  { %9257 = vmatpush3.bf16.msra.mxu1 %v12314_v4  ;;  %v14363_v4 = vand.u32 4294901760, %v12187_v14  ;;  %v9310_v14 = vpack.c.bf16 %v5306_v15, %v5299_v49 }
 0x490   :  { %9259 = vmatprep.subr.bf16.mxu1 %v12318_v5 }
 0x493   :  { %9261 = vmatpush3.bf16.msra.mxu1 %v12318_v5  ;;  %v9298_v5 = vpack.c.bf16 %v14363_v4, %v14362_v34  ;;  %v14380_v34 = vmov 920167782  }
 0x494   :  { %9263 = vmatprep.subr.bf16.mxu1 %v12322_v1 }
 0x497   :  { %9265 = vmatpush3.bf16.msra.mxu1 %v12322_v1  ;;  %v9302_v1 = vpack.c.bf16 %v5278_v36, %v5271_v40  ;;  %v9314_v40 = vpack.c.bf16 %v14365_v42, %v14364_v9  ;;  %v14366_v36 = vand.u32 4294901760, %v12251_v43 }
 0x498   :  { %9267 = vmatprep.subr.bf16.mxu1 %v11929_v44 }
 0x499   :  { %v9318_v61 = vpack.c.bf16 %v14367_v21, %v14366_v36 }
 0x49a   :  { %8067 = vmatmul.mubr.f32.vlgmr.msra.gmra.mrb[8].mxu1 %v12397_v29  ;;  %v14369_v29 = vld [vmem:[#allocation43_spill] sm:$0xff] }
 0x49b   :  { %9269 = vmatpush3.bf16.msra.mxu1 %v11929_v44  ;;  %8101 = vmatprep.mubr.f32.mxu1 %v5236_v41  ;;  %v14370_v19 = vand.u32 4294901760, %v14369_v29 }
 0x49c   :  { %9271 = vmatprep.subr.bf16.mxu1 %v11937_v26 }
 0x49d   :  { %v9322_v51 = vpack.c.bf16 %v14370_v19, %v14368_v11 }
 0x49f   :  { %9273 = vmatpush3.bf16.msra.mxu1 %v11937_v26 }
 0x4a0   :  { %9275 = vmatprep.subr.bf16.mxu1 %v11952_v6 }
 0x4a3   :  { %9277 = vmatpush3.bf16.msra.mxu1 %v11952_v6 }
 0x4a4   :  { %9279 = vmatprep.subr.bf16.mxu1 %v11964_v10 }
 0x4a7   :  { %9281 = vmatpush3.bf16.msra.mxu1 %v11964_v10 }
 0x4a8   :  { %9283 = vmatprep.subr.bf16.mxu1 %v12167_v0 }
 0x4ab   :  { %9285 = vmatpush3.bf16.msra.mxu1 %v12167_v0 }
 0x4ac   :  { %9287 = vmatprep.subr.bf16.mxu1 %v12178_v13 }
 0x4af   :  { %9289 = vmatpush3.bf16.msra.mxu1 %v12178_v13 }
 0x4b0   :  { %9291 = vmatprep.subr.bf16.mxu1 %v12206_v27 }
 0x4b3   :  { %9293 = vmatpush3.bf16.msra.mxu1 %v12206_v27 }
 0x4b4   :  { %9295 = vmatprep.subr.bf16.mxu1 %v12228_v30 }
 0x4b7   :  { %9297 = vmatpush3.bf16.msra.mxu1 %v12228_v30 }
 0x4b8   :  { %9299 = vmatprep.subr.bf16.mxu1 %v9298_v5 }
 0x4ba   :  { %8102 = vmatmul.mubr.f32.vlgmr.msra.gmra.mrb[8].mxu1 %v5246_v38  ;;  %v9326_v38 = vpack.c.bf16 %v14374_v46, %v14372_v57 }
 0x4bb   :  { %9301 = vmatpush3.bf16.msra.mxu1 %v9298_v5  ;;  %8136 = vmatprep.mubr.f32.mxu1 %v12387_v16  ;;  %v14381_v5 = vmov 1326507024  }
 0x4bc   :  { %9303 = vmatprep.subr.bf16.mxu1 %v9302_v1 }
 0x4bf   :  { %9305 = vmatpush3.bf16.msra.mxu1 %v9302_v1 }
 0x4c0   :  { %9307 = vmatprep.subr.bf16.mxu1 %v9306_v55 }
 0x4c3   :  { %9309 = vmatpush3.bf16.msra.mxu1 %v9306_v55  ;;  %v14382_v55 = vmov 683565275  }
 0x4c4   :  { %9311 = vmatprep.subr.bf16.mxu1 %v9310_v14 }
 0x4c7   :  { %9313 = vmatpush3.bf16.msra.mxu1 %v9310_v14 }
 0x4c8   :  { %9315 = vmatprep.subr.bf16.mxu1 %v9314_v40 }
 0x4cb   :  { %9317 = vmatpush3.bf16.msra.mxu1 %v9314_v40 }
 0x4cc   :  { %9319 = vmatprep.subr.bf16.mxu1 %v9318_v61 }
 0x4cf   :  { %9321 = vmatpush3.bf16.msra.mxu1 %v9318_v61 }
 0x4d0   :  { %9323 = vmatprep.subr.bf16.mxu1 %v9322_v51 }
 0x4d3   :  { %9325 = vmatpush3.bf16.msra.mxu1 %v9322_v51 }
 0x4d4   :  { %9327 = vmatprep.subr.bf16.mxu1 %v9326_v38 }
 0x4d7   :  { %9329 = vmatpush3.bf16.msra.mxu1 %v9326_v38 }
 0x4d8   :  { %9331 = vmatprep.subr.bf16.mxu1 %v11929_v44 }
 0x4da   :  { %8137 = vmatmul.mubr.f32.vlgmr.msra.gmra.mrb[8].mxu1 %v12385_v62 }
 0x4db   :  { %9333 = vmatpush3.bf16.msra.mxu1 %v11929_v44  ;;  %8171 = vmatprep.mubr.f32.mxu1 %v12387_v16  ;;  %v14375_v44 = vld [vmem:[#allocation24_spill] sm:$0xff] }
 0x4dc   :  { %9335 = vmatprep.subr.bf16.mxu1 %v11937_v26  ;;  %vm3775_vm3 = vcmp.lt.s32.totalorder %v14375_v44, 0 }
 0x4df   :  { %9337 = vmatpush3.bf16.msra.mxu1 %v11937_v26  ;;  %v3776_v26 = vand.u32 2139095040, %v14375_v44 }
 0x4e0   :  { %9339 = vmatprep.subr.bf16.mxu1 %v11952_v6 }
 0x4e1   :  { %v3777_v43 = vshrl.u32 %v3776_v26, 23 }
 0x4e3   :  { %9341 = vmatpush3.bf16.msra.mxu1 %v11952_v6  ;;  %v14376_v6 = vld [vmem:[#allocation28_spill] sm:$0xff]  ;;  %v7294_v2 = vadd.s32 4294967169, %v3777_v43 }
 0x4e4   :  { %9343 = vmatprep.subr.bf16.mxu1 %v11964_v10  ;;  %v14009_v23 = vand.u32 2147483647, %v14376_v6  ;;  %vm4191_vm4 = vcmp.lt.s32.totalorder %v14376_v6, 0 }
 0x4e5   :  { %v3783_v16 = vadd.s32 1, %v7294_v2 }
 0x4e7   :  { %9345 = vmatpush3.bf16.msra.mxu1 %v11964_v10  ;;  %v4192_v10 = vand.u32 2139095040, %v14376_v6  ;;  %vm3784_vm5 = vcmp.gt.s32.totalorder %v3783_v16, 0 }
 0x4e8   :  { %9347 = vmatprep.subr.bf16.mxu1 %v12167_v0  ;;  %v3785_v41 = vsel %vm3784_vm5, %v3783_v16, 0 }
 0x4e9   :  { %v12615_v21 = vshrl.u32 %v3785_v41, 5 }
 0x4eb   :  { %9349 = vmatpush3.bf16.msra.mxu1 %v12167_v0  ;;  %v4193_v0 = vshrl.u32 %v4192_v10, 23  ;;  %vm3805_vm7 = vcmp.lt.s32.totalorder %v12615_v21, 1  ;;  %vm3808_vm8 = vcmp.lt.s32.totalorder %v12615_v21, 4  ;;  %vm3807_vm9 = vcmp.lt.s32.totalorder %v12615_v21, 3 }
 0x4ec   :  { %9351 = vmatprep.subr.bf16.mxu1 %v12178_v13  ;;  %vm3806_vm11 = vcmp.lt.s32.totalorder %v12615_v21, 2 }
 0x4ed   :  { %v7310_v47 = vadd.s32 4294967169, %v4193_v0 }
 0x4ef   :  { %9353 = vmatpush3.bf16.msra.mxu1 %v12178_v13  ;;  %v4199_v13 = vadd.s32 1, %v7310_v47 }
 0x4f0   :  { %9355 = vmatprep.subr.bf16.mxu1 %v12206_v27 }
 0x4f1   :  { %vm4200_vm6 = vcmp.gt.s32.totalorder %v4199_v13, 0 }
 0x4f2   :  { %v4201_v49 = vsel %vm4200_vm6, %v4199_v13, 0 }
 0x4f3   :  { %9357 = vmatpush3.bf16.msra.mxu1 %v12206_v27  ;;  %v3787_v27 = vand.u32 31, %v3785_v41  ;;  %v4203_v15 = vand.u32 31, %v4201_v49  ;;  %v12628_v26 = vshrl.u32 %v4201_v49, 5 }
 0x4f4   :  { %9359 = vmatprep.subr.bf16.mxu1 %v12228_v30 }
 0x4f5   :  { %v12594_v39 = vsub.s32 32, %v3787_v27  ;;  %v3790_v14 = vshll.u32 %v14382_v55, %v3787_v27  ;;  %v3793_v9 = vshll.u32 %v14377_v28, %v3787_v27  ;;  %v3796_v42 = vshll.u32 %v14378_v37, %v3787_v27 }
 0x4f6   :  { %v3799_v40 = vshll.u32 %v14379_v12, %v3787_v27  ;;  %v3802_v61 = vshll.u32 %v14380_v34, %v3787_v27  ;;  %v4215_v46 = vshll.u32 %v14379_v12, %v4203_v15  ;;  %v4218_v47 = vshll.u32 %v14380_v34, %v4203_v15 }
 0x4f7   :  { %9361 = vmatpush3.bf16.msra.mxu1 %v12228_v30  ;;  %v14010_v30 = vand.u32 2147483647, %v14375_v44  ;;  %v3791_v7 = vshrl.u32 %v14377_v28, %v12594_v39  ;;  %v3794_v50 = vshrl.u32 %v14378_v37, %v12594_v39  ;;  %v3797_v25 = vshrl.u32 %v14379_v12, %v12594_v39 }
 0x4f8   :  { %v3800_v4 = vshrl.u32 %v14380_v34, %v12594_v39  ;;  %v3803_v1 = vshrl.u32 %v14381_v5, %v12594_v39  ;;  %v4206_v13 = vshll.u32 %v14382_v55, %v4203_v15  ;;  %v4209_v41 = vshll.u32 %v14377_v28, %v4203_v15 }
 0x4f9   :  { %v3780_v36 = vand.u32 8388607, %v14010_v30  ;;  %v12620_v29 = vor.u32 %v3791_v7, %v3790_v14  ;;  %v12622_v19 = vor.u32 %v3794_v50, %v3793_v9  ;;  %v3798_v51 = vor.u32 %v3797_v25, %v3796_v42 }
 0x4fa   :  { %8172 = vmatmul.mubr.f32.vlgmr.msra.gmra.mrb[8].mxu1 %v12385_v62  ;;  %v12597_v62 = vsub.s32 32, %v4203_v15  ;;  %v3801_v53 = vor.u32 %v3800_v4, %v3799_v40  ;;  %v3804_v57 = vor.u32 %v3803_v1, %v3802_v61  ;;  %v4212_v27 = vshll.u32 %v14378_v37, %v4203_v15 }
 0x4fb   :  { %v4196_v7 = vand.u32 8388607, %v14009_v23  ;;  %vm4224_vm10 = vcmp.lt.s32.totalorder %v12628_v26, 4  ;;  %v3781_v14 = vor.u32 8388608, %v3780_v36  ;;  %v3813_v15 = vsel %vm3805_vm7, %v12620_v29, %v12622_v19 }
 0x4fc   :  { %v4216_v11 = vshrl.u32 %v14380_v34, %v12597_v62  ;;  %v4219_v38 = vshrl.u32 %v14381_v5, %v12597_v62  ;;  %v4207_v10 = vshrl.u32 %v14377_v28, %v12597_v62  ;;  %v4210_v43 = vshrl.u32 %v14378_v37, %v12597_v62 }
 0x4fd   :  { %v4213_v0 = vshrl.u32 %v14379_v12, %v12597_v62  ;;  %v3814_v16 = vsel %vm3808_vm8, %v3801_v53, 920167782  ;;  %v3818_v49 = vsel %vm3808_vm8, %v3804_v57, 1326507024  ;;  %v3817_v40 = vsel %vm3805_vm7, %v12622_v19, %v3798_v51 }
 0x4fe   :  { %v4217_v2 = vor.u32 %v4216_v11, %v4215_v46  ;;  %v4220_v50 = vor.u32 %v4219_v38, %v4218_v47  ;;  %v12649_v25 = vor.u32 %v4207_v10, %v4206_v13  ;;  %v12651_v4 = vor.u32 %v4210_v43, %v4209_v41 }
 0x4ff   :  { %v4214_v1 = vor.u32 %v4213_v0, %v4212_v27  ;;  %v3815_v9 = vsel %vm3807_vm9, %v3798_v51, %v3814_v16  ;;  %v3819_v61 = vsel %vm3807_vm9, %v3801_v53, %v3818_v49  ;;  %vm4221_vm12 = vcmp.lt.s32.totalorder %v12628_v26, 1 }
 0x500   :  { %v4230_v42 = vsel %vm4224_vm10, %v4217_v2, 920167782  ;;  %vm4223_vm13 = vcmp.lt.s32.totalorder %v12628_v26, 3  ;;  %v4234_v36 = vsel %vm4224_vm10, %v4220_v50, 1326507024  ;;  %v3816_v11 = vsel %vm3806_vm11, %v3813_v15, %v3815_v9  ;;  %v12705_v50 = vld [vmem:[#allocation6 + $0x48] sm:$0xff] }
 0x501   :  { %v4197_v57 = vor.u32 8388608, %v4196_v7  ;;  %v4229_v46 = vsel %vm4221_vm12, %v12649_v25, %v12651_v4  ;;  %v4231_v53 = vsel %vm4223_vm13, %v4214_v1, %v4230_v42  ;;  %v3820_v38 = vsel %vm3806_vm11, %v3817_v40, %v3819_v61  ;;  %v12703_v7 = vld [vmem:[#allocation6 + $0x40] sm:$0xff]  ;;  %v12713_v42 = vld [vmem:[#allocation6 + $0x58] sm:$0xff] }
 0x502   :  { %v12682_v10 = vshll.u32 %v3781_v14, 8  ;;  %vm4222_vm14 = vcmp.lt.s32.totalorder %v12628_v26, 2  ;;  %v4233_v43 = vsel %vm4221_vm12, %v12651_v4, %v4214_v1  ;;  %v4235_v0 = vsel %vm4223_vm13, %v4217_v2, %v4234_v36  ;;  %v12707_v14 = vld [vmem:[#allocation6 + $0x50] sm:$0xff]  ;;  %v12716_v61 = vld [vmem:[#allocation6 + $0x60] sm:$0xff]  ;;  %v12718_v36 = vld [vmem:[#allocation6 + $0x68] sm:$0xff] }
 0x503   :  { %v4232_v13 = vsel %vm4222_vm14, %v4229_v46, %v4231_v53  ;;  %v12701_v49 = vshll.u32 %v4197_v57, 8  ;;  %v4236_v2 = vsel %vm4222_vm14, %v4233_v43, %v4235_v0  ;;  %v5887_v15 = vand.u32 4294901760, %v12703_v7 }
 0x504   :  { %v12691_v47 = vmul.u32.u64.low %v12682_v10, %v3816_v11  ;;  %v12692_v16 = vmul.u32.u64.high %v12682_v10, %v3816_v11, %v12691_v47  ;;  %v12698_v41 = vmul.u32.u64.low %v12682_v10, %v3820_v38  ;;  %v12699_v27 = vmul.u32.u64.high %v12682_v10, %v3820_v38, %v12698_v41 }
 0x505   :  { %v5890_v9 = vand.u32 4294901760, %v12705_v50  ;;  %v5893_v40 = vand.u32 4294901760, %v12707_v14  ;;  %v12721_v11 = vmul.u32.u64.low %v12701_v49, %v4232_v13  ;;  %v12722_v57 = vmul.u32.u64.high %v12701_v49, %v4232_v13, %v12721_v11  ;;  %v12732_v41 = vld [vmem:[#allocation6 + $0x70] sm:$0xff] }
 0x506   :  { %v5896_v46 = vand.u32 4294901760, %v12713_v42  ;;  %v3810_v53 = vsel %vm3808_vm8, %v3798_v51, 2102212464  ;;  %v5899_v43 = vand.u32 4294901760, %v12716_v61  ;;  %v5902_v0 = vand.u32 4294901760, %v12718_v36 }
 0x507   :  { %v12728_v38 = vpack.c.bf16 %v5890_v9, %v5887_v15  ;;  %v3789_v32 = vshrl.u32 %v14382_v55, %v12594_v39  ;;  %v12737_v13 = vmul.u32.u64.low %v12701_v49, %v4236_v2  ;;  %v12738_v58 = vmul.u32.u64.high %v12701_v49, %v4236_v2, %v12737_v13 }
 0x508   :  { %v12744_v51 = vpack.c.bf16 %v5896_v46, %v5893_v40  ;;  %v3811_v39 = vsel %vm3807_vm9, %v12622_v19, %v3810_v53  ;;  %v4226_v2 = vsel %vm4224_vm10, %v4214_v1, 2102212464  ;;  %v14014_v13 = vand.u32 4294901760, %v12732_v41 }
 0x509   :  { %9379 = vmatprep.subr.bf16.mxu0 %v12728_v38  ;;  %v3809_v31 = vsel %vm3805_vm7, %v3789_v32, %v12620_v29  ;;  %v12764_v63 = vpack.c.bf16 %v5902_v0, %v5899_v43  ;;  %v14013_v32 = vand.u32 4294901760, %v12746_v20  ;;  %v12770_v29 = vsub.f32 %v12449_v8, %v5863_v33 }
 0x50a   :  { %9381 = vmatpush3.bf16.msra.mxu0 %v12728_v38  ;;  %v12775_v19 = vsub.f32 %v12451_v3, %v5866_v60  ;;  %v4205_v1 = vshrl.u32 %v14382_v55, %v12597_v62  ;;  %v3831_v53 = vadd.s32 1, %v12692_v16  ;;  %v3812_v30 = vsel %vm3806_vm11, %v3809_v31, %v3811_v39 }
 0x50b   :  { %9383 = vmatprep.subr.bf16.mxu0 %v12744_v51  ;;  %v14011_v45 = vand.u32 4294901760, %v12770_v29  ;;  %vm3830_vm15 = vc.u32 %v12699_v27, %v12691_v47  ;;  %v4227_v3 = vsel %vm4223_vm13, %v12651_v4, %v4226_v2  ;;  %v4247_v33 = vadd.s32 1, %v12722_v57 }
 0x50c   :  { %v14012_v23 = vand.u32 4294901760, %v12775_v19  ;;  %v4225_v8 = vsel %vm4221_vm12, %v4205_v1, %v12649_v25  ;;  %v12799_v60 = vpack.c.bf16 %v14013_v32, %v14014_v13  ;;  %vm4246_vm0 = vc.u32 %v12738_v58, %v12721_v11 }
 0x50d   :  { %v5967_v31 = vsub.f32 %v12770_v29, %v14011_v45  ;;  %v3832_v21 = vsel %vm3830_vm15, %v3831_v53, %v12692_v16  ;;  %v4228_v25 = vsel %vm4222_vm14, %v4225_v8, %v4227_v3  ;;  %v3828_v2 = vmul.u32 %v12682_v10, %v3812_v30 }
 0x50e   :  { %9385 = vmatpush3.bf16.msra.mxu0 %v12744_v51  ;;  %v5974_v62 = vsub.f32 %v12775_v19, %v14012_v23  ;;  %v4248_v1 = vsel %vm4246_vm0, %v4247_v33, %v12722_v57  ;;  %v4244_v32 = vmul.u32 %v12701_v49, %v4228_v25  ;;  %v12822_v16 = vsub.f32 %v12703_v7, %v5887_v15 }
 0x50f   :  { %9387 = vmatprep.subr.bf16.mxu0 %v12764_v63  ;;  %v5968_v4 = vand.u32 4294901760, %v5967_v31  ;;  %v3833_v23 = vadd.s32 %v3832_v21, %v3828_v2  ;;  %v12825_v30 = vsub.f32 %v12705_v50, %v5890_v9  ;;  %v12840_v7 = vsub.f32 %v12707_v14, %v5893_v40 }
 0x510   :  { %v5975_v39 = vand.u32 4294901760, %v5974_v62  ;;  %v4249_v13 = vadd.s32 %v4248_v1, %v4244_v32  ;;  %v14022_v57 = vand.u32 4294901760, %v12822_v16  ;;  %v12847_v15 = vsub.f32 %v12713_v42, %v5896_v46 }
 0x511   :  { %v3834_v26 = vadd.s32 536870912, %v3833_v23  ;;  %v14021_v53 = vand.u32 4294901760, %v12825_v30  ;;  %v14020_v33 = vand.u32 4294901760, %v12840_v7  ;;  %v12860_v40 = vsub.f32 %v12716_v61, %v5899_v43 }
 0x512   :  { %9389 = vmatpush3.bf16.msra.mxu0 %v12764_v63  ;;  %v12816_v45 = vpack.c.bf16 %v5975_v39, %v5968_v4  ;;  %v4250_v10 = vadd.s32 536870912, %v4249_v13  ;;  %v6023_v49 = vsub.f32 %v12822_v16, %v14022_v57  ;;  %v14019_v62 = vand.u32 4294901760, %v12847_v15 }
 0x513   :  { %9391 = vmatprep.subr.bf16.mxu0 %v12799_v60  ;;  %v12829_v8 = vshrl.u32 %v3834_v26, 30  ;;  %v6030_v32 = vsub.f32 %v12825_v30, %v14021_v53  ;;  %v6037_v14 = vsub.f32 %v12840_v7, %v14020_v33  ;;  %v12865_v42 = vsub.f32 %v12718_v36, %v5902_v0 }
 0x514   :  { %v12842_v50 = vshrl.u32 %v4250_v10, 30  ;;  %v6024_v9 = vand.u32 4294901760, %v6023_v49  ;;  %v6044_v25 = vsub.f32 %v12847_v15, %v14019_v62  ;;  %v14016_v39 = vand.u32 4294901760, %v12860_v40 }
 0x515   :  { %v6031_v3 = vand.u32 4294901760, %v6030_v32  ;;  %v3836_v31 = vshll.u32 %v12829_v8, 30  ;;  %14383 = vst [vmem:[#allocation9_spill] sm:$0xff] %v12865_v42  ;;  %v6038_v4 = vand.u32 4294901760, %v6037_v14  ;;  %v14015_v2 = vand.u32 4294901760, %v12865_v42 }
 0x516   :  { %9393 = vmatpush3.bf16.msra.mxu0 %v12799_v60  ;;  %v4252_v46 = vshll.u32 %v12842_v50, 30  ;;  %v6045_v26 = vand.u32 4294901760, %v6044_v25  ;;  %v6051_v61 = vsub.f32 %v12860_v40, %v14016_v39  ;;  %v14384_v43 = vand.u32 4294901760, %v12732_v41 }
 0x517   :  { %9395 = vmatprep.subr.bf16.mxu0 %v12816_v45  ;;  %v12852_v21 = vpack.c.bf16 %v6031_v3, %v6024_v9  ;;  %v3837_v1 = vsub.s32 %v3833_v23, %v3836_v31  ;;  %v6058_v36 = vsub.f32 %v12865_v42, %v14015_v2  ;;  %v14386_v10 = vand.u32 4294901760, %v12746_v20 }
 0x518   :  { %v12882_v0 = vsub.f32 %v12732_v41, %v14384_v43  ;;  %v4253_v23 = vsub.s32 %v4249_v13, %v4252_v46  ;;  %v12889_v32 = vpack.c.bf16 %v6045_v26, %v6038_v4  ;;  %v6052_v9 = vand.u32 4294901760, %v6051_v61 }
 0x519   :  { %v12887_v49 = vsub.f32 %v12746_v20, %v14386_v10  ;;  %v6059_v3 = vand.u32 4294901760, %v6058_v36  ;;  %v3839_v25 = vsub.s32 0, %v3837_v1  ;;  %v12903_v26 = vpack.c.bf16 %v12775_v19, %v12770_v29 }
 0x51a   :  { %14385 = vst [vmem:[#allocation12_spill] sm:$0xff] %v12882_v0  ;;  %v14017_v31 = vand.u32 4294901760, %v12882_v0  ;;  %v4255_v13 = vsub.s32 0, %v4253_v23  ;;  %vm4281_vm13 = vweird.f32 %v14376_v6  ;;  %vm3865_vm14 = vweird.f32 %v14375_v44 }
 0x51b   :  { %14387 = vst [vmem:[#allocation48_spill] sm:$0xff] %v12887_v49  ;;  %v14018_v14 = vand.u32 4294901760, %v12887_v49  ;;  %v12893_v2 = vpack.c.bf16 %v6059_v3, %v6052_v9  ;;  %v7295_v61 = vmin.u32 %v3839_v25, %v3837_v1 }
 0x51c   :  { %v6065_v41 = vsub.f32 %v12882_v0, %v14017_v31  ;;  %v7311_v43 = vmin.u32 %v4255_v13, %v4253_v23  ;;  %v12909_v31 = vpack.c.bf16 %v12825_v30, %v12822_v16  ;;  %v12917_v13 = vpack.c.bf16 %v12865_v42, %v12860_v40 }
 0x51d   :  { %v6072_v20 = vsub.f32 %v12887_v49, %v14018_v14  ;;  %v3841_v10 = vclz %v7295_v61 }
 0x51e   :  { %v6066_v46 = vand.u32 4294901760, %v6065_v41  ;;  %v4257_v9 = vclz %v7311_v43 }
 0x51f   :  { %v6073_v4 = vand.u32 4294901760, %v6072_v20  ;;  %v7296_v3 = vadd.s32 4294967294, %v3841_v10  ;;  %v12913_v20 = vpack.c.bf16 %v12847_v15, %v12840_v7  ;;  %v12921_v10 = vpack.c.bf16 %v12887_v49, %v12882_v0 }
 0x520   :  { %v7312_v39 = vadd.s32 4294967294, %v4257_v9  ;;  %v3829_v9 = vadd.s32 %v12691_v47, %v12699_v27 }
 0x521   :  { %v12905_v36 = vpack.c.bf16 %v6073_v4, %v6066_v46  ;;  %vm7297_vm1 = vcmp.lt.s32.totalorder %v7296_v3, 0 }
 0x522   :  { %vm7313_vm2 = vcmp.lt.s32.totalorder %v7312_v39, 0  ;;  %v3844_v41 = vsel %vm7297_vm1, 0, %v7296_v3 }
 0x523   :  { %v4260_v14 = vsel %vm7313_vm2, 0, %v7312_v39  ;;  %v3849_v25 = vsub.s32 4294967266, %v3844_v41  ;;  %v3845_v61 = vsub.s32 32, %v3844_v41  ;;  %v4245_v39 = vadd.s32 %v12721_v11, %v12738_v58 }
 0x524   :  { %v4265_v46 = vsub.s32 4294967266, %v4260_v14  ;;  %v4261_v62 = vsub.s32 32, %v4260_v14  ;;  %v3846_v57 = vshll.u32 %v3837_v1, %v3844_v41  ;;  %v4262_v5 = vshll.u32 %v4253_v23, %v4260_v14  ;;  %v14394_v1 = vld [vmem:[#allocation23_spill] sm:$0xff]  ;;  %v14395_v23 = vld [vmem:[#allocation40_spill] sm:$0xff] }
 0x525   :  { %v3850_v4 = vadd.s32 127, %v3849_v25  ;;  %v3847_v33 = vshrl.u32 %v3829_v9, %v3845_v61  ;;  %v14388_v58 = vand.u32 2147483647, %v14375_v44  ;;  %v4409_v14 = vmul.f32 1.442695, %v14395_v23 }
 0x526   :  { %v4266_v43 = vadd.s32 127, %v4265_v46  ;;  %v4263_v34 = vshrl.u32 %v4245_v39, %v4261_v62 }
 0x527   :  { %v3851_v3 = vshll.u32 %v3850_v4, 23  ;;  %v3848_v25 = vor.u32 %v3847_v33, %v3846_v57  ;;  %vm12931_vm5 = vcmp.le.f32.partialorder %v14388_v58, 0.7853982  ;;  %v3859_v57 = vsub.s32 4, %v12829_v8 }
 0x528   :  { %v4267_v53 = vshll.u32 %v4266_v43, 23  ;;  %v4264_v37 = vor.u32 %v4263_v34, %v4262_v5  ;;  %v4275_v5 = vsub.s32 4, %v12842_v50 }
 0x529   :  { %v3852_v55 = vor.u32 4788187, %v3851_v3  ;;  %v3855_v28 = vcvt.s32.f32 %v3848_v25  ;;  %v3860_v33 = vsel %vm3775_vm3, %v3859_v57, %v12829_v8 }
 0x52a   :  { %v4268_v46 = vor.u32 4788187, %v4267_v53  ;;  %v4271_v42 = vcvt.s32.f32 %v4264_v37  ;;  %v14391_v37 = vand.u32 2147483647, %v14376_v6  ;;  %v4276_v53 = vsel %vm4191_vm4, %v4275_v5, %v12842_v50 }
 0x52b   :  { %v3853_v12 = vand.u32 2147483647, %v3852_v55  ;;  %v14396_v5 = vand.u32 4294901760, %v12453_v35 }
 0x52c   :  { %v4269_v49 = vand.u32 2147483647, %v4268_v46  ;;  %vm12940_vm6 = vcmp.le.f32.partialorder %v14391_v37, 0.7853982 }
 0x52d   :  { %v3856_v0 = vmul.f32 %v3855_v28, %v3853_v12  ;;  %v4278_v62 = vsel %vm12940_vm6, 0, %v4276_v53  ;;  %v12963_v57 = vsub.f32 %v12453_v35, %v14396_v5  ;;  %v14397_v53 = vand.u32 4294901760, %v12459_v17 }
 0x52e   :  { %v4272_v47 = vmul.f32 %v4271_v42, %v4269_v49  ;;  %v3862_v42 = vsel %vm12931_vm5, 0, %v3860_v33  ;;  %v4282_v43 = vadd.s32 3, %v4278_v62 }
 0x52f   :  { %v3857_v27 = vxor.u32 2147483648, %v3856_v0  ;;  %v3866_v9 = vadd.s32 3, %v3862_v42  ;;  %v12968_v33 = vsub.f32 %v12459_v17, %v14397_v53  ;;  %v5980_v35 = vand.u32 4294901760, %v12963_v57 }
 0x530   :  { %v4273_v4 = vxor.u32 2147483648, %v4272_v47  ;;  %v4283_v50 = vand.u32 3, %v4282_v43 }
 0x531   :  { %v3858_v61 = vsel %vm3775_vm3, %v3857_v27, %v3856_v0  ;;  %v4401_v0 = vmul.f32 1.442695, %v14394_v1  ;;  %v3867_v8 = vand.u32 3, %v3866_v9  ;;  %v5987_v43 = vand.u32 4294901760, %v12968_v33 }
 0x532   :  { %v4274_v55 = vsel %vm4191_vm4, %v4273_v4, %v4272_v47  ;;  %v3861_v28 = vsel %vm12931_vm5, %v14375_v44, %v3858_v61  ;;  %vm4285_vm7 = vcmp.eq.s32.totalorder %v4283_v50, 0  ;;  %vm4288_vm8 = vcmp.eq.s32.totalorder %v4283_v50, 2 }
 0x533   :  { %v4277_v34 = vsel %vm12940_vm6, %v14376_v6, %v4274_v55  ;;  %9973 = vcosq.f32 %v3861_v28  ;;  %vm3869_vm9 = vcmp.eq.s32.totalorder %v3867_v8, 0  ;;  %vm3872_vm10 = vcmp.eq.s32.totalorder %v3867_v8, 2 }
 0x534   :  { %9975 = vsinq.f32 %v3861_v28  ;;  %vm4284_vm11 = vcmp.lt.s32.totalorder %v4283_v50, 2  ;;  %vm3868_vm12 = vcmp.lt.s32.totalorder %v3867_v8, 2  ;;  %v14398_v9 = vand.u32 4294901760, %v12462_v54 }
 0x535   :  { %9977 = vcosq.f32 %v4277_v34  ;;  %v14399_v44 = vand.u32 4294901760, %v12464_v48 }
 0x536   :  { %9979 = vsinq.f32 %v4277_v34  ;;  %v7319_v34 = vld [vmem:[%s13797_s10] ss:$0 sm:$0xff]  ;;  %v12977_v17 = vsub.f32 %v12462_v54, %v14398_v9  ;;  %v5988_v54 = vsub.f32 %v12968_v33, %v5987_v43 }
 0x537   :  { %9981 = vpow2.f32 %v4401_v0 }
 0x538   :  { %9983 = vpow2.f32 %v4409_v14 }
 0x53d   :  { %v9974_v49 = vpop.eup %9973 }
 0x53e   :  { %v9976_v41 = vpop.eup %9975  ;;  %v3873_v27 = vxor.u32 2147483648, %v9974_v49 }
 0x53f   :  { %v9978_v3 = vpop.eup %9977  ;;  %v3870_v47 = vxor.u32 2147483648, %v9976_v41 }
 0x540   :  { %v9980_v39 = vpop.eup %9979  ;;  %v4289_v46 = vxor.u32 2147483648, %v9978_v3  ;;  %v3874_v11 = vsel %vm3872_vm10, %v3873_v27, %v9976_v41  ;;  %v14400_v27 = vand.u32 4294901760, %v12483_v22 }
 0x541   :  { %v4286_v25 = vxor.u32 2147483648, %v9980_v39  ;;  %v3871_v58 = vsel %vm3869_vm9, %v9974_v49, %v3870_v47  ;;  %v9982_v55 = vpop.eup %9981 }
 0x542   :  { %v4290_v61 = vsel %vm4288_vm8, %v4289_v46, %v9980_v39  ;;  %v3875_v37 = vsel %vm3868_vm12, %v3871_v58, %v3874_v11  ;;  %v9984_v12 = vpop.eup %9983  ;;  %v5994_v46 = vand.u32 4294901760, %v12977_v17 }
 0x543   :  { %v4287_v4 = vsel %vm4285_vm7, %v9978_v3, %v4286_v25  ;;  %v3876_v1 = vsel %vm3865_vm14, nan, %v3875_v37  ;;  %v12982_v3 = vsub.f32 %v12464_v48, %v14399_v44  ;;  %v5981_v25 = vsub.f32 %v12963_v57, %v5980_v35 }
 0x544   :  { %v4291_v28 = vsel %vm4284_vm11, %v4287_v4, %v4290_v61  ;;  %v4415_v23 = vmul.f32 %v9982_v55, %v3876_v1  ;;  %v13002_v4 = vsub.f32 %v12483_v22, %v14400_v27  ;;  %v14401_v61 = vand.u32 4294901760, %v12485_v18 }
 0x545   :  { %v4292_v62 = vsel %vm4281_vm13, nan, %v4291_v28  ;;  %v6001_v48 = vand.u32 4294901760, %v12982_v3  ;;  %v5982_v37 = vand.u32 4294901760, %v5981_v25 }
 0x546   :  { %v4419_v0 = vmul.f32 %v9984_v12, %v4292_v62  ;;  %v13007_v58 = vsub.f32 %v12485_v18, %v14401_v61  ;;  %v5989_v12 = vand.u32 4294901760, %v5988_v54  ;;  %v6008_v5 = vand.u32 4294901760, %v13002_v4  ;;  %v13070_v54 = vld [vmem:[%s13799_s12 + $0x18] sm:$0xff]  ;;  %v13076_v61 = vld [vmem:[%s13799_s12 + $0x20] sm:$0xff] }
 0x547   :  { %v6002_v18 = vsub.f32 %v12982_v3, %v6001_v48 }
 0x548   :  { %v6015_v53 = vand.u32 4294901760, %v13007_v58  ;;  %v9398_v1 = vpack.c.bf16 %v5989_v12, %v5982_v37  ;;  %v9434_v37 = vpack.c.bf16 %v12982_v3, %v12977_v17  ;;  %v14046_v12 = vand.u32 4294901760, %v13070_v54 }
 0x5cd   :  { %v8173_v42 = vpop.f32.mrb[8].mxu1 }
 0x5ce   :  { %v9748_v49 = vadd.f32 %v8173_v42, %v7319_v34  ;;  %v5827_v14 = vpop.f32.mrb[9].mxu1 }
 0x5cf   :  { %v9749_v41 = vadd.f32 %v7319_v34, %v5827_v14  ;;  %v5995_v34 = vsub.f32 %v12977_v17, %v5994_v46  ;;  %v6009_v14 = vsub.f32 %v13002_v4, %v6008_v5  ;;  %v14407_v17 = vand.u32 4294901760, %v12847_v15 }
 0x5d0   :  { %v5838_v6 = vmul.f32 %v9748_v49, %v4419_v0 }
 0x5d1   :  { %v5837_v39 = vmul.f32 %v9749_v41, %v4415_v23  ;;  %v5996_v0 = vand.u32 4294901760, %v5995_v34  ;;  %v6003_v23 = vand.u32 4294901760, %v6002_v18  ;;  %v6016_v41 = vsub.f32 %v13007_v58, %v6015_v53 }
 0x5d2   :  { %v12984_v50 = vand.u32 4294901760, %v5838_v6 }
 0x5d3   :  { %v12986_v8 = vand.u32 4294901760, %v5837_v39  ;;  %v9402_v9 = vpack.c.bf16 %v6003_v23, %v5996_v0  ;;  %v6017_v44 = vand.u32 4294901760, %v6016_v41  ;;  %v9438_v0 = vpack.c.bf16 %v13007_v58, %v13002_v4 }
 0x5d4   :  { %v12996_v47 = vsub.f32 %v5838_v6, %v12984_v50  ;;  %v6010_v6 = vand.u32 4294901760, %v6009_v14 }
 0x5d5   :  { %v13010_v11 = vsub.f32 %v5837_v39, %v12986_v8 }
 0x5d6   :  { %v5955_v55 = vand.u32 4294901760, %v12996_v47  ;;  %v9406_v39 = vpack.c.bf16 %v6017_v44, %v6010_v6  ;;  %v14417_v6 = vmov 2475754826  }
 0x5d7   :  { %v5945_v28 = vand.u32 4294901760, %v13010_v11 }
 0x5d8   :  { %v5956_v22 = vsub.f32 %v12996_v47, %v5955_v55 }
 0x5d9   :  { %v5946_v62 = vsub.f32 %v13010_v11, %v5945_v28 }
 0x5da   :  { %v5957_v49 = vand.u32 4294901760, %v5956_v22  ;;  %v14037_v22 = vand.u32 4294901760, %v13076_v61 }
 0x5db   :  { %v5947_v42 = vand.u32 4294901760, %v5946_v62 }
 0x5dd   :  { %8206 = vmatprep.mubr.f32.mxu0 %v5947_v42  ;;  %v13103_v42 = vld [vmem:[%s13799_s12 + $0x30] sm:$0xff] }
 0x5de   :  { %8207 = vmatmul.mubr.f32.vlgmr.msra.gmra.mrb[10].mxu0 %v5957_v49  ;;  %v14033_v23 = vand.u32 4294901760, %v13103_v42 }
 0x5df   :  { %9397 = vmatpush3.bf16.msra.mxu0 %v12816_v45  ;;  %8241 = vmatprep.mubr.f32.mxu0 %v12986_v8  ;;  %v9430_v45 = vpack.c.bf16 %v12968_v33, %v12963_v57  ;;  %v14404_v57 = vand.u32 4294901760, %v12822_v16  ;;  %v14405_v33 = vand.u32 4294901760, %v12825_v30  ;;  %v14411_v16 = vld [vmem:[#allocation12_spill] sm:$0xff] }
 0x5e0   :  { %9399 = vmatprep.subr.bf16.mxu0 %v9398_v1  ;;  %v14412_v58 = vand.u32 4294901760, %v14411_v16  ;;  %v14413_v30 = vld [vmem:[#allocation48_spill] sm:$0xff] }
 0x5e3   :  { %9401 = vmatpush3.bf16.msra.mxu0 %v9398_v1  ;;  %v13108_v1 = vld [vmem:[%s13799_s12 + $0x38] sm:$0xff] }
 0x5e4   :  { %9403 = vmatprep.subr.bf16.mxu0 %v9402_v9  ;;  %v14032_v14 = vand.u32 4294901760, %v13108_v1 }
 0x5e6   :  { %v13129_v41 = vpack.c.bf16 %v14032_v14, %v14033_v23 }
 0x5e7   :  { %9405 = vmatpush3.bf16.msra.mxu0 %v9402_v9 }
 0x5e8   :  { %9407 = vmatprep.subr.bf16.mxu0 %v9406_v39 }
 0x5eb   :  { %9409 = vmatpush3.bf16.msra.mxu0 %v9406_v39  ;;  %v14418_v39 = vmov 2131351028  }
 0x5ec   :  { %9411 = vmatprep.subr.bf16.mxu0 %v12852_v21 }
 0x5ef   :  { %9413 = vmatpush3.bf16.msra.mxu0 %v12852_v21  ;;  %v13051_v21 = vld [vmem:[%s13799_s12] sm:$0xff] }
 0x5f0   :  { %9415 = vmatprep.subr.bf16.mxu0 %v12889_v32 }
 0x5f3   :  { %9417 = vmatpush3.bf16.msra.mxu0 %v12889_v32  ;;  %v13061_v32 = vld [vmem:[%s13799_s12 + $0x10] sm:$0xff] }
 0x5f4   :  { %9419 = vmatprep.subr.bf16.mxu0 %v12893_v2  ;;  %v14047_v27 = vand.u32 4294901760, %v13061_v32 }
 0x5f6   :  { %v13098_v62 = vpack.c.bf16 %v14046_v12, %v14047_v27 }
 0x5f7   :  { %9421 = vmatpush3.bf16.msra.mxu0 %v12893_v2  ;;  %v13056_v2 = vld [vmem:[%s13799_s12 + $0x8] sm:$0xff] }
 0x5f8   :  { %9423 = vmatprep.subr.bf16.mxu0 %v12905_v36  ;;  %v6575_v25 = vand.u32 4294901760, %v13056_v2 }
 0x5fb   :  { %9425 = vmatpush3.bf16.msra.mxu0 %v12905_v36  ;;  %v6572_v36 = vand.u32 4294901760, %v13051_v21 }
 0x5fc   :  { %9427 = vmatprep.subr.bf16.mxu0 %v12903_v26 }
 0x5fd   :  { %v13090_v34 = vpack.c.bf16 %v6575_v25, %v6572_v36 }
 0x5fe   :  { %8242 = vmatmul.mubr.f32.vlgmr.msra.gmra.mrb[10].mxu0 %v12984_v50 }
 0x5ff   :  { %9429 = vmatpush3.bf16.msra.mxu0 %v12903_v26  ;;  %8276 = vmatprep.mubr.f32.mxu0 %v13010_v11  ;;  %v13081_v26 = vld [vmem:[%s13799_s12 + $0x28] sm:$0xff]  ;;  %v14414_v11 = vand.u32 4294901760, %v14413_v30 }
 0x600   :  { %9431 = vmatprep.subr.bf16.mxu0 %v9430_v45  ;;  %v14034_v18 = vand.u32 4294901760, %v13081_v26  ;;  %9555 = vmatprep.subr.bf16.mxu1 %v13090_v34 }
 0x601   :  { %9557 = vmatpush3.bf16.msra.mxu1 %v13090_v34 }
 0x602   :  { %9559 = vmatprep.subr.bf16.mxu1 %v13098_v62  ;;  %v13119_v49 = vpack.c.bf16 %v14034_v18, %v14037_v22 }
 0x603   :  { %9433 = vmatpush3.bf16.msra.mxu0 %v9430_v45 }
 0x604   :  { %9435 = vmatprep.subr.bf16.mxu0 %v9434_v37 }
 0x605   :  { %9561 = vmatpush3.bf16.msra.mxu1 %v13098_v62 }
 0x606   :  { %9563 = vmatprep.subr.bf16.mxu1 %v13119_v49 }
 0x607   :  { %9437 = vmatpush3.bf16.msra.mxu0 %v9434_v37  ;;  %v14419_v37 = vmov 2102212464  }
 0x608   :  { %9439 = vmatprep.subr.bf16.mxu0 %v9438_v0 }
 0x609   :  { %9565 = vmatpush3.bf16.msra.mxu1 %v13119_v49 }
 0x60a   :  { %9567 = vmatprep.subr.bf16.mxu1 %v13129_v41 }
 0x60b   :  { %9441 = vmatpush3.bf16.msra.mxu0 %v9438_v0 }
 0x60c   :  { %9443 = vmatprep.subr.bf16.mxu0 %v12909_v31 }
 0x60d   :  { %9569 = vmatpush3.bf16.msra.mxu1 %v13129_v41 }
 0x60f   :  { %9445 = vmatpush3.bf16.msra.mxu0 %v12909_v31  ;;  %v14402_v31 = vand.u32 4294901760, %v12770_v29  ;;  %v9498_v29 = vpack.c.bf16 %v6001_v48, %v5994_v46  ;;  %v14408_v46 = vand.u32 4294901760, %v12860_v40 }
 0x610   :  { %9447 = vmatprep.subr.bf16.mxu0 %v12913_v20 }
 0x613   :  { %9449 = vmatpush3.bf16.msra.mxu0 %v12913_v20  ;;  %v14403_v20 = vand.u32 4294901760, %v12775_v19  ;;  %v9502_v19 = vpack.c.bf16 %v6015_v53, %v6008_v5 }
 0x614   :  { %9451 = vmatprep.subr.bf16.mxu0 %v12917_v13 }
 0x617   :  { %9453 = vmatpush3.bf16.msra.mxu0 %v12917_v13  ;;  %v9490_v13 = vpack.c.bf16 %v14403_v20, %v14402_v31  ;;  %v14420_v31 = vmov 1326507024  }
 0x618   :  { %9455 = vmatprep.subr.bf16.mxu0 %v12921_v10 }
 0x61b   :  { %9457 = vmatpush3.bf16.msra.mxu0 %v12921_v10  ;;  %v9494_v10 = vpack.c.bf16 %v5987_v43, %v5980_v35  ;;  %v9506_v35 = vpack.c.bf16 %v14405_v33, %v14404_v57  ;;  %v14406_v43 = vand.u32 4294901760, %v12840_v7 }
 0x61c   :  { %9459 = vmatprep.subr.bf16.mxu0 %v12473_v24 }
 0x61d   :  { %v9510_v3 = vpack.c.bf16 %v14407_v17, %v14406_v43 }
 0x61e   :  { %8277 = vmatmul.mubr.f32.vlgmr.msra.gmra.mrb[10].mxu0 %v12996_v47  ;;  %v14409_v47 = vld [vmem:[#allocation9_spill] sm:$0xff] }
 0x61f   :  { %9461 = vmatpush3.bf16.msra.mxu0 %v12473_v24  ;;  %8311 = vmatprep.mubr.f32.mxu0 %v5945_v28  ;;  %v14410_v48 = vand.u32 4294901760, %v14409_v47 }
 0x620   :  { %9463 = vmatprep.subr.bf16.mxu0 %v12481_v56 }
 0x621   :  { %v9514_v4 = vpack.c.bf16 %v14410_v48, %v14408_v46 }
 0x623   :  { %9465 = vmatpush3.bf16.msra.mxu0 %v12481_v56 }
 0x624   :  { %9467 = vmatprep.subr.bf16.mxu0 %v12496_v52 }
 0x627   :  { %9469 = vmatpush3.bf16.msra.mxu0 %v12496_v52 }
 0x628   :  { %9471 = vmatprep.subr.bf16.mxu0 %v12506_v59 }
 0x62b   :  { %9473 = vmatpush3.bf16.msra.mxu0 %v12506_v59 }
 0x62c   :  { %9475 = vmatprep.subr.bf16.mxu0 %v12728_v38 }
 0x62f   :  { %9477 = vmatpush3.bf16.msra.mxu0 %v12728_v38 }
 0x630   :  { %9479 = vmatprep.subr.bf16.mxu0 %v12744_v51 }
 0x633   :  { %9481 = vmatpush3.bf16.msra.mxu0 %v12744_v51 }
 0x634   :  { %9483 = vmatprep.subr.bf16.mxu0 %v12764_v63 }
 0x637   :  { %9485 = vmatpush3.bf16.msra.mxu0 %v12764_v63 }
 0x638   :  { %9487 = vmatprep.subr.bf16.mxu0 %v12799_v60 }
 0x63b   :  { %9489 = vmatpush3.bf16.msra.mxu0 %v12799_v60 }
 0x63c   :  { %9491 = vmatprep.subr.bf16.mxu0 %v9490_v13 }
 0x63e   :  { %8312 = vmatmul.mubr.f32.vlgmr.msra.gmra.mrb[10].mxu0 %v5955_v55  ;;  %v9518_v55 = vpack.c.bf16 %v14414_v11, %v14412_v58 }
 0x63f   :  { %9493 = vmatpush3.bf16.msra.mxu0 %v9490_v13  ;;  %8346 = vmatprep.mubr.f32.mxu0 %v12986_v8  ;;  %v14421_v13 = vmov 920167782  }
 0x640   :  { %9495 = vmatprep.subr.bf16.mxu0 %v9494_v10 }
 0x643   :  { %9497 = vmatpush3.bf16.msra.mxu0 %v9494_v10 }
 0x644   :  { %9499 = vmatprep.subr.bf16.mxu0 %v9498_v29 }
 0x647   :  { %9501 = vmatpush3.bf16.msra.mxu0 %v9498_v29  ;;  %v14422_v29 = vmov 683565275  }
 0x648   :  { %9503 = vmatprep.subr.bf16.mxu0 %v9502_v19 }
 0x64b   :  { %9505 = vmatpush3.bf16.msra.mxu0 %v9502_v19 }
 0x64c   :  { %9507 = vmatprep.subr.bf16.mxu0 %v9506_v35 }
 0x64f   :  { %9509 = vmatpush3.bf16.msra.mxu0 %v9506_v35 }
 0x650   :  { %9511 = vmatprep.subr.bf16.mxu0 %v9510_v3 }
 0x653   :  { %9513 = vmatpush3.bf16.msra.mxu0 %v9510_v3 }
 0x654   :  { %9515 = vmatprep.subr.bf16.mxu0 %v9514_v4 }
 0x657   :  { %9517 = vmatpush3.bf16.msra.mxu0 %v9514_v4 }
 0x658   :  { %9519 = vmatprep.subr.bf16.mxu0 %v9518_v55 }
 0x65b   :  { %9521 = vmatpush3.bf16.msra.mxu0 %v9518_v55 }
 0x65c   :  { %9523 = vmatprep.subr.bf16.mxu0 %v12473_v24 }
 0x65e   :  { %8347 = vmatmul.mubr.f32.vlgmr.msra.gmra.mrb[10].mxu0 %v12984_v50 }
 0x65f   :  { %9525 = vmatpush3.bf16.msra.mxu0 %v12473_v24  ;;  %8381 = vmatprep.mubr.f32.mxu0 %v12986_v8  ;;  %v14415_v24 = vld [vmem:[#allocation27_spill] sm:$0xff] }
 0x660   :  { %9527 = vmatprep.subr.bf16.mxu0 %v12481_v56  ;;  %vm3879_vm13 = vcmp.lt.s32.totalorder %v14415_v24, 0 }
 0x663   :  { %9529 = vmatpush3.bf16.msra.mxu0 %v12481_v56  ;;  %v3880_v56 = vand.u32 2139095040, %v14415_v24 }
 0x664   :  { %9531 = vmatprep.subr.bf16.mxu0 %v12496_v52 }
 0x665   :  { %v3881_v7 = vshrl.u32 %v3880_v56, 23 }
 0x667   :  { %9533 = vmatpush3.bf16.msra.mxu0 %v12496_v52  ;;  %v14416_v52 = vld [vmem:[#allocation29_spill] sm:$0xff]  ;;  %v7298_v15 = vadd.s32 4294967169, %v3881_v7 }
 0x668   :  { %9535 = vmatprep.subr.bf16.mxu0 %v12506_v59  ;;  %v14048_v30 = vand.u32 2147483647, %v14416_v52  ;;  %vm4295_vm14 = vcmp.lt.s32.totalorder %v14416_v52, 0 }
 0x669   :  { %v3887_v8 = vadd.s32 1, %v7298_v15 }
 0x66b   :  { %9537 = vmatpush3.bf16.msra.mxu0 %v12506_v59  ;;  %v4296_v59 = vand.u32 2139095040, %v14416_v52  ;;  %vm3888_vm15 = vcmp.gt.s32.totalorder %v3887_v8, 0 }
 0x66c   :  { %9539 = vmatprep.subr.bf16.mxu0 %v12728_v38  ;;  %v3889_v28 = vsel %vm3888_vm15, %v3887_v8, 0 }
 0x66d   :  { %v13238_v17 = vshrl.u32 %v3889_v28, 5 }
 0x66f   :  { %9541 = vmatpush3.bf16.msra.mxu0 %v12728_v38  ;;  %v4297_v38 = vshrl.u32 %v4296_v59, 23  ;;  %vm3909_vm1 = vcmp.lt.s32.totalorder %v13238_v17, 1  ;;  %vm3912_vm2 = vcmp.lt.s32.totalorder %v13238_v17, 4  ;;  %vm3911_vm3 = vcmp.lt.s32.totalorder %v13238_v17, 3 }
 0x670   :  { %9543 = vmatprep.subr.bf16.mxu0 %v12744_v51  ;;  %vm3910_vm5 = vcmp.lt.s32.totalorder %v13238_v17, 2 }
 0x671   :  { %v7314_v40 = vadd.s32 4294967169, %v4297_v38 }
 0x673   :  { %9545 = vmatpush3.bf16.msra.mxu0 %v12744_v51  ;;  %v4303_v51 = vadd.s32 1, %v7314_v40 }
 0x674   :  { %9547 = vmatprep.subr.bf16.mxu0 %v12764_v63 }
 0x675   :  { %vm4304_vm0 = vcmp.gt.s32.totalorder %v4303_v51, 0 }
 0x676   :  { %v4305_v5 = vsel %vm4304_vm0, %v4303_v51, 0 }
 0x677   :  { %9549 = vmatpush3.bf16.msra.mxu0 %v12764_v63  ;;  %v3891_v63 = vand.u32 31, %v3889_v28  ;;  %v4307_v53 = vand.u32 31, %v4305_v5  ;;  %v13251_v56 = vshrl.u32 %v4305_v5, 5 }
 0x678   :  { %9551 = vmatprep.subr.bf16.mxu0 %v12799_v60 }
 0x679   :  { %v13217_v9 = vsub.s32 32, %v3891_v63  ;;  %v3894_v19 = vshll.u32 %v14422_v29, %v3891_v63  ;;  %v3897_v57 = vshll.u32 %v14417_v6, %v3891_v63  ;;  %v3900_v33 = vshll.u32 %v14418_v39, %v3891_v63 }
 0x67a   :  { %v3906_v35 = vshll.u32 %v14421_v13, %v3891_v63  ;;  %v3903_v3 = vshll.u32 %v14419_v37, %v3891_v63  ;;  %v4319_v11 = vshll.u32 %v14419_v37, %v4307_v53  ;;  %v4322_v40 = vshll.u32 %v14421_v13, %v4307_v53 }
 0x67b   :  { %9553 = vmatpush3.bf16.msra.mxu0 %v12799_v60  ;;  %v14049_v60 = vand.u32 2147483647, %v14415_v24  ;;  %v3895_v44 = vshrl.u32 %v14417_v6, %v13217_v9  ;;  %v3898_v45 = vshrl.u32 %v14418_v39, %v13217_v9  ;;  %v3901_v0 = vshrl.u32 %v14419_v37, %v13217_v9 }
 0x67c   :  { %v3907_v20 = vshrl.u32 %v14420_v31, %v13217_v9  ;;  %v3904_v10 = vshrl.u32 %v14421_v13, %v13217_v9  ;;  %v4310_v51 = vshll.u32 %v14422_v29, %v4307_v53  ;;  %v4313_v28 = vshll.u32 %v14417_v6, %v4307_v53 }
 0x67d   :  { %v3884_v43 = vand.u32 8388607, %v14049_v60  ;;  %v13243_v47 = vor.u32 %v3895_v44, %v3894_v19  ;;  %v13245_v48 = vor.u32 %v3898_v45, %v3897_v57  ;;  %v3902_v4 = vor.u32 %v3901_v0, %v3900_v33 }
 0x67e   :  { %8382 = vmatmul.mubr.f32.vlgmr.msra.gmra.mrb[10].mxu0 %v12984_v50  ;;  %v13220_v50 = vsub.s32 32, %v4307_v53  ;;  %v3908_v16 = vor.u32 %v3907_v20, %v3906_v35  ;;  %v3905_v58 = vor.u32 %v3904_v10, %v3903_v3  ;;  %v4316_v63 = vshll.u32 %v14418_v39, %v4307_v53 }
 0x67f   :  { %v4300_v44 = vand.u32 8388607, %v14048_v30  ;;  %vm4328_vm4 = vcmp.lt.s32.totalorder %v13251_v56, 4  ;;  %v3885_v20 = vor.u32 8388608, %v3884_v43  ;;  %v3921_v53 = vsel %vm3909_vm1, %v13245_v48, %v3902_v4 }
 0x680   :  { %v4320_v46 = vshrl.u32 %v14421_v13, %v13220_v50  ;;  %v4323_v55 = vshrl.u32 %v14420_v31, %v13220_v50  ;;  %v4311_v59 = vshrl.u32 %v14417_v6, %v13220_v50  ;;  %v4314_v7 = vshrl.u32 %v14418_v39, %v13220_v50 }
 0x681   :  { %v4317_v38 = vshrl.u32 %v14419_v37, %v13220_v50  ;;  %v3922_v8 = vsel %vm3912_vm2, %v3908_v16, 1326507024  ;;  %v3918_v5 = vsel %vm3912_vm2, %v3905_v58, 920167782  ;;  %v3917_v13 = vsel %vm3909_vm1, %v13243_v47, %v13245_v48 }
 0x682   :  { %v4321_v15 = vor.u32 %v4320_v46, %v4319_v11  ;;  %v4324_v45 = vor.u32 %v4323_v55, %v4322_v40  ;;  %v13272_v37 = vor.u32 %v4311_v59, %v4310_v51  ;;  %v13274_v0 = vor.u32 %v4314_v7, %v4313_v28  ;;  %v13339_v51 = vld [vmem:[%s13799_s12 + $0x50] sm:$0xff] }
 0x683   :  { %v4318_v31 = vor.u32 %v4317_v38, %v4316_v63  ;;  %v3923_v6 = vsel %vm3911_vm3, %v3905_v58, %v3922_v8  ;;  %v3919_v10 = vsel %vm3911_vm3, %v3902_v4, %v3918_v5  ;;  %vm4325_vm6 = vcmp.lt.s32.totalorder %v13251_v56, 1  ;;  %v13329_v8 = vld [vmem:[%s13799_s12 + $0x40] sm:$0xff] }
 0x684   :  { %v4334_v39 = vsel %vm4328_vm4, %v4321_v15, 920167782  ;;  %vm4327_vm7 = vcmp.lt.s32.totalorder %v13251_v56, 3  ;;  %v4338_v19 = vsel %vm4328_vm4, %v4324_v45, 1326507024  ;;  %v3924_v57 = vsel %vm3910_vm5, %v3921_v53, %v3923_v6  ;;  %v13359_v53 = vld [vmem:[%s13799_s12 + $0x68] sm:$0xff] }
 0x685   :  { %v4301_v33 = vor.u32 8388608, %v4300_v44  ;;  %v4333_v35 = vsel %vm4325_vm6, %v13272_v37, %v13274_v0  ;;  %v4335_v43 = vsel %vm4327_vm7, %v4318_v31, %v4334_v39  ;;  %v3920_v3 = vsel %vm3910_vm5, %v3917_v13, %v3919_v10  ;;  %v13348_v44 = vld [vmem:[%s13799_s12 + $0x58] sm:$0xff] }
 0x686   :  { %v13305_v46 = vshll.u32 %v3885_v20, 8  ;;  %vm4326_vm8 = vcmp.lt.s32.totalorder %v13251_v56, 2  ;;  %v4337_v16 = vsel %vm4325_vm6, %v13274_v0, %v4318_v31  ;;  %v4339_v58 = vsel %vm4327_vm7, %v4321_v15, %v4338_v19  ;;  %v13334_v15 = vld [vmem:[%s13799_s12 + $0x48] sm:$0xff]  ;;  %v13354_v20 = vld [vmem:[%s13799_s12 + $0x60] sm:$0xff] }
 0x687   :  { %v4336_v59 = vsel %vm4326_vm8, %v4333_v35, %v4335_v43  ;;  %v13324_v40 = vshll.u32 %v4301_v33, 8  ;;  %v4340_v28 = vsel %vm4326_vm8, %v4337_v16, %v4339_v58  ;;  %v6596_v63 = vand.u32 4294901760, %v13329_v8  ;;  %v13376_v35 = vld [vmem:[%s13799_s12 + $0x70] sm:$0xff]  ;;  %v13393_v58 = vld [vmem:[%s13799_s12 + $0x78] sm:$0xff] }
 0x688   :  { %v13314_v11 = vmul.u32.u64.low %v13305_v46, %v3924_v57  ;;  %v13315_v55 = vmul.u32.u64.high %v13305_v46, %v3924_v57, %v13314_v11  ;;  %v13320_v7 = vmul.u32.u64.low %v13305_v46, %v3920_v3  ;;  %v13321_v38 = vmul.u32.u64.high %v13305_v46, %v3920_v3, %v13320_v7 }
 0x689   :  { %v6599_v5 = vand.u32 4294901760, %v13334_v15  ;;  %v6602_v45 = vand.u32 4294901760, %v13339_v51  ;;  %v13362_v6 = vmul.u32.u64.low %v13324_v40, %v4336_v59  ;;  %v13363_v39 = vmul.u32.u64.high %v13324_v40, %v4336_v59, %v13362_v6 }
 0x68a   :  { %v6605_v13 = vand.u32 4294901760, %v13348_v44  ;;  %v3914_v10 = vsel %vm3912_vm2, %v3902_v4, 2102212464  ;;  %v6608_v57 = vand.u32 4294901760, %v13354_v20  ;;  %v6611_v33 = vand.u32 4294901760, %v13359_v53 }
 0x68b   :  { %v13369_v19 = vpack.c.bf16 %v6599_v5, %v6596_v63  ;;  %v3893_v43 = vshrl.u32 %v14422_v29, %v13217_v9  ;;  %v13381_v3 = vmul.u32.u64.low %v13324_v40, %v4340_v28  ;;  %v13382_v16 = vmul.u32.u64.high %v13324_v40, %v4340_v28, %v13381_v3 }
 0x68c   :  { %v13388_v4 = vpack.c.bf16 %v6605_v13, %v6602_v45  ;;  %v3915_v11 = vsel %vm3911_vm3, %v13245_v48, %v3914_v10  ;;  %v4330_v59 = vsel %vm4328_vm4, %v4318_v31, 2102212464  ;;  %v6614_v28 = vand.u32 4294901760, %v13376_v35 }
 0x68d   :  { %9571 = vmatprep.subr.bf16.mxu1 %v13369_v19  ;;  %v3913_v9 = vsel %vm3909_vm1, %v3893_v43, %v13243_v47  ;;  %v13411_v3 = vpack.c.bf16 %v6611_v33, %v6608_v57  ;;  %v6617_v47 = vand.u32 4294901760, %v13393_v58  ;;  %v13417_v48 = vsub.f32 %v13051_v21, %v6572_v36 }
 0x68e   :  { %9573 = vmatpush3.bf16.msra.mxu1 %v13369_v19  ;;  %v13422_v31 = vsub.f32 %v13056_v2, %v6575_v25  ;;  %v4309_v10 = vshrl.u32 %v14422_v29, %v13220_v50  ;;  %v3935_v43 = vadd.s32 1, %v13321_v38  ;;  %v3916_v18 = vsel %vm3910_vm5, %v3913_v9, %v3915_v11 }
 0x68f   :  { %9575 = vmatprep.subr.bf16.mxu1 %v13388_v4  ;;  %v14036_v14 = vand.u32 4294901760, %v13417_v48  ;;  %vm3934_vm9 = vc.u32 %v13315_v55, %v13320_v7  ;;  %v4331_v2 = vsel %vm4327_vm7, %v13274_v0, %v4330_v59  ;;  %v4351_v36 = vadd.s32 1, %v13363_v39 }
 0x690   :  { %v14035_v23 = vand.u32 4294901760, %v13422_v31  ;;  %v4329_v21 = vsel %vm4325_vm6, %v4309_v10, %v13272_v37  ;;  %v13446_v25 = vpack.c.bf16 %v6617_v47, %v6614_v28  ;;  %vm4350_vm10 = vc.u32 %v13382_v16, %v13362_v6 }
 0x691   :  { %v6676_v50 = vsub.f32 %v13417_v48, %v14036_v14  ;;  %v3936_v17 = vsel %vm3934_vm9, %v3935_v43, %v13321_v38  ;;  %v4332_v37 = vsel %vm4326_vm8, %v4329_v21, %v4331_v2  ;;  %v3932_v11 = vmul.u32 %v13305_v46, %v3916_v18 }
 0x692   :  { %9577 = vmatpush3.bf16.msra.mxu1 %v13388_v4  ;;  %v6683_v29 = vsub.f32 %v13422_v31, %v14035_v23  ;;  %v4352_v59 = vsel %vm4350_vm10, %v4351_v36, %v13363_v39  ;;  %v4348_v14 = vmul.u32 %v13324_v40, %v4332_v37  ;;  %v13469_v38 = vsub.f32 %v13329_v8, %v6596_v63 }
 0x693   :  { %9579 = vmatprep.subr.bf16.mxu1 %v13411_v3  ;;  %v6677_v0 = vand.u32 4294901760, %v6676_v50  ;;  %v3937_v23 = vadd.s32 %v3936_v17, %v3932_v11  ;;  %v13472_v18 = vsub.f32 %v13334_v15, %v6599_v5  ;;  %v13487_v8 = vsub.f32 %v13339_v51, %v6602_v45 }
 0x694   :  { %v6684_v9 = vand.u32 4294901760, %v6683_v29  ;;  %v4353_v22 = vadd.s32 %v4352_v59, %v4348_v14  ;;  %v14045_v39 = vand.u32 4294901760, %v13469_v38  ;;  %v13494_v63 = vsub.f32 %v13348_v44, %v6605_v13 }
 0x695   :  { %v3938_v56 = vadd.s32 536870912, %v3937_v23  ;;  %v14044_v43 = vand.u32 4294901760, %v13472_v18  ;;  %v14043_v36 = vand.u32 4294901760, %v13487_v8  ;;  %v13507_v45 = vsub.f32 %v13354_v20, %v6608_v57 }
 0x696   :  { %9581 = vmatpush3.bf16.msra.mxu1 %v13411_v3  ;;  %v13463_v10 = vpack.c.bf16 %v6684_v9, %v6677_v0  ;;  %v4354_v46 = vadd.s32 536870912, %v4353_v22  ;;  %v6732_v14 = vsub.f32 %v13469_v38, %v14045_v39  ;;  %v14042_v29 = vand.u32 4294901760, %v13494_v63 }
 0x697   :  { %9583 = vmatprep.subr.bf16.mxu1 %v13446_v25  ;;  %v13476_v21 = vshrl.u32 %v3938_v56, 30  ;;  %v6739_v40 = vsub.f32 %v13472_v18, %v14044_v43  ;;  %v6746_v51 = vsub.f32 %v13487_v8, %v14043_v36  ;;  %v13512_v44 = vsub.f32 %v13359_v53, %v6611_v33 }
 0x698   :  { %v13489_v15 = vshrl.u32 %v4354_v46, 30  ;;  %v6733_v5 = vand.u32 4294901760, %v6732_v14  ;;  %v6753_v37 = vsub.f32 %v13494_v63, %v14042_v29  ;;  %v14041_v9 = vand.u32 4294901760, %v13507_v45 }
 0x699   :  { %v6740_v2 = vand.u32 4294901760, %v6739_v40  ;;  %v3940_v50 = vshll.u32 %v13476_v21, 30  ;;  %14423 = vst [vmem:[#allocation32_spill] sm:$0xff] %v13512_v44  ;;  %v6747_v0 = vand.u32 4294901760, %v6746_v51  ;;  %v14040_v11 = vand.u32 4294901760, %v13512_v44 }
 0x69a   :  { %9585 = vmatpush3.bf16.msra.mxu1 %v13446_v25  ;;  %v4356_v13 = vshll.u32 %v13489_v15, 30  ;;  %v6754_v56 = vand.u32 4294901760, %v6753_v37  ;;  %v6760_v20 = vsub.f32 %v13507_v45, %v14041_v9  ;;  %v13529_v57 = vsub.f32 %v13376_v35, %v6614_v28 }
 0x69b   :  { %9587 = vmatprep.subr.bf16.mxu1 %v13463_v10  ;;  %v13499_v17 = vpack.c.bf16 %v6740_v2, %v6733_v5  ;;  %v3941_v59 = vsub.s32 %v3937_v23, %v3940_v50  ;;  %v6767_v53 = vsub.f32 %v13512_v44, %v14040_v11  ;;  %v13534_v33 = vsub.f32 %v13393_v58, %v6617_v47 }
 0x69c   :  { %14424 = vst [vmem:[#allocation36_spill] sm:$0xff] %v13529_v57  ;;  %v4357_v23 = vsub.s32 %v4353_v22, %v4356_v13  ;;  %v13536_v46 = vpack.c.bf16 %v6754_v56, %v6747_v0  ;;  %v6761_v14 = vand.u32 4294901760, %v6760_v20  ;;  %v14038_v5 = vand.u32 4294901760, %v13529_v57 }
 0x69d   :  { %14425 = vst [vmem:[#allocation10_spill] sm:$0xff] %v13534_v33  ;;  %v6768_v40 = vand.u32 4294901760, %v6767_v53  ;;  %v14039_v2 = vand.u32 4294901760, %v13534_v33  ;;  %v3943_v50 = vsub.s32 0, %v3941_v59  ;;  %v13550_v13 = vpack.c.bf16 %v13422_v31, %v13417_v48 }
 0x69e   :  { %v6774_v35 = vsub.f32 %v13529_v57, %v14038_v5  ;;  %v4359_v22 = vsub.s32 0, %v4357_v23  ;;  %v13556_v5 = vpack.c.bf16 %v13472_v18, %v13469_v38  ;;  %vm4385_vm7 = vweird.f32 %v14416_v52 }
 0x69f   :  { %v13540_v51 = vpack.c.bf16 %v6768_v40, %v6761_v14  ;;  %v6781_v58 = vsub.f32 %v13534_v33, %v14039_v2  ;;  %v7299_v37 = vmin.u32 %v3943_v50, %v3941_v59  ;;  %vm3969_vm8 = vweird.f32 %v14415_v24 }
 0x6a0   :  { %v6775_v28 = vand.u32 4294901760, %v6774_v35  ;;  %v7315_v56 = vmin.u32 %v4359_v22, %v4357_v23  ;;  %v13564_v22 = vpack.c.bf16 %v13512_v44, %v13507_v45  ;;  %vm7255_vm9 = vcmask 31744  }
 0x6a1   :  { %v6782_v47 = vand.u32 4294901760, %v6781_v58  ;;  %v3945_v20 = vclz %v7299_v37  ;;  %v13560_v58 = vpack.c.bf16 %v13494_v63, %v13487_v8 }
 0x6a2   :  { %v4361_v53 = vclz %v7315_v56 }
 0x6a3   :  { %v13552_v0 = vpack.c.bf16 %v6782_v47, %v6775_v28  ;;  %v7300_v14 = vadd.s32 4294967294, %v3945_v20  ;;  %v13568_v20 = vpack.c.bf16 %v13534_v33, %v13529_v57 }
 0x6a4   :  { %v7316_v40 = vadd.s32 4294967294, %v4361_v53  ;;  %v3933_v53 = vadd.s32 %v13320_v7, %v13315_v55 }
 0x6a5   :  { %vm7301_vm11 = vcmp.lt.s32.totalorder %v7300_v14, 0 }
 0x6a6   :  { %vm7317_vm12 = vcmp.lt.s32.totalorder %v7316_v40, 0  ;;  %v3948_v35 = vsel %vm7301_vm11, 0, %v7300_v14 }
 0x6a7   :  { %v4364_v2 = vsel %vm7317_vm12, 0, %v7316_v40  ;;  %v3953_v50 = vsub.s32 4294967266, %v3948_v35  ;;  %v3949_v37 = vsub.s32 32, %v3948_v35  ;;  %v4349_v40 = vadd.s32 %v13362_v6, %v13382_v16 }
 0x6a8   :  { %v4369_v28 = vsub.s32 4294967266, %v4364_v2  ;;  %v4365_v11 = vsub.s32 32, %v4364_v2  ;;  %v3950_v36 = vshll.u32 %v3941_v59, %v3948_v35  ;;  %v4366_v12 = vshll.u32 %v4357_v23, %v4364_v2  ;;  %v14432_v59 = vld [vmem:[#allocation26_spill] sm:$0xff] }
 0x6a9   :  { %v3954_v47 = vadd.s32 127, %v3953_v50  ;;  %v3951_v9 = vshrl.u32 %v3933_v53, %v3949_v37  ;;  %v14426_v6 = vand.u32 2147483647, %v14415_v24  ;;  %v14433_v23 = vld [vmem:[#allocation42_spill] sm:$0xff] }
 0x6aa   :  { %v4370_v56 = vadd.s32 127, %v4369_v28  ;;  %v4367_v39 = vshrl.u32 %v4349_v40, %v4365_v11  ;;  %v4411_v2 = vmul.f32 1.442695, %v14433_v23 }
 0x6ab   :  { %v3955_v14 = vshll.u32 %v3954_v47, 23  ;;  %v3952_v50 = vor.u32 %v3951_v9, %v3950_v36  ;;  %vm13578_vm15 = vcmp.le.f32.partialorder %v14426_v6, 0.7853982  ;;  %v3963_v36 = vsub.s32 4, %v13476_v21 }
 0x6ac   :  { %v4371_v29 = vshll.u32 %v4370_v56, 23  ;;  %v4368_v30 = vor.u32 %v4367_v39, %v4366_v12  ;;  %v14429_v12 = vand.u32 2147483647, %v14416_v52  ;;  %v4379_v39 = vsub.s32 4, %v13489_v15 }
 0x6ad   :  { %v3956_v43 = vor.u32 4788187, %v3955_v14  ;;  %v3959_v60 = vcvt.s32.f32 %v3952_v50 }
 0x6ae   :  { %v4372_v28 = vor.u32 4788187, %v4371_v29  ;;  %v4375_v44 = vcvt.s32.f32 %v4368_v30  ;;  %vm13587_vm0 = vcmp.le.f32.partialorder %v14429_v12, 0.7853982  ;;  %v4380_v29 = vsel %vm4295_vm14, %v4379_v39, %v13489_v15 }
 0x6af   :  { %v3957_v27 = vand.u32 2147483647, %v3956_v43  ;;  %v4382_v9 = vsel %vm13587_vm0, 0, %v4380_v29  ;;  %v14434_v39 = vand.u32 4294901760, %v13061_v32  ;;  %v14435_v29 = vand.u32 4294901760, %v13070_v54 }
 0x6b0   :  { %v4373_v33 = vand.u32 2147483647, %v4372_v28  ;;  %v4386_v56 = vadd.s32 3, %v4382_v9 }
 0x6b1   :  { %v3960_v57 = vmul.f32 %v3959_v60, %v3957_v27 }
 0x6b2   :  { %v4376_v55 = vmul.f32 %v4375_v44, %v4373_v33  ;;  %v3964_v44 = vsel %vm3879_vm13, %v3963_v36, %v13476_v21  ;;  %v4387_v15 = vand.u32 3, %v4386_v56  ;;  %v13610_v36 = vsub.f32 %v13061_v32, %v14434_v39 }
 0x6b3   :  { %v3961_v7 = vxor.u32 2147483648, %v3960_v57  ;;  %v3966_v11 = vsel %vm13578_vm15, 0, %v3964_v44  ;;  %v13615_v44 = vsub.f32 %v13070_v54, %v14435_v29 }
 0x6b4   :  { %v4377_v47 = vxor.u32 2147483648, %v4376_v55  ;;  %v3970_v53 = vadd.s32 3, %v3966_v11  ;;  %vm4389_vm1 = vcmp.eq.s32.totalorder %v4387_v15, 0  ;;  %vm4392_vm2 = vcmp.eq.s32.totalorder %v4387_v15, 2 }
 0x6b5   :  { %v3962_v37 = vsel %vm3879_vm13, %v3961_v7, %v3960_v57  ;;  %v4403_v57 = vmul.f32 1.442695, %v14432_v59  ;;  %vm4388_vm5 = vcmp.lt.s32.totalorder %v4387_v15, 2  ;;  %v6689_v32 = vand.u32 4294901760, %v13610_v36 }
 0x6b6   :  { %v4378_v43 = vsel %vm4295_vm14, %v4377_v47, %v4376_v55  ;;  %v3965_v27 = vsel %vm13578_vm15, %v14415_v24, %v3962_v37  ;;  %v3971_v21 = vand.u32 3, %v3970_v53  ;;  %v6696_v56 = vand.u32 4294901760, %v13615_v44 }
 0x6b7   :  { %v4381_v30 = vsel %vm13587_vm0, %v14416_v52, %v4378_v43  ;;  %9985 = vcosq.f32 %v3965_v27  ;;  %v14436_v53 = vand.u32 4294901760, %v13076_v61  ;;  %v14437_v24 = vand.u32 4294901760, %v13081_v26 }
 0x6b8   :  { %9987 = vsinq.f32 %v3965_v27  ;;  %vm3973_vm3 = vcmp.eq.s32.totalorder %v3971_v21, 0  ;;  %vm3976_vm4 = vcmp.eq.s32.totalorder %v3971_v21, 2  ;;  %vm3972_vm6 = vcmp.lt.s32.totalorder %v3971_v21, 2 }
 0x6b9   :  { %9989 = vcosq.f32 %v4381_v30  ;;  %v13624_v54 = vsub.f32 %v13076_v61, %v14436_v53  ;;  %v6697_v61 = vsub.f32 %v13615_v44, %v6696_v56 }
 0x6ba   :  { %9991 = vsinq.f32 %v4381_v30  ;;  %v7320_v30 = vld [vmem:[%s13798_s11] ss:$0 sm:$0xff] }
 0x6bb   :  { %9993 = vpow2.f32 %v4403_v57 }
 0x6bc   :  { %9995 = vpow2.f32 %v4411_v2 }
 0x6c1   :  { %v9986_v33 = vpop.eup %9985 }
 0x6c2   :  { %v9988_v35 = vpop.eup %9987  ;;  %v3977_v7 = vxor.u32 2147483648, %v9986_v33 }
 0x6c3   :  { %v9990_v14 = vpop.eup %9989  ;;  %v3974_v55 = vxor.u32 2147483648, %v9988_v35 }
 0x6c4   :  { %v9992_v40 = vpop.eup %9991  ;;  %v4393_v28 = vxor.u32 2147483648, %v9990_v14  ;;  %v3978_v16 = vsel %vm3976_vm4, %v3977_v7, %v9988_v35  ;;  %v14438_v7 = vand.u32 4294901760, %v13103_v42 }
 0x6c5   :  { %v4390_v50 = vxor.u32 2147483648, %v9992_v40  ;;  %v3975_v6 = vsel %vm3973_vm3, %v9986_v33, %v3974_v55  ;;  %v9994_v43 = vpop.eup %9993 }
 0x6c6   :  { %v4394_v37 = vsel %vm4392_vm2, %v4393_v28, %v9992_v40  ;;  %v3979_v12 = vsel %vm3972_vm6, %v3975_v6, %v3978_v16  ;;  %v9996_v60 = vpop.eup %9995  ;;  %v6703_v28 = vand.u32 4294901760, %v13624_v54 }
 0x6c7   :  { %v4391_v47 = vsel %vm4389_vm1, %v9990_v14, %v4390_v50  ;;  %v3980_v59 = vsel %vm3969_vm8, nan, %v3979_v12  ;;  %v13629_v14 = vsub.f32 %v13081_v26, %v14437_v24  ;;  %v6690_v50 = vsub.f32 %v13610_v36, %v6689_v32 }
 0x6c8   :  { %v4395_v27 = vsel %vm4388_vm5, %v4391_v47, %v4394_v37  ;;  %v4416_v23 = vmul.f32 %v9994_v43, %v3980_v59  ;;  %v13649_v47 = vsub.f32 %v13103_v42, %v14438_v7  ;;  %v14439_v37 = vand.u32 4294901760, %v13108_v1 }
 0x6c9   :  { %v4396_v9 = vsel %vm4385_vm7, nan, %v4395_v27  ;;  %v6710_v26 = vand.u32 4294901760, %v13629_v14  ;;  %v6691_v12 = vand.u32 4294901760, %v6690_v50 }
 0x6ca   :  { %v4420_v57 = vmul.f32 %v9996_v60, %v4396_v9  ;;  %v13654_v6 = vsub.f32 %v13108_v1, %v14439_v37  ;;  %v6698_v60 = vand.u32 4294901760, %v6697_v61  ;;  %v6717_v39 = vand.u32 4294901760, %v13649_v47 }
 0x6cb   :  { %v6711_v1 = vsub.f32 %v13629_v14, %v6710_v26 }
 0x6cc   :  { %v6724_v29 = vand.u32 4294901760, %v13654_v6  ;;  %v9590_v59 = vpack.c.bf16 %v6698_v60, %v6691_v12 }
 0x751   :  { %v8383_v11 = vpop.f32.mrb[10].mxu0 }
 0x752   :  { %v9750_v33 = vadd.f32 %v8383_v11, %v7320_v30  ;;  %v6536_v2 = vpop.f32.mrb[11].mxu0 }
 0x753   :  { %v9751_v35 = vadd.f32 %v7320_v30, %v6536_v2  ;;  %v6704_v30 = vsub.f32 %v13624_v54, %v6703_v28  ;;  %v6718_v2 = vsub.f32 %v13649_v47, %v6717_v39 }
 0x754   :  { %v6547_v52 = vmul.f32 %v9750_v33, %v4420_v57 }
 0x755   :  { %v6546_v40 = vmul.f32 %v9751_v35, %v4416_v23  ;;  %v6705_v57 = vand.u32 4294901760, %v6704_v30  ;;  %v6712_v23 = vand.u32 4294901760, %v6711_v1  ;;  %v6725_v35 = vsub.f32 %v13654_v6, %v6724_v29 }
 0x756   :  { %v13631_v15 = vand.u32 4294901760, %v6547_v52 }
 0x757   :  { %v13633_v21 = vand.u32 4294901760, %v6546_v40  ;;  %v9594_v53 = vpack.c.bf16 %v6712_v23, %v6705_v57  ;;  %v6726_v24 = vand.u32 4294901760, %v6725_v35 }
 0x758   :  { %v13643_v55 = vsub.f32 %v6547_v52, %v13631_v15  ;;  %v6719_v52 = vand.u32 4294901760, %v6718_v2 }
 0x759   :  { %v13657_v16 = vsub.f32 %v6546_v40, %v13633_v21 }
 0x75a   :  { %v6664_v43 = vand.u32 4294901760, %v13643_v55  ;;  %v9598_v40 = vpack.c.bf16 %v6726_v24, %v6719_v52 }
 0x75b   :  { %v6654_v27 = vand.u32 4294901760, %v13657_v16 }
 0x75c   :  { %v6665_v42 = vsub.f32 %v13643_v55, %v6664_v43 }
 0x75d   :  { %v6655_v9 = vsub.f32 %v13657_v16, %v6654_v27 }
 0x75e   :  { %v6666_v33 = vand.u32 4294901760, %v6665_v42 }
 0x75f   :  { %v6656_v11 = vand.u32 4294901760, %v6655_v9 }
 0x761   :  { %8416 = vmatprep.mubr.f32.mxu1 %v6656_v11 }
 0x762   :  { %8417 = vmatmul.mubr.f32.vlgmr.msra.gmra.mrb[10].mxu1 %v6666_v33 }
 0x763   :  { %9589 = vmatpush3.bf16.msra.mxu1 %v13463_v10  ;;  %8451 = vmatprep.mubr.f32.mxu1 %v13633_v21  ;;  %v9622_v10 = vpack.c.bf16 %v13615_v44, %v13610_v36  ;;  %v14444_v36 = vand.u32 4294901760, %v13487_v8  ;;  %v14445_v44 = vand.u32 4294901760, %v13494_v63 }
 0x764   :  { %9591 = vmatprep.subr.bf16.mxu1 %v9590_v59 }
 0x767   :  { %9593 = vmatpush3.bf16.msra.mxu1 %v9590_v59 }
 0x768   :  { %9595 = vmatprep.subr.bf16.mxu1 %v9594_v53 }
 0x76b   :  { %9597 = vmatpush3.bf16.msra.mxu1 %v9594_v53 }
 0x76c   :  { %9599 = vmatprep.subr.bf16.mxu1 %v9598_v40 }
 0x76f   :  { %9601 = vmatpush3.bf16.msra.mxu1 %v9598_v40 }
 0x770   :  { %9603 = vmatprep.subr.bf16.mxu1 %v13499_v17 }
 0x773   :  { %9605 = vmatpush3.bf16.msra.mxu1 %v13499_v17  ;;  %v9626_v17 = vpack.c.bf16 %v13629_v14, %v13624_v54  ;;  %v14447_v54 = vld [vmem:[#allocation32_spill] sm:$0xff] }
 0x774   :  { %9607 = vmatprep.subr.bf16.mxu1 %v13536_v46  ;;  %v14448_v14 = vand.u32 4294901760, %v14447_v54 }
 0x777   :  { %9609 = vmatpush3.bf16.msra.mxu1 %v13536_v46  ;;  %v9630_v46 = vpack.c.bf16 %v13654_v6, %v13649_v47 }
 0x778   :  { %9611 = vmatprep.subr.bf16.mxu1 %v13540_v51 }
 0x77b   :  { %9613 = vmatpush3.bf16.msra.mxu1 %v13540_v51  ;;  %v14441_v51 = vand.u32 4294901760, %v13422_v31  ;;  %v9694_v31 = vpack.c.bf16 %v6724_v29, %v6717_v39 }
 0x77c   :  { %9615 = vmatprep.subr.bf16.mxu1 %v13552_v0 }
 0x77f   :  { %9617 = vmatpush3.bf16.msra.mxu1 %v13552_v0  ;;  %v9686_v0 = vpack.c.bf16 %v6696_v56, %v6689_v32  ;;  %v9702_v32 = vpack.c.bf16 %v14445_v44, %v14444_v36  ;;  %v14446_v56 = vand.u32 4294901760, %v13507_v45 }
 0x780   :  { %9619 = vmatprep.subr.bf16.mxu1 %v13550_v13 }
 0x781   :  { %v9706_v50 = vpack.c.bf16 %v14448_v14, %v14446_v56 }
 0x782   :  { %8452 = vmatmul.mubr.f32.vlgmr.msra.gmra.mrb[10].mxu1 %v13631_v15 }
 0x783   :  { %9621 = vmatpush3.bf16.msra.mxu1 %v13550_v13  ;;  %8486 = vmatprep.mubr.f32.mxu1 %v13657_v16 }
 0x784   :  { %9623 = vmatprep.subr.bf16.mxu1 %v9622_v10 }
 0x787   :  { %9625 = vmatpush3.bf16.msra.mxu1 %v9622_v10 }
 0x788   :  { %9627 = vmatprep.subr.bf16.mxu1 %v9626_v17 }
 0x78b   :  { %9629 = vmatpush3.bf16.msra.mxu1 %v9626_v17 }
 0x78c   :  { %9631 = vmatprep.subr.bf16.mxu1 %v9630_v46 }
 0x78f   :  { %9633 = vmatpush3.bf16.msra.mxu1 %v9630_v46 }
 0x790   :  { %9635 = vmatprep.subr.bf16.mxu1 %v13556_v5 }
 0x793   :  { %9637 = vmatpush3.bf16.msra.mxu1 %v13556_v5  ;;  %v14440_v5 = vand.u32 4294901760, %v13417_v48  ;;  %v9690_v48 = vpack.c.bf16 %v6710_v26, %v6703_v28 }
 0x794   :  { %9639 = vmatprep.subr.bf16.mxu1 %v13560_v58 }
 0x795   :  { %v9682_v13 = vpack.c.bf16 %v14441_v51, %v14440_v5 }
 0x797   :  { %9641 = vmatpush3.bf16.msra.mxu1 %v13560_v58  ;;  %v14442_v58 = vand.u32 4294901760, %v13469_v38  ;;  %v14449_v38 = vld [vmem:[#allocation36_spill] sm:$0xff] }
 0x798   :  { %9643 = vmatprep.subr.bf16.mxu1 %v13564_v22  ;;  %v14450_v61 = vand.u32 4294901760, %v14449_v38 }
 0x79b   :  { %9645 = vmatpush3.bf16.msra.mxu1 %v13564_v22  ;;  %v14443_v22 = vand.u32 4294901760, %v13472_v18  ;;  %v14451_v18 = vld [vmem:[#allocation10_spill] sm:$0xff] }
 0x79c   :  { %9647 = vmatprep.subr.bf16.mxu1 %v13568_v20  ;;  %v14452_v28 = vand.u32 4294901760, %v14451_v18 }
 0x79f   :  { %9649 = vmatpush3.bf16.msra.mxu1 %v13568_v20  ;;  %v9698_v20 = vpack.c.bf16 %v14443_v22, %v14442_v58 }
 0x7a0   :  { %9651 = vmatprep.subr.bf16.mxu1 %v13090_v34 }
 0x7a2   :  { %8487 = vmatmul.mubr.f32.vlgmr.msra.gmra.mrb[10].mxu1 %v13643_v55  ;;  %v9710_v55 = vpack.c.bf16 %v14452_v28, %v14450_v61 }
 0x7a3   :  { %9653 = vmatpush3.bf16.msra.mxu1 %v13090_v34  ;;  %8521 = vmatprep.mubr.f32.mxu1 %v6654_v27 }
 0x7a4   :  { %9655 = vmatprep.subr.bf16.mxu1 %v13098_v62 }
 0x7a7   :  { %9657 = vmatpush3.bf16.msra.mxu1 %v13098_v62 }
 0x7a8   :  { %9659 = vmatprep.subr.bf16.mxu1 %v13119_v49 }
 0x7ab   :  { %9661 = vmatpush3.bf16.msra.mxu1 %v13119_v49 }
 0x7ac   :  { %9663 = vmatprep.subr.bf16.mxu1 %v13129_v41 }
 0x7af   :  { %9665 = vmatpush3.bf16.msra.mxu1 %v13129_v41 }
 0x7b0   :  { %9667 = vmatprep.subr.bf16.mxu1 %v13369_v19 }
 0x7b3   :  { %9669 = vmatpush3.bf16.msra.mxu1 %v13369_v19 }
 0x7b4   :  { %9671 = vmatprep.subr.bf16.mxu1 %v13388_v4 }
 0x7b7   :  { %9673 = vmatpush3.bf16.msra.mxu1 %v13388_v4 }
 0x7b8   :  { %9675 = vmatprep.subr.bf16.mxu1 %v13411_v3 }
 0x7bb   :  { %9677 = vmatpush3.bf16.msra.mxu1 %v13411_v3 }
 0x7bc   :  { %9679 = vmatprep.subr.bf16.mxu1 %v13446_v25 }
 0x7bf   :  { %9681 = vmatpush3.bf16.msra.mxu1 %v13446_v25 }
 0x7c0   :  { %9683 = vmatprep.subr.bf16.mxu1 %v9682_v13 }
 0x7c2   :  { %8522 = vmatmul.mubr.f32.vlgmr.msra.gmra.mrb[10].mxu1 %v6664_v43 }
 0x7c3   :  { %9685 = vmatpush3.bf16.msra.mxu1 %v9682_v13  ;;  %8556 = vmatprep.mubr.f32.mxu1 %v13633_v21 }
 0x7c4   :  { %9687 = vmatprep.subr.bf16.mxu1 %v9686_v0 }
 0x7c7   :  { %9689 = vmatpush3.bf16.msra.mxu1 %v9686_v0 }
 0x7c8   :  { %9691 = vmatprep.subr.bf16.mxu1 %v9690_v48 }
 0x7cb   :  { %9693 = vmatpush3.bf16.msra.mxu1 %v9690_v48 }
 0x7cc   :  { %9695 = vmatprep.subr.bf16.mxu1 %v9694_v31 }
 0x7cf   :  { %9697 = vmatpush3.bf16.msra.mxu1 %v9694_v31 }
 0x7d0   :  { %9699 = vmatprep.subr.bf16.mxu1 %v9698_v20 }
 0x7d3   :  { %9701 = vmatpush3.bf16.msra.mxu1 %v9698_v20 }
 0x7d4   :  { %9703 = vmatprep.subr.bf16.mxu1 %v9702_v32 }
 0x7d7   :  { %9705 = vmatpush3.bf16.msra.mxu1 %v9702_v32 }
 0x7d8   :  { %9707 = vmatprep.subr.bf16.mxu1 %v9706_v50 }
 0x7db   :  { %9709 = vmatpush3.bf16.msra.mxu1 %v9706_v50 }
 0x7dc   :  { %9711 = vmatprep.subr.bf16.mxu1 %v9710_v55 }
 0x7df   :  { %9713 = vmatpush3.bf16.msra.mxu1 %v9710_v55 }
 0x7e0   :  { %9715 = vmatprep.subr.bf16.mxu1 %v13090_v34 }
 0x7e2   :  { %8557 = vmatmul.mubr.f32.vlgmr.msra.gmra.mrb[10].mxu1 %v13631_v15 }
 0x7e3   :  { %9717 = vmatpush3.bf16.msra.mxu1 %v13090_v34  ;;  %8591 = vmatprep.mubr.f32.mxu1 %v13633_v21  ;;  %v7321_v34 = vld [vmem:[%s13800_s13] ss:$0 sm:$0xff] }
 0x7e4   :  { %9719 = vmatprep.subr.bf16.mxu1 %v13098_v62 }
 0x7e7   :  { %9721 = vmatpush3.bf16.msra.mxu1 %v13098_v62 }
 0x7e8   :  { %9723 = vmatprep.subr.bf16.mxu1 %v13119_v49 }
 0x7eb   :  { %9725 = vmatpush3.bf16.msra.mxu1 %v13119_v49 }
 0x7ec   :  { %9727 = vmatprep.subr.bf16.mxu1 %v13129_v41 }
 0x7ef   :  { %9729 = vmatpush3.bf16.msra.mxu1 %v13129_v41 }
 0x7f0   :  { %9731 = vmatprep.subr.bf16.mxu1 %v13369_v19 }
 0x7f3   :  { %9733 = vmatpush3.bf16.msra.mxu1 %v13369_v19 }
 0x7f4   :  { %9735 = vmatprep.subr.bf16.mxu1 %v13388_v4 }
 0x7f7   :  { %9737 = vmatpush3.bf16.msra.mxu1 %v13388_v4 }
 0x7f8   :  { %9739 = vmatprep.subr.bf16.mxu1 %v13411_v3 }
 0x7fb   :  { %9741 = vmatpush3.bf16.msra.mxu1 %v13411_v3 }
 0x7fc   :  { %9743 = vmatprep.subr.bf16.mxu1 %v13446_v25 }
 0x7ff   :  { %9745 = vmatpush3.bf16.msra.mxu1 %v13446_v25 }
 0x802   :  { %8592 = vmatmul.mubr.f32.vlgmr.msra.gmra.mrb[10].mxu1 %v13631_v15 }
 0x8d5   :  { %v8593_v62 = vpop.f32.mrb[10].mxu1 }
 0x8d6   :  { %v9752_v49 = vadd.f32 %v8593_v62, %v7321_v34  ;;  %v7245_v41 = vpop.f32.mrb[11].mxu1 }
 0x8d7   :  { %v9753_v19 = vadd.f32 %v7321_v34, %v7245_v41 }
 0x8d8   :  { %7257 = vst.msk [vmem:[%s13801_s14 + $0x8] sm:$0xff] %vm7255_vm9, %v9752_v49 }
 0x8d9   :  { %7256 = vst.msk [vmem:[%s13801_s14] sm:$0xff] %vm7255_vm9, %v9753_v19 }
 0x8da   :  { %7262 = vsyncpa [#allocation3], 1 }
 0x8db   :  { %7263 = vsyncpa [#allocation5], 1 }

// kernel: tpu_custom_call.1
= control target key start
LH: loop header
LB: loop body
LE: loop exit
PB: predicated region body
PF: predicated region fallthrough
CT: control target
= control target key end

     0   :  { %19 = vsyncpa [#allocation3], 0  ;;  %s13787_s0 = inlined_call_operand.vmem [shape: f32[16,3], index: 0, kind: input, shape index: {}]   ;;  %s13788_s1 = inlined_call_operand.vmem [shape: f32[8,64], index: 1, kind: input, shape index: {}]   ;;  %s13789_s2 = inlined_call_operand.hbm [shape: f32[64,1024], index: 2, kind: input, shape index: {}]   ;;  %s13790_s3 = inlined_call_operand.vmem [shape: f32[1,512], index: 3, kind: input, shape index: {}]   ;;  %s13791_s4 = inlined_call_operand.vmem [shape: f32[1,512], index: 4, kind: input, shape index: {}]   ;;  %s13792_s5 = inlined_call_operand.vmem [shape: f32[1,512], index: 5, kind: input, shape index: {}]   ;;  %s13793_s6 = inlined_call_operand.vmem [shape: f32[128,128], index: 6, kind: input, shape index: {}]   ;;  %s13794_s7 = inlined_call_operand.hbm [shape: f32[128,128], index: 7, kind: input, shape index: {}]   ;;  %s13795_s8 = inlined_call_operand.hbm [shape: f32[128,128], index: 8, kind: input, shape index: {}]   ;;  %s13796_s9 = inlined_call_operand.vmem [shape: f32[1,128], index: 9, kind: input, shape index: {}]   ;;  %s13797_s10 = inlined_call_operand.vmem [shape: f32[1,128], index: 10, kind: input, shape index: {}]   ;;  %s13798_s11 = inlined_call_operand.vmem [shape: f32[1,128], index: 11, kind: input, shape index: {}]   ;;  %s13799_s12 = inlined_call_operand.vmem [shape: f32[128,4], index: 12, kind: input, shape index: {}]   ;;  %s13800_s13 = inlined_call_operand.vmem [shape: f32[1,4], index: 13, kind: input, shape index: {}]   ;;  %s13801_s14 = inlined_call_operand.vmem [shape: f32[16,4], index: 14, kind: output, shape index: {}]  }
   0x1   :  { %20 = vsyncpa [#allocation5], 0  ;;  %s10069_s29 = smov [#allocation4]   ;;  %s9999_s17 = scalar_lea.hbm %s13794_s7, 2048 }
   0x2   :  { %s50_s30 = sshll.u32 %s10069_s29, 4  ;;  %p10000_p0 = scmp.ne.s32.totalorder %s13794_s7, %s9999_s17  ;;  %s51_s30 = int_to_ptr.vmem [resolvable:$true] %s50_s30 }
   0x3   :  { %p10003_p1 = scmp.lt.u32.totalorder %s9999_s17, %s13794_s7 }
   0x5   :  { %p10005_p2 = pnand %p10003_p1, %p10000_p0 }
   0x7   :  { %10008 = shalt.err (!%p10005_p2)
}
   0x8   :  { %s10009_s22 = scalar_lea.vmem %s51_s30, 2048  ;;  %p10014_p4 = scmp.lt.s32.totalorder %s51_s30, %s51_s30 }
   0x9   :  { %p10010_p3 = scmp.ne.s32.totalorder %s51_s30, %s10009_s22  ;;  %p10015_p5 = scmp.lt.s32.totalorder %s10009_s22, %s10009_s22 }
   0xb   :  { %p10016_p6 = por %p10015_p5, %p10014_p4 }
   0xd   :  { %p10017_p7 = pnand %p10016_p6, %p10010_p3 }
   0xf   :  { %10020 = shalt.err (!%p10017_p7)
}
  0x10   :  { %s10070_s23 = smov 128   ;;  %s10071_s24 = smov 8  }
  0x11   :  { %56 = dma.hbm_to_vmem [thread:$0]  %s13794_s7, 2048, %s51_s30, [#allocation5], %s10070_s23, %s10070_s23, %s10071_s24  }
  0x12   :  { %s10072_s27 = smov [#allocation2]   ;;  %s10021_s16 = scalar_lea.hbm %s13789_s2, 8192 }
  0x13   :  { %s30_s28 = sshll.u32 %s10072_s27, 4  ;;  %p10022_p8 = scmp.ne.s32.totalorder %s13789_s2, %s10021_s16  ;;  %s31_s28 = int_to_ptr.vmem [resolvable:$true] %s30_s28 }
  0x14   :  { %p10025_p9 = scmp.lt.u32.totalorder %s10021_s16, %s13789_s2 }
  0x16   :  { %p10027_p10 = pnand %p10025_p9, %p10022_p8 }
  0x18   :  { %10030 = shalt.err (!%p10027_p10)
}
  0x19   :  { %s10031_s21 = scalar_lea.vmem %s31_s28, 8192  ;;  %p10036_p12 = scmp.lt.s32.totalorder %s31_s28, %s31_s28 }
  0x1a   :  { %p10032_p11 = scmp.ne.s32.totalorder %s31_s28, %s10031_s21  ;;  %p10037_p13 = scmp.lt.s32.totalorder %s10031_s21, %s10031_s21 }
  0x1c   :  { %p10038_p0 = por %p10037_p13, %p10036_p12 }
  0x1e   :  { %p10039_p1 = pnand %p10038_p0, %p10032_p11 }
  0x20   :  { %10042 = shalt.err (!%p10039_p1)
}
  0x21   :  { %s10073_s7 = smov 1024   ;;  %s10074_s30 = smov 64  }
  0x22   :  { %36 = dma.hbm_to_vmem [thread:$0]  %s13789_s2, 8192, %s31_s28, [#allocation3], %s10073_s7, %s10073_s7, %s10074_s30  }
  0x23   :  { %s10075_s26 = smov [#allocation6]   ;;  %s10043_s16 = scalar_lea.hbm %s13795_s8, 2048 }
  0x24   :  { %s62_s27 = sshll.u32 %s10075_s26, 4  ;;  %p10044_p2 = scmp.ne.s32.totalorder %s13795_s8, %s10043_s16  ;;  %s63_s27 = int_to_ptr.vmem [resolvable:$true] %s62_s27 }
  0x25   :  { %p10047_p3 = scmp.lt.u32.totalorder %s10043_s16, %s13795_s8 }
  0x27   :  { %p10049_p4 = pnand %p10047_p3, %p10044_p2 }
  0x29   :  { %10052 = shalt.err (!%p10049_p4)
}
  0x2a   :  { %s10053_s21 = scalar_lea.vmem %s63_s27, 2048  ;;  %p10058_p6 = scmp.lt.s32.totalorder %s63_s27, %s63_s27 }
  0x2b   :  { %p10054_p5 = scmp.ne.s32.totalorder %s63_s27, %s10053_s21  ;;  %p10059_p7 = scmp.lt.s32.totalorder %s10053_s21, %s10053_s21 }
  0x2d   :  { %p10060_p8 = por %p10059_p7, %p10058_p6 }
  0x2f   :  { %p10061_p9 = pnand %p10060_p8, %p10054_p5 }
  0x31   :  { %10064 = shalt.err (!%p10061_p9)
}
  0x32   :  { %68 = dma.hbm_to_vmem [thread:$0]  %s13795_s8, 2048, %s63_s27, [#allocation5], %s10070_s23, %s10070_s23, %s10071_s24  }
  0x33   :  { %10065 = dma.done.wait [#allocation3], 8192  }
  0x34   :  { %10066 = vsyncadd [#allocation3], 4294959104 }
  0x35   :  { %10067 = dma.done.wait [#allocation5], 4096  }
  0x36   :  { %10068 = vsyncadd [#allocation5], 4294963200  ;;  %v10076_v0 = vmov 2   ;;  %v10077_v1 = vmov 0   ;;  %v88_v2 = vld [vmem:[%s13787_s0] sm:$0xff]  ;;  %v89_v3 = vld [vmem:[%s13787_s0 + $0x8] sm:$0xff] }
  0x37   :  { %9935 = vset.pattern.permute.xlu1 %v10076_v0  ;;  %9933 = vset.pattern.permute.xlu0 %v10077_v1  ;;  %v10078_v4 = vmov 1   ;;  %v603_v5 = vld [vmem:[#allocation2 + $0x8] sm:$0xff]  ;;  %v605_v7 = vld [vmem:[#allocation2 + $0x18] sm:$0xff]  ;;  %v602_v12 = vld [vmem:[#allocation2] sm:$0xff]  ;;  %s10086_s2 = smov 127   ;;  %s10087_s28 = smov 126  }
  0x38   :  { %126 = vperm.xlu1 %9935, %v88_v2   ;;  %93 = vperm.xlu0 %9933, %v88_v2   ;;  %v611_v6 = vld [vmem:[#allocation2 + $0x48] sm:$0xff]  ;;  %v673_v8 = vand.u32 4294901760, %v603_v5  ;;  %v613_v10 = vld [vmem:[#allocation2 + $0x58] sm:$0xff]  ;;  %v1369_v11 = vand.u32 4294901760, %v605_v7  ;;  %v610_v14 = vld [vmem:[#allocation2 + $0x40] sm:$0xff]  ;;  %v675_v15 = vand.u32 4294901760, %v602_v12 }
  0x39   :  { %v677_v9 = vand.u32 4294901760, %v611_v6  ;;  %v1373_v13 = vand.u32 4294901760, %v613_v10  ;;  %v604_v16 = vld [vmem:[#allocation2 + $0x10] sm:$0xff]  ;;  %v679_v19 = vand.u32 4294901760, %v610_v14  ;;  %v10215_v23 = vld [vmem:[#allocation2 + $0x88] sm:$0xff]  ;;  %v10219_v25 = vld [vmem:[#allocation2 + $0x98] sm:$0xff] }
  0x3a   :  { %v612_v17 = vld [vmem:[#allocation2 + $0x50] sm:$0xff]  ;;  %v1371_v20 = vand.u32 4294901760, %v604_v16  ;;  %v10217_v24 = vld [vmem:[#allocation2 + $0xc8] sm:$0xff]  ;;  %v681_v28 = vand.u32 4294901760, %v10215_v23  ;;  %v629_v30 = vld [vmem:[#allocation2 + $0xd8] sm:$0xff]  ;;  %v1377_v33 = vand.u32 4294901760, %v10219_v25  ;;  %v10242_v58 = vsub.f32 %v603_v5, %v673_v8 }
  0x3b   :  { %v10211_v18 = vpack.c.bf16 %v677_v9, %v673_v8  ;;  %v1375_v21 = vand.u32 4294901760, %v612_v17  ;;  %v10213_v22 = vpack.c.bf16 %v1373_v13, %v1369_v11  ;;  %v10222_v26 = vpack.c.bf16 %v679_v19, %v675_v15  ;;  %v618_v31 = vld [vmem:[#allocation2 + $0x80] sm:$0xff]  ;;  %v620_v37 = vld [vmem:[#allocation2 + $0x90] sm:$0xff]  ;;  %v635_v44 = vld [vmem:[#allocation2 + $0x108] sm:$0xff] }
  0x3c   :  { %9936 = vset.pattern.permute.xlu1 %v10077_v1  ;;  %9934 = vset.pattern.permute.xlu0 %v10078_v4  ;;  %v685_v29 = vand.u32 4294901760, %v10217_v24  ;;  %v626_v32 = vld [vmem:[#allocation2 + $0xc0] sm:$0xff]  ;;  %v1381_v34 = vand.u32 4294901760, %v629_v30  ;;  %v683_v35 = vand.u32 4294901760, %v618_v31  ;;  %v628_v38 = vld [vmem:[#allocation2 + $0xd0] sm:$0xff]  ;;  %v1379_v40 = vand.u32 4294901760, %v620_v37 }
  0x3d   :  { %98 = vperm.xlu1 %9936, %v89_v3   ;;  %109 = vperm.xlu0 %9934, %v88_v2   ;;  %14053 = vst [vmem:[#allocation9_spill] sm:$0xff] %v10211_v18  ;;  %14054 = vst [vmem:[#allocation10_spill] sm:$0xff] %v10213_v22  ;;  %v10224_v27 = vpack.c.bf16 %v1375_v21, %v1371_v20  ;;  %v687_v36 = vand.u32 4294901760, %v626_v32  ;;  %v1383_v41 = vand.u32 4294901760, %v628_v38  ;;  %v643_v45 = vld [vmem:[#allocation2 + $0x148] sm:$0xff]  ;;  %v637_v46 = vld [vmem:[#allocation2 + $0x118] sm:$0xff] }
  0x3e   :  { %8595 = vmatprep.subr.bf16.mxu0 %v10211_v18  ;;  %14055 = vst [vmem:[#allocation11_spill] sm:$0xff] %v10222_v26  ;;  %8691 = vmatprep.subr.bf16.mxu1 %v10213_v22  ;;  %v10232_v39 = vpack.c.bf16 %v685_v29, %v681_v28  ;;  %v10234_v42 = vpack.c.bf16 %v1381_v34, %v1377_v33  ;;  %v689_v48 = vand.u32 4294901760, %v635_v44  ;;  %v693_v49 = vand.u32 4294901760, %v643_v45  ;;  %v645_v50 = vld [vmem:[#allocation2 + $0x158] sm:$0xff]  ;;  %v634_v52 = vld [vmem:[#allocation2 + $0x100] sm:$0xff]  ;;  %v636_v57 = vld [vmem:[#allocation2 + $0x110] sm:$0xff] }
  0x3f   :  { %14056 = vst [vmem:[#allocation12_spill] sm:$0xff] %v10224_v27  ;;  %8597 = vmatpush1.bf16.msra.mxu0 %v10222_v26  ;;  %8693 = vmatpush1.bf16.msra.mxu1 %v10224_v27  ;;  %v10236_v43 = vpack.c.bf16 %v687_v36, %v683_v35  ;;  %v10239_v47 = vpack.c.bf16 %v1383_v41, %v1379_v40  ;;  %v1385_v51 = vand.u32 4294901760, %v637_v46  ;;  %v642_v53 = vld [vmem:[#allocation2 + $0x140] sm:$0xff]  ;;  %v1389_v54 = vand.u32 4294901760, %v645_v50  ;;  %v644_v62 = vld [vmem:[#allocation2 + $0x150] sm:$0xff]  ;;  %v653_v5 = vld [vmem:[#allocation2 + $0x198] sm:$0xff] }
  0x40   :  { %14057 = vst [vmem:[#allocation13_spill] sm:$0xff] %v10232_v39  ;;  %14058 = vst [vmem:[#allocation14_spill] sm:$0xff] %v10234_v42  ;;  %8599 = vmatprep.subr.bf16.mxu0 %v10232_v39  ;;  %8695 = vmatprep.subr.bf16.mxu1 %v10234_v42  ;;  %v691_v55 = vand.u32 4294901760, %v634_v52  ;;  %v695_v56 = vand.u32 4294901760, %v642_v53  ;;  %v10244_v59 = vsub.f32 %v611_v6, %v677_v9  ;;  %v1387_v9 = vand.u32 4294901760, %v636_v57 }
  0x41   :  { %9937 = vset.pattern.permute.xlu1 %v10078_v4  ;;  %9938 = vset.pattern.permute.xlu0 %v10076_v0  ;;  %14059 = vst [vmem:[#allocation15_spill] sm:$0xff] %v10236_v43  ;;  %14060 = vst [vmem:[#allocation16_spill] sm:$0xff] %v10239_v47  ;;  %v10246_v60 = vsub.f32 %v605_v7, %v1369_v11  ;;  %v10248_v61 = vsub.f32 %v613_v10, %v1373_v13  ;;  %v659_v4 = vld [vmem:[#allocation2 + $0x1c8] sm:$0xff]  ;;  %v1391_v10 = vand.u32 4294901760, %v644_v62 }
  0x42   :  { %113 = vperm.xlu1 %9937, %v89_v3   ;;  %130 = vperm.xlu0 %9938, %v89_v3   ;;  %14061 = vst [vmem:[#allocation17_spill] sm:$0xff] %v10242_v58  ;;  %14062 = vst [vmem:[#allocation18_spill] sm:$0xff] %v10244_v59  ;;  %v10251_v63 = vsub.f32 %v602_v12, %v675_v15  ;;  %v10253_v0 = vsub.f32 %v610_v14, %v679_v19  ;;  %v651_v3 = vld [vmem:[#allocation2 + $0x188] sm:$0xff]  ;;  %v701_v12 = vand.u32 4294901760, %v659_v4 }
  0x43   :  { %8601 = vmatpush1.bf16.msra.mxu0 %v10236_v43  ;;  %v10257_v2 = vsub.f32 %v612_v17, %v1375_v21  ;;  %8697 = vmatpush1.bf16.msra.mxu1 %v10239_v47  ;;  %v10260_v6 = vpack.c.bf16 %v693_v49, %v689_v48  ;;  %v10262_v7 = vpack.c.bf16 %v1389_v54, %v1385_v51  ;;  %v697_v11 = vand.u32 4294901760, %v651_v3 }
  0x44   :  { %v10264_v8 = vpack.c.bf16 %v695_v56, %v691_v55  ;;  %v1393_v13 = vand.u32 4294901760, %v653_v5  ;;  %v10267_v14 = vsub.f32 %v10215_v23, %v681_v28  ;;  %v10270_v15 = vsub.f32 %v10217_v24, %v685_v29  ;;  %v661_v29 = vld [vmem:[#allocation2 + $0x1d8] sm:$0xff] }
  0x45   :  { %14063 = vst [vmem:[#allocation19_spill] sm:$0xff] %v10260_v6  ;;  %14064 = vst [vmem:[#allocation20_spill] sm:$0xff] %v10262_v7  ;;  %v10275_v17 = vsub.f32 %v629_v30, %v1381_v34  ;;  %8603 = vmatprep.subr.bf16.mxu0 %v10260_v6  ;;  %v10278_v19 = vsub.f32 %v618_v31, %v683_v35  ;;  %v10282_v21 = vsub.f32 %v620_v37, %v1379_v40  ;;  %v650_v30 = vld [vmem:[#allocation2 + $0x180] sm:$0xff]  ;;  %v660_v37 = vld [vmem:[#allocation2 + $0x1d0] sm:$0xff] }
  0x46   :  { %9939 = vset.pattern.permute.xlu0 %v10077_v1  ;;  %9940 = vset.pattern.permute.xlu1 %v10077_v1  ;;  %v10255_v1 = vsub.f32 %v604_v16, %v1371_v20  ;;  %14065 = vst [vmem:[#allocation21_spill] sm:$0xff] %v10264_v8  ;;  %v10273_v16 = vsub.f32 %v10219_v25, %v1377_v33  ;;  %v658_v31 = vld [vmem:[#allocation2 + $0x1c0] sm:$0xff] }
  0x47   :  { %v10280_v20 = vsub.f32 %v626_v32, %v687_v36  ;;  %v10284_v47 = vsub.f32 %v628_v38, %v1383_v41  ;;  %8699 = vmatprep.subr.bf16.mxu1 %v10262_v7  ;;  %v10287_v23 = vsub.f32 %v635_v44, %v689_v48  ;;  %v10289_v24 = vsub.f32 %v643_v45, %v693_v49  ;;  %v652_v36 = vld [vmem:[#allocation2 + $0x190] sm:$0xff] }
  0x48   :  { %v10291_v25 = vsub.f32 %v637_v46, %v1385_v51  ;;  %v10293_v28 = vsub.f32 %v645_v50, %v1389_v54  ;;  %8605 = vmatpush1.bf16.msra.mxu0 %v10264_v8  ;;  %v10296_v32 = vsub.f32 %v634_v52, %v691_v55  ;;  %v10298_v33 = vsub.f32 %v642_v53, %v695_v56 }
  0x49   :  { %v10300_v34 = vpack.c.bf16 %v1391_v10, %v1387_v9  ;;  %v10302_v35 = vsub.f32 %v636_v57, %v1387_v9  ;;  %v10304_v38 = vsub.f32 %v644_v62, %v1391_v10  ;;  %v10306_v40 = vpack.c.bf16 %v701_v12, %v697_v11 }
  0x4a   :  { %v10308_v41 = vsub.f32 %v651_v3, %v697_v11  ;;  %v10310_v44 = vsub.f32 %v659_v4, %v701_v12  ;;  %v1397_v45 = vand.u32 4294901760, %v661_v29  ;;  %v10313_v46 = vsub.f32 %v653_v5, %v1393_v13 }
  0x4b   :  { %14066 = vst [vmem:[#allocation22_spill] sm:$0xff] %v10300_v34  ;;  %14067 = vst [vmem:[#allocation23_spill] sm:$0xff] %v10304_v38  ;;  %8701 = vmatpush1.bf16.msra.mxu1 %v10300_v34  ;;  %v699_v48 = vand.u32 4294901760, %v650_v30  ;;  %v703_v49 = vand.u32 4294901760, %v658_v31  ;;  %8607 = vmatprep.subr.bf16.mxu0 %v10306_v40  ;;  %v1395_v50 = vand.u32 4294901760, %v652_v36  ;;  %v1399_v51 = vand.u32 4294901760, %v660_v37 }
  0x4c   :  { %14068 = vst [vmem:[#allocation24_spill] sm:$0xff] %v10306_v40  ;;  %14069 = vst [vmem:[#allocation25_spill] sm:$0xff] %v10308_v41  ;;  %v13807_v52 = vand.u32 4294901760, %v10242_v58  ;;  %v10317_v53 = vpack.c.bf16 %v1397_v45, %v1393_v13  ;;  %v10319_v54 = vsub.f32 %v661_v29, %v1397_v45  ;;  %v13808_v57 = vmov 0.0  }
  0x4d   :  { %14070 = vst [vmem:[#allocation26_spill] sm:$0xff] %v10310_v44  ;;  %v10321_v55 = vpack.c.bf16 %v703_v49, %v699_v48  ;;  %v10323_v56 = vsub.f32 %v650_v30, %v699_v48  ;;  %753 = vmatprep.mubr.f32.mxu0 %v13808_v57  ;;  %v10326_v62 = vsub.f32 %v658_v31, %v703_v49  ;;  %v13806_v10 = vand.u32 4294901760, %v10244_v59 }
  0x4e   :  { %14071 = vst [vmem:[#allocation27_spill] sm:$0xff] %v10317_v53  ;;  %v10328_v3 = vpack.c.bf16 %v1399_v51, %v1395_v50  ;;  %v10330_v4 = vsub.f32 %v652_v36, %v1395_v50  ;;  %v10332_v5 = vsub.f32 %v660_v37, %v1399_v51  ;;  %1449 = vmatprep.mubr.f32.mxu1 %v13808_v57  ;;  %v13805_v11 = vand.u32 4294901760, %v10246_v60 }
  0x4f   :  { %14072 = vst [vmem:[#allocation28_spill] sm:$0xff] %v10321_v55  ;;  %8703 = vmatprep.subr.bf16.mxu1 %v10317_v53  ;;  %8609 = vmatpush1.bf16.msra.mxu0 %v10321_v55  ;;  %v779_v9 = vsub.f32 %v10242_v58, %v13807_v52  ;;  %v13804_v12 = vand.u32 4294901760, %v10248_v61  ;;  %v13811_v13 = vand.u32 4294901760, %v10251_v63  ;;  %v13810_v29 = vand.u32 4294901760, %v10253_v0 }
  0x50   :  { %14073 = vst [vmem:[#allocation29_spill] sm:$0xff] %v10328_v3  ;;  %8705 = vmatpush1.bf16.msra.mxu1 %v10328_v3  ;;  %v13812_v30 = vand.u32 4294901760, %v10255_v1  ;;  %v13819_v31 = vand.u32 4294901760, %v10257_v2  ;;  %v791_v37 = vsub.f32 %v10244_v59, %v13806_v10  ;;  %v1475_v45 = vsub.f32 %v10246_v60, %v13805_v11 }
  0x51   :  { %v780_v36 = vand.u32 4294901760, %v779_v9  ;;  %v1487_v48 = vsub.f32 %v10248_v61, %v13804_v12  ;;  %v785_v49 = vsub.f32 %v10251_v63, %v13811_v13  ;;  %v797_v50 = vsub.f32 %v10253_v0, %v13810_v29  ;;  %v7264_v12 = vld [vmem:[%s13788_s1] ss:$0 sm:$0xff]  ;;  %v10376_v29 = vld [vmem:[%s13788_s1 + $0x2] ss:$0 sm:$0xff] }
  0x52   :  { %v1481_v51 = vsub.f32 %v10255_v1, %v13812_v30  ;;  %v1493_v9 = vsub.f32 %v10257_v2, %v13819_v31  ;;  %v792_v11 = vand.u32 4294901760, %v791_v37  ;;  %v1476_v10 = vand.u32 4294901760, %v1475_v45 }
  0x53   :  { %v1488_v52 = vand.u32 4294901760, %v1487_v48  ;;  %v13831_v57 = vand.u32 4294901760, %v10267_v14  ;;  %v786_v13 = vand.u32 4294901760, %v785_v49  ;;  %v798_v30 = vand.u32 4294901760, %v797_v50 }
  0x54   :  { %v1482_v3 = vand.u32 4294901760, %v1481_v51  ;;  %v1494_v55 = vand.u32 4294901760, %v1493_v9  ;;  %v8610_v53 = vpack.c.bf16 %v792_v11, %v780_v36  ;;  %v13830_v37 = vand.u32 4294901760, %v10270_v15 }
  0x55   :  { %v8706_v31 = vpack.c.bf16 %v1488_v52, %v1476_v10  ;;  %v803_v40 = vsub.f32 %v10267_v14, %v13831_v57  ;;  %v10382_v34 = vpack.c.bf16 %v798_v30, %v786_v13  ;;  %v13829_v7 = vand.u32 4294901760, %v10273_v16 }
  0x56   :  { %v10384_v8 = vpack.c.bf16 %v1494_v55, %v1482_v3  ;;  %v13828_v49 = vand.u32 4294901760, %v10275_v17  ;;  %8611 = vmatprep.subr.bf16.mxu0 %v8610_v53  ;;  %v815_v10 = vsub.f32 %v10270_v15, %v13830_v37  ;;  %v13832_v3 = vand.u32 4294901760, %v10278_v19 }
  0x57   :  { %14074 = vst [vmem:[#allocation30_spill] sm:$0xff] %v10382_v34  ;;  %8707 = vmatprep.subr.bf16.mxu1 %v8706_v31  ;;  %v804_v52 = vand.u32 4294901760, %v803_v40  ;;  %v1499_v13 = vsub.f32 %v10273_v16, %v13829_v7  ;;  %v13837_v30 = vand.u32 4294901760, %v10280_v20  ;;  %v7265_v40 = vld [vmem:[%s13788_s1 + $0x1] ss:$0 sm:$0xff]  ;;  %v13844_v31 = vand.u32 4294901760, %v10282_v21 }
  0x58   :  { %14075 = vst [vmem:[#allocation31_spill] sm:$0xff] %v10384_v8  ;;  %v1511_v55 = vsub.f32 %v10275_v17, %v13828_v49  ;;  %v816_v53 = vand.u32 4294901760, %v815_v10  ;;  %v13847_v36 = vand.u32 4294901760, %v10284_v47  ;;  %v13860_v51 = vand.u32 4294901760, %v10287_v23 }
  0x59   :  { %v1500_v9 = vand.u32 4294901760, %v1499_v13  ;;  %v821_v49 = vsub.f32 %v10280_v20, %v13837_v30  ;;  %v1505_v10 = vsub.f32 %v10282_v21, %v13844_v31  ;;  %v13856_v31 = vand.u32 4294901760, %v10289_v24 }
  0x5a   :  { %v10412_v57 = vpack.c.bf16 %v816_v53, %v804_v52  ;;  %v1517_v13 = vsub.f32 %v10284_v47, %v13847_v36  ;;  %v13854_v26 = vand.u32 4294901760, %v10291_v25  ;;  %v13853_v36 = vand.u32 4294901760, %v10293_v28 }
  0x5b   :  { %v822_v42 = vand.u32 4294901760, %v821_v49  ;;  %v1506_v52 = vand.u32 4294901760, %v1505_v10 }
  0x5c   :  { %14076 = vst [vmem:[#allocation32_spill] sm:$0xff] %v10412_v57  ;;  %v1518_v53 = vand.u32 4294901760, %v1517_v13 }
  0x5e   :  { %v10430_v18 = vpack.c.bf16 %v1518_v53, %v1506_v52 }
  0x60   :  { %14079 = vst [vmem:[#allocation35_spill] sm:$0xff] %v10430_v18 }
  0xb7   :  { %v94_v45 = vpop.permute.xlu0 %93  ;;  %v127_v48 = vpop.permute.xlu1 %126 }
  0xb8   :  { %v105_v50 = vmul.f32 %v7264_v12, %v94_v45  ;;  %v137_v11 = vmul.f32 %v10376_v29, %v127_v48  ;;  %v1512_v45 = vand.u32 4294901760, %v1511_v55  ;;  %v809_v48 = vsub.f32 %v10278_v19, %v13832_v3 }
  0xb9   :  { %v827_v55 = vsub.f32 %v10287_v23, %v13860_v51 }
  0xba   :  { %v10423_v43 = vpack.c.bf16 %v1512_v45, %v1500_v9  ;;  %v810_v30 = vand.u32 4294901760, %v809_v48 }
  0xbb   :  { %v828_v39 = vand.u32 4294901760, %v827_v55 }
  0xbc   :  { %v110_v7 = vpop.permute.xlu0 %109  ;;  %v99_v37 = vpop.permute.xlu1 %98  ;;  %14077 = vst [vmem:[#allocation33_spill] sm:$0xff] %v10423_v43  ;;  %v10428_v22 = vpack.c.bf16 %v822_v42, %v810_v30  ;;  %v1535_v42 = vsub.f32 %v10293_v28, %v13853_v36 }
  0xbd   :  { %v120_v3 = vmul.f32 %v7265_v40, %v110_v7  ;;  %v106_v6 = vmul.f32 %v7264_v12, %v99_v37  ;;  %v13852_v7 = vand.u32 4294901760, %v10296_v32  ;;  %v13855_v12 = vand.u32 4294901760, %v10298_v33 }
  0xbe   :  { %14078 = vst [vmem:[#allocation34_spill] sm:$0xff] %v10428_v22 }
  0xbf   :  { %v122_v27 = vadd.f32 %v120_v3, %v105_v50  ;;  %v839_v50 = vsub.f32 %v10289_v24, %v13856_v31  ;;  %v1523_v3 = vsub.f32 %v10291_v25, %v13854_v26  ;;  %v13859_v31 = vand.u32 4294901760, %v10302_v35 }
  0xc1   :  { %v10434_v37 = vadd.f32 %v137_v11, %v122_v27  ;;  %v114_v49 = vpop.permute.xlu1 %113  ;;  %v131_v9 = vpop.permute.xlu0 %130  ;;  %v833_v27 = vsub.f32 %v10296_v32, %v13852_v7  ;;  %v845_v11 = vsub.f32 %v10298_v33, %v13855_v12  ;;  %v840_v55 = vand.u32 4294901760, %v839_v50 }
  0xc2   :  { %v121_v30 = vmul.f32 %v7265_v40, %v114_v49  ;;  %v138_v45 = vmul.f32 %v10376_v29, %v131_v9  ;;  %v1524_v52 = vand.u32 4294901760, %v1523_v3  ;;  %v1536_v29 = vand.u32 4294901760, %v1535_v42 }
  0xc3   :  { %v13861_v48 = vand.u32 2147483647, %v10434_v37  ;;  %v152_v10 = vand.u32 2139095040, %v10434_v37  ;;  %v10458_v9 = vpack.c.bf16 %v840_v55, %v828_v39  ;;  %v834_v7 = vand.u32 4294901760, %v833_v27 }
  0xc4   :  { %v123_v13 = vadd.f32 %v121_v30, %v106_v6  ;;  %v846_v36 = vand.u32 4294901760, %v845_v11  ;;  %v10460_v12 = vpack.c.bf16 %v1536_v29, %v1524_v52  ;;  %v13858_v27 = vand.u32 4294901760, %v10304_v38 }
  0xc5   :  { %v153_v53 = vshrl.u32 %v152_v10, 23  ;;  %v156_v40 = vand.u32 8388607, %v13861_v48  ;;  %14081 = vst [vmem:[#allocation37_spill] sm:$0xff] %v10458_v9  ;;  %v13862_v11 = vand.u32 4294901760, %v10308_v41  ;;  %vm151_vm13 = vcmp.lt.s32.totalorder %v10434_v37, 0 }
  0xc6   :  { %v10456_v49 = vadd.f32 %v138_v45, %v123_v13  ;;  %14082 = vst [vmem:[#allocation38_spill] sm:$0xff] %v10460_v12  ;;  %v10465_v10 = vpack.c.bf16 %v846_v36, %v834_v7  ;;  %v10472_v45 = vsub.f32 %v10302_v35, %v13859_v31  ;;  %v13869_v13 = vand.u32 4294901760, %v10310_v44 }
  0xc7   :  { %v7268_v26 = vadd.s32 4294967169, %v153_v53  ;;  %v157_v3 = vor.u32 8388608, %v156_v40  ;;  %v13872_v31 = vmov 2131351028   ;;  %v13874_v48 = vmov 2102212464  }
  0xc8   :  { %14080 = vst [vmem:[#allocation36_spill] sm:$0xff] %v10456_v49  ;;  %v13857_v6 = vand.u32 2147483647, %v10456_v49  ;;  %v256_v50 = vand.u32 2139095040, %v10456_v49  ;;  %14083 = vst [vmem:[#allocation39_spill] sm:$0xff] %v10465_v10 }
  0xc9   :  { %v159_v30 = vadd.s32 1, %v7268_v26  ;;  %v10477_v53 = vshll.u32 %v157_v3, 8  ;;  %v10496_v3 = vsub.f32 %v10310_v44, %v13869_v13  ;;  %v13878_v29 = vmov 920167782  }
  0xca   :  { %v257_v42 = vshrl.u32 %v256_v50, 23  ;;  %v260_v39 = vand.u32 8388607, %v13857_v6  ;;  %v10483_v50 = vsub.f32 %v10304_v38, %v13858_v27  ;;  %v10488_v6 = vsub.f32 %v10308_v41, %v13862_v11 }
  0xcb   :  { %vm160_vm0 = vcmp.gt.s32.totalorder %v159_v30, 0  ;;  %v14084_v13 = vmov 683565275   ;;  %v13880_v9 = vmov 1326507024  }
  0xcc   :  { %v161_v55 = vsel %vm160_vm0, %v159_v30, 0  ;;  %v7272_v26 = vadd.s32 4294967169, %v257_v42  ;;  %v261_v36 = vor.u32 8388608, %v260_v39  ;;  %v13865_v42 = vmov 683565275  }
  0xcd   :  { %v162_v7 = vshrl.u32 %v161_v55, 5  ;;  %v163_v52 = vand.u32 31, %v161_v55 }
  0xce   :  { %v263_v40 = vadd.s32 1, %v7272_v26  ;;  %v10491_v55 = vshll.u32 %v261_v36, 8  ;;  %v13870_v26 = vmov 2475754826  }
  0xcf   :  { %v164_v30 = vsub.s32 32, %v163_v52  ;;  %v166_v39 = vshll.u32 %v13865_v42, %v163_v52  ;;  %v169_v27 = vshll.u32 %v13870_v26, %v163_v52  ;;  %v172_v51 = vshll.u32 %v13872_v31, %v163_v52 }
  0xd0   :  { %v175_v11 = vshll.u32 %v13874_v48, %v163_v52  ;;  %v178_v59 = vshll.u32 %v13878_v29, %v163_v52  ;;  %vm181_vm1 = vcmp.lt.s32.totalorder %v162_v7, 1  ;;  %vm183_vm2 = vcmp.lt.s32.totalorder %v162_v7, 3 }
  0xd1   :  { %v167_v36 = vshrl.u32 %v13870_v26, %v164_v30  ;;  %v170_v42 = vshrl.u32 %v13872_v31, %v164_v30  ;;  %v173_v58 = vshrl.u32 %v13874_v48, %v164_v30  ;;  %v165_v10 = vshrl.u32 %v14084_v13, %v164_v30 }
  0xd2   :  { %v176_v12 = vshrl.u32 %v13878_v29, %v164_v30  ;;  %v179_v18 = vshrl.u32 %v13880_v9, %v164_v30  ;;  %vm264_vm3 = vcmp.gt.s32.totalorder %v263_v40, 0  ;;  %vm184_vm4 = vcmp.lt.s32.totalorder %v162_v7, 4 }
  0xd3   :  { %v168_v22 = vor.u32 %v167_v36, %v166_v39  ;;  %v171_v43 = vor.u32 %v170_v42, %v169_v27  ;;  %v174_v57 = vor.u32 %v173_v58, %v172_v51  ;;  %v265_v26 = vsel %vm264_vm3, %v263_v40, 0 }
  0xd4   :  { %v177_v52 = vor.u32 %v176_v12, %v175_v11  ;;  %v180_v8 = vor.u32 %v179_v18, %v178_v59  ;;  %vm182_vm5 = vcmp.lt.s32.totalorder %v162_v7, 2  ;;  %v266_v51 = vshrl.u32 %v265_v26, 5 }
  0xd5   :  { %v185_v31 = vsel %vm181_vm1, %v165_v10, %v168_v22  ;;  %v186_v48 = vsel %vm184_vm4, %v174_v57, 2102212464  ;;  %v189_v34 = vsel %vm181_vm1, %v168_v22, %v171_v43  ;;  %v193_v49 = vsel %vm181_vm1, %v171_v43, %v174_v57 }
  0xd6   :  { %v187_v29 = vsel %vm183_vm2, %v171_v43, %v186_v48  ;;  %v190_v30 = vsel %vm184_vm4, %v177_v52, 920167782  ;;  %v194_v9 = vsel %vm184_vm4, %v180_v8, 1326507024  ;;  %v267_v18 = vand.u32 31, %v265_v26 }
  0xd7   :  { %v191_v27 = vsel %vm183_vm2, %v174_v57, %v190_v30  ;;  %v195_v58 = vsel %vm183_vm2, %v177_v52, %v194_v9  ;;  %v188_v59 = vsel %vm182_vm5, %v185_v31, %v187_v29  ;;  %v14085_v48 = vmov 2475754826  }
  0xd8   :  { %v192_v12 = vsel %vm182_vm5, %v189_v34, %v191_v27  ;;  %v196_v11 = vsel %vm182_vm5, %v193_v49, %v195_v58  ;;  %v268_v8 = vsub.s32 32, %v267_v18  ;;  %v270_v57 = vshll.u32 %v14084_v13, %v267_v18 }
  0xd9   :  { %v10516_v22 = vmul.u32.u64.low %v10477_v53, %v196_v11  ;;  %v10517_v40 = vmul.u32.u64.high %v10477_v53, %v196_v11, %v10516_v22  ;;  %v10520_v42 = vmul.u32.u64.low %v10477_v53, %v192_v12  ;;  %v10521_v43 = vmul.u32.u64.high %v10477_v53, %v192_v12, %v10520_v42 }
  0xda   :  { %v273_v9 = vshll.u32 %v14085_v48, %v267_v18  ;;  %v14086_v7 = vmov 2131351028   ;;  %v204_v34 = vmul.u32 %v10477_v53, %v188_v59  ;;  %v14087_v49 = vmov 2102212464  }
  0xdb   :  { %v276_v31 = vshll.u32 %v14086_v7, %v267_v18  ;;  %v279_v29 = vshll.u32 %v14087_v49, %v267_v18  ;;  %vm285_vm6 = vcmp.lt.s32.totalorder %v266_v51, 1  ;;  %v1542_v39 = vand.u32 4294901760, %v10483_v50 }
  0xdc   :  { %v271_v26 = vshrl.u32 %v14085_v48, %v268_v8  ;;  %v274_v36 = vshrl.u32 %v14086_v7, %v268_v8  ;;  %v277_v52 = vshrl.u32 %v14087_v49, %v268_v8  ;;  %v14088_v30 = vmov 920167782  }
  0xdd   :  { %v282_v27 = vshll.u32 %v14088_v30, %v267_v18  ;;  %vm206_vm7 = vc.u32 %v10517_v40, %v10520_v42  ;;  %v207_v58 = vadd.s32 1, %v10521_v43  ;;  %v269_v53 = vshrl.u32 %v14084_v13, %v268_v8 }
  0xde   :  { %v280_v59 = vshrl.u32 %v14088_v30, %v268_v8  ;;  %v272_v12 = vor.u32 %v271_v26, %v270_v57  ;;  %v275_v11 = vor.u32 %v274_v36, %v273_v9  ;;  %v278_v50 = vor.u32 %v277_v52, %v276_v31 }
  0xdf   :  { %v14089_v22 = vmov 1326507024   ;;  %v208_v7 = vsel %vm206_vm7, %v207_v58, %v10521_v43  ;;  %vm288_vm8 = vcmp.lt.s32.totalorder %v266_v51, 4  ;;  %v14090_v18 = vand.u32 4294901760, %v10472_v45 }
  0xe0   :  { %v283_v10 = vshrl.u32 %v14089_v22, %v268_v8  ;;  %v281_v48 = vor.u32 %v280_v59, %v279_v29  ;;  %v209_v44 = vadd.s32 %v208_v7, %v204_v34  ;;  %vm286_vm9 = vcmp.lt.s32.totalorder %v266_v51, 2 }
  0xe1   :  { %v10543_v49 = vpack.c.bf16 %v1542_v39, %v14090_v18  ;;  %v290_v38 = vsel %vm288_vm8, %v278_v50, 2102212464  ;;  %vm287_vm10 = vcmp.lt.s32.totalorder %v266_v51, 3  ;;  %v293_v13 = vsel %vm285_vm6, %v272_v12, %v275_v11 }
  0xe2   :  { %v284_v41 = vor.u32 %v283_v10, %v282_v27  ;;  %v294_v57 = vsel %vm288_vm8, %v281_v48, 920167782  ;;  %v297_v9 = vsel %vm285_vm6, %v275_v11, %v278_v50  ;;  %v210_v31 = vadd.s32 536870912, %v209_v44 }
  0xe3   :  { %v289_v8 = vsel %vm285_vm6, %v269_v53, %v272_v12  ;;  %v295_v43 = vsel %vm287_vm10, %v278_v50, %v294_v57  ;;  %v291_v26 = vsel %vm287_vm10, %v275_v11, %v290_v38  ;;  %v852_v7 = vand.u32 4294901760, %v10488_v6 }
  0xe4   :  { %v298_v29 = vsel %vm288_vm8, %v284_v41, 1326507024  ;;  %v296_v45 = vsel %vm286_vm9, %v293_v13, %v295_v43  ;;  %v10550_v10 = vshrl.u32 %v210_v31, 30  ;;  %v864_v38 = vand.u32 4294901760, %v10496_v3 }
  0xe5   :  { %v299_v39 = vsel %vm287_vm10, %v281_v48, %v298_v29  ;;  %v10554_v36 = vmul.u32.u64.low %v10491_v55, %v296_v45  ;;  %v10555_v52 = vmul.u32.u64.high %v10491_v55, %v296_v45, %v10554_v36  ;;  %v14091_v41 = vand.u32 4294901760, %v10313_v46 }
  0xe6   :  { %v300_v34 = vsel %vm286_vm9, %v297_v9, %v299_v39  ;;  %v212_v6 = vshll.u32 %v10550_v10, 30  ;;  %v292_v48 = vsel %vm286_vm9, %v289_v8, %v291_v26  ;;  %v13896_v53 = vand.u32 4294901760, %v10319_v54 }
  0xe7   :  { %v10559_v27 = vmul.u32.u64.low %v10491_v55, %v300_v34  ;;  %v10560_v58 = vmul.u32.u64.high %v10491_v55, %v300_v34, %v10559_v27  ;;  %v1547_v13 = vsub.f32 %v10313_v46, %v14091_v41  ;;  %v13895_v59 = vand.u32 4294901760, %v10323_v56 }
  0xe8   :  { %v10570_v12 = vpack.c.bf16 %v864_v38, %v852_v7  ;;  %v13894_v11 = vand.u32 4294901760, %v10326_v62  ;;  %v213_v50 = vsub.s32 %v209_v44, %v212_v6  ;;  %v311_v18 = vadd.s32 1, %v10555_v52 }
  0xe9   :  { %v1559_v3 = vsub.f32 %v10319_v54, %v13896_v53  ;;  %v308_v57 = vmul.u32 %v10491_v55, %v292_v48  ;;  %vm310_vm11 = vc.u32 %v10560_v58, %v10554_v36  ;;  %v1548_v51 = vand.u32 4294901760, %v1547_v13 }
  0xea   :  { %v857_v9 = vsub.f32 %v10323_v56, %v13895_v59  ;;  %v215_v31 = vsub.s32 0, %v213_v50  ;;  %v312_v8 = vsel %vm310_vm11, %v311_v18, %v10555_v52  ;;  %v13893_v44 = vand.u32 4294901760, %v10330_v4 }
  0xeb   :  { %v313_v43 = vadd.s32 %v312_v8, %v308_v57  ;;  %v1560_v29 = vand.u32 4294901760, %v1559_v3  ;;  %v869_v55 = vsub.f32 %v10326_v62, %v13894_v11  ;;  %v13892_v13 = vand.u32 4294901760, %v10332_v5 }
  0xec   :  { %v858_v26 = vand.u32 4294901760, %v857_v9  ;;  %v7269_v45 = vmin.u32 %v215_v31, %v213_v50  ;;  %v1553_v52 = vsub.f32 %v10330_v4, %v13893_v44  ;;  %v14105_v31 = vand.u32 4294901760, %v10275_v17 }
  0xed   :  { %v314_v39 = vadd.s32 536870912, %v313_v43  ;;  %v10588_v7 = vpack.c.bf16 %v1560_v29, %v1548_v51  ;;  %v870_v34 = vand.u32 4294901760, %v869_v55  ;;  %v1565_v51 = vsub.f32 %v10332_v5, %v13892_v13 }
  0xee   :  { %v217_v27 = vclz %v7269_v45  ;;  %v1554_v57 = vand.u32 4294901760, %v1553_v52  ;;  %v205_v45 = vadd.s32 %v10520_v42, %v10517_v40  ;;  %v235_v52 = vsub.s32 4, %v10550_v10 }
  0xef   :  { %v10590_v38 = vshrl.u32 %v314_v39, 30  ;;  %v10592_v41 = vpack.c.bf16 %v870_v34, %v858_v26  ;;  %v1566_v55 = vand.u32 4294901760, %v1565_v51  ;;  %v14111_v11 = vand.u32 4294901760, %v10287_v23 }
  0xf0   :  { %v7270_v6 = vadd.s32 4294967294, %v217_v27  ;;  %v14117_v53 = vand.u32 4294901760, %v10296_v32  ;;  %v14118_v22 = vand.u32 4294901760, %v10298_v33  ;;  %vm241_vm8 = vweird.f32 %v10434_v37 }
  0xf1   :  { %v316_v3 = vshll.u32 %v10590_v38, 30  ;;  %v10615_v48 = vpack.c.bf16 %v1566_v55, %v1554_v57  ;;  %v236_v55 = vsel %vm151_vm13, %v235_v52, %v10550_v10  ;;  %v14102_v52 = vand.u32 4294901760, %v10267_v14 }
  0xf2   :  { %vm7271_vm12 = vcmp.lt.s32.totalorder %v7270_v6, 0  ;;  %vm666_vm9 = vcmask 523264  }
  0xf3   :  { %v220_v29 = vsel %vm7271_vm12, 0, %v7270_v6  ;;  %v317_v26 = vsub.s32 %v313_v43, %v316_v3  ;;  %v14103_v43 = vand.u32 4294901760, %v10270_v15 }
  0xf4   :  { %v221_v39 = vsub.s32 32, %v220_v29  ;;  %v225_v34 = vsub.s32 4294967266, %v220_v29  ;;  %v222_v27 = vshll.u32 %v213_v50, %v220_v29  ;;  %v14092_v50 = vand.u32 2147483647, %v10434_v37 }
  0xf5   :  { %v319_v18 = vsub.s32 0, %v317_v26 }
  0xf6   :  { %v223_v9 = vshrl.u32 %v205_v45, %v221_v39  ;;  %v226_v13 = vadd.s32 127, %v225_v34  ;;  %vm10626_vm14 = vcmp.le.f32.partialorder %v14092_v50, 0.7853982  ;;  %v14095_v45 = vld [vmem:[#allocation23_spill] sm:$0xff]  ;;  %v14096_v34 = vld [vmem:[#allocation25_spill] sm:$0xff]  ;;  %v14098_v39 = vand.u32 4294901760, %v10251_v63 }
  0xf7   :  { %v7273_v6 = vmin.u32 %v319_v18, %v317_v26  ;;  %v14099_v18 = vand.u32 4294901760, %v10253_v0  ;;  %v14121_v30 = vand.u32 4294901760, %v14095_v45 }
  0xf8   :  { %v224_v3 = vor.u32 %v223_v9, %v222_v27  ;;  %v227_v51 = vshll.u32 %v226_v13, 23  ;;  %v14097_v27 = vld [vmem:[#allocation26_spill] sm:$0xff] }
  0xf9   :  { %v321_v42 = vclz %v7273_v6  ;;  %v10653_v6 = vpack.c.bf16 %v14099_v18, %v14098_v39 }
  0xfa   :  { %v228_v29 = vor.u32 4788187, %v227_v51  ;;  %v231_v40 = vcvt.s32.f32 %v224_v3  ;;  %v14100_v51 = vand.u32 4294901760, %v10255_v1  ;;  %v14101_v3 = vand.u32 4294901760, %v10257_v2 }
  0xfb   :  { %v7274_v9 = vadd.s32 4294967294, %v321_v42  ;;  %v309_v42 = vadd.s32 %v10554_v36, %v10560_v58  ;;  %v10665_v36 = vpack.c.bf16 %v14103_v43, %v14102_v52  ;;  %v14104_v58 = vand.u32 4294901760, %v10273_v16 }
  0xfc   :  { %v229_v50 = vand.u32 2147483647, %v228_v29  ;;  %v10659_v29 = vpack.c.bf16 %v14101_v3, %v14100_v51  ;;  %v14106_v51 = vand.u32 4294901760, %v10278_v19  ;;  %v14108_v3 = vand.u32 4294901760, %v10282_v21 }
  0xfd   :  { %vm7275_vm15 = vcmp.lt.s32.totalorder %v7274_v9, 0  ;;  %v10671_v18 = vpack.c.bf16 %v14105_v31, %v14104_v58  ;;  %v14109_v43 = vand.u32 4294901760, %v10284_v47  ;;  %v14112_v31 = vand.u32 4294901760, %v10289_v24 }
  0xfe   :  { %v232_v10 = vmul.f32 %v231_v40, %v229_v50  ;;  %v324_v13 = vsel %vm7275_vm15, 0, %v7274_v9  ;;  %v14107_v40 = vand.u32 4294901760, %v10280_v20 }
  0xff   :  { %v325_v39 = vsub.s32 32, %v324_v13  ;;  %v326_v8 = vshll.u32 %v317_v26, %v324_v13  ;;  %v329_v44 = vsub.s32 4294967266, %v324_v13  ;;  %v10683_v52 = vpack.c.bf16 %v14109_v43, %v14108_v3 }
 0x100   :  { %v10677_v9 = vpack.c.bf16 %v14107_v40, %v14106_v51  ;;  %v233_v50 = vxor.u32 2147483648, %v232_v10  ;;  %v10689_v58 = vpack.c.bf16 %v14112_v31, %v14111_v11  ;;  %v14114_v26 = vand.u32 4294901760, %v10291_v25 }
 0x101   :  { %14110 = vst [vmem:[#allocation23_spill] sm:$0xff] %v10683_v52  ;;  %v14115_v13 = vand.u32 4294901760, %v10293_v28  ;;  %v327_v51 = vshrl.u32 %v309_v42, %v325_v39  ;;  %v330_v40 = vadd.s32 127, %v329_v44  ;;  %v10701_v3 = vpack.c.bf16 %v14118_v22, %v14117_v53 }
 0x102   :  { %14113 = vst [vmem:[#allocation25_spill] sm:$0xff] %v10689_v58  ;;  %v14120_v43 = vand.u32 4294901760, %v10302_v35  ;;  %v234_v31 = vsel %vm151_vm13, %v233_v50, %v232_v10  ;;  %v14124_v42 = vand.u32 4294901760, %v14097_v27  ;;  %v14126_v39 = vand.u32 4294901760, %v10313_v46 }
 0x103   :  { %v10695_v59 = vpack.c.bf16 %v14115_v13, %v14114_v26  ;;  %14119 = vst [vmem:[#allocation40_spill] sm:$0xff] %v10701_v3  ;;  %v14123_v26 = vand.u32 4294901760, %v14096_v34  ;;  %v14127_v22 = vand.u32 4294901760, %v10319_v54  ;;  %v14129_v13 = vand.u32 4294901760, %v10323_v56  ;;  %v14135_v3 = vld [vmem:[#allocation36_spill] sm:$0xff] }
 0x104   :  { %v10707_v11 = vpack.c.bf16 %v14121_v30, %v14120_v43  ;;  %v14130_v30 = vand.u32 4294901760, %v10326_v62  ;;  %v237_v10 = vsel %vm10626_vm14, %v10434_v37, %v234_v31  ;;  %v328_v50 = vor.u32 %v327_v51, %v326_v8 }
 0x105   :  { %14116 = vst [vmem:[#allocation26_spill] sm:$0xff] %v10695_v59  ;;  %v10715_v44 = vpack.c.bf16 %v14124_v42, %v14123_v26  ;;  %v10721_v53 = vpack.c.bf16 %v14127_v22, %v14126_v39  ;;  %v14132_v26 = vand.u32 4294901760, %v10330_v4  ;;  %v14133_v42 = vand.u32 4294901760, %v10332_v5 }
 0x106   :  { %14122 = vst [vmem:[#allocation41_spill] sm:$0xff] %v10707_v11  ;;  %v10727_v43 = vpack.c.bf16 %v14130_v30, %v14129_v13  ;;  %v331_v11 = vshll.u32 %v330_v40, 23  ;;  %9941 = vcosq.f32 %v237_v10  ;;  %v238_v39 = vsel %vm10626_vm14, 0, %v236_v55 }
 0x107   :  { %14125 = vst [vmem:[#allocation42_spill] sm:$0xff] %v10715_v44  ;;  %14128 = vst [vmem:[#allocation43_spill] sm:$0xff] %v10721_v53  ;;  %v10736_v44 = vpack.c.bf16 %v14133_v42, %v14132_v26  ;;  %9943 = vsinq.f32 %v237_v10  ;;  %v335_v30 = vcvt.s32.f32 %v328_v50  ;;  %v339_v31 = vsub.s32 4, %v10590_v38 }
 0x108   :  { %14131 = vst [vmem:[#allocation44_spill] sm:$0xff] %v10727_v43  ;;  %v332_v22 = vor.u32 4788187, %v331_v11  ;;  %v242_v43 = vadd.s32 3, %v238_v39  ;;  %v459_v8 = vand.u32 3, %v238_v39  ;;  %vm255_vm0 = vcmp.lt.s32.totalorder %v14135_v3, 0 }
 0x109   :  { %14134 = vst [vmem:[#allocation45_spill] sm:$0xff] %v10736_v44  ;;  %v14136_v26 = vand.u32 2147483647, %v14135_v3  ;;  %v340_v57 = vsel %vm255_vm0, %v339_v31, %v10590_v38  ;;  %v7267_v38 = vld [vmem:[%s13788_s1 + $0x3] ss:$0 sm:$0xff] }
 0x10a   :  { %v333_v13 = vand.u32 2147483647, %v332_v22  ;;  %v243_v40 = vand.u32 3, %v242_v43  ;;  %vm464_vm2 = vcmp.eq.s32.totalorder %v459_v8, 2  ;;  %vm461_vm5 = vcmp.eq.s32.totalorder %v459_v8, 0 }
 0x10b   :  { %vm254_vm1 = vcmp.le.f32.partialorder %v14136_v26, 0.7853982  ;;  %vm460_vm7 = vcmp.lt.s32.totalorder %v459_v8, 2  ;;  %v7276_v31 = vld [vmem:[%s13788_s1 + $0x4] ss:$0 sm:$0xff] }
 0x10c   :  { %v336_v53 = vmul.f32 %v335_v30, %v333_v13  ;;  %vm248_vm3 = vcmp.eq.s32.totalorder %v243_v40, 2  ;;  %v342_v39 = vsel %vm254_vm1, 0, %v340_v57  ;;  %vm245_vm4 = vcmp.eq.s32.totalorder %v243_v40, 0  ;;  %v7285_v8 = vld [vmem:[%s13788_s1 + $0x5] ss:$0 sm:$0xff] }
 0x10d   :  { %vm244_vm6 = vcmp.lt.s32.totalorder %v243_v40, 2  ;;  %v146_v40 = vmul.f32 %v7267_v38, %v10434_v37 }
 0x10e   :  { %v337_v51 = vxor.u32 2147483648, %v336_v53 }
 0x110   :  { %v338_v42 = vsel %vm255_vm0, %v337_v51, %v336_v53  ;;  %v9942_v55 = vpop.eup %9941  ;;  %vm345_vm0 = vweird.f32 %v14135_v3 }
 0x111   :  { %v341_v11 = vsel %vm254_vm1, %v14135_v3, %v338_v42  ;;  %v9944_v10 = vpop.eup %9943  ;;  %v249_v50 = vxor.u32 2147483648, %v9942_v55  ;;  %v346_v42 = vadd.s32 3, %v342_v39 }
 0x112   :  { %9945 = vcosq.f32 %v341_v11  ;;  %v246_v22 = vxor.u32 2147483648, %v9944_v10 }
 0x113   :  { %9947 = vsinq.f32 %v341_v11  ;;  %v250_v43 = vsel %vm248_vm3, %v249_v50, %v9944_v10  ;;  %v466_v13 = vsel %vm464_vm2, %v249_v50, %v9944_v10  ;;  %v562_v10 = vand.u32 3, %v342_v39 }
 0x114   :  { %v247_v30 = vsel %vm245_vm4, %v9942_v55, %v246_v22  ;;  %v463_v53 = vsel %vm461_vm5, %v9942_v55, %v246_v22  ;;  %v347_v44 = vand.u32 3, %v346_v42 }
 0x115   :  { %v251_v51 = vsel %vm244_vm6, %v247_v30, %v250_v43  ;;  %v467_v26 = vsel %vm460_vm7, %v463_v53, %v466_v13  ;;  %vm564_vm10 = vcmp.eq.s32.totalorder %v562_v10, 0  ;;  %vm567_vm12 = vcmp.eq.s32.totalorder %v562_v10, 2 }
 0x116   :  { %v252_v57 = vsel %vm241_vm8, nan, %v251_v51  ;;  %v468_v11 = vsel %vm241_vm8, nan, %v467_v26  ;;  %vm352_vm11 = vcmp.eq.s32.totalorder %v347_v44, 2  ;;  %vm349_vm13 = vcmp.eq.s32.totalorder %v347_v44, 0 }
 0x117   :  { %v361_v55 = vmul.f32 %v7276_v31, %v252_v57  ;;  %v576_v22 = vmul.f32 %v7285_v8, %v468_v11  ;;  %vm348_vm14 = vcmp.lt.s32.totalorder %v347_v44, 2  ;;  %vm563_vm15 = vcmp.lt.s32.totalorder %v562_v10, 2 }
 0x119   :  { %v363_v50 = vadd.f32 %v361_v55, %v146_v40 }
 0x11b   :  { %v578_v58 = vadd.f32 %v576_v22, %v363_v50 }
 0x11c   :  { %v9946_v59 = vpop.eup %9945 }
 0x11d   :  { %v9948_v52 = vpop.eup %9947  ;;  %v353_v43 = vxor.u32 2147483648, %v9946_v59  ;;  %v668_v30 = vsel %vm666_vm9, %v578_v58, 0  ;;  %v147_v58 = vmul.f32 %v7267_v38, %v14135_v3  ;;  %v14142_v3 = vld [vmem:[#allocation30_spill] sm:$0xff]  ;;  %v14143_v38 = vld [vmem:[#allocation31_spill] sm:$0xff] }
 0x11e   :  { %v350_v13 = vxor.u32 2147483648, %v9948_v52  ;;  %v10758_v37 = vand.u32 4294901760, %v668_v30 }
 0x11f   :  { %v354_v53 = vsel %vm352_vm11, %v353_v43, %v9948_v52  ;;  %v569_v51 = vsel %vm567_vm12, %v353_v43, %v9948_v52 }
 0x120   :  { %14137 = vst [vmem:[#allocation36_spill] sm:$0xff] %v10758_v37  ;;  %v351_v39 = vsel %vm349_vm13, %v9946_v59, %v350_v13  ;;  %v566_v26 = vsel %vm564_vm10, %v9946_v59, %v350_v13  ;;  %v10762_v11 = vsub.f32 %v668_v30, %v10758_v37 }
 0x121   :  { %v355_v42 = vsel %vm348_vm14, %v351_v39, %v354_v53  ;;  %v570_v57 = vsel %vm563_vm15, %v566_v26, %v569_v51  ;;  %v14146_v53 = vmov 0.0   ;;  %v14148_v39 = vld [vmem:[#allocation34_spill] sm:$0xff]  ;;  %v14149_v26 = vld [vmem:[#allocation35_spill] sm:$0xff] }
 0x122   :  { %14138 = vst [vmem:[#allocation46_spill] sm:$0xff] %v10762_v11  ;;  %v356_v40 = vsel %vm345_vm0, nan, %v355_v42  ;;  %v571_v55 = vsel %vm345_vm0, nan, %v570_v57  ;;  %v10766_v52 = vand.u32 4294901760, %v10762_v11  ;;  %v14151_v57 = vld [vmem:[#allocation37_spill] sm:$0xff] }
 0x123   :  { %v362_v50 = vmul.f32 %v7276_v31, %v356_v40  ;;  %v577_v44 = vmul.f32 %v7285_v8, %v571_v55  ;;  %v14144_v31 = vld [vmem:[#allocation32_spill] sm:$0xff]  ;;  %v14145_v8 = vld [vmem:[#allocation33_spill] sm:$0xff]  ;;  %v14152_v40 = vld [vmem:[#allocation38_spill] sm:$0xff] }
 0x124   :  { %14139 = vst [vmem:[#allocation47_spill] sm:$0xff] %v10766_v52  ;;  %v757_v59 = vsub.f32 %v10762_v11, %v10766_v52 }
 0x125   :  { %v364_v22 = vadd.f32 %v362_v50, %v147_v58  ;;  %v14154_v50 = vld [vmem:[#allocation39_spill] sm:$0xff] }
 0x126   :  { %v10770_v43 = vand.u32 4294901760, %v757_v59 }
 0x127   :  { %v579_v10 = vadd.f32 %v577_v44, %v364_v22  ;;  %v14155_v22 = vld [vmem:[#allocation17_spill] sm:$0xff]  ;;  %v14156_v44 = vld [vmem:[#allocation18_spill] sm:$0xff] }
 0x128   :  { %14140 = vst [vmem:[#allocation48_spill] sm:$0xff] %v10770_v43  ;;  %759 = vmatmul.mubr.f32.vlgmr.msra.gmra.mrb[0].mxu0 %v10770_v43  ;;  %1455 = vmatmul.mubr.f32.vlgmr.msra.gmra.mrb[0].mxu1 %v10770_v43  ;;  %v8626_v59 = vpack.c.bf16 %v14156_v44, %v14155_v22 }
 0x129   :  { %v671_v13 = vsel %vm666_vm9, %v579_v10, 0  ;;  %8613 = vmatpush1.bf16.msra.mxu0 %v14142_v3  ;;  %8709 = vmatpush1.bf16.msra.mxu1 %v14143_v38  ;;  %v14188_v10 = vand.u32 4294901760, %v14155_v22  ;;  %v14190_v38 = vand.u32 4294901760, %v10246_v60  ;;  %v606_v22 = vld [vmem:[#allocation2 + $0x20] sm:$0xff] }
 0x12a   :  { %v10775_v30 = vand.u32 4294901760, %v671_v13  ;;  %8615 = vmatprep.subr.bf16.mxu0 %v14144_v31  ;;  %8711 = vmatprep.subr.bf16.mxu1 %v14145_v8  ;;  %v14191_v31 = vand.u32 4294901760, %v10248_v61 }
 0x12b   :  { %764 = vmatprep.mubr.f32.mxu0 %v14146_v53  ;;  %1460 = vmatprep.mubr.f32.mxu1 %v14146_v53 }
 0x12c   :  { %14141 = vst [vmem:[#allocation49_spill] sm:$0xff] %v10775_v30  ;;  %v10784_v51 = vsub.f32 %v671_v13, %v10775_v30  ;;  %v14189_v13 = vand.u32 4294901760, %v14156_v44  ;;  %v8754_v8 = vpack.c.bf16 %v14191_v31, %v14190_v38  ;;  %v614_v44 = vld [vmem:[#allocation2 + $0x60] sm:$0xff]  ;;  %v632_v38 = vld [vmem:[#allocation2 + $0xf0] sm:$0xff] }
 0x12d   :  { %8617 = vmatpush1.bf16.msra.mxu0 %v14148_v39  ;;  %8713 = vmatpush1.bf16.msra.mxu1 %v14149_v26  ;;  %v14192_v39 = vld [vmem:[#allocation28_spill] sm:$0xff]  ;;  %v14193_v26 = vld [vmem:[#allocation29_spill] sm:$0xff] }
 0x12e   :  { %14147 = vst [vmem:[#allocation30_spill] sm:$0xff] %v10784_v51  ;;  %v10789_v42 = vand.u32 4294901760, %v10784_v51  ;;  %8619 = vmatprep.subr.bf16.mxu0 %v14151_v57  ;;  %8715 = vmatprep.subr.bf16.mxu1 %v14152_v40  ;;  %v8658_v3 = vpack.c.bf16 %v14189_v13, %v14188_v10  ;;  %v607_v57 = vld [vmem:[#allocation2 + $0x28] sm:$0xff] }
 0x12f   :  { %v615_v40 = vld [vmem:[#allocation2 + $0x68] sm:$0xff] }
 0x130   :  { %14150 = vst [vmem:[#allocation31_spill] sm:$0xff] %v10789_v42  ;;  %v768_v55 = vsub.f32 %v10784_v51, %v10789_v42 }
 0x131   :  { %8621 = vmatpush1.bf16.msra.mxu0 %v14154_v50  ;;  %8717 = vmatpush1.bf16.msra.mxu1 %v10543_v49  ;;  %v14157_v49 = vpack.c.bf16 %v10248_v61, %v10246_v60  ;;  %v617_v50 = vld [vmem:[#allocation2 + $0x78] sm:$0xff]  ;;  %v2065_v60 = vand.u32 4294901760, %v607_v57  ;;  %v2069_v61 = vand.u32 4294901760, %v615_v40 }
 0x132   :  { %v10795_v58 = vand.u32 4294901760, %v768_v55  ;;  %8623 = vmatprep.subr.bf16.mxu0 %v10570_v12  ;;  %8719 = vmatprep.subr.bf16.mxu1 %v10588_v7  ;;  %v14158_v12 = vpack.c.bf16 %v10253_v0, %v10251_v63  ;;  %v14159_v7 = vpack.c.bf16 %v10257_v2, %v10255_v1  ;;  %v14162_v63 = vpack.c.bf16 %v10280_v20, %v10278_v19  ;;  %v14172_v20 = vld [vmem:[#allocation9_spill] sm:$0xff]  ;;  %v609_v55 = vld [vmem:[#allocation2 + $0x38] sm:$0xff] }
 0x133   :  { %v14163_v0 = vpack.c.bf16 %v10284_v47, %v10282_v21  ;;  %v14164_v1 = vpack.c.bf16 %v10289_v24, %v10287_v23  ;;  %v14165_v2 = vpack.c.bf16 %v10293_v28, %v10291_v25  ;;  %v14167_v47 = vpack.c.bf16 %v14095_v45, %v10302_v35  ;;  %v14173_v21 = vld [vmem:[#allocation10_spill] sm:$0xff]  ;;  %v14174_v23 = vld [vmem:[#allocation11_spill] sm:$0xff]  ;;  %v14175_v24 = vld [vmem:[#allocation12_spill] sm:$0xff] }
 0x134   :  { %14153 = vst [vmem:[#allocation32_spill] sm:$0xff] %v10795_v58  ;;  %770 = vmatmul.mubr.f32.gmra.mrb[2].mxu0 %v10795_v58  ;;  %1466 = vmatmul.mubr.f32.gmra.mrb[2].mxu1 %v10795_v58  ;;  %v14171_v19 = vpack.c.bf16 %v10332_v5, %v10330_v4  ;;  %v14176_v25 = vld [vmem:[#allocation13_spill] sm:$0xff]  ;;  %v14177_v28 = vld [vmem:[#allocation14_spill] sm:$0xff]  ;;  %v14179_v35 = vld [vmem:[#allocation15_spill] sm:$0xff] }
 0x135   :  { %920 = vmatprep.mubr.f32.mxu0 %v14146_v53  ;;  %1616 = vmatprep.mubr.f32.mxu1 %v14146_v53  ;;  %v14184_v5 = vld [vmem:[#allocation21_spill] sm:$0xff]  ;;  %v14185_v45 = vld [vmem:[#allocation22_spill] sm:$0xff] }
 0x136   :  { %8625 = vmatpush1.bf16.msra.mxu0 %v10592_v41  ;;  %8721 = vmatpush1.bf16.msra.mxu1 %v10615_v48  ;;  %v14160_v41 = vpack.c.bf16 %v10270_v15, %v10267_v14  ;;  %v14161_v48 = vpack.c.bf16 %v10275_v17, %v10273_v16  ;;  %v14166_v14 = vpack.c.bf16 %v10298_v33, %v10296_v32  ;;  %v9997_v32 = vld [vmem:[%s13787_s0] sm:$0xff] }
 0x137   :  { %8627 = vmatprep.subr.bf16.mxu0 %v8626_v59  ;;  %8723 = vmatprep.subr.bf16.mxu1 %v14157_v49  ;;  %v14168_v15 = vpack.c.bf16 %v14097_v27, %v14096_v34  ;;  %v14169_v16 = vpack.c.bf16 %v10319_v54, %v10313_v46  ;;  %v14170_v17 = vpack.c.bf16 %v10326_v62, %v10323_v56  ;;  %v14180_v46 = vld [vmem:[#allocation16_spill] sm:$0xff]  ;;  %v14181_v54 = vld [vmem:[#allocation19_spill] sm:$0xff]  ;;  %v9998_v62 = vld [vmem:[%s13787_s0 + $0x8] sm:$0xff] }
 0x138   :  { %v10877_v33 = vmul.f32 %v9997_v32, %v9997_v32  ;;  %v14182_v56 = vld [vmem:[#allocation20_spill] sm:$0xff]  ;;  %v10891_v4 = vmul.f32 %v9998_v62, %v9998_v62  ;;  %v14187_v27 = vld [vmem:[#allocation27_spill] sm:$0xff]  ;;  %v646_v58 = vld [vmem:[#allocation2 + $0x160] sm:$0xff] }
 0x139   :  { %922 = vmatmul.mubr.f32.vlgmr.msra.gmra.mrb[0].mxu0 %v10758_v37  ;;  %1618 = vmatmul.mubr.f32.vlgmr.msra.gmra.mrb[0].mxu1 %v10758_v37  ;;  %v14186_v34 = vld [vmem:[#allocation24_spill] sm:$0xff]  ;;  %v608_v59 = vld [vmem:[#allocation2 + $0x30] sm:$0xff] }
 0x13a   :  { %8629 = vmatpush1.bf16.msra.mxu0 %v14158_v12  ;;  %8725 = vmatpush1.bf16.msra.mxu1 %v14159_v7  ;;  %14178 = vst [vmem:[#allocation33_spill] sm:$0xff] %v10877_v33  ;;  %14183 = vst [vmem:[#allocation34_spill] sm:$0xff] %v10891_v4  ;;  %v616_v49 = vld [vmem:[#allocation2 + $0x70] sm:$0xff]  ;;  %v2761_v12 = vand.u32 4294901760, %v609_v55  ;;  %v2765_v7 = vand.u32 4294901760, %v617_v50 }
 0x13b   :  { %927 = vmatprep.mubr.f32.mxu0 %v14146_v53  ;;  %1623 = vmatprep.mubr.f32.mxu1 %v14146_v53 }
 0x13c   :  { %8631 = vmatprep.subr.bf16.mxu0 %v14160_v41  ;;  %8727 = vmatprep.subr.bf16.mxu1 %v14161_v48  ;;  %v623_v41 = vld [vmem:[#allocation2 + $0xa8] sm:$0xff]  ;;  %v10932_v32 = vpack.c.bf16 %v2765_v7, %v2761_v12  ;;  %v10934_v62 = vsub.f32 %v617_v50, %v2765_v7 }
 0x13d   :  { %929 = vmatmul.mubr.f32.gmra.mrb[2].mxu0 %v10775_v30  ;;  %1625 = vmatmul.mubr.f32.gmra.mrb[2].mxu1 %v10775_v30  ;;  %v631_v48 = vld [vmem:[#allocation2 + $0xe8] sm:$0xff]  ;;  %v2073_v10 = vand.u32 4294901760, %v623_v41 }
 0x13e   :  { %8633 = vmatpush1.bf16.msra.mxu0 %v14162_v63  ;;  %8729 = vmatpush1.bf16.msra.mxu1 %v14163_v0  ;;  %v14194_v63 = vld [vmem:[#allocation23_spill] sm:$0xff]  ;;  %v10920_v0 = vpack.c.bf16 %v2069_v61, %v2065_v60  ;;  %14198 = vst [vmem:[#allocation37_spill] sm:$0xff] %v10932_v32  ;;  %v2077_v13 = vand.u32 4294901760, %v631_v48 }
 0x13f   :  { %8635 = vmatprep.subr.bf16.mxu0 %v14164_v1  ;;  %8731 = vmatprep.subr.bf16.mxu1 %v14165_v2  ;;  %v2763_v1 = vand.u32 4294901760, %v608_v59  ;;  %v625_v2 = vld [vmem:[#allocation2 + $0xb8] sm:$0xff] }
 0x140   :  { %1031 = vmatprep.mubr.f32.mxu0 %v14146_v53  ;;  %1727 = vmatprep.mubr.f32.mxu1 %v14146_v53  ;;  %14195 = vst [vmem:[#allocation35_spill] sm:$0xff] %v10920_v0  ;;  %v10958_v43 = vsub.f32 %v631_v48, %v2077_v13  ;;  %v655_v48 = vld [vmem:[#allocation2 + $0x1a8] sm:$0xff] }
 0x141   :  { %584 = vrot.lane.b32.xlu1 %v10877_v33, %s10086_s2  ;;  %592 = vrot.lane.b32.xlu0 %v10877_v33, %s10087_s28 }
 0x142   :  { %8637 = vmatpush1.bf16.msra.mxu0 %v14166_v14  ;;  %8733 = vmatpush1.bf16.msra.mxu1 %v14167_v47  ;;  %v14196_v14 = vld [vmem:[#allocation25_spill] sm:$0xff]  ;;  %v14197_v47 = vld [vmem:[#allocation26_spill] sm:$0xff] }
 0x143   :  { %8639 = vmatprep.subr.bf16.mxu0 %v14168_v15  ;;  %8735 = vmatprep.subr.bf16.mxu1 %v14169_v16  ;;  %v10924_v15 = vsub.f32 %v607_v57, %v2065_v60  ;;  %v10926_v16 = vsub.f32 %v615_v40, %v2069_v61  ;;  %v2769_v57 = vand.u32 4294901760, %v625_v2  ;;  %v647_v60 = vld [vmem:[#allocation2 + $0x168] sm:$0xff]  ;;  %v14200_v61 = vld [vmem:[#allocation40_spill] sm:$0xff] }
 0x145   :  { %586 = vrot.lane.b32.xlu1 %v10891_v4, %s10086_s2 }
 0x146   :  { %8641 = vmatpush1.bf16.msra.mxu0 %v14170_v17  ;;  %8737 = vmatpush1.bf16.msra.mxu1 %v14171_v19  ;;  %v10928_v17 = vsub.f32 %v609_v55, %v2761_v12  ;;  %v622_v19 = vld [vmem:[#allocation2 + $0xa0] sm:$0xff]  ;;  %v639_v55 = vld [vmem:[#allocation2 + $0x128] sm:$0xff] }
 0x147   :  { %8643 = vmatprep.subr.bf16.mxu0 %v14172_v20  ;;  %8739 = vmatprep.subr.bf16.mxu1 %v14173_v21  ;;  %v14201_v12 = vld [vmem:[#allocation41_spill] sm:$0xff] }
 0x149   :  { %1034 = vmatmul.mubr.f32.vlgmr.msra.gmra.mrb[0].mxu0 %v10762_v11  ;;  %1730 = vmatmul.mubr.f32.vlgmr.msra.gmra.mrb[0].mxu1 %v10762_v11  ;;  %v638_v11 = vld [vmem:[#allocation2 + $0x120] sm:$0xff] }
 0x14a   :  { %8645 = vmatpush1.bf16.msra.mxu0 %v14174_v23  ;;  %8741 = vmatpush1.bf16.msra.mxu1 %v14175_v24 }
 0x14b   :  { %1039 = vmatprep.mubr.f32.mxu0 %v14146_v53  ;;  %1735 = vmatprep.mubr.f32.mxu1 %v14146_v53 }
 0x14c   :  { %8647 = vmatprep.subr.bf16.mxu0 %v14176_v25  ;;  %8743 = vmatprep.subr.bf16.mxu1 %v14177_v28 }
 0x14d   :  { %1042 = vmatmul.mubr.f32.gmra.mrb[2].mxu0 %v10784_v51  ;;  %1738 = vmatmul.mubr.f32.gmra.mrb[2].mxu1 %v10784_v51  ;;  %v10954_v51 = vpack.c.bf16 %v2077_v13, %v2073_v10  ;;  %v663_v13 = vld [vmem:[#allocation2 + $0x1e8] sm:$0xff] }
 0x14e   :  { %8649 = vmatpush1.bf16.msra.mxu0 %v14179_v35  ;;  %8745 = vmatpush1.bf16.msra.mxu1 %v14180_v46 }
 0x14f   :  { %8651 = vmatprep.subr.bf16.mxu0 %v14181_v54  ;;  %8747 = vmatprep.subr.bf16.mxu1 %v14182_v56  ;;  %14205 = vst [vmem:[#allocation17_spill] sm:$0xff] %v10954_v51 }
 0x150   :  { %1128 = vmatprep.mubr.f32.mxu0 %v14146_v53  ;;  %1824 = vmatprep.mubr.f32.mxu1 %v14146_v53 }
 0x151   :  { %594 = vrot.lane.b32.xlu1 %v10891_v4, %s10087_s28  ;;  %v2775_v4 = vand.u32 4294901760, %v632_v38 }
 0x152   :  { %8653 = vmatpush1.bf16.msra.mxu0 %v14184_v5  ;;  %8749 = vmatpush1.bf16.msra.mxu1 %v14185_v45 }
 0x153   :  { %8655 = vmatprep.subr.bf16.mxu0 %v14186_v34  ;;  %8751 = vmatprep.subr.bf16.mxu1 %v14187_v27 }
 0x156   :  { %8657 = vmatpush1.bf16.msra.mxu0 %v14192_v39  ;;  %8753 = vmatpush1.bf16.msra.mxu1 %v14193_v26 }
 0x157   :  { %8659 = vmatprep.subr.bf16.mxu0 %v8658_v3  ;;  %8755 = vmatprep.subr.bf16.mxu1 %v8754_v8  ;;  %v624_v3 = vld [vmem:[#allocation2 + $0xb0] sm:$0xff] }
 0x159   :  { %1132 = vmatmul.mubr.f32.vlgmr.msra.gmra.mrb[0].mxu0 %v10766_v52  ;;  %1828 = vmatmul.mubr.f32.vlgmr.msra.gmra.mrb[0].mxu1 %v10766_v52  ;;  %v641_v52 = vld [vmem:[#allocation2 + $0x138] sm:$0xff] }
 0x15a   :  { %8661 = vmatpush1.bf16.msra.mxu0 %v10653_v6  ;;  %8757 = vmatpush1.bf16.msra.mxu1 %v10659_v29  ;;  %v2067_v6 = vand.u32 4294901760, %v606_v22  ;;  %v2071_v29 = vand.u32 4294901760, %v614_v44 }
 0x15b   :  { %1137 = vmatprep.mubr.f32.mxu0 %v14146_v53  ;;  %1833 = vmatprep.mubr.f32.mxu1 %v14146_v53 }
 0x15c   :  { %8663 = vmatprep.subr.bf16.mxu0 %v10665_v36  ;;  %8759 = vmatprep.subr.bf16.mxu1 %v10671_v18  ;;  %v2767_v36 = vand.u32 4294901760, %v616_v49  ;;  %v633_v18 = vld [vmem:[#allocation2 + $0xf8] sm:$0xff]  ;;  %v10936_v31 = vpack.c.bf16 %v2071_v29, %v2067_v6  ;;  %v10938_v8 = vsub.f32 %v606_v22, %v2067_v6  ;;  %v10944_v50 = vsub.f32 %v614_v44, %v2071_v29  ;;  %v14204_v22 = vld [vmem:[#allocation43_spill] sm:$0xff] }
 0x15d   :  { %1141 = vmatmul.mubr.f32.gmra.mrb[2].mxu0 %v10789_v42  ;;  %1837 = vmatmul.mubr.f32.gmra.mrb[2].mxu1 %v10789_v42  ;;  %v2773_v40 = vand.u32 4294901760, %v633_v18  ;;  %v10950_v6 = vsub.f32 %v608_v59, %v2763_v1  ;;  %v2771_v42 = vand.u32 4294901760, %v624_v3  ;;  %v10956_v44 = vsub.f32 %v623_v41, %v2073_v10 }
 0x15e   :  { %8665 = vmatpush1.bf16.msra.mxu0 %v10677_v9  ;;  %8761 = vmatpush1.bf16.msra.mxu1 %v14194_v63  ;;  %v630_v9 = vld [vmem:[#allocation2 + $0xe0] sm:$0xff]  ;;  %14199 = vst [vmem:[#allocation38_spill] sm:$0xff] %v10936_v31  ;;  %v10946_v7 = vpack.c.bf16 %v2767_v36, %v2763_v1  ;;  %v2075_v63 = vand.u32 4294901760, %v622_v19  ;;  %v10952_v33 = vsub.f32 %v616_v49, %v2767_v36  ;;  %v2081_v29 = vand.u32 4294901760, %v639_v55  ;;  %v640_v1 = vld [vmem:[#allocation2 + $0x130] sm:$0xff]  ;;  %v14207_v36 = vld [vmem:[#allocation44_spill] sm:$0xff] }
 0x15f   :  { %8667 = vmatprep.subr.bf16.mxu0 %v14196_v14  ;;  %8763 = vmatprep.subr.bf16.mxu1 %v14197_v47  ;;  %v2079_v14 = vand.u32 4294901760, %v630_v9  ;;  %v14203_v47 = vld [vmem:[#allocation42_spill] sm:$0xff]  ;;  %v10962_v59 = vsub.f32 %v625_v2, %v2769_v57  ;;  %v10964_v49 = vsub.f32 %v633_v18, %v2773_v40  ;;  %v2777_v10 = vand.u32 4294901760, %v641_v52  ;;  %v648_v31 = vld [vmem:[#allocation2 + $0x170] sm:$0xff] }
 0x160   :  { %1259 = vmatprep.mubr.f32.mxu0 %v14146_v53  ;;  %1955 = vmatprep.mubr.f32.mxu1 %v14146_v53  ;;  %14202 = vst [vmem:[#allocation39_spill] sm:$0xff] %v10946_v7  ;;  %v10970_v41 = vsub.f32 %v622_v19, %v2075_v63  ;;  %v10976_v18 = vpack.c.bf16 %v2775_v4, %v2771_v42 }
 0x161   :  { %v10968_v51 = vpack.c.bf16 %v2079_v14, %v2075_v63  ;;  %v10974_v2 = vsub.f32 %v630_v9, %v2079_v14  ;;  %v10984_v63 = vsub.f32 %v639_v55, %v2081_v29  ;;  %v2089_v9 = vand.u32 4294901760, %v655_v48 }
 0x162   :  { %8669 = vmatpush1.bf16.msra.mxu0 %v14200_v61  ;;  %8765 = vmatpush1.bf16.msra.mxu1 %v14201_v12  ;;  %v649_v61 = vld [vmem:[#allocation2 + $0x178] sm:$0xff]  ;;  %v2085_v12 = vand.u32 4294901760, %v647_v60  ;;  %14210 = vst [vmem:[#allocation10_spill] sm:$0xff] %v10970_v41  ;;  %14212 = vst [vmem:[#allocation12_spill] sm:$0xff] %v10976_v18  ;;  %v2093_v14 = vand.u32 4294901760, %v663_v13  ;;  %v654_v18 = vld [vmem:[#allocation2 + $0x1a0] sm:$0xff] }
 0x163   :  { %8671 = vmatprep.subr.bf16.mxu0 %v14203_v47  ;;  %8767 = vmatprep.subr.bf16.mxu1 %v14204_v22  ;;  %v10960_v47 = vpack.c.bf16 %v2773_v40, %v2769_v57  ;;  %v14208_v22 = vld [vmem:[#allocation45_spill] sm:$0xff]  ;;  %14209 = vst [vmem:[#allocation9_spill] sm:$0xff] %v10968_v51  ;;  %v2781_v7 = vand.u32 4294901760, %v649_v61  ;;  %14211 = vst [vmem:[#allocation11_spill] sm:$0xff] %v10974_v2  ;;  %v2083_v57 = vand.u32 4294901760, %v638_v11  ;;  %v2087_v40 = vand.u32 4294901760, %v646_v58 }
 0x164   :  { %v10982_v19 = vpack.c.bf16 %v2085_v12, %v2081_v29  ;;  %v657_v51 = vld [vmem:[#allocation2 + $0x1b8] sm:$0xff] }
 0x165   :  { %14206 = vst [vmem:[#allocation18_spill] sm:$0xff] %v10960_v47  ;;  %v665_v47 = vld [vmem:[#allocation2 + $0x1f8] sm:$0xff]  ;;  %v11000_v55 = vpack.c.bf16 %v2087_v40, %v2083_v57  ;;  %v2785_v29 = vand.u32 4294901760, %v657_v51 }
 0x166   :  { %8673 = vmatpush1.bf16.msra.mxu0 %v14207_v36  ;;  %8769 = vmatpush1.bf16.msra.mxu1 %v14208_v22  ;;  %v10978_v36 = vsub.f32 %v624_v3, %v2771_v42  ;;  %v10980_v22 = vsub.f32 %v632_v38, %v2775_v4  ;;  %14213 = vst [vmem:[#allocation13_spill] sm:$0xff] %v10982_v19  ;;  %v2789_v19 = vand.u32 4294901760, %v665_v47 }
 0x167   :  { %8675 = vmatprep.subr.bf16.mxu0 %v14172_v20  ;;  %8771 = vmatprep.subr.bf16.mxu1 %v14173_v21  ;;  %v2779_v20 = vand.u32 4294901760, %v640_v1  ;;  %v2783_v21 = vand.u32 4294901760, %v648_v31  ;;  %v10990_v42 = vsub.f32 %v647_v60, %v2085_v12  ;;  %v10992_v4 = vpack.c.bf16 %v2781_v7, %v2777_v10  ;;  %14215 = vst [vmem:[#allocation15_spill] sm:$0xff] %v11000_v55  ;;  %v656_v12 = vld [vmem:[#allocation2 + $0x1b0] sm:$0xff] }
 0x168   :  { %v10994_v3 = vsub.f32 %v641_v52, %v2777_v10  ;;  %v10998_v38 = vsub.f32 %v649_v61, %v2781_v7  ;;  %v11006_v52 = vsub.f32 %v646_v58, %v2087_v40  ;;  %v11016_v10 = vpack.c.bf16 %v2093_v14, %v2089_v9 }
 0x169   :  { %1261 = vmatmul.mubr.f32.vlgmr.msra.gmra.mrb[0].mxu0 %v10758_v37  ;;  %1957 = vmatmul.mubr.f32.vlgmr.msra.gmra.mrb[0].mxu1 %v10758_v37  ;;  %14214 = vst [vmem:[#allocation14_spill] sm:$0xff] %v10992_v4  ;;  %v11008_v60 = vsub.f32 %v640_v1, %v2779_v20  ;;  %v11012_v7 = vpack.c.bf16 %v2783_v21, %v2779_v20  ;;  %v2787_v40 = vand.u32 4294901760, %v656_v12  ;;  %v13923_v20 = vand.u32 4294901760, %v10944_v50 }
 0x16a   :  { %8677 = vmatpush1.bf16.msra.mxu0 %v14174_v23  ;;  %8773 = vmatpush1.bf16.msra.mxu1 %v14175_v24  ;;  %v662_v23 = vld [vmem:[#allocation2 + $0x1e0] sm:$0xff]  ;;  %v11004_v24 = vsub.f32 %v638_v11, %v2083_v57  ;;  %v11014_v61 = vsub.f32 %v648_v31, %v2783_v21  ;;  %14217 = vst [vmem:[#allocation19_spill] sm:$0xff] %v11016_v10  ;;  %v664_v57 = vld [vmem:[#allocation2 + $0x1f0] sm:$0xff]  ;;  %v13924_v21 = vand.u32 4294901760, %v10950_v6 }
 0x16b   :  { %1266 = vmatprep.mubr.f32.mxu0 %v14146_v53  ;;  %1962 = vmatprep.mubr.f32.mxu1 %v14146_v53  ;;  %14216 = vst [vmem:[#allocation16_spill] sm:$0xff] %v11012_v7  ;;  %v11020_v11 = vsub.f32 %v655_v48, %v2089_v9  ;;  %v11022_v58 = vsub.f32 %v663_v13, %v2093_v14  ;;  %v13920_v48 = vand.u32 4294901760, %v10928_v17 }
 0x16c   :  { %8679 = vmatprep.subr.bf16.mxu0 %v14176_v25  ;;  %8775 = vmatprep.subr.bf16.mxu1 %v14177_v28  ;;  %v2091_v25 = vand.u32 4294901760, %v654_v18  ;;  %v2095_v28 = vand.u32 4294901760, %v662_v23  ;;  %v11026_v1 = vpack.c.bf16 %v2789_v19, %v2785_v29  ;;  %v11028_v31 = vsub.f32 %v657_v51, %v2785_v29 }
 0x16d   :  { %1268 = vmatmul.mubr.f32.gmra.mrb[2].mxu0 %v10775_v30  ;;  %1964 = vmatmul.mubr.f32.gmra.mrb[2].mxu1 %v10775_v30  ;;  %v11037_v13 = vsub.f32 %v665_v47, %v2789_v19  ;;  %v2791_v29 = vand.u32 4294901760, %v664_v57 }
 0x16e   :  { %8681 = vmatpush1.bf16.msra.mxu0 %v14179_v35  ;;  %8777 = vmatpush1.bf16.msra.mxu1 %v14180_v46  ;;  %14218 = vst [vmem:[#allocation20_spill] sm:$0xff] %v11026_v1  ;;  %v13921_v35 = vand.u32 4294901760, %v10924_v15  ;;  %v13919_v46 = vand.u32 4294901760, %v10926_v16  ;;  %v11039_v51 = vsub.f32 %v654_v18, %v2091_v25  ;;  %v11045_v9 = vpack.c.bf16 %v2095_v28, %v2091_v25 }
 0x16f   :  { %8683 = vmatprep.subr.bf16.mxu0 %v14181_v54  ;;  %8779 = vmatprep.subr.bf16.mxu1 %v14182_v56  ;;  %v13922_v56 = vand.u32 4294901760, %v10938_v8  ;;  %v11047_v14 = vsub.f32 %v662_v23, %v2095_v28  ;;  %v11049_v54 = vsub.f32 %v656_v12, %v2787_v40  ;;  %v13925_v18 = vand.u32 4294901760, %v10952_v33 }
 0x170   :  { %1354 = vmatprep.mubr.f32.mxu0 %v14146_v53  ;;  %2050 = vmatprep.mubr.f32.mxu1 %v14146_v53  ;;  %14219 = vst [vmem:[#allocation21_spill] sm:$0xff] %v11045_v9  ;;  %v2171_v47 = vsub.f32 %v10924_v15, %v13921_v35  ;;  %v2183_v19 = vsub.f32 %v10926_v16, %v13919_v46  ;;  %v13931_v46 = vand.u32 4294901760, %v10962_v59 }
 0x171   :  { %v2177_v12 = vsub.f32 %v10938_v8, %v13922_v56  ;;  %v2189_v25 = vsub.f32 %v10944_v50, %v13923_v20  ;;  %v2873_v28 = vsub.f32 %v10950_v6, %v13924_v21  ;;  %v11083_v35 = vsub.f32 %v664_v57, %v2791_v29 }
 0x172   :  { %8685 = vmatpush1.bf16.msra.mxu0 %v14184_v5  ;;  %8781 = vmatpush1.bf16.msra.mxu1 %v14185_v45  ;;  %v13926_v5 = vand.u32 4294901760, %v10956_v44  ;;  %v13932_v45 = vand.u32 4294901760, %v10958_v43  ;;  %v2172_v21 = vand.u32 4294901760, %v2171_v47  ;;  %v2184_v57 = vand.u32 4294901760, %v2183_v19  ;;  %v14224_v19 = vld [vmem:[#allocation39_spill] sm:$0xff] }
 0x173   :  { %8687 = vmatprep.subr.bf16.mxu0 %v14186_v34  ;;  %8783 = vmatprep.subr.bf16.mxu1 %v14187_v27  ;;  %v2867_v34 = vsub.f32 %v10928_v17, %v13920_v48  ;;  %v14220_v27 = vand.u32 4294901760, %v10934_v62  ;;  %v2885_v48 = vsub.f32 %v10952_v33, %v13925_v18  ;;  %v2178_v20 = vand.u32 4294901760, %v2177_v12 }
 0x174   :  { %v2190_v47 = vand.u32 4294901760, %v2189_v25  ;;  %v2874_v56 = vand.u32 4294901760, %v2873_v28  ;;  %v2891_v18 = vsub.f32 %v10962_v59, %v13931_v46  ;;  %v14226_v12 = vand.u32 4294901760, %v10974_v2 }
 0x175   :  { %v2879_v23 = vsub.f32 %v10934_v62, %v14220_v27  ;;  %v11081_v27 = vpack.c.bf16 %v2791_v29, %v2787_v40  ;;  %v2868_v40 = vand.u32 4294901760, %v2867_v34  ;;  %v14225_v34 = vand.u32 4294901760, %v10970_v41 }
 0x176   :  { %8689 = vmatpush1.bf16.msra.mxu0 %v14192_v39  ;;  %8785 = vmatpush1.bf16.msra.mxu1 %v14193_v26  ;;  %v2195_v39 = vsub.f32 %v10956_v44, %v13926_v5  ;;  %v2207_v26 = vsub.f32 %v10958_v43, %v13932_v45  ;;  %v14222_v5 = vand.u32 4294901760, %v10964_v49  ;;  %v2213_v25 = vsub.f32 %v10974_v2, %v14226_v12  ;;  %v14229_v2 = vld [vmem:[#allocation9_spill] sm:$0xff] }
 0x177   :  { %14221 = vst [vmem:[#allocation22_spill] sm:$0xff] %v11081_v27  ;;  %8787 = vmatprep.subr.bf16.mxu0 %v10920_v0  ;;  %8883 = vmatprep.subr.bf16.mxu1 %v10932_v32  ;;  %v2880_v29 = vand.u32 4294901760, %v2879_v23  ;;  %v14223_v0 = vld [vmem:[#allocation38_spill] sm:$0xff]  ;;  %v2201_v23 = vsub.f32 %v10970_v41, %v14225_v34  ;;  %v8802_v41 = vpack.c.bf16 %v2184_v57, %v2172_v21  ;;  %v14231_v12 = vand.u32 4294901760, %v10978_v36 }
 0x178   :  { %v2903_v32 = vsub.f32 %v10964_v49, %v14222_v5  ;;  %v2886_v5 = vand.u32 4294901760, %v2885_v48  ;;  %v2196_v45 = vand.u32 4294901760, %v2195_v39  ;;  %v14228_v34 = vld [vmem:[#allocation18_spill] sm:$0xff]  ;;  %v11126_v39 = vpack.c.bf16 %v2190_v47, %v2178_v20 }
 0x179   :  { %1356 = vmatmul.mubr.f32.vlgmr.msra.gmra.mrb[0].mxu0 %v10758_v37  ;;  %2052 = vmatmul.mubr.f32.vlgmr.msra.gmra.mrb[0].mxu1 %v10758_v37  ;;  %v14227_v37 = vld [vmem:[#allocation17_spill] sm:$0xff]  ;;  %v8898_v48 = vpack.c.bf16 %v2880_v29, %v2868_v40  ;;  %v2202_v21 = vand.u32 4294901760, %v2201_v23  ;;  %v2214_v57 = vand.u32 4294901760, %v2213_v25  ;;  %v2897_v28 = vsub.f32 %v10978_v36, %v14231_v12 }
 0x17a   :  { %8789 = vmatpush1.bf16.msra.mxu0 %v14223_v0  ;;  %8885 = vmatpush1.bf16.msra.mxu1 %v14224_v19  ;;  %v2208_v0 = vand.u32 4294901760, %v2207_v26  ;;  %v2892_v26 = vand.u32 4294901760, %v2891_v18  ;;  %v2904_v19 = vand.u32 4294901760, %v2903_v32  ;;  %v14232_v46 = vand.u32 4294901760, %v10980_v22 }
 0x17b   :  { %1361 = vmatprep.mubr.f32.mxu0 %v14146_v53  ;;  %2057 = vmatprep.mubr.f32.mxu1 %v14146_v53  ;;  %v8900_v20 = vpack.c.bf16 %v2886_v5, %v2874_v56  ;;  %v14234_v18 = vand.u32 4294901760, %v10984_v63  ;;  %v14235_v29 = vand.u32 4294901760, %v10990_v42  ;;  %v14237_v56 = vand.u32 4294901760, %v10998_v38 }
 0x17c   :  { %8791 = vmatprep.subr.bf16.mxu0 %v14227_v37  ;;  %8887 = vmatprep.subr.bf16.mxu1 %v14228_v34  ;;  %v14230_v37 = vld [vmem:[#allocation12_spill] sm:$0xff]  ;;  %v2909_v34 = vsub.f32 %v10980_v22, %v14232_v46  ;;  %v11138_v32 = vpack.c.bf16 %v2208_v0, %v2196_v45  ;;  %v14236_v46 = vand.u32 4294901760, %v10994_v3  ;;  %v8902_v25 = vpack.c.bf16 %v2904_v19, %v2892_v26 }
 0x17d   :  { %1363 = vmatmul.mubr.f32.gmra.mrb[2].mxu0 %v10775_v30  ;;  %2059 = vmatmul.mubr.f32.gmra.mrb[2].mxu1 %v10775_v30  ;;  %v14233_v30 = vld [vmem:[#allocation13_spill] sm:$0xff]  ;;  %v2219_v40 = vsub.f32 %v10984_v63, %v14234_v18  ;;  %v2231_v47 = vsub.f32 %v10990_v42, %v14235_v29  ;;  %v2927_v0 = vsub.f32 %v10998_v38, %v14237_v56  ;;  %v14241_v26 = vand.u32 4294901760, %v11014_v61 }
 0x17e   :  { %8793 = vmatpush1.bf16.msra.mxu0 %v14229_v2  ;;  %8889 = vmatpush1.bf16.msra.mxu1 %v14230_v37  ;;  %v2915_v23 = vsub.f32 %v10994_v3, %v14236_v46  ;;  %v8808_v29 = vpack.c.bf16 %v2214_v57, %v2202_v21  ;;  %v2910_v46 = vand.u32 4294901760, %v2909_v34  ;;  %v14238_v21 = vand.u32 4294901760, %v11004_v24 }
 0x17f   :  { %8795 = vmatprep.subr.bf16.mxu0 %v14233_v30  ;;  %8891 = vmatprep.subr.bf16.mxu1 %v10992_v4  ;;  %v2898_v4 = vand.u32 4294901760, %v2897_v28  ;;  %v2220_v19 = vand.u32 4294901760, %v2219_v40  ;;  %v2232_v12 = vand.u32 4294901760, %v2231_v47  ;;  %v2928_v45 = vand.u32 4294901760, %v2927_v0 }
 0x180   :  { %2145 = vmatprep.mubr.f32.mxu0 %v14146_v53  ;;  %2841 = vmatprep.mubr.f32.mxu1 %v14146_v53  ;;  %v2916_v5 = vand.u32 4294901760, %v2915_v23  ;;  %v2225_v28 = vsub.f32 %v11004_v24, %v14238_v21  ;;  %v14239_v34 = vand.u32 4294901760, %v11006_v52  ;;  %v14240_v30 = vand.u32 4294901760, %v11008_v60 }
 0x181   :  { %v2933_v56 = vsub.f32 %v11014_v61, %v14241_v26  ;;  %v14242_v23 = vand.u32 4294901760, %v11020_v11  ;;  %v14243_v26 = vand.u32 4294901760, %v11022_v58  ;;  %v14244_v18 = vand.u32 4294901760, %v11028_v31 }
 0x182   :  { %8797 = vmatpush1.bf16.msra.mxu0 %v11000_v55  ;;  %8893 = vmatpush1.bf16.msra.mxu1 %v11012_v7  ;;  %v2237_v57 = vsub.f32 %v11006_v52, %v14239_v34  ;;  %v2921_v40 = vsub.f32 %v11008_v60, %v14240_v30  ;;  %v8810_v21 = vpack.c.bf16 %v2232_v12, %v2220_v19  ;;  %v2226_v34 = vand.u32 4294901760, %v2225_v28  ;;  %v14246_v7 = vld [vmem:[#allocation48_spill] sm:$0xff] }
 0x183   :  { %8799 = vmatprep.subr.bf16.mxu0 %v11016_v10  ;;  %8895 = vmatprep.subr.bf16.mxu1 %v11026_v1  ;;  %v2243_v0 = vsub.f32 %v11020_v11, %v14242_v23  ;;  %v2255_v47 = vsub.f32 %v11022_v58, %v14243_v26  ;;  %v8904_v1 = vpack.c.bf16 %v2910_v46, %v2898_v4  ;;  %v2934_v30 = vand.u32 4294901760, %v2933_v56  ;;  %v14251_v19 = vld [vmem:[#allocation32_spill] sm:$0xff] }
 0x184   :  { %v8906_v10 = vpack.c.bf16 %v2928_v45, %v2916_v5  ;;  %v14247_v26 = vand.u32 4294901760, %v11039_v51  ;;  %v14249_v45 = vand.u32 4294901760, %v11049_v54 }
 0x185   :  { %v2256_v46 = vand.u32 4294901760, %v2255_v47 }
 0x186   :  { %8801 = vmatpush1.bf16.msra.mxu0 %v11045_v9  ;;  %8897 = vmatpush1.bf16.msra.mxu1 %v11081_v27  ;;  %v2939_v27 = vsub.f32 %v11028_v31, %v14244_v18  ;;  %v14245_v9 = vand.u32 4294901760, %v11037_v13  ;;  %v2249_v55 = vsub.f32 %v11039_v51, %v14247_v26  ;;  %v2945_v5 = vsub.f32 %v11049_v54, %v14249_v45 }
 0x187   :  { %8803 = vmatprep.subr.bf16.mxu0 %v8802_v41  ;;  %8899 = vmatprep.subr.bf16.mxu1 %v8898_v48  ;;  %v2238_v41 = vand.u32 4294901760, %v2237_v57  ;;  %v2922_v48 = vand.u32 4294901760, %v2921_v40  ;;  %v2244_v18 = vand.u32 4294901760, %v2243_v0  ;;  %v8822_v0 = vpack.c.bf16 %v10958_v43, %v10956_v44 }
 0x188   :  { %v2951_v23 = vsub.f32 %v11037_v13, %v14245_v9  ;;  %v14248_v9 = vand.u32 4294901760, %v11047_v14  ;;  %v2250_v57 = vand.u32 4294901760, %v2249_v55  ;;  %v2946_v26 = vand.u32 4294901760, %v2945_v5  ;;  %v14255_v5 = vld [vmem:[#allocation49_spill] sm:$0xff] }
 0x189   :  { %2151 = vmatmul.mubr.f32.vlgmr.msra.gmra.mrb[4].mxu0 %v14246_v7  ;;  %2847 = vmatmul.mubr.f32.vlgmr.msra.gmra.mrb[4].mxu1 %v14246_v7  ;;  %v14250_v7 = vand.u32 4294901760, %v11083_v35  ;;  %v8812_v56 = vpack.c.bf16 %v2238_v41, %v2226_v34  ;;  %v8908_v28 = vpack.c.bf16 %v2934_v30, %v2922_v48  ;;  %v8814_v47 = vpack.c.bf16 %v2256_v46, %v2244_v18  ;;  %v14252_v34 = vld [vmem:[#allocation36_spill] sm:$0xff]  ;;  %v14253_v30 = vld [vmem:[#allocation10_spill] sm:$0xff] }
 0x18a   :  { %8805 = vmatpush1.bf16.msra.mxu0 %v11126_v39  ;;  %8901 = vmatpush1.bf16.msra.mxu1 %v8900_v20  ;;  %v2261_v4 = vsub.f32 %v11047_v14, %v14248_v9  ;;  %v2940_v39 = vand.u32 4294901760, %v2939_v27  ;;  %v2952_v20 = vand.u32 4294901760, %v2951_v23  ;;  %v8818_v55 = vpack.c.bf16 %v10926_v16, %v10924_v15  ;;  %v14254_v23 = vld [vmem:[#allocation11_spill] sm:$0xff] }
 0x18b   :  { %v2957_v12 = vsub.f32 %v11083_v35, %v14250_v7  ;;  %2156 = vmatprep.mubr.f32.mxu0 %v14146_v53  ;;  %2852 = vmatprep.mubr.f32.mxu1 %v14146_v53  ;;  %v8824_v41 = vpack.c.bf16 %v14254_v23, %v14253_v30  ;;  %v8920_v48 = vpack.c.bf16 %v10980_v22, %v10978_v36 }
 0x18c   :  { %8807 = vmatprep.subr.bf16.mxu0 %v11138_v32  ;;  %8903 = vmatprep.subr.bf16.mxu1 %v8902_v25  ;;  %v2262_v40 = vand.u32 4294901760, %v2261_v4  ;;  %v8910_v27 = vpack.c.bf16 %v2952_v20, %v2940_v39  ;;  %v8826_v4 = vpack.c.bf16 %v10990_v42, %v10984_v63  ;;  %v8922_v45 = vpack.c.bf16 %v10998_v38, %v10994_v3 }
 0x18d   :  { %2162 = vmatmul.mubr.f32.gmra.mrb[6].mxu0 %v14251_v19  ;;  %2858 = vmatmul.mubr.f32.gmra.mrb[6].mxu1 %v14251_v19  ;;  %v2958_v9 = vand.u32 4294901760, %v2957_v12  ;;  %v8828_v7 = vpack.c.bf16 %v11006_v52, %v11004_v24  ;;  %v8924_v12 = vpack.c.bf16 %v11014_v61, %v11008_v60  ;;  %v8830_v18 = vpack.c.bf16 %v11022_v58, %v11020_v11  ;;  %v14256_v19 = vld [vmem:[#allocation35_spill] sm:$0xff] }
 0x18e   :  { %8809 = vmatpush1.bf16.msra.mxu0 %v8808_v29  ;;  %8905 = vmatpush1.bf16.msra.mxu1 %v8904_v1  ;;  %v8816_v32 = vpack.c.bf16 %v2262_v40, %v2250_v57  ;;  %v8914_v1 = vpack.c.bf16 %v10934_v62, %v10928_v17  ;;  %v8916_v29 = vpack.c.bf16 %v10952_v33, %v10950_v6  ;;  %v14259_v57 = vld [vmem:[#allocation38_spill] sm:$0xff]  ;;  %v14260_v40 = vld [vmem:[#allocation39_spill] sm:$0xff] }
 0x18f   :  { %8811 = vmatprep.subr.bf16.mxu0 %v8810_v21  ;;  %8907 = vmatprep.subr.bf16.mxu1 %v8906_v10  ;;  %v8912_v25 = vpack.c.bf16 %v2958_v9, %v2946_v26  ;;  %v8820_v10 = vpack.c.bf16 %v10944_v50, %v10938_v8  ;;  %v8918_v21 = vpack.c.bf16 %v10964_v49, %v10962_v59  ;;  %v14261_v26 = vld [vmem:[#allocation17_spill] sm:$0xff]  ;;  %v14262_v9 = vld [vmem:[#allocation18_spill] sm:$0xff] }
 0x190   :  { %2312 = vmatprep.mubr.f32.mxu0 %v14146_v53  ;;  %3008 = vmatprep.mubr.f32.mxu1 %v14146_v53  ;;  %v8926_v46 = vpack.c.bf16 %v11037_v13, %v11028_v31  ;;  %v8832_v39 = vpack.c.bf16 %v11047_v14, %v11039_v51  ;;  %v8928_v20 = vpack.c.bf16 %v11083_v35, %v11049_v54 }
 0x192   :  { %8813 = vmatpush1.bf16.msra.mxu0 %v8812_v56  ;;  %8909 = vmatpush1.bf16.msra.mxu1 %v8908_v28  ;;  %v14257_v56 = vld [vmem:[#allocation37_spill] sm:$0xff]  ;;  %v14258_v28 = vld [vmem:[#allocation46_spill] sm:$0xff] }
 0x193   :  { %8815 = vmatprep.subr.bf16.mxu0 %v8814_v47  ;;  %8911 = vmatprep.subr.bf16.mxu1 %v8910_v27  ;;  %v14263_v47 = vld [vmem:[#allocation30_spill] sm:$0xff]  ;;  %v14264_v27 = vld [vmem:[#allocation13_spill] sm:$0xff] }
 0x196   :  { %8817 = vmatpush1.bf16.msra.mxu0 %v8816_v32  ;;  %8913 = vmatpush1.bf16.msra.mxu1 %v8912_v25  ;;  %v14265_v32 = vld [vmem:[#allocation14_spill] sm:$0xff]  ;;  %v14266_v25 = vld [vmem:[#allocation15_spill] sm:$0xff] }
 0x197   :  { %8819 = vmatprep.subr.bf16.mxu0 %v8818_v55  ;;  %8915 = vmatprep.subr.bf16.mxu1 %v8914_v1  ;;  %v14267_v55 = vld [vmem:[#allocation16_spill] sm:$0xff]  ;;  %v14268_v1 = vld [vmem:[#allocation19_spill] sm:$0xff] }
 0x199   :  { %2314 = vmatmul.mubr.f32.vlgmr.msra.gmra.mrb[4].mxu0 %v14252_v34  ;;  %3010 = vmatmul.mubr.f32.vlgmr.msra.gmra.mrb[4].mxu1 %v14252_v34 }
 0x19a   :  { %8821 = vmatpush1.bf16.msra.mxu0 %v8820_v10  ;;  %8917 = vmatpush1.bf16.msra.mxu1 %v8916_v29  ;;  %v14269_v10 = vld [vmem:[#allocation20_spill] sm:$0xff]  ;;  %v14270_v29 = vand.u32 4294901760, %v10924_v15  ;;  %v14279_v15 = vand.u32 4294901760, %v10952_v33  ;;  %v14285_v33 = vand.u32 4294901760, %v14253_v30  ;;  %v14292_v30 = vand.u32 4294901760, %v10998_v38 }
 0x19b   :  { %2319 = vmatprep.mubr.f32.mxu0 %v14146_v53  ;;  %3015 = vmatprep.mubr.f32.mxu1 %v14146_v53  ;;  %v14298_v38 = vand.u32 4294901760, %v11020_v11  ;;  %v14304_v11 = vand.u32 4294901760, %v11049_v54 }
 0x19c   :  { %8823 = vmatprep.subr.bf16.mxu0 %v8822_v0  ;;  %8919 = vmatprep.subr.bf16.mxu1 %v8918_v21  ;;  %v14271_v0 = vand.u32 4294901760, %v10926_v16 }
 0x19d   :  { %2321 = vmatmul.mubr.f32.gmra.mrb[6].mxu0 %v14255_v5  ;;  %3017 = vmatmul.mubr.f32.gmra.mrb[6].mxu1 %v14255_v5 }
 0x19e   :  { %8825 = vmatpush1.bf16.msra.mxu0 %v8824_v41  ;;  %8921 = vmatpush1.bf16.msra.mxu1 %v8920_v48  ;;  %v8850_v21 = vpack.c.bf16 %v14271_v0, %v14270_v29  ;;  %v14272_v41 = vand.u32 4294901760, %v10928_v17  ;;  %v14273_v48 = vand.u32 4294901760, %v10934_v62  ;;  %v14280_v17 = vand.u32 4294901760, %v10956_v44  ;;  %v14284_v29 = vld [vmem:[#allocation47_spill] sm:$0xff] }
 0x19f   :  { %8827 = vmatprep.subr.bf16.mxu0 %v8826_v4  ;;  %8923 = vmatprep.subr.bf16.mxu1 %v8922_v45  ;;  %v14274_v45 = vld [vmem:[#allocation21_spill] sm:$0xff]  ;;  %v14281_v62 = vand.u32 4294901760, %v10958_v43  ;;  %v14287_v44 = vand.u32 4294901760, %v10978_v36  ;;  %v14288_v43 = vand.u32 4294901760, %v10980_v22  ;;  %v14293_v36 = vld [vmem:[#allocation31_spill] sm:$0xff]  ;;  %v14294_v22 = vand.u32 4294901760, %v11004_v24 }
 0x1a0   :  { %2423 = vmatprep.mubr.f32.mxu0 %v14146_v53  ;;  %3119 = vmatprep.mubr.f32.mxu1 %v14146_v53  ;;  %v8946_v4 = vpack.c.bf16 %v14273_v48, %v14272_v41  ;;  %v14291_v41 = vand.u32 4294901760, %v10994_v3  ;;  %v14297_v3 = vand.u32 4294901760, %v11014_v61 }
 0x1a1   :  { %v8952_v0 = vpack.c.bf16 %v14288_v43, %v14287_v44 }
 0x1a2   :  { %8829 = vmatpush1.bf16.msra.mxu0 %v8828_v7  ;;  %8925 = vmatpush1.bf16.msra.mxu1 %v8924_v12  ;;  %v14275_v7 = vld [vmem:[#allocation22_spill] sm:$0xff]  ;;  %v14276_v12 = vand.u32 4294901760, %v10938_v8 }
 0x1a3   :  { %8831 = vmatprep.subr.bf16.mxu0 %v8830_v18  ;;  %8927 = vmatprep.subr.bf16.mxu1 %v8926_v46  ;;  %v14277_v18 = vand.u32 4294901760, %v10944_v50  ;;  %v14286_v50 = vand.u32 4294901760, %v14254_v23  ;;  %v8954_v23 = vpack.c.bf16 %v14292_v30, %v14291_v41  ;;  %v14310_v41 = vmov 920167782  }
 0x1a5   :  { %v8852_v46 = vpack.c.bf16 %v14277_v18, %v14276_v12  ;;  %v14299_v12 = vand.u32 4294901760, %v11022_v58  ;;  %v14305_v58 = vand.u32 4294901760, %v11083_v35 }
 0x1a6   :  { %8833 = vmatpush1.bf16.msra.mxu0 %v8832_v39  ;;  %8929 = vmatpush1.bf16.msra.mxu1 %v8928_v20  ;;  %v14278_v39 = vand.u32 4294901760, %v10950_v6  ;;  %v8854_v20 = vpack.c.bf16 %v14281_v62, %v14280_v17  ;;  %v8856_v6 = vpack.c.bf16 %v14286_v50, %v14285_v33 }
 0x1a7   :  { %8835 = vmatprep.subr.bf16.mxu0 %v14256_v19  ;;  %8931 = vmatprep.subr.bf16.mxu1 %v14257_v56  ;;  %v8862_v18 = vpack.c.bf16 %v14299_v12, %v14298_v38  ;;  %v14314_v12 = vmov 1326507024  }
 0x1a8   :  { %v8948_v16 = vpack.c.bf16 %v14279_v15, %v14278_v39  ;;  %v14301_v39 = vand.u32 4294901760, %v11037_v13  ;;  %v8960_v15 = vpack.c.bf16 %v14305_v58, %v14304_v11  ;;  %v14306_v13 = vld [vmem:[#allocation33_spill] sm:$0xff] }
 0x1a9   :  { %2426 = vmatmul.mubr.f32.vlgmr.msra.gmra.mrb[4].mxu0 %v14258_v28  ;;  %3122 = vmatmul.mubr.f32.vlgmr.msra.gmra.mrb[4].mxu1 %v14258_v28  ;;  %v14282_v28 = vand.u32 4294901760, %v10962_v59  ;;  %v14289_v59 = vand.u32 4294901760, %v10984_v63  ;;  %v14295_v63 = vand.u32 4294901760, %v11006_v52  ;;  %v14302_v52 = vand.u32 4294901760, %v11039_v51 }
 0x1aa   :  { %8837 = vmatpush1.bf16.msra.mxu0 %v14259_v57  ;;  %8933 = vmatpush1.bf16.msra.mxu1 %v14260_v40 }
 0x1ab   :  { %2431 = vmatprep.mubr.f32.mxu0 %v14146_v53  ;;  %3127 = vmatprep.mubr.f32.mxu1 %v14146_v53  ;;  %v8860_v48 = vpack.c.bf16 %v14295_v63, %v14294_v22  ;;  %v14311_v22 = vmov 2102212464  }
 0x1ac   :  { %8839 = vmatprep.subr.bf16.mxu0 %v14261_v26  ;;  %8935 = vmatprep.subr.bf16.mxu1 %v14262_v9 }
 0x1ad   :  { %2434 = vmatmul.mubr.f32.gmra.mrb[6].mxu0 %v14263_v47  ;;  %3130 = vmatmul.mubr.f32.gmra.mrb[6].mxu1 %v14263_v47  ;;  %v14283_v47 = vand.u32 4294901760, %v10964_v49  ;;  %v14290_v49 = vand.u32 4294901760, %v10990_v42  ;;  %v14296_v42 = vand.u32 4294901760, %v11008_v60  ;;  %v14303_v60 = vand.u32 4294901760, %v11047_v14  ;;  %v14307_v14 = vld [vmem:[#allocation34_spill] sm:$0xff] }
 0x1ae   :  { %8841 = vmatpush1.bf16.msra.mxu0 %v14229_v2  ;;  %8937 = vmatpush1.bf16.msra.mxu1 %v14230_v37 }
 0x1af   :  { %8843 = vmatprep.subr.bf16.mxu0 %v14264_v27  ;;  %8939 = vmatprep.subr.bf16.mxu1 %v14265_v32  ;;  %v8950_v8 = vpack.c.bf16 %v14283_v47, %v14282_v28  ;;  %v8864_v61 = vpack.c.bf16 %v14303_v60, %v14302_v52 }
 0x1b0   :  { %2520 = vmatprep.mubr.f32.mxu0 %v14146_v53  ;;  %3216 = vmatprep.mubr.f32.mxu1 %v14146_v53 }
 0x1b2   :  { %8845 = vmatpush1.bf16.msra.mxu0 %v14266_v25  ;;  %8941 = vmatpush1.bf16.msra.mxu1 %v14267_v55 }
 0x1b3   :  { %8847 = vmatprep.subr.bf16.mxu0 %v14268_v1  ;;  %8943 = vmatprep.subr.bf16.mxu1 %v14269_v10  ;;  %v593_v17 = vpop.permute.xlu0 %592 }
 0x1b6   :  { %8849 = vmatpush1.bf16.msra.mxu0 %v14274_v45  ;;  %8945 = vmatpush1.bf16.msra.mxu1 %v14275_v7 }
 0x1b7   :  { %8851 = vmatprep.subr.bf16.mxu0 %v8850_v21  ;;  %8947 = vmatprep.subr.bf16.mxu1 %v8946_v4  ;;  %v8858_v21 = vpack.c.bf16 %v14290_v49, %v14289_v59  ;;  %v8956_v4 = vpack.c.bf16 %v14297_v3, %v14296_v42  ;;  %v14313_v3 = vmov 2131351028  }
 0x1b9   :  { %2524 = vmatmul.mubr.f32.vlgmr.msra.gmra.mrb[4].mxu0 %v14284_v29  ;;  %3220 = vmatmul.mubr.f32.vlgmr.msra.gmra.mrb[4].mxu1 %v14284_v29 }
 0x1ba   :  { %8853 = vmatpush1.bf16.msra.mxu0 %v8852_v46  ;;  %8949 = vmatpush1.bf16.msra.mxu1 %v8948_v16  ;;  %v14300_v46 = vand.u32 4294901760, %v11028_v31  ;;  %v585_v31 = vpop.permute.xlu1 %584 }
 0x1bb   :  { %2529 = vmatprep.mubr.f32.mxu0 %v14146_v53  ;;  %3225 = vmatprep.mubr.f32.mxu1 %v14146_v53  ;;  %v590_v16 = vadd.f32 %v585_v31, %v14306_v13 }
 0x1bc   :  { %8855 = vmatprep.subr.bf16.mxu0 %v8854_v20  ;;  %8951 = vmatprep.subr.bf16.mxu1 %v8950_v8  ;;  %v8958_v24 = vpack.c.bf16 %v14301_v39, %v14300_v46  ;;  %v14315_v39 = vmov 683565275  }
 0x1bd   :  { %2533 = vmatmul.mubr.f32.gmra.mrb[6].mxu0 %v14293_v36  ;;  %3229 = vmatmul.mubr.f32.gmra.mrb[6].mxu1 %v14293_v36  ;;  %v598_v54 = vadd.f32 %v593_v17, %v590_v16 }
 0x1be   :  { %8857 = vmatpush1.bf16.msra.mxu0 %v8856_v6  ;;  %8953 = vmatpush1.bf16.msra.mxu1 %v8952_v0  ;;  %v587_v51 = vpop.permute.xlu1 %586 }
 0x1bf   :  { %8859 = vmatprep.subr.bf16.mxu0 %v8858_v21  ;;  %8955 = vmatprep.subr.bf16.mxu1 %v8954_v23  ;;  %v600_v35 = vadd.f32 30.0, %v598_v54 }
 0x1c0   :  { %2651 = vmatprep.mubr.f32.mxu0 %v14146_v53  ;;  %3347 = vmatprep.mubr.f32.mxu1 %v14146_v53 }
 0x1c1   :  { %3511 = vperm.xlu0 %9939, %v600_v35  }
 0x1c2   :  { %8861 = vmatpush1.bf16.msra.mxu0 %v8860_v48  ;;  %8957 = vmatpush1.bf16.msra.mxu1 %v8956_v4  ;;  %v14312_v48 = vmov 2475754826  }
 0x1c3   :  { %8863 = vmatprep.subr.bf16.mxu0 %v8862_v18  ;;  %8959 = vmatprep.subr.bf16.mxu1 %v8958_v24 }
 0x1c6   :  { %8865 = vmatpush1.bf16.msra.mxu0 %v8864_v61  ;;  %8961 = vmatpush1.bf16.msra.mxu1 %v8960_v15 }
 0x1c7   :  { %8867 = vmatprep.subr.bf16.mxu0 %v14256_v19  ;;  %8963 = vmatprep.subr.bf16.mxu1 %v14257_v56  ;;  %v591_v19 = vadd.f32 %v587_v51, %v14307_v14 }
 0x1c9   :  { %2653 = vmatmul.mubr.f32.vlgmr.msra.gmra.mrb[4].mxu0 %v14252_v34  ;;  %3349 = vmatmul.mubr.f32.vlgmr.msra.gmra.mrb[4].mxu1 %v14252_v34 }
 0x1ca   :  { %8869 = vmatpush1.bf16.msra.mxu0 %v14259_v57  ;;  %8965 = vmatpush1.bf16.msra.mxu1 %v14260_v40  ;;  %v3459_v57 = vlaneseq }
 0x1cb   :  { %2658 = vmatprep.mubr.f32.mxu0 %v14146_v53  ;;  %3354 = vmatprep.mubr.f32.mxu1 %v14146_v53 }
 0x1cc   :  { %8871 = vmatprep.subr.bf16.mxu0 %v14261_v26  ;;  %8967 = vmatprep.subr.bf16.mxu1 %v14262_v9  ;;  %v3460_v40 = vshrl.u32 %v3459_v57, 7  ;;  %v3457_v9 = vld [vmem:[%s13790_s3] sm:$0xf] }
 0x1cd   :  { %2660 = vmatmul.mubr.f32.gmra.mrb[6].mxu0 %v14255_v5  ;;  %3356 = vmatmul.mubr.f32.gmra.mrb[6].mxu1 %v14255_v5 }
 0x1ce   :  { %8873 = vmatpush1.bf16.msra.mxu0 %v14229_v2  ;;  %8969 = vmatpush1.bf16.msra.mxu1 %v14230_v37  ;;  %v595_v37 = vpop.permute.xlu1 %594  ;;  %v11386_v26 = vsub.s32 2, %v3460_v40  ;;  %v11410_v29 = vsub.s32 0, %v3460_v40 }
 0x1cf   :  { %8875 = vmatprep.subr.bf16.mxu0 %v14264_v27  ;;  %8971 = vmatprep.subr.bf16.mxu1 %v14265_v32  ;;  %v599_v2 = vadd.f32 %v595_v37, %v591_v19  ;;  %v11391_v27 = vsub.s32 1, %v3460_v40  ;;  %v11393_v32 = vsub.s32 3, %v3460_v40 }
 0x1d0   :  { %2746 = vmatprep.mubr.f32.mxu0 %v14146_v53  ;;  %3442 = vmatprep.mubr.f32.mxu1 %v14146_v53  ;;  %v3462_v33 = vrot.slane %v3457_v9, %v11410_v29 }
 0x1d1   :  { %v601_v56 = vadd.f32 30.0, %v599_v2 }
 0x1d2   :  { %8877 = vmatpush1.bf16.msra.mxu0 %v14266_v25  ;;  %8973 = vmatpush1.bf16.msra.mxu1 %v14267_v55  ;;  %v11400_v25 = vrot.slane %v3457_v9, %v11393_v32 }
 0x1d3   :  { %8879 = vmatprep.subr.bf16.mxu0 %v14268_v1  ;;  %8975 = vmatprep.subr.bf16.mxu1 %v14269_v10 }
 0x1d4   :  { %3516 = vperm.xlu1 %9940, %v601_v56  }
 0x1d6   :  { %8881 = vmatpush1.bf16.msra.mxu0 %v14274_v45  ;;  %8977 = vmatpush1.bf16.msra.mxu1 %v14275_v7 }
 0x1d9   :  { %2748 = vmatmul.mubr.f32.vlgmr.msra.gmra.mrb[4].mxu0 %v14252_v34  ;;  %3444 = vmatmul.mubr.f32.vlgmr.msra.gmra.mrb[4].mxu1 %v14252_v34  ;;  %v3470_v34 = vrot.slane %v3457_v9, %v11386_v26 }
 0x1da   :  { %2753 = vmatprep.mubr.f32.mxu0 %v14146_v53  ;;  %3449 = vmatprep.mubr.f32.mxu1 %v14146_v53  ;;  %v11397_v53 = vrot.slane %v3457_v9, %v11391_v27 }
 0x1dd   :  { %2755 = vmatmul.mubr.f32.gmra.mrb[6].mxu0 %v14255_v5  ;;  %3451 = vmatmul.mubr.f32.gmra.mrb[6].mxu1 %v14255_v5 }
 0x24c   :  { %v1357_v5 = vpop.f32.mrb[0].mxu0  ;;  %v2053_v55 = vpop.f32.mrb[0].mxu1 }
 0x24d   :  { %v11402_v1 = vadd.f32 %v3470_v34, %v2053_v55  ;;  %v1359_v10 = vpop.f32.mrb[1].mxu0  ;;  %v2055_v45 = vpop.f32.mrb[1].mxu1  ;;  %v11413_v50 = vadd.f32 %v3462_v33, %v1357_v5 }
 0x24e   :  { %v11405_v7 = vadd.f32 %v11397_v53, %v1359_v10  ;;  %v11408_v62 = vadd.f32 %v11400_v25, %v2055_v45 }
 0x24f   :  { %14308 = vst [vmem:[#allocation24_spill] sm:$0xff] %v11402_v1  ;;  %v3568_v6 = vand.u32 2139095040, %v11413_v50  ;;  %v3565_v23 = vand.u32 2147483647, %v11413_v50 }
 0x250   :  { %14309 = vst [vmem:[#allocation27_spill] sm:$0xff] %v11408_v62  ;;  %v1364_v20 = vpop.f32.mrb[2].mxu0  ;;  %v2060_v28 = vpop.f32.mrb[2].mxu1 }
 0x251   :  { %v1366_v47 = vpop.f32.mrb[3].mxu0  ;;  %v2062_v8 = vpop.f32.mrb[3].mxu1  ;;  %v3569_v44 = vshrl.u32 %v3568_v6, 23  ;;  %v3572_v11 = vand.u32 8388607, %v3565_v23  ;;  %v11429_v58 = vadd.f32 %v3462_v33, %v1364_v20  ;;  %v11436_v37 = vadd.f32 %v3470_v34, %v2060_v28 }
 0x252   :  { %v11448_v28 = vadd.f32 %v11397_v53, %v1366_v47  ;;  %v11451_v33 = vadd.f32 %v11400_v25, %v2062_v8 }
 0x253   :  { %v7286_v43 = vadd.s32 4294967169, %v3569_v44  ;;  %v3573_v54 = vor.u32 8388608, %v3572_v11  ;;  %v3984_v35 = vand.u32 2139095040, %v11429_v58  ;;  %14316 = vst [vmem:[#allocation28_spill] sm:$0xff] %v11436_v37  ;;  %vm3983_vm15 = vcmp.lt.s32.totalorder %v11429_v58, 0 }
 0x254   :  { %14317 = vst [vmem:[#allocation29_spill] sm:$0xff] %v11451_v33 }
 0x255   :  { %v3575_v0 = vadd.s32 1, %v7286_v43  ;;  %v3985_v40 = vshrl.u32 %v3984_v35, 23  ;;  %v3613_v9 = vshll.u32 %v3573_v54, 8 }
 0x257   :  { %vm3576_vm1 = vcmp.gt.s32.totalorder %v3575_v0, 0  ;;  %v7302_v5 = vadd.s32 4294967169, %v3985_v40 }
 0x258   :  { %v3577_v59 = vsel %vm3576_vm1, %v3575_v0, 0  ;;  %v3981_v0 = vand.u32 2147483647, %v11429_v58  ;;  %vm3567_vm1 = vcmp.lt.s32.totalorder %v11413_v50, 0 }
 0x259   :  { %v3579_v49 = vand.u32 31, %v3577_v59  ;;  %v3578_v36 = vshrl.u32 %v3577_v59, 5  ;;  %v3991_v20 = vadd.s32 1, %v7302_v5 }
 0x25a   :  { %v3988_v47 = vand.u32 8388607, %v3981_v0  ;;  %vm11528_vm0 = vcmp.le.f32.partialorder %v3981_v0, 0.7853982  ;;  %v11541_v0 = vld [vmem:[%s13793_s6] sm:$0xff] }
 0x25b   :  { %v3580_v21 = vsub.s32 32, %v3579_v49  ;;  %v3591_v63 = vshll.u32 %v14311_v22, %v3579_v49  ;;  %v3582_v24 = vshll.u32 %v14315_v39, %v3579_v49  ;;  %v3585_v52 = vshll.u32 %v14312_v48, %v3579_v49 }
 0x25c   :  { %v3588_v60 = vshll.u32 %v14313_v3, %v3579_v49  ;;  %v3594_v61 = vshll.u32 %v14310_v41, %v3579_v49  ;;  %vm3600_vm2 = vcmp.lt.s32.totalorder %v3578_v36, 4  ;;  %vm3597_vm3 = vcmp.lt.s32.totalorder %v3578_v36, 1 }
 0x25d   :  { %v3592_v30 = vshrl.u32 %v14310_v41, %v3580_v21  ;;  %v3583_v42 = vshrl.u32 %v14312_v48, %v3580_v21  ;;  %v3586_v4 = vshrl.u32 %v14313_v3, %v3580_v21  ;;  %v3589_v38 = vshrl.u32 %v14311_v22, %v3580_v21 }
 0x25e   :  { %v3595_v18 = vshrl.u32 %v14314_v12, %v3580_v21  ;;  %vm3599_vm4 = vcmp.lt.s32.totalorder %v3578_v36, 3  ;;  %vm3598_vm5 = vcmp.lt.s32.totalorder %v3578_v36, 2  ;;  %v3581_v6 = vshrl.u32 %v14315_v39, %v3580_v21 }
 0x25f   :  { %v3593_v46 = vor.u32 %v3592_v30, %v3591_v63  ;;  %v3584_v15 = vor.u32 %v3583_v42, %v3582_v24  ;;  %v3587_v31 = vor.u32 %v3586_v4, %v3585_v52  ;;  %v3590_v13 = vor.u32 %v3589_v38, %v3588_v60 }
 0x260   :  { %v3596_v16 = vor.u32 %v3595_v18, %v3594_v61  ;;  %vm3992_vm6 = vcmp.gt.s32.totalorder %v3991_v20, 0 }
 0x261   :  { %v3606_v17 = vsel %vm3600_vm2, %v3593_v46, 920167782  ;;  %v3605_v51 = vsel %vm3597_vm3, %v3584_v15, %v3587_v31  ;;  %v3609_v56 = vsel %vm3597_vm3, %v3587_v31, %v3590_v13  ;;  %v3602_v34 = vsel %vm3600_vm2, %v3590_v13, 2102212464 }
 0x262   :  { %v3607_v14 = vsel %vm3599_vm4, %v3590_v13, %v3606_v17  ;;  %v3610_v19 = vsel %vm3600_vm2, %v3596_v16, 1326507024  ;;  %v3993_v59 = vsel %vm3992_vm6, %v3991_v20, 0  ;;  %v3601_v49 = vsel %vm3597_vm3, %v3581_v6, %v3584_v15 }
 0x263   :  { %v3608_v2 = vsel %vm3598_vm5, %v3605_v51, %v3607_v14  ;;  %v3611_v57 = vsel %vm3599_vm4, %v3593_v46, %v3610_v19  ;;  %v3603_v30 = vsel %vm3599_vm4, %v3587_v31, %v3602_v34  ;;  %v3995_v63 = vand.u32 31, %v3993_v59 }
 0x264   :  { %v3612_v55 = vsel %vm3598_vm5, %v3609_v56, %v3611_v57  ;;  %v11442_v10 = vmul.u32.u64.low %v3613_v9, %v3608_v2  ;;  %v11443_v45 = vmul.u32.u64.high %v3613_v9, %v3608_v2, %v11442_v10  ;;  %v3604_v53 = vsel %vm3598_vm5, %v3601_v49, %v3603_v30 }
 0x265   :  { %v11454_v44 = vmul.u32.u64.low %v3613_v9, %v3612_v55  ;;  %v11455_v43 = vmul.u32.u64.high %v3613_v9, %v3612_v55, %v11454_v44  ;;  %v3996_v42 = vsub.s32 32, %v3995_v63  ;;  %v3994_v8 = vshrl.u32 %v3993_v59, 5 }
 0x266   :  { %v3623_v25 = vadd.s32 1, %v11443_v45  ;;  %v3998_v21 = vshll.u32 %v14315_v39, %v3995_v63  ;;  %v4001_v38 = vshll.u32 %v14312_v48, %v3995_v63  ;;  %v4004_v18 = vshll.u32 %v14313_v3, %v3995_v63 }
 0x267   :  { %v3999_v4 = vshrl.u32 %v14312_v48, %v3996_v42  ;;  %v4002_v46 = vshrl.u32 %v14313_v3, %v3996_v42  ;;  %v4005_v24 = vshrl.u32 %v14311_v22, %v3996_v42  ;;  %v4007_v36 = vshll.u32 %v14311_v22, %v3995_v63 }
 0x268   :  { %v4008_v52 = vshrl.u32 %v14310_v41, %v3996_v42  ;;  %vm3622_vm7 = vc.u32 %v11455_v43, %v11442_v10  ;;  %v4010_v61 = vshll.u32 %v14310_v41, %v3995_v63  ;;  %v4011_v11 = vshrl.u32 %v14314_v12, %v3996_v42 }
 0x269   :  { %v4000_v60 = vor.u32 %v3999_v4, %v3998_v21  ;;  %v3989_v15 = vor.u32 8388608, %v3988_v47  ;;  %v4003_v31 = vor.u32 %v4002_v46, %v4001_v38  ;;  %v4006_v13 = vor.u32 %v4005_v24, %v4004_v18 }
 0x26a   :  { %v4009_v16 = vor.u32 %v4008_v52, %v4007_v36  ;;  %v3620_v17 = vmul.u32 %v3613_v9, %v3604_v53  ;;  %v4012_v54 = vor.u32 %v4011_v11, %v4010_v61  ;;  %vm4013_vm8 = vcmp.lt.s32.totalorder %v3994_v8, 1 }
 0x26b   :  { %v3624_v35 = vsel %vm3622_vm7, %v3623_v25, %v11443_v45  ;;  %v3997_v51 = vshrl.u32 %v14315_v39, %v3996_v42  ;;  %vm4016_vm9 = vcmp.lt.s32.totalorder %v3994_v8, 4  ;;  %v4021_v14 = vsel %vm4013_vm8, %v4000_v60, %v4003_v31 }
 0x26c   :  { %vm4015_vm10 = vcmp.lt.s32.totalorder %v3994_v8, 3  ;;  %v4018_v56 = vsel %vm4016_vm9, %v4006_v13, 2102212464  ;;  %v4022_v57 = vsel %vm4016_vm9, %v4009_v16, 920167782  ;;  %v4025_v40 = vsel %vm4013_vm8, %v4003_v31, %v4006_v13 }
 0x26d   :  { %vm4014_vm11 = vcmp.lt.s32.totalorder %v3994_v8, 2  ;;  %v4023_v9 = vsel %vm4015_vm10, %v4006_v13, %v4022_v57  ;;  %v4026_v55 = vsel %vm4016_vm9, %v4012_v54, 1326507024  ;;  %v4029_v45 = vshll.u32 %v3989_v15, 8 }
 0x26e   :  { %v3625_v34 = vadd.s32 %v3624_v35, %v3620_v17  ;;  %v4017_v6 = vsel %vm4013_vm8, %v3997_v51, %v4000_v60  ;;  %v4024_v44 = vsel %vm4014_vm11, %v4021_v14, %v4023_v9  ;;  %v4027_v59 = vsel %vm4015_vm10, %v4009_v16, %v4026_v55 }
 0x26f   :  { %v4019_v49 = vsel %vm4015_vm10, %v4003_v31, %v4018_v56  ;;  %v4028_v30 = vsel %vm4014_vm11, %v4025_v40, %v4027_v59  ;;  %v11491_v63 = vmul.u32.u64.low %v4029_v45, %v4024_v44  ;;  %v11492_v42 = vmul.u32.u64.high %v4029_v45, %v4024_v44, %v11491_v63 }
 0x270   :  { %v11502_v4 = vmul.u32.u64.low %v4029_v45, %v4028_v30  ;;  %v11503_v38 = vmul.u32.u64.high %v4029_v45, %v4028_v30, %v11502_v4  ;;  %v3626_v18 = vadd.s32 536870912, %v3625_v34  ;;  %v4020_v46 = vsel %vm4014_vm11, %v4017_v6, %v4019_v49  ;;  %v3487_v30 = vld [vmem:[%s13791_s4] sm:$0xf] }
 0x271   :  { %v4039_v24 = vadd.s32 1, %v11492_v42  ;;  %v4036_v36 = vmul.u32 %v4029_v45, %v4020_v46  ;;  %v3500_v46 = vrot.slane %v3487_v30, %v11386_v26  ;;  %vm11568_vm2 = vcmp.le.f32.partialorder %v3565_v23, 0.7853982 }
 0x272   :  { %vm4038_vm12 = vc.u32 %v11503_v38, %v11491_v63  ;;  %v11508_v52 = vshrl.u32 %v3626_v18, 30  ;;  %v4037_v59 = vadd.s32 %v11491_v63, %v11503_v38  ;;  %v3621_v63 = vadd.s32 %v11442_v10, %v11455_v43  ;;  %v3535_v10 = vld [vmem:[%s13792_s5] sm:$0xf] }
 0x273   :  { %v4040_v60 = vsel %vm4038_vm12, %v4039_v24, %v11492_v42  ;;  %vm4073_vm6 = vweird.f32 %v11429_v58  ;;  %vm3657_vm10 = vweird.f32 %v11413_v50 }
 0x274   :  { %v4041_v61 = vadd.s32 %v4040_v60, %v4036_v36  ;;  %v3628_v15 = vshll.u32 %v11508_v52, 30  ;;  %v3512_v36 = vpop.permute.xlu0 %3511 }
 0x276   :  { %v4042_v11 = vadd.s32 536870912, %v4041_v61  ;;  %v3629_v16 = vsub.s32 %v3625_v34, %v3628_v15  ;;  %v3521_v15 = vmul.f32 %v3512_v36, %v3500_v46 }
 0x278   :  { %v4043_v31 = vshrl.u32 %v4042_v11, 30  ;;  %v3631_v8 = vsub.s32 0, %v3629_v16 }
 0x27a   :  { %v4044_v13 = vshll.u32 %v4043_v31, 30  ;;  %v7287_v14 = vmin.u32 %v3631_v8, %v3629_v16 }
 0x27c   :  { %v4045_v17 = vsub.s32 %v4041_v61, %v4044_v13  ;;  %v3633_v57 = vclz %v7287_v14 }
 0x27e   :  { %v4047_v54 = vsub.s32 0, %v4045_v17  ;;  %v7288_v55 = vadd.s32 4294967294, %v3633_v57 }
 0x280   :  { %v7303_v35 = vmin.u32 %v4047_v54, %v4045_v17  ;;  %vm7289_vm14 = vcmp.lt.s32.totalorder %v7288_v55, 0 }
 0x281   :  { %v3636_v44 = vsel %vm7289_vm14, 0, %v7288_v55  ;;  %v4067_v55 = vsub.s32 4, %v4043_v31 }
 0x282   :  { %v4049_v51 = vclz %v7303_v35  ;;  %v3641_v42 = vsub.s32 4294967266, %v3636_v44  ;;  %v3637_v11 = vsub.s32 32, %v3636_v44 }
 0x284   :  { %v7304_v56 = vadd.s32 4294967294, %v4049_v51  ;;  %v3642_v60 = vadd.s32 127, %v3641_v42  ;;  %v3639_v35 = vshrl.u32 %v3621_v63, %v3637_v11  ;;  %v3638_v51 = vshll.u32 %v3629_v16, %v3636_v44 }
 0x285   :  { %v3492_v44 = vrot.slane %v3487_v30, %v11410_v29  ;;  %v4068_v42 = vsel %vm3983_vm15, %v4067_v55, %v4043_v31  ;;  %v4445_v11 = vand.u32 4294901760, %v11541_v0  ;;  %v11601_v55 = vld [vmem:[%s13793_s6 + $0x18] sm:$0xff] }
 0x286   :  { %vm7305_vm13 = vcmp.lt.s32.totalorder %v7304_v56, 0  ;;  %v3643_v38 = vshll.u32 %v3642_v60, 23  ;;  %v3651_v60 = vsub.s32 4, %v11508_v52  ;;  %v4070_v63 = vsel %vm11528_vm0, 0, %v4068_v42 }
 0x287   :  { %v4052_v40 = vsel %vm7305_vm13, 0, %v7304_v56  ;;  %v3640_v56 = vor.u32 %v3639_v35, %v3638_v51 }
 0x288   :  { %v4057_v9 = vsub.s32 4294967266, %v4052_v40  ;;  %v4053_v6 = vsub.s32 32, %v4052_v40  ;;  %v4054_v4 = vshll.u32 %v4045_v17, %v4052_v40  ;;  %v3644_v17 = vor.u32 4788187, %v3643_v38 }
 0x289   :  { %v3652_v35 = vsel %vm3567_vm1, %v3651_v60, %v11508_v52  ;;  %v11629_v60 = vld [vmem:[%s13793_s6 + $0x38] sm:$0xff] }
 0x28a   :  { %v4058_v45 = vadd.s32 127, %v4057_v9  ;;  %v4055_v34 = vshrl.u32 %v4037_v59, %v4053_v6  ;;  %v3645_v57 = vand.u32 2147483647, %v3644_v17  ;;  %v3647_v9 = vcvt.s32.f32 %v3640_v56 }
 0x28b   :  { %v3548_v6 = vrot.slane %v3535_v10, %v11386_v26 }
 0x28c   :  { %v4059_v49 = vshll.u32 %v4058_v45, 23  ;;  %v4056_v24 = vor.u32 %v4055_v34, %v4054_v4  ;;  %v3648_v16 = vmul.f32 %v3647_v9, %v3645_v57  ;;  %v11591_v9 = vld [vmem:[%s13793_s6 + $0x10] sm:$0xff] }
 0x28e   :  { %v4060_v18 = vor.u32 4788187, %v4059_v49  ;;  %v4063_v13 = vcvt.s32.f32 %v4056_v24  ;;  %v11546_v49 = vld [vmem:[%s13793_s6 + $0x8] sm:$0xff]  ;;  %v3649_v34 = vxor.u32 2147483648, %v3648_v16  ;;  %v3504_v24 = vrot.slane %v3487_v30, %v11393_v32 }
 0x290   :  { %v4061_v61 = vand.u32 2147483647, %v4060_v18  ;;  %v3544_v18 = vrot.slane %v3535_v10, %v11391_v27  ;;  %v3650_v31 = vsel %vm3567_vm1, %v3649_v34, %v3648_v16  ;;  %v3522_v38 = vmul.f32 %v3512_v36, %v3504_v24 }
 0x291   :  { %v4451_v34 = vand.u32 4294901760, %v11591_v9 }
 0x292   :  { %v4064_v8 = vmul.f32 %v4063_v13, %v4061_v61  ;;  %v3519_v61 = vmul.f32 %v3512_v36, %v3492_v44 }
 0x294   :  { %v4065_v14 = vxor.u32 2147483648, %v4064_v8 }
 0x296   :  { %v4066_v40 = vsel %vm3983_vm15, %v4065_v14, %v4064_v8  ;;  %v11642_v8 = vld [vmem:[%s13793_s6 + $0x40] sm:$0xff] }
 0x297   :  { %v4069_v45 = vsel %vm11528_vm0, %v11429_v58, %v4066_v40  ;;  %v11696_v58 = vld [vmem:[%s13793_s6 + $0x68] sm:$0xff] }
 0x298   :  { %9949 = vcosq.f32 %v4069_v45 }
 0x299   :  { %9951 = vsinq.f32 %v4069_v45 }
 0x2a2   :  { %v9950_v52 = vpop.eup %9949 }
 0x2a3   :  { %v4081_v42 = vxor.u32 2147483648, %v9950_v52 }
 0x2ac   :  { %v11479_v19 = vpop.f32.mrb[4].mxu0  ;;  %v11481_v2 = vpop.f32.mrb[4].mxu1 }
 0x2ad   :  { %v11484_v5 = vpop.f32.mrb[5].mxu0  ;;  %v11486_v20 = vpop.f32.mrb[5].mxu1  ;;  %v3529_v54 = vadd.f32 %v3521_v15, %v11481_v2  ;;  %v3496_v2 = vrot.slane %v3487_v30, %v11391_v27  ;;  %v4448_v15 = vand.u32 4294901760, %v11546_v49  ;;  %v3540_v27 = vrot.slane %v3535_v10, %v11410_v29 }
 0x2ae   :  { %v3517_v30 = vpop.permute.xlu1 %3516  ;;  %v3653_v29 = vsel %vm11568_vm2, %v11413_v50, %v3650_v31 }
 0x2af   :  { %v3520_v59 = vmul.f32 %v3512_v36, %v3496_v2  ;;  %v11550_v26 = vadd.f32 %v3548_v6, %v3529_v54  ;;  %v3552_v54 = vrot.slane %v3535_v10, %v11393_v32  ;;  %v11577_v51 = vpack.c.bf16 %v4448_v15, %v4445_v11 }
 0x2b0   :  { %v11494_v53 = vpop.f32.mrb[6].mxu0  ;;  %v11496_v25 = vpop.f32.mrb[6].mxu1  ;;  %v3530_v32 = vadd.f32 %v3522_v38, %v11486_v20  ;;  %v3523_v36 = vmul.f32 %v3517_v30, %v3492_v44  ;;  %v3525_v17 = vmul.f32 %v3517_v30, %v3500_v46  ;;  %v3524_v14 = vmul.f32 %v3517_v30, %v3496_v2 }
 0x2b1   :  { %v11498_v47 = vpop.f32.mrb[7].mxu0  ;;  %v11500_v21 = vpop.f32.mrb[7].mxu1  ;;  %14320 = vst [vmem:[#allocation23_spill] sm:$0xff] %v11550_v26  ;;  %v3528_v4 = vadd.f32 %v3520_v59, %v11484_v5  ;;  %v3527_v5 = vadd.f32 %v3519_v61, %v11479_v19  ;;  %v4074_v19 = vadd.s32 3, %v4070_v63  ;;  %8979 = vmatprep.subr.bf16.mxu0 %v11577_v51  ;;  %v3526_v40 = vmul.f32 %v3517_v30, %v3504_v24  ;;  %v11618_v24 = vld [vmem:[%s13793_s6 + $0x28] sm:$0xff] }
 0x2b2   :  { %v11584_v56 = vadd.f32 %v3552_v54, %v3530_v32  ;;  %8981 = vmatpush3.bf16.msra.mxu0 %v11577_v51  ;;  %v3531_v57 = vadd.f32 %v3523_v36, %v11494_v53  ;;  %v9952_v20 = vpop.eup %9951  ;;  %v3654_v10 = vsel %vm11568_vm2, 0, %v3652_v35  ;;  %9953 = vcosq.f32 %v3653_v29  ;;  %v11647_v35 = vld [vmem:[%s13793_s6 + $0x48] sm:$0xff] }
 0x2b3   :  { %v11559_v13 = vadd.f32 %v3544_v18, %v3528_v4  ;;  %v3557_v23 = vadd.f32 %v3540_v27, %v3527_v5  ;;  %v3533_v46 = vadd.f32 %v3525_v17, %v11496_v25  ;;  %v3532_v43 = vadd.f32 %v3524_v14, %v11498_v47  ;;  %v11611_v25 = vld [vmem:[%s13793_s6 + $0x20] sm:$0xff] }
 0x2b4   :  { %14324 = vst [vmem:[#allocation26_spill] sm:$0xff] %v11584_v56  ;;  %9955 = vsinq.f32 %v3653_v29  ;;  %v4075_v2 = vand.u32 3, %v4074_v19  ;;  %v3561_v16 = vadd.f32 %v3540_v27, %v3531_v57  ;;  %v3534_v53 = vadd.f32 %v3526_v40, %v11500_v21  ;;  %v11674_v57 = vld [vmem:[%s13793_s6 + $0x58] sm:$0xff]  ;;  %v11679_v40 = vld [vmem:[%s13793_s6 + $0x60] sm:$0xff] }
 0x2b5   :  { %14321 = vst [vmem:[#allocation25_spill] sm:$0xff] %v11559_v13  ;;  %v4397_v45 = vmul.f32 1.442695, %v3557_v23  ;;  %v11603_v44 = vadd.f32 %v3548_v6, %v3533_v46  ;;  %v11605_v59 = vadd.f32 %v3544_v18, %v3532_v43  ;;  %v4078_v47 = vxor.u32 2147483648, %v9952_v20  ;;  %v11624_v18 = vld [vmem:[%s13793_s6 + $0x30] sm:$0xff] }
 0x2b6   :  { %v4405_v21 = vmul.f32 1.442695, %v3561_v16  ;;  %v11613_v4 = vadd.f32 %v3552_v54, %v3534_v53  ;;  %v4454_v6 = vand.u32 4294901760, %v11601_v55  ;;  %v3658_v61 = vadd.s32 3, %v3654_v10 }
 0x2b7   :  { %14325 = vst [vmem:[#allocation40_spill] sm:$0xff] %v11603_v44  ;;  %14326 = vst [vmem:[#allocation41_spill] sm:$0xff] %v11605_v59  ;;  %vm4077_vm3 = vcmp.eq.s32.totalorder %v4075_v2, 0  ;;  %v4457_v31 = vand.u32 4294901760, %v11611_v25  ;;  %vm4080_vm4 = vcmp.eq.s32.totalorder %v4075_v2, 2  ;;  %v4460_v5 = vand.u32 4294901760, %v11618_v24 }
 0x2b8   :  { %14327 = vst [vmem:[#allocation42_spill] sm:$0xff] %v11613_v4  ;;  %9957 = vpow2.f32 %v4405_v21  ;;  %v11634_v63 = vpack.c.bf16 %v4454_v6, %v4451_v34  ;;  %v4079_v27 = vsel %vm4077_vm3, %v9950_v52, %v4078_v47  ;;  %v4082_v30 = vsel %vm4080_vm4, %v4081_v42, %v9952_v20  ;;  %v11669_v52 = vld [vmem:[%s13793_s6 + $0x50] sm:$0xff] }
 0x2b9   :  { %9959 = vpow2.f32 %v4397_v45  ;;  %v4463_v38 = vand.u32 4294901760, %v11624_v18  ;;  %v4466_v54 = vand.u32 4294901760, %v11629_v60  ;;  %v11654_v29 = vpack.c.bf16 %v4460_v5, %v4457_v31 }
 0x2ba   :  { %8983 = vmatprep.subr.bf16.mxu0 %v11634_v63  ;;  %v3659_v19 = vand.u32 3, %v3658_v61  ;;  %vm4076_vm5 = vcmp.lt.s32.totalorder %v4075_v2, 2  ;;  %v13956_v17 = vand.u32 4294901760, %v11642_v8  ;;  %v13955_v14 = vand.u32 4294901760, %v11647_v35 }
 0x2bb   :  { %8985 = vmatpush3.bf16.msra.mxu0 %v11634_v63  ;;  %v4083_v36 = vsel %vm4076_vm5, %v4079_v27, %v4082_v30  ;;  %v11662_v23 = vpack.c.bf16 %v4466_v54, %v4463_v38  ;;  %v13968_v46 = vand.u32 4294901760, %v11669_v52  ;;  %v13966_v43 = vand.u32 4294901760, %v11674_v57  ;;  %v11711_v30 = vld [vmem:[%s13793_s6 + $0x70] sm:$0xff] }
 0x2bc   :  { %v9954_v32 = vpop.eup %9953  ;;  %8987 = vmatprep.subr.bf16.mxu0 %v11654_v29  ;;  %v4084_v10 = vsel %vm4073_vm6, nan, %v4083_v36  ;;  %v13964_v2 = vand.u32 4294901760, %v11679_v40  ;;  %v11691_v16 = vpack.c.bf16 %v13955_v14, %v13956_v17  ;;  %vm3660_vm7 = vcmp.lt.s32.totalorder %v3659_v19, 2 }
 0x2bd   :  { %v3665_v45 = vxor.u32 2147483648, %v9954_v32  ;;  %vm3661_vm8 = vcmp.eq.s32.totalorder %v3659_v19, 0  ;;  %vm3664_vm9 = vcmp.eq.s32.totalorder %v3659_v19, 2  ;;  %v11701_v42 = vsub.f32 %v11541_v0, %v4445_v11  ;;  %v11727_v11 = vld [vmem:[%s13793_s6 + $0x78] sm:$0xff] }
 0x2be   :  { %v9956_v20 = vpop.eup %9955  ;;  %v11706_v21 = vsub.f32 %v11546_v49, %v4448_v15  ;;  %v11714_v17 = vsub.f32 %v11591_v9, %v4451_v34  ;;  %v11721_v0 = vpack.c.bf16 %v13966_v43, %v13968_v46  ;;  %v13959_v49 = vand.u32 4294901760, %v11696_v58 }
 0x2bf   :  { %8989 = vmatpush3.bf16.msra.mxu0 %v11654_v29  ;;  %v3662_v53 = vxor.u32 2147483648, %v9956_v20  ;;  %v3666_v14 = vsel %vm3664_vm9, %v3665_v45, %v9956_v20  ;;  %v11745_v19 = vsub.f32 %v11601_v55, %v4454_v6  ;;  %v14329_v4 = vand.u32 4294901760, %v11647_v35 }
 0x2c0   :  { %8991 = vmatprep.subr.bf16.mxu0 %v11662_v23  ;;  %v13958_v20 = vand.u32 4294901760, %v11706_v21  ;;  %v13962_v50 = vand.u32 4294901760, %v11714_v17  ;;  %vm3671_vm9 = vcmp.lt.s32.totalorder %v11405_v7, 0 }
 0x2c1   :  { %v3663_v36 = vsel %vm3661_vm8, %v9954_v32, %v3662_v53  ;;  %v13957_v32 = vand.u32 4294901760, %v11701_v42  ;;  %v13963_v6 = vand.u32 4294901760, %v11745_v19  ;;  %v11825_v56 = vsub.f32 %v11647_v35, %v14329_v4 }
 0x2c2   :  { %v9958_v47 = vpop.eup %9957  ;;  %v3667_v15 = vsel %vm3660_vm7, %v3663_v36, %v3666_v14  ;;  %v4556_v55 = vsub.f32 %v11706_v21, %v13958_v20  ;;  %v11780_v20 = vsub.f32 %v11611_v25, %v4457_v31  ;;  %v14331_v35 = vand.u32 4294901760, %v11674_v57 }
 0x2c3   :  { %v9960_v61 = vpop.eup %9959  ;;  %v4417_v27 = vmul.f32 %v9958_v47, %v4084_v10  ;;  %8993 = vmatpush3.bf16.msra.mxu0 %v11662_v23  ;;  %v3668_v34 = vsel %vm3657_vm10, nan, %v3667_v15  ;;  %v13961_v10 = vand.u32 4294901760, %v11711_v30  ;;  %v13960_v47 = vand.u32 4294901760, %v11727_v11 }
 0x2c4   :  { %8995 = vmatprep.subr.bf16.mxu0 %v11691_v16  ;;  %v4413_v53 = vmul.f32 %v9960_v61, %v3668_v34  ;;  %v4549_v61 = vsub.f32 %v11701_v42, %v13957_v32  ;;  %v4563_v32 = vsub.f32 %v11714_v17, %v13962_v50  ;;  %v4557_v50 = vand.u32 4294901760, %v4556_v55 }
 0x2c5   :  { %v11731_v9 = vand.u32 4294901760, %v4417_v27  ;;  %v11771_v15 = vpack.c.bf16 %v13960_v47, %v13961_v10  ;;  %v11787_v47 = vsub.f32 %v11618_v24, %v4460_v5  ;;  %v11792_v10 = vsub.f32 %v11624_v18, %v4463_v38 }
 0x2c6   :  { %v11748_v14 = vand.u32 4294901760, %v4413_v53  ;;  %v4570_v25 = vsub.f32 %v11745_v19, %v13963_v6  ;;  %v4576_v31 = vand.u32 4294901760, %v11780_v20  ;;  %vm4087_vm10 = vcmp.lt.s32.totalorder %v11448_v28, 0 }
 0x2c7   :  { %v11738_v45 = vsub.f32 %v4417_v27, %v11731_v9  ;;  %8997 = vmatpush3.bf16.msra.mxu0 %v11691_v16  ;;  %v11758_v27 = vpack.c.bf16 %v13959_v49, %v13964_v2  ;;  %v4550_v49 = vand.u32 4294901760, %v4549_v61  ;;  %v11802_v61 = vsub.f32 %v11629_v60, %v4466_v54 }
 0x2c8   :  { %8999 = vmatprep.subr.bf16.mxu0 %v11721_v0  ;;  %v11765_v36 = vsub.f32 %v4413_v53, %v11748_v14  ;;  %v4583_v18 = vand.u32 4294901760, %v11787_v47  ;;  %v4577_v38 = vsub.f32 %v11780_v20, %v4576_v31  ;;  %v4590_v55 = vand.u32 4294901760, %v11792_v10 }
 0x2c9   :  { %v13967_v34 = vand.u32 4294901760, %v11738_v45  ;;  %v4597_v6 = vand.u32 4294901760, %v11802_v61  ;;  %v14328_v2 = vand.u32 4294901760, %v11642_v8  ;;  %v9010_v43 = vpack.c.bf16 %v4557_v50, %v4550_v49 }
 0x2ca   :  { %v13965_v53 = vand.u32 4294901760, %v11765_v36  ;;  %v4584_v54 = vsub.f32 %v11787_v47, %v4583_v18  ;;  %v4571_v46 = vand.u32 4294901760, %v4570_v25  ;;  %v4591_v62 = vsub.f32 %v11792_v10, %v4590_v55 }
 0x2cb   :  { %9001 = vmatpush3.bf16.msra.mxu0 %v11721_v0  ;;  %v4538_v5 = vsub.f32 %v11738_v45, %v13967_v34  ;;  %v4564_v34 = vand.u32 4294901760, %v4563_v32  ;;  %v4598_v44 = vsub.f32 %v11802_v61, %v4597_v6  ;;  %v4611_v49 = vand.u32 4294901760, %v11825_v56 }
 0x2cc   :  { %9003 = vmatprep.subr.bf16.mxu0 %v11758_v27  ;;  %v4528_v24 = vsub.f32 %v11765_v36, %v13965_v53  ;;  %v11819_v53 = vsub.f32 %v11642_v8, %v14328_v2  ;;  %v4585_v8 = vand.u32 4294901760, %v4584_v54  ;;  %v14330_v32 = vand.u32 4294901760, %v11669_v52 }
 0x2cd   :  { %v4539_v33 = vand.u32 4294901760, %v4538_v5  ;;  %v9014_v4 = vpack.c.bf16 %v4571_v46, %v4564_v34  ;;  %v11840_v25 = vsub.f32 %v11674_v57, %v14331_v35  ;;  %v4592_v5 = vand.u32 4294901760, %v4591_v62 }
 0x2ce   :  { %v4529_v60 = vand.u32 4294901760, %v4528_v24  ;;  %v4578_v24 = vand.u32 4294901760, %v4577_v38  ;;  %v4604_v2 = vand.u32 4294901760, %v11819_v53  ;;  %v11835_v50 = vsub.f32 %v11669_v52, %v14330_v32 }
 0x2cf   :  { %9005 = vmatpush3.bf16.msra.mxu0 %v11758_v27  ;;  %v4599_v38 = vand.u32 4294901760, %v4598_v44  ;;  %v4612_v26 = vsub.f32 %v11825_v56, %v4611_v49  ;;  %v4625_v46 = vand.u32 4294901760, %v11840_v25  ;;  %v14332_v34 = vand.u32 4294901760, %v11679_v40 }
 0x2d0   :  { %9007 = vmatprep.subr.bf16.mxu0 %v11771_v15  ;;  %7786 = vmatprep.mubr.f32.mxu0 %v4529_v60  ;;  %v9018_v60 = vpack.c.bf16 %v4585_v8, %v4578_v24  ;;  %v4605_v54 = vsub.f32 %v11819_v53, %v4604_v2  ;;  %v4618_v52 = vand.u32 4294901760, %v11835_v50  ;;  %v14333_v62 = vand.u32 4294901760, %v11696_v58 }
 0x2d1   :  { %v11850_v57 = vsub.f32 %v11679_v40, %v14332_v34  ;;  %v14334_v44 = vand.u32 4294901760, %v11711_v30  ;;  %v14335_v24 = vand.u32 4294901760, %v11727_v11  ;;  %v9022_v32 = vpack.c.bf16 %v4599_v38, %v4592_v5 }
 0x2d2   :  { %v4606_v35 = vand.u32 4294901760, %v4605_v54  ;;  %v4613_v40 = vand.u32 4294901760, %v4612_v26  ;;  %v4619_v34 = vsub.f32 %v11835_v50, %v4618_v52  ;;  %v14338_v26 = vand.u32 4294901760, %v11714_v17 }
 0x2d3   :  { %9009 = vmatpush3.bf16.msra.mxu0 %v11771_v15  ;;  %v11865_v8 = vsub.f32 %v11727_v11, %v14335_v24  ;;  %v14336_v11 = vand.u32 4294901760, %v11701_v42  ;;  %v14339_v38 = vand.u32 4294901760, %v11745_v19  ;;  %v11885_v24 = vpack.c.bf16 %v4583_v18, %v4576_v31 }
 0x2d4   :  { %9011 = vmatprep.subr.bf16.mxu0 %v9010_v43  ;;  %v11887_v1 = vpack.c.bf16 %v4597_v6, %v4590_v55  ;;  %v11889_v59 = vpack.c.bf16 %v4611_v49, %v4604_v2  ;;  %v11891_v13 = vpack.c.bf16 %v4625_v46, %v4618_v52  ;;  %v4620_v3 = vand.u32 4294901760, %v4619_v34 }
 0x2d5   :  { %v11883_v54 = vpack.c.bf16 %v14339_v38, %v14338_v26 }
 0x2d6   :  { %7787 = vmatmul.mubr.f32.vlgmr.msra.gmra.mrb[8].mxu0 %v4539_v33  ;;  %v11855_v33 = vsub.f32 %v11696_v58, %v14333_v62  ;;  %v4626_v58 = vsub.f32 %v11840_v25, %v4625_v46  ;;  %v4632_v62 = vand.u32 4294901760, %v11850_v57 }
 0x2d7   :  { %9013 = vmatpush3.bf16.msra.mxu0 %v9010_v43  ;;  %7821 = vmatprep.mubr.f32.mxu0 %v11748_v14  ;;  %v11860_v43 = vsub.f32 %v11711_v30, %v14334_v44  ;;  %v4653_v44 = vand.u32 4294901760, %v11865_v8 }
 0x2d8   :  { %9015 = vmatprep.subr.bf16.mxu0 %v9014_v4  ;;  %v4639_v37 = vand.u32 4294901760, %v11855_v33  ;;  %v4627_v39 = vand.u32 4294901760, %v4626_v58  ;;  %v4633_v26 = vsub.f32 %v11850_v57, %v4632_v62 }
 0x2d9   :  { %v4646_v30 = vand.u32 4294901760, %v11860_v43  ;;  %v4654_v49 = vsub.f32 %v11865_v8, %v4653_v44 }
 0x2da   :  { %v11893_v22 = vpack.c.bf16 %v4639_v37, %v4632_v62  ;;  %v4640_v31 = vsub.f32 %v11855_v33, %v4639_v37  ;;  %v9030_v18 = vpack.c.bf16 %v4627_v39, %v4620_v3  ;;  %v4634_v55 = vand.u32 4294901760, %v4633_v26  ;;  %v11906_v39 = vld [vmem:[#allocation4] sm:$0xff] }
 0x2db   :  { %9017 = vmatpush3.bf16.msra.mxu0 %v9014_v4  ;;  %v14337_v4 = vand.u32 4294901760, %v11706_v21  ;;  %v4647_v6 = vsub.f32 %v11860_v43, %v4646_v30  ;;  %v4655_v46 = vand.u32 4294901760, %v4654_v49  ;;  %v9042_v37 = vpack.c.bf16 %v11706_v21, %v11701_v42  ;;  %v11915_v21 = vld [vmem:[#allocation4 + $0x18] sm:$0xff] }
 0x2dc   :  { %9019 = vmatprep.subr.bf16.mxu0 %v9018_v60  ;;  %v4641_v2 = vand.u32 4294901760, %v4640_v31  ;;  %v9046_v3 = vpack.c.bf16 %v11745_v19, %v11714_v17  ;;  %v5154_v34 = vand.u32 4294901760, %v11906_v39  ;;  %v11918_v17 = vld [vmem:[#allocation4 + $0x20] sm:$0xff]  ;;  %v11920_v19 = vld [vmem:[#allocation4 + $0x28] sm:$0xff]  ;;  %v9050_v62 = vpack.c.bf16 %v11787_v47, %v11780_v20  ;;  %v11939_v31 = vld [vmem:[#allocation4 + $0x30] sm:$0xff] }
 0x2dd   :  { %v11877_v5 = vpack.c.bf16 %v14337_v4, %v14336_v11  ;;  %v11895_v11 = vpack.c.bf16 %v4653_v44, %v4646_v30  ;;  %v9026_v4 = vpack.c.bf16 %v4613_v40, %v4606_v35  ;;  %v4648_v52 = vand.u32 4294901760, %v4647_v6  ;;  %v11910_v40 = vld [vmem:[#allocation4 + $0x10] sm:$0xff]  ;;  %v11941_v20 = vld [vmem:[#allocation4 + $0x38] sm:$0xff] }
 0x2de   :  { %v13982_v58 = vand.u32 4294901760, %v11910_v40  ;;  %v13981_v30 = vand.u32 4294901760, %v11915_v21  ;;  %v13979_v38 = vand.u32 4294901760, %v11918_v17  ;;  %v9054_v47 = vpack.c.bf16 %v11802_v61, %v11792_v10 }
 0x2df   :  { %9021 = vmatpush3.bf16.msra.mxu0 %v9018_v60  ;;  %v9034_v60 = vpack.c.bf16 %v4641_v2, %v4634_v55  ;;  %v9038_v35 = vpack.c.bf16 %v4655_v46, %v4648_v52  ;;  %v13976_v55 = vand.u32 4294901760, %v11941_v20  ;;  %v9058_v2 = vpack.c.bf16 %v11825_v56, %v11819_v53 }
 0x2e0   :  { %9023 = vmatprep.subr.bf16.mxu0 %v9022_v32  ;;  %v11937_v26 = vpack.c.bf16 %v13981_v30, %v13982_v58  ;;  %v9062_v61 = vpack.c.bf16 %v11840_v25, %v11835_v50  ;;  %v9066_v56 = vpack.c.bf16 %v11855_v33, %v11850_v57  ;;  %v9070_v53 = vpack.c.bf16 %v11865_v8, %v11860_v43 }
 0x2e1   :  { %v14340_v50 = vand.u32 4294901760, %v11765_v36  ;;  %v14344_v49 = vmov 2131351028  }
 0x2e3   :  { %9025 = vmatpush3.bf16.msra.mxu0 %v9022_v32  ;;  %v11908_v32 = vld [vmem:[#allocation4 + $0x8] sm:$0xff] }
 0x2e4   :  { %9027 = vmatprep.subr.bf16.mxu0 %v9026_v4  ;;  %v5157_v42 = vand.u32 4294901760, %v11908_v32 }
 0x2e6   :  { %v11929_v44 = vpack.c.bf16 %v5157_v42, %v5154_v34 }
 0x2e7   :  { %9029 = vmatpush3.bf16.msra.mxu0 %v9026_v4  ;;  %v13978_v4 = vand.u32 4294901760, %v11920_v19 }
 0x2e8   :  { %9031 = vmatprep.subr.bf16.mxu0 %v9030_v18  ;;  %9171 = vmatprep.subr.bf16.mxu1 %v11929_v44 }
 0x2e9   :  { %9173 = vmatpush3.bf16.msra.mxu1 %v11929_v44  ;;  %v11952_v6 = vpack.c.bf16 %v13978_v4, %v13979_v38 }
 0x2ea   :  { %9175 = vmatprep.subr.bf16.mxu1 %v11937_v26 }
 0x2eb   :  { %9033 = vmatpush3.bf16.msra.mxu0 %v9030_v18  ;;  %v13977_v18 = vand.u32 4294901760, %v11939_v31 }
 0x2ec   :  { %9035 = vmatprep.subr.bf16.mxu0 %v9034_v60 }
 0x2ed   :  { %9177 = vmatpush3.bf16.msra.mxu1 %v11937_v26  ;;  %v11964_v10 = vpack.c.bf16 %v13976_v55, %v13977_v18  ;;  %v12174_v55 = vsub.f32 %v11906_v39, %v5154_v34 }
 0x2ee   :  { %9179 = vmatprep.subr.bf16.mxu1 %v11952_v6 }
 0x2ef   :  { %9037 = vmatpush3.bf16.msra.mxu0 %v9034_v60  ;;  %v13980_v34 = vand.u32 4294901760, %v12174_v55 }
 0x2f0   :  { %9039 = vmatprep.subr.bf16.mxu0 %v9038_v35 }
 0x2f1   :  { %9181 = vmatpush3.bf16.msra.mxu1 %v11952_v6 }
 0x2f2   :  { %9183 = vmatprep.subr.bf16.mxu1 %v11964_v10 }
 0x2f3   :  { %9041 = vmatpush3.bf16.msra.mxu0 %v9038_v35 }
 0x2f4   :  { %9043 = vmatprep.subr.bf16.mxu0 %v9042_v37 }
 0x2f5   :  { %9185 = vmatpush3.bf16.msra.mxu1 %v11964_v10 }
 0x2f6   :  { %7822 = vmatmul.mubr.f32.vlgmr.msra.gmra.mrb[8].mxu0 %v11731_v9 }
 0x2f7   :  { %9045 = vmatpush3.bf16.msra.mxu0 %v9042_v37  ;;  %7856 = vmatprep.mubr.f32.mxu0 %v11765_v36  ;;  %v14341_v36 = vand.u32 4294901760, %v11738_v45 }
 0x2f8   :  { %9047 = vmatprep.subr.bf16.mxu0 %v9046_v3 }
 0x2fb   :  { %9049 = vmatpush3.bf16.msra.mxu0 %v9046_v3 }
 0x2fc   :  { %9051 = vmatprep.subr.bf16.mxu0 %v9050_v62 }
 0x2ff   :  { %9053 = vmatpush3.bf16.msra.mxu0 %v9050_v62 }
 0x300   :  { %9055 = vmatprep.subr.bf16.mxu0 %v9054_v47 }
 0x303   :  { %9057 = vmatpush3.bf16.msra.mxu0 %v9054_v47 }
 0x304   :  { %9059 = vmatprep.subr.bf16.mxu0 %v9058_v2 }
 0x307   :  { %9061 = vmatpush3.bf16.msra.mxu0 %v9058_v2 }
 0x308   :  { %9063 = vmatprep.subr.bf16.mxu0 %v9062_v61 }
 0x30b   :  { %9065 = vmatpush3.bf16.msra.mxu0 %v9062_v61  ;;  %v13984_v61 = vand.u32 2147483647, %v11448_v28 }
 0x30c   :  { %9067 = vmatprep.subr.bf16.mxu0 %v9066_v56 }
 0x30f   :  { %9069 = vmatpush3.bf16.msra.mxu0 %v9066_v56 }
 0x310   :  { %9071 = vmatprep.subr.bf16.mxu0 %v9070_v53 }
 0x313   :  { %9073 = vmatpush3.bf16.msra.mxu0 %v9070_v53 }
 0x314   :  { %9075 = vmatprep.subr.bf16.mxu0 %v11577_v51 }
 0x316   :  { %7857 = vmatmul.mubr.f32.vlgmr.msra.gmra.mrb[8].mxu0 %v11738_v45 }
 0x317   :  { %9077 = vmatpush3.bf16.msra.mxu0 %v11577_v51  ;;  %7891 = vmatprep.mubr.f32.mxu0 %v14340_v50 }
 0x318   :  { %9079 = vmatprep.subr.bf16.mxu0 %v11634_v63 }
 0x31b   :  { %9081 = vmatpush3.bf16.msra.mxu0 %v11634_v63 }
 0x31c   :  { %9083 = vmatprep.subr.bf16.mxu0 %v11654_v29 }
 0x31f   :  { %9085 = vmatpush3.bf16.msra.mxu0 %v11654_v29 }
 0x320   :  { %9087 = vmatprep.subr.bf16.mxu0 %v11662_v23 }
 0x323   :  { %9089 = vmatpush3.bf16.msra.mxu0 %v11662_v23 }
 0x324   :  { %9091 = vmatprep.subr.bf16.mxu0 %v11691_v16 }
 0x327   :  { %9093 = vmatpush3.bf16.msra.mxu0 %v11691_v16 }
 0x328   :  { %9095 = vmatprep.subr.bf16.mxu0 %v11721_v0 }
 0x32b   :  { %9097 = vmatpush3.bf16.msra.mxu0 %v11721_v0 }
 0x32c   :  { %9099 = vmatprep.subr.bf16.mxu0 %v11758_v27 }
 0x32f   :  { %9101 = vmatpush3.bf16.msra.mxu0 %v11758_v27 }
 0x330   :  { %9103 = vmatprep.subr.bf16.mxu0 %v11771_v15 }
 0x333   :  { %9105 = vmatpush3.bf16.msra.mxu0 %v11771_v15 }
 0x334   :  { %9107 = vmatprep.subr.bf16.mxu0 %v11877_v5 }
 0x336   :  { %7892 = vmatmul.mubr.f32.vlgmr.msra.gmra.mrb[8].mxu0 %v14341_v36 }
 0x337   :  { %9109 = vmatpush3.bf16.msra.mxu0 %v11877_v5  ;;  %7926 = vmatprep.mubr.f32.mxu0 %v11748_v14  ;;  %v14342_v5 = vmov 683565275  }
 0x338   :  { %9111 = vmatprep.subr.bf16.mxu0 %v11883_v54 }
 0x33b   :  { %9113 = vmatpush3.bf16.msra.mxu0 %v11883_v54 }
 0x33c   :  { %9115 = vmatprep.subr.bf16.mxu0 %v11885_v24 }
 0x33f   :  { %9117 = vmatpush3.bf16.msra.mxu0 %v11885_v24  ;;  %v14343_v24 = vmov 2102212464  }
 0x340   :  { %9119 = vmatprep.subr.bf16.mxu0 %v11887_v1 }
 0x343   :  { %9121 = vmatpush3.bf16.msra.mxu0 %v11887_v1  ;;  %v3672_v1 = vand.u32 2139095040, %v11405_v7 }
 0x344   :  { %9123 = vmatprep.subr.bf16.mxu0 %v11889_v59 }
 0x347   :  { %9125 = vmatpush3.bf16.msra.mxu0 %v11889_v59 }
 0x348   :  { %9127 = vmatprep.subr.bf16.mxu0 %v11891_v13 }
 0x34b   :  { %9129 = vmatpush3.bf16.msra.mxu0 %v11891_v13  ;;  %v3673_v13 = vshrl.u32 %v3672_v1, 23 }
 0x34c   :  { %9131 = vmatprep.subr.bf16.mxu0 %v11893_v22 }
 0x34d   :  { %v7290_v59 = vadd.s32 4294967169, %v3673_v13 }
 0x34f   :  { %9133 = vmatpush3.bf16.msra.mxu0 %v11893_v22  ;;  %v4088_v22 = vand.u32 2139095040, %v11448_v28 }
 0x350   :  { %9135 = vmatprep.subr.bf16.mxu0 %v11895_v11 }
 0x353   :  { %9137 = vmatpush3.bf16.msra.mxu0 %v11895_v11 }
 0x354   :  { %9139 = vmatprep.subr.bf16.mxu0 %v11577_v51 }
 0x356   :  { %7927 = vmatmul.mubr.f32.vlgmr.msra.gmra.mrb[8].mxu0 %v11731_v9 }
 0x357   :  { %9141 = vmatpush3.bf16.msra.mxu0 %v11577_v51  ;;  %7961 = vmatprep.mubr.f32.mxu0 %v11748_v14  ;;  %v4089_v51 = vshrl.u32 %v4088_v22, 23 }
 0x358   :  { %9143 = vmatprep.subr.bf16.mxu0 %v11634_v63 }
 0x35b   :  { %9145 = vmatpush3.bf16.msra.mxu0 %v11634_v63  ;;  %v7306_v63 = vadd.s32 4294967169, %v4089_v51 }
 0x35c   :  { %9147 = vmatprep.subr.bf16.mxu0 %v11654_v29 }
 0x35f   :  { %9149 = vmatpush3.bf16.msra.mxu0 %v11654_v29  ;;  %v3679_v29 = vadd.s32 1, %v7290_v59 }
 0x360   :  { %9151 = vmatprep.subr.bf16.mxu0 %v11662_v23 }
 0x361   :  { %vm3680_vm11 = vcmp.gt.s32.totalorder %v3679_v29, 0 }
 0x363   :  { %9153 = vmatpush3.bf16.msra.mxu0 %v11662_v23  ;;  %v4095_v23 = vadd.s32 1, %v7306_v63 }
 0x364   :  { %9155 = vmatprep.subr.bf16.mxu0 %v11691_v16 }
 0x365   :  { %vm4096_vm12 = vcmp.gt.s32.totalorder %v4095_v23, 0 }
 0x366   :  { %v4097_v45 = vsel %vm4096_vm12, %v4095_v23, 0 }
 0x367   :  { %9157 = vmatpush3.bf16.msra.mxu0 %v11691_v16  ;;  %v3681_v16 = vsel %vm3680_vm11, %v3679_v29, 0  ;;  %v4099_v14 = vand.u32 31, %v4097_v45  ;;  %v12066_v50 = vshrl.u32 %v4097_v45, 5 }
 0x368   :  { %9159 = vmatprep.subr.bf16.mxu0 %v11721_v0  ;;  %v12047_v8 = vshrl.u32 %v3681_v16, 5 }
 0x369   :  { %v4111_v56 = vshll.u32 %v14343_v24, %v4099_v14  ;;  %v4114_v63 = vshll.u32 %v14310_v41, %v4099_v14  ;;  %v4102_v29 = vshll.u32 %v14342_v5, %v4099_v14  ;;  %v4105_v23 = vshll.u32 %v14312_v48, %v4099_v14 }
 0x36a   :  { %vm3704_vm13 = vcmp.lt.s32.totalorder %v12047_v8, 4  ;;  %vm4120_vm14 = vcmp.lt.s32.totalorder %v12066_v50, 4  ;;  %vm3701_vm15 = vcmp.lt.s32.totalorder %v12047_v8, 1  ;;  %vm3703_vm0 = vcmp.lt.s32.totalorder %v12047_v8, 3 }
 0x36b   :  { %9161 = vmatpush3.bf16.msra.mxu0 %v11721_v0  ;;  %v3683_v0 = vand.u32 31, %v3681_v16  ;;  %v4108_v16 = vshll.u32 %v14344_v49, %v4099_v14  ;;  %vm4117_vm1 = vcmp.lt.s32.totalorder %v12066_v50, 1  ;;  %vm4119_vm2 = vcmp.lt.s32.totalorder %v12066_v50, 3 }
 0x36c   :  { %9163 = vmatprep.subr.bf16.mxu0 %v11758_v27  ;;  %vm3702_vm3 = vcmp.lt.s32.totalorder %v12047_v8, 2  ;;  %vm4118_vm4 = vcmp.lt.s32.totalorder %v12066_v50, 2 }
 0x36d   :  { %v3686_v54 = vshll.u32 %v14342_v5, %v3683_v0  ;;  %v3695_v11 = vshll.u32 %v14343_v24, %v3683_v0  ;;  %v3698_v46 = vshll.u32 %v14310_v41, %v3683_v0  ;;  %v3689_v3 = vshll.u32 %v14312_v48, %v3683_v0 }
 0x36e   :  { %v3692_v62 = vshll.u32 %v14344_v49, %v3683_v0 }
 0x36f   :  { %9165 = vmatpush3.bf16.msra.mxu0 %v11758_v27  ;;  %v12034_v27 = vsub.s32 32, %v3683_v0 }
 0x370   :  { %9167 = vmatprep.subr.bf16.mxu0 %v11771_v15 }
 0x371   :  { %v3687_v25 = vshrl.u32 %v14312_v48, %v12034_v27  ;;  %v3696_v57 = vshrl.u32 %v14310_v41, %v12034_v27  ;;  %v3699_v33 = vshrl.u32 %v14314_v12, %v12034_v27  ;;  %v3690_v60 = vshrl.u32 %v14344_v49, %v12034_v27 }
 0x372   :  { %v3693_v52 = vshrl.u32 %v14343_v24, %v12034_v27 }
 0x373   :  { %9169 = vmatpush3.bf16.msra.mxu0 %v11771_v15  ;;  %v12037_v15 = vsub.s32 32, %v4099_v14  ;;  %v12058_v37 = vor.u32 %v3687_v25, %v3686_v54  ;;  %v3697_v47 = vor.u32 %v3696_v57, %v3695_v11  ;;  %v3700_v2 = vor.u32 %v3699_v33, %v3698_v46 }
 0x374   :  { %v3691_v13 = vor.u32 %v3690_v60, %v3689_v3  ;;  %v3694_v51 = vor.u32 %v3693_v52, %v3692_v62  ;;  %v4092_v25 = vand.u32 8388607, %v13984_v61 }
 0x375   :  { %v4112_v35 = vshrl.u32 %v14310_v41, %v12037_v15  ;;  %v4115_v53 = vshrl.u32 %v14314_v12, %v12037_v15  ;;  %v4103_v36 = vshrl.u32 %v14312_v48, %v12037_v15  ;;  %v4106_v1 = vshrl.u32 %v14344_v49, %v12037_v15 }
 0x376   :  { %7962 = vmatmul.mubr.f32.vlgmr.msra.gmra.mrb[8].mxu0 %v11731_v9  ;;  %v13985_v9 = vand.u32 2147483647, %v11405_v7  ;;  %v4109_v22 = vshrl.u32 %v14343_v24, %v12037_v15  ;;  %v3710_v0 = vsel %vm3704_vm13, %v3697_v47, 920167782  ;;  %v3714_v45 = vsel %vm3704_vm13, %v3700_v2, 1326507024 }
 0x377   :  { %v4113_v59 = vor.u32 %v4112_v35, %v4111_v56  ;;  %v4116_v57 = vor.u32 %v4115_v53, %v4114_v63  ;;  %v12085_v33 = vor.u32 %v4103_v36, %v4102_v29  ;;  %v12087_v54 = vor.u32 %v4106_v1, %v4105_v23 }
 0x378   :  { %v3676_v43 = vand.u32 8388607, %v13985_v9  ;;  %v4110_v11 = vor.u32 %v4109_v22, %v4108_v16  ;;  %v3709_v52 = vsel %vm3701_vm15, %v12058_v37, %v3691_v13  ;;  %v3711_v46 = vsel %vm3703_vm0, %v3694_v51, %v3710_v0 }
 0x379   :  { %v4126_v14 = vsel %vm4120_vm14, %v4113_v59, 920167782  ;;  %v3713_v35 = vsel %vm3701_vm15, %v3691_v13, %v3694_v51  ;;  %v4130_v3 = vsel %vm4120_vm14, %v4116_v57, 1326507024  ;;  %v4093_v62 = vor.u32 8388608, %v4092_v25 }
 0x37a   :  { %v3677_v60 = vor.u32 8388608, %v3676_v43  ;;  %v3715_v43 = vsel %vm3703_vm0, %v3697_v47, %v3714_v45  ;;  %v4125_v2 = vsel %vm4117_vm1, %v12085_v33, %v12087_v54  ;;  %v4127_v56 = vsel %vm4119_vm2, %v4110_v11, %v4126_v14 }
 0x37b   :  { %v3712_v47 = vsel %vm3702_vm3, %v3709_v52, %v3711_v46  ;;  %v3716_v36 = vsel %vm3702_vm3, %v3713_v35, %v3715_v43  ;;  %v4129_v1 = vsel %vm4117_vm1, %v12087_v54, %v4110_v11  ;;  %v4131_v22 = vsel %vm4119_vm2, %v4113_v59, %v4130_v3  ;;  %v5138_v35 = vld [vmem:[#allocation4 + $0x40] sm:$0xff]  ;;  %v5139_v43 = vld [vmem:[#allocation4 + $0x48] sm:$0xff]  ;;  %v12150_v3 = vld [vmem:[#allocation4 + $0x50] sm:$0xff] }
 0x37c   :  { %v12116_v53 = vshll.u32 %v3677_v60, 8  ;;  %v4128_v63 = vsel %vm4118_vm4, %v4125_v2, %v4127_v56  ;;  %v4133_v16 = vshll.u32 %v4093_v62, 8  ;;  %v4132_v25 = vsel %vm4118_vm4, %v4129_v1, %v4131_v22  ;;  %v12152_v56 = vld [vmem:[#allocation4 + $0x58] sm:$0xff]  ;;  %v12157_v1 = vld [vmem:[#allocation4 + $0x68] sm:$0xff] }
 0x37d   :  { %v3706_v59 = vsel %vm3704_vm13, %v3694_v51, 2102212464  ;;  %v3685_v14 = vshrl.u32 %v14342_v5, %v12034_v27  ;;  %v5178_v62 = vand.u32 4294901760, %v5138_v35  ;;  %v5181_v2 = vand.u32 4294901760, %v5139_v43 }
 0x37e   :  { %v12129_v29 = vmul.u32.u64.low %v12116_v53, %v3712_v47  ;;  %v12130_v23 = vmul.u32.u64.high %v12116_v53, %v3712_v47, %v12129_v29  ;;  %v12134_v0 = vmul.u32.u64.low %v12116_v53, %v3716_v36  ;;  %v12135_v45 = vmul.u32.u64.high %v12116_v53, %v3716_v36, %v12134_v0  ;;  %v12155_v36 = vld [vmem:[#allocation4 + $0x60] sm:$0xff] }
 0x37f   :  { %v12139_v57 = vmul.u32.u64.low %v4133_v16, %v4128_v63  ;;  %v12140_v60 = vmul.u32.u64.high %v4133_v16, %v4128_v63, %v12139_v57  ;;  %v12147_v52 = vmul.u32.u64.low %v4133_v16, %v4132_v25  ;;  %v12148_v46 = vmul.u32.u64.high %v4133_v16, %v4132_v25, %v12147_v52 }
 0x380   :  { %v5184_v47 = vand.u32 4294901760, %v12150_v3  ;;  %v3705_v27 = vsel %vm3701_vm15, %v3685_v14, %v12058_v37  ;;  %v3707_v51 = vsel %vm3703_vm0, %v3691_v13, %v3706_v59  ;;  %v4122_v22 = vsel %vm4120_vm14, %v4110_v11, 2102212464  ;;  %v12180_v59 = vld [vmem:[#allocation4 + $0x70] sm:$0xff]  ;;  %v12182_v11 = vld [vmem:[#allocation4 + $0x78] sm:$0xff] }
 0x381   :  { %v5187_v63 = vand.u32 4294901760, %v12152_v56  ;;  %v12167_v0 = vpack.c.bf16 %v5181_v2, %v5178_v62  ;;  %v5190_v25 = vand.u32 4294901760, %v12155_v36  ;;  %v5193_v52 = vand.u32 4294901760, %v12157_v1 }
 0x382   :  { %v4101_v37 = vshrl.u32 %v14342_v5, %v12037_v15  ;;  %v12187_v14 = vsub.f32 %v11908_v32, %v5157_v42  ;;  %v3708_v18 = vsel %vm3702_vm3, %v3705_v27, %v3707_v51  ;;  %vm3726_vm5 = vc.u32 %v12135_v45, %v12129_v29 }
 0x383   :  { %v12178_v13 = vpack.c.bf16 %v5187_v63, %v5184_v47  ;;  %v3727_v39 = vadd.s32 1, %v12130_v23  ;;  %9187 = vmatprep.subr.bf16.mxu1 %v12167_v0  ;;  %v4123_v32 = vsel %vm4119_vm2, %v12087_v54, %v4122_v22  ;;  %v4143_v42 = vadd.s32 1, %v12140_v60 }
 0x384   :  { %v4121_v15 = vsel %vm4117_vm1, %v4101_v37, %v12085_v33  ;;  %9189 = vmatpush3.bf16.msra.mxu1 %v12167_v0  ;;  %v13983_v8 = vand.u32 4294901760, %v12187_v14  ;;  %v12206_v27 = vpack.c.bf16 %v5193_v52, %v5190_v25  ;;  %v5196_v51 = vand.u32 4294901760, %v12180_v59 }
 0x385   :  { %9191 = vmatprep.subr.bf16.mxu1 %v12178_v13  ;;  %v5199_v4 = vand.u32 4294901760, %v12182_v11  ;;  %v5258_v33 = vsub.f32 %v12174_v55, %v13980_v34  ;;  %vm4142_vm6 = vc.u32 %v12148_v46, %v12139_v57  ;;  %v3728_v22 = vsel %vm3726_vm5, %v3727_v39, %v12130_v23 }
 0x386   :  { %v5265_v54 = vsub.f32 %v12187_v14, %v13983_v8  ;;  %v4124_v37 = vsel %vm4118_vm4, %v4121_v15, %v4123_v32  ;;  %v3724_v38 = vmul.u32 %v12116_v53, %v3708_v18  ;;  %v4144_v34 = vsel %vm4142_vm6, %v4143_v42, %v12140_v60 }
 0x387   :  { %v12228_v30 = vpack.c.bf16 %v5199_v4, %v5196_v51  ;;  %v5259_v58 = vand.u32 4294901760, %v5258_v33  ;;  %v4140_v9 = vmul.u32 %v4133_v16, %v4124_v37  ;;  %v12234_v53 = vsub.f32 %v5138_v35, %v5178_v62 }
 0x388   :  { %9193 = vmatpush3.bf16.msra.mxu1 %v12178_v13  ;;  %v5266_v8 = vand.u32 4294901760, %v5265_v54  ;;  %v3729_v61 = vadd.s32 %v3728_v22, %v3724_v38  ;;  %v12236_v23 = vsub.f32 %v5139_v43, %v5181_v2  ;;  %v12251_v43 = vsub.f32 %v12150_v3, %v5184_v47 }
 0x389   :  { %9195 = vmatprep.subr.bf16.mxu1 %v12206_v27  ;;  %v4145_v5 = vadd.s32 %v4144_v34, %v4140_v9  ;;  %v13994_v38 = vand.u32 4294901760, %v12234_v53  ;;  %v12256_v2 = vsub.f32 %v12152_v56, %v5187_v63  ;;  %v12267_v47 = vsub.f32 %v12155_v36, %v5190_v25 }
 0x38a   :  { %v12232_v50 = vpack.c.bf16 %v5266_v8, %v5259_v58  ;;  %v3730_v18 = vadd.s32 536870912, %v3729_v61  ;;  %v13993_v9 = vand.u32 4294901760, %v12236_v23  ;;  %v13992_v15 = vand.u32 4294901760, %v12251_v43 }
 0x38b   :  { %v4146_v60 = vadd.s32 536870912, %v4145_v5  ;;  %v5314_v58 = vsub.f32 %v12234_v53, %v13994_v38  ;;  %v13991_v42 = vand.u32 4294901760, %v12256_v2  ;;  %v12270_v56 = vsub.f32 %v12157_v1, %v5193_v52 }
 0x38c   :  { %9197 = vmatpush3.bf16.msra.mxu1 %v12206_v27  ;;  %v12242_v16 = vshrl.u32 %v3730_v18, 30  ;;  %v5321_v35 = vsub.f32 %v12236_v23, %v13993_v9  ;;  %v5328_v3 = vsub.f32 %v12251_v43, %v13992_v15  ;;  %v13990_v22 = vand.u32 4294901760, %v12267_v47 }
 0x38d   :  { %9199 = vmatprep.subr.bf16.mxu1 %v12228_v30  ;;  %v12253_v62 = vshrl.u32 %v4146_v60, 30  ;;  %v5315_v39 = vand.u32 4294901760, %v5314_v58  ;;  %14345 = vst [vmem:[#allocation43_spill] sm:$0xff] %v12270_v56  ;;  %v5335_v33 = vsub.f32 %v12256_v2, %v13991_v42  ;;  %v13987_v37 = vand.u32 4294901760, %v12270_v56 }
 0x38e   :  { %v5322_v34 = vand.u32 4294901760, %v5321_v35  ;;  %v3732_v32 = vshll.u32 %v12242_v16, 30  ;;  %v5329_v54 = vand.u32 4294901760, %v5328_v3  ;;  %v5342_v36 = vsub.f32 %v12267_v47, %v13990_v22 }
 0x38f   :  { %v4148_v63 = vshll.u32 %v12253_v62, 30  ;;  %v5336_v60 = vand.u32 4294901760, %v5335_v33  ;;  %v5349_v1 = vsub.f32 %v12270_v56, %v13987_v37  ;;  %v12285_v25 = vsub.f32 %v12180_v59, %v5196_v51 }
 0x390   :  { %9201 = vmatpush3.bf16.msra.mxu1 %v12228_v30  ;;  %v12261_v8 = vpack.c.bf16 %v5322_v34, %v5315_v39  ;;  %v3733_v18 = vsub.s32 %v3729_v61, %v3732_v32  ;;  %v12288_v52 = vsub.f32 %v12182_v11, %v5199_v4  ;;  %v5343_v39 = vand.u32 4294901760, %v5342_v36 }
 0x391   :  { %9203 = vmatprep.subr.bf16.mxu1 %v12232_v50  ;;  %14346 = vst [vmem:[#allocation44_spill] sm:$0xff] %v12285_v25  ;;  %v4149_v58 = vsub.s32 %v4145_v5, %v4148_v63  ;;  %v12290_v35 = vpack.c.bf16 %v5336_v60, %v5329_v54  ;;  %v5350_v61 = vand.u32 4294901760, %v5349_v1  ;;  %v13988_v34 = vand.u32 4294901760, %v12285_v25 }
 0x392   :  { %14347 = vst [vmem:[#allocation45_spill] sm:$0xff] %v12288_v52  ;;  %v13989_v32 = vand.u32 4294901760, %v12288_v52  ;;  %v3735_v3 = vsub.s32 0, %v3733_v18  ;;  %v12304_v63 = vpack.c.bf16 %v12187_v14, %v12174_v55  ;;  %vm4177_vm3 = vweird.f32 %v11448_v28 }
 0x393   :  { %v12294_v33 = vpack.c.bf16 %v5350_v61, %v5343_v39  ;;  %v5356_v59 = vsub.f32 %v12285_v25, %v13988_v34  ;;  %v4151_v5 = vsub.s32 0, %v4149_v58  ;;  %v12310_v34 = vpack.c.bf16 %v12236_v23, %v12234_v53 }
 0x394   :  { %v5363_v4 = vsub.f32 %v12288_v52, %v13989_v32  ;;  %v7291_v54 = vmin.u32 %v3735_v3, %v3733_v18  ;;  %vm3761_vm4 = vweird.f32 %v11405_v7 }
 0x395   :  { %v5357_v11 = vand.u32 4294901760, %v5356_v59  ;;  %v7307_v36 = vmin.u32 %v4151_v5, %v4149_v58  ;;  %v12318_v5 = vpack.c.bf16 %v12270_v56, %v12267_v47 }
 0x396   :  { %v5364_v51 = vand.u32 4294901760, %v5363_v4  ;;  %v3737_v1 = vclz %v7291_v54  ;;  %v12314_v4 = vpack.c.bf16 %v12256_v2, %v12251_v43 }
 0x397   :  { %v4153_v39 = vclz %v7307_v36 }
 0x398   :  { %v12306_v60 = vpack.c.bf16 %v5364_v51, %v5357_v11  ;;  %v7292_v61 = vadd.s32 4294967294, %v3737_v1  ;;  %v12322_v1 = vpack.c.bf16 %v12288_v52, %v12285_v25 }
 0x399   :  { %v7308_v37 = vadd.s32 4294967294, %v4153_v39  ;;  %v3725_v39 = vadd.s32 %v12129_v29, %v12135_v45 }
 0x39a   :  { %vm7293_vm7 = vcmp.lt.s32.totalorder %v7292_v61, 0 }
 0x39b   :  { %vm7309_vm8 = vcmp.lt.s32.totalorder %v7308_v37, 0  ;;  %v3740_v59 = vsel %vm7293_vm7, 0, %v7292_v61 }
 0x39c   :  { %v4156_v32 = vsel %vm7309_vm8, 0, %v7308_v37  ;;  %v3745_v3 = vsub.s32 4294967266, %v3740_v59  ;;  %v3741_v54 = vsub.s32 32, %v3740_v59  ;;  %v4141_v37 = vadd.s32 %v12139_v57, %v12148_v46 }
 0x39d   :  { %v4161_v11 = vsub.s32 4294967266, %v4156_v32  ;;  %v4157_v22 = vsub.s32 32, %v4156_v32  ;;  %v3742_v9 = vshll.u32 %v3733_v18, %v3740_v59  ;;  %v4158_v41 = vshll.u32 %v4149_v58, %v4156_v32  ;;  %v14354_v18 = vld [vmem:[#allocation25_spill] sm:$0xff] }
 0x39e   :  { %v3746_v51 = vadd.s32 127, %v3745_v3  ;;  %v3743_v42 = vshrl.u32 %v3725_v39, %v3741_v54  ;;  %v14348_v57 = vand.u32 2147483647, %v11405_v7  ;;  %v14355_v58 = vld [vmem:[#allocation41_spill] sm:$0xff] }
 0x39f   :  { %v4162_v36 = vadd.s32 127, %v4161_v11  ;;  %v4159_v12 = vshrl.u32 %v4141_v37, %v4157_v22  ;;  %v4407_v32 = vmul.f32 1.442695, %v14355_v58 }
 0x3a0   :  { %v3747_v61 = vshll.u32 %v3746_v51, 23  ;;  %v3744_v3 = vor.u32 %v3743_v42, %v3742_v9  ;;  %vm12332_vm11 = vcmp.le.f32.partialorder %v14348_v57, 0.7853982  ;;  %v3755_v9 = vsub.s32 4, %v12242_v16 }
 0x3a1   :  { %v4163_v15 = vshll.u32 %v4162_v36, 23  ;;  %v4160_v49 = vor.u32 %v4159_v12, %v4158_v41 }
 0x3a2   :  { %v3748_v38 = vor.u32 4788187, %v3747_v61  ;;  %v3751_v48 = vcvt.s32.f32 %v3744_v3  ;;  %v3756_v42 = vsel %vm3671_vm9, %v3755_v9, %v12242_v16 }
 0x3a3   :  { %v4164_v11 = vor.u32 4788187, %v4163_v15  ;;  %v4167_v56 = vcvt.s32.f32 %v4160_v49  ;;  %v4171_v49 = vsub.s32 4, %v12253_v62  ;;  %v3758_v22 = vsel %vm12332_vm11, 0, %v3756_v42 }
 0x3a4   :  { %v3749_v24 = vand.u32 2147483647, %v3748_v38  ;;  %v3762_v39 = vadd.s32 3, %v3758_v22 }
 0x3a5   :  { %v4165_v52 = vand.u32 2147483647, %v4164_v11  ;;  %v4172_v15 = vsel %vm4087_vm10, %v4171_v49, %v12253_v62  ;;  %v14356_v49 = vand.u32 4294901760, %v11910_v40 }
 0x3a6   :  { %v3752_v25 = vmul.f32 %v3751_v48, %v3749_v24  ;;  %v14351_v48 = vand.u32 2147483647, %v11448_v28  ;;  %v3763_v16 = vand.u32 3, %v3762_v39  ;;  %v14358_v39 = vand.u32 4294901760, %v11918_v17 }
 0x3a7   :  { %v4168_v29 = vmul.f32 %v4167_v56, %v4165_v52  ;;  %v12364_v9 = vsub.f32 %v11910_v40, %v14356_v49 }
 0x3a8   :  { %v3753_v45 = vxor.u32 2147483648, %v3752_v25  ;;  %vm12341_vm12 = vcmp.le.f32.partialorder %v14351_v48, 0.7853982  ;;  %vm3765_vm15 = vcmp.eq.s32.totalorder %v3763_v16, 0  ;;  %vm3768_vm0 = vcmp.eq.s32.totalorder %v3763_v16, 2 }
 0x3a9   :  { %v4169_v51 = vxor.u32 2147483648, %v4168_v29  ;;  %v4174_v56 = vsel %vm12341_vm12, 0, %v4172_v15  ;;  %vm3764_vm2 = vcmp.lt.s32.totalorder %v3763_v16, 2  ;;  %v14357_v15 = vand.u32 4294901760, %v11915_v21 }
 0x3aa   :  { %v3754_v54 = vsel %vm3671_vm9, %v3753_v45, %v3752_v25  ;;  %v4399_v25 = vmul.f32 1.442695, %v14354_v18  ;;  %v4178_v36 = vadd.s32 3, %v4174_v56  ;;  %v5271_v40 = vand.u32 4294901760, %v12364_v9 }
 0x3ab   :  { %v4170_v38 = vsel %vm4087_vm10, %v4169_v51, %v4168_v29  ;;  %v3757_v41 = vsel %vm12332_vm11, %v11405_v7, %v3754_v54  ;;  %v12369_v42 = vsub.f32 %v11915_v21, %v14357_v15  ;;  %v12378_v21 = vsub.f32 %v11918_v17, %v14358_v39 }
 0x3ac   :  { %v4173_v24 = vsel %vm12341_vm12, %v11448_v28, %v4170_v38  ;;  %9961 = vcosq.f32 %v3757_v41  ;;  %v4179_v62 = vand.u32 3, %v4178_v36  ;;  %v14359_v7 = vand.u32 4294901760, %v11920_v19 }
 0x3ad   :  { %9963 = vsinq.f32 %v3757_v41  ;;  %v5278_v36 = vand.u32 4294901760, %v12369_v42 }
 0x3ae   :  { %9965 = vcosq.f32 %v4173_v24  ;;  %vm4181_vm13 = vcmp.eq.s32.totalorder %v4179_v62, 0  ;;  %vm4184_vm14 = vcmp.eq.s32.totalorder %v4179_v62, 2  ;;  %vm4180_vm1 = vcmp.lt.s32.totalorder %v4179_v62, 2 }
 0x3af   :  { %9967 = vsinq.f32 %v4173_v24  ;;  %v7318_v24 = vld [vmem:[%s13796_s9] ss:$0 sm:$0xff]  ;;  %v5279_v17 = vsub.f32 %v12369_v42, %v5278_v36 }
 0x3b0   :  { %9969 = vpow2.f32 %v4399_v25 }
 0x3b1   :  { %9971 = vpow2.f32 %v4407_v32 }
 0x3b6   :  { %v9962_v52 = vpop.eup %9961 }
 0x3b7   :  { %v9964_v59 = vpop.eup %9963  ;;  %v3769_v45 = vxor.u32 2147483648, %v9962_v52 }
 0x3b8   :  { %v9966_v61 = vpop.eup %9965  ;;  %v3766_v29 = vxor.u32 2147483648, %v9964_v59 }
 0x3b9   :  { %v9968_v37 = vpop.eup %9967  ;;  %v4185_v11 = vxor.u32 2147483648, %v9966_v61  ;;  %v3770_v46 = vsel %vm3768_vm0, %v3769_v45, %v9964_v59  ;;  %v14360_v45 = vand.u32 4294901760, %v11939_v31 }
 0x3ba   :  { %v4182_v3 = vxor.u32 2147483648, %v9968_v37  ;;  %v3767_v57 = vsel %vm3765_vm15, %v9962_v52, %v3766_v29  ;;  %v9970_v38 = vpop.eup %9969 }
 0x3bb   :  { %v4186_v54 = vsel %vm4184_vm14, %v4185_v11, %v9968_v37  ;;  %v3771_v48 = vsel %vm3764_vm2, %v3767_v57, %v3770_v46  ;;  %v9972_v12 = vpop.eup %9971  ;;  %v5285_v11 = vand.u32 4294901760, %v12378_v21 }
 0x3bc   :  { %v4183_v51 = vsel %vm4181_vm13, %v9966_v61, %v4182_v3  ;;  %v3772_v18 = vsel %vm3761_vm4, nan, %v3771_v48  ;;  %v12383_v61 = vsub.f32 %v11920_v19, %v14359_v7  ;;  %v5272_v3 = vsub.f32 %v12364_v9, %v5271_v40 }
 0x3bd   :  { %v4187_v41 = vsel %vm4180_vm1, %v4183_v51, %v4186_v54  ;;  %v4414_v58 = vmul.f32 %v9970_v38, %v3772_v18  ;;  %v12403_v51 = vsub.f32 %v11939_v31, %v14360_v45  ;;  %v14361_v54 = vand.u32 4294901760, %v11941_v20 }
 0x3be   :  { %v4188_v56 = vsel %vm4177_vm3, nan, %v4187_v41  ;;  %v5292_v19 = vand.u32 4294901760, %v12383_v61  ;;  %v5273_v48 = vand.u32 4294901760, %v5272_v3  ;;  %v12451_v3 = vld [vmem:[#allocation6 + $0x8] sm:$0xff] }
 0x3bf   :  { %v4418_v25 = vmul.f32 %v9972_v12, %v4188_v56  ;;  %v12408_v57 = vsub.f32 %v11941_v20, %v14361_v54  ;;  %v5280_v12 = vand.u32 4294901760, %v5279_v17  ;;  %v5299_v49 = vand.u32 4294901760, %v12403_v51  ;;  %v12459_v17 = vld [vmem:[#allocation6 + $0x18] sm:$0xff]  ;;  %v12462_v54 = vld [vmem:[#allocation6 + $0x20] sm:$0xff] }
 0x3c0   :  { %v5293_v20 = vsub.f32 %v12383_v61, %v5292_v19 }
 0x3c1   :  { %v5306_v15 = vand.u32 4294901760, %v12408_v57  ;;  %v9206_v18 = vpack.c.bf16 %v5280_v12, %v5273_v48  ;;  %v12464_v48 = vld [vmem:[#allocation6 + $0x28] sm:$0xff]  ;;  %v9242_v12 = vpack.c.bf16 %v12383_v61, %v12378_v21 }
 0x449   :  { %v7963_v22 = vpop.f32.mrb[8].mxu0 }
 0x44a   :  { %v9746_v52 = vadd.f32 %v7963_v22, %v7318_v24  ;;  %v5118_v32 = vpop.f32.mrb[9].mxu0 }
 0x44b   :  { %v9747_v59 = vadd.f32 %v7318_v24, %v5118_v32  ;;  %v5286_v24 = vsub.f32 %v12378_v21, %v5285_v11  ;;  %v5300_v32 = vsub.f32 %v12403_v51, %v5299_v49  ;;  %v14367_v21 = vand.u32 4294901760, %v12256_v2 }
 0x44c   :  { %v5129_v28 = vmul.f32 %v9746_v52, %v4418_v25 }
 0x44d   :  { %v5128_v37 = vmul.f32 %v9747_v59, %v4414_v58  ;;  %v5287_v25 = vand.u32 4294901760, %v5286_v24  ;;  %v5294_v58 = vand.u32 4294901760, %v5293_v20  ;;  %v5307_v59 = vsub.f32 %v12408_v57, %v5306_v15 }
 0x44e   :  { %v12385_v62 = vand.u32 4294901760, %v5129_v28  ;;  %v14005_v20 = vand.u32 4294901760, %v12464_v48 }
 0x44f   :  { %v12387_v16 = vand.u32 4294901760, %v5128_v37  ;;  %v9210_v39 = vpack.c.bf16 %v5294_v58, %v5287_v25  ;;  %v5308_v7 = vand.u32 4294901760, %v5307_v59  ;;  %v9246_v25 = vpack.c.bf16 %v12408_v57, %v12403_v51 }
 0x450   :  { %v12397_v29 = vsub.f32 %v5129_v28, %v12385_v62  ;;  %v5301_v28 = vand.u32 4294901760, %v5300_v32 }
 0x451   :  { %v12411_v46 = vsub.f32 %v5128_v37, %v12387_v16 }
 0x452   :  { %v5246_v38 = vand.u32 4294901760, %v12397_v29  ;;  %v9214_v37 = vpack.c.bf16 %v5308_v7, %v5301_v28  ;;  %v14377_v28 = vmov 2475754826  }
 0x453   :  { %v5236_v41 = vand.u32 4294901760, %v12411_v46 }
 0x454   :  { %v5247_v31 = vsub.f32 %v12397_v29, %v5246_v38 }
 0x455   :  { %v5237_v56 = vsub.f32 %v12411_v46, %v5236_v41 }
 0x456   :  { %v5248_v52 = vand.u32 4294901760, %v5247_v31  ;;  %v14006_v31 = vand.u32 4294901760, %v12462_v54 }
 0x457   :  { %v5238_v22 = vand.u32 4294901760, %v5237_v56 }
 0x459   :  { %7996 = vmatprep.mubr.f32.mxu1 %v5238_v22  ;;  %v12483_v22 = vld [vmem:[#allocation6 + $0x30] sm:$0xff] }
 0x45a   :  { %7997 = vmatmul.mubr.f32.vlgmr.msra.gmra.mrb[8].mxu1 %v5248_v52  ;;  %v12496_v52 = vpack.c.bf16 %v14005_v20, %v14006_v31  ;;  %v14004_v58 = vand.u32 4294901760, %v12483_v22  ;;  %v12746_v20 = vld [vmem:[#allocation6 + $0x78] sm:$0xff] }
 0x45b   :  { %9205 = vmatpush3.bf16.msra.mxu1 %v12232_v50  ;;  %8031 = vmatprep.mubr.f32.mxu1 %v12387_v16  ;;  %v9238_v50 = vpack.c.bf16 %v12369_v42, %v12364_v9  ;;  %v14364_v9 = vand.u32 4294901760, %v12234_v53  ;;  %v14365_v42 = vand.u32 4294901760, %v12236_v23  ;;  %v14371_v53 = vld [vmem:[#allocation44_spill] sm:$0xff]  ;;  %v14373_v23 = vld [vmem:[#allocation45_spill] sm:$0xff] }
 0x45c   :  { %9207 = vmatprep.subr.bf16.mxu1 %v9206_v18  ;;  %v14372_v57 = vand.u32 4294901760, %v14371_v53 }
 0x45f   :  { %9209 = vmatpush3.bf16.msra.mxu1 %v9206_v18  ;;  %v12485_v18 = vld [vmem:[#allocation6 + $0x38] sm:$0xff] }
 0x460   :  { %9211 = vmatprep.subr.bf16.mxu1 %v9210_v39  ;;  %v14003_v32 = vand.u32 4294901760, %v12485_v18 }
 0x462   :  { %v12506_v59 = vpack.c.bf16 %v14003_v32, %v14004_v58 }
 0x463   :  { %9213 = vmatpush3.bf16.msra.mxu1 %v9210_v39 }
 0x464   :  { %9215 = vmatprep.subr.bf16.mxu1 %v9214_v37 }
 0x467   :  { %9217 = vmatpush3.bf16.msra.mxu1 %v9214_v37  ;;  %v14378_v37 = vmov 2131351028  }
 0x468   :  { %9219 = vmatprep.subr.bf16.mxu1 %v12261_v8 }
 0x46b   :  { %9221 = vmatpush3.bf16.msra.mxu1 %v12261_v8  ;;  %v12449_v8 = vld [vmem:[#allocation6] sm:$0xff] }
 0x46c   :  { %9223 = vmatprep.subr.bf16.mxu1 %v12290_v35 }
 0x46f   :  { %9225 = vmatpush3.bf16.msra.mxu1 %v12290_v35  ;;  %v12453_v35 = vld [vmem:[#allocation6 + $0x10] sm:$0xff] }
 0x470   :  { %9227 = vmatprep.subr.bf16.mxu1 %v12294_v33  ;;  %v14008_v45 = vand.u32 4294901760, %v12453_v35 }
 0x473   :  { %9229 = vmatpush3.bf16.msra.mxu1 %v12294_v33  ;;  %v5863_v33 = vand.u32 4294901760, %v12449_v8 }
 0x474   :  { %9231 = vmatprep.subr.bf16.mxu1 %v12306_v60 }
 0x477   :  { %9233 = vmatpush3.bf16.msra.mxu1 %v12306_v60  ;;  %v5866_v60 = vand.u32 4294901760, %v12451_v3 }
 0x478   :  { %9235 = vmatprep.subr.bf16.mxu1 %v12304_v63 }
 0x479   :  { %v12473_v24 = vpack.c.bf16 %v5866_v60, %v5863_v33 }
 0x47a   :  { %8032 = vmatmul.mubr.f32.vlgmr.msra.gmra.mrb[8].mxu1 %v12385_v62 }
 0x47b   :  { %9237 = vmatpush3.bf16.msra.mxu1 %v12304_v63  ;;  %8066 = vmatprep.mubr.f32.mxu1 %v12411_v46  ;;  %v14007_v63 = vand.u32 4294901760, %v12459_v17  ;;  %v14374_v46 = vand.u32 4294901760, %v14373_v23 }
 0x47c   :  { %9239 = vmatprep.subr.bf16.mxu1 %v9238_v50  ;;  %9363 = vmatprep.subr.bf16.mxu0 %v12473_v24 }
 0x47d   :  { %v12481_v56 = vpack.c.bf16 %v14007_v63, %v14008_v45  ;;  %9365 = vmatpush3.bf16.msra.mxu0 %v12473_v24 }
 0x47f   :  { %9241 = vmatpush3.bf16.msra.mxu1 %v9238_v50  ;;  %9367 = vmatprep.subr.bf16.mxu0 %v12481_v56 }
 0x480   :  { %9243 = vmatprep.subr.bf16.mxu1 %v9242_v12 }
 0x481   :  { %9369 = vmatpush3.bf16.msra.mxu0 %v12481_v56 }
 0x482   :  { %9371 = vmatprep.subr.bf16.mxu0 %v12496_v52 }
 0x483   :  { %9245 = vmatpush3.bf16.msra.mxu1 %v9242_v12  ;;  %v14379_v12 = vmov 2102212464  }
 0x484   :  { %9247 = vmatprep.subr.bf16.mxu1 %v9246_v25 }
 0x485   :  { %9373 = vmatpush3.bf16.msra.mxu0 %v12496_v52 }
 0x486   :  { %9375 = vmatprep.subr.bf16.mxu0 %v12506_v59 }
 0x487   :  { %9249 = vmatpush3.bf16.msra.mxu1 %v9246_v25 }
 0x488   :  { %9251 = vmatprep.subr.bf16.mxu1 %v12310_v34 }
 0x489   :  { %9377 = vmatpush3.bf16.msra.mxu0 %v12506_v59 }
 0x48b   :  { %9253 = vmatpush3.bf16.msra.mxu1 %v12310_v34  ;;  %v14362_v34 = vand.u32 4294901760, %v12174_v55  ;;  %v9306_v55 = vpack.c.bf16 %v5292_v19, %v5285_v11  ;;  %v14368_v11 = vand.u32 4294901760, %v12267_v47 }
 0x48c   :  { %9255 = vmatprep.subr.bf16.mxu1 %v12314_v4 }
 0x48f   :  { %9257 = vmatpush3.bf16.msra.mxu1 %v12314_v4  ;;  %v14363_v4 = vand.u32 4294901760, %v12187_v14  ;;  %v9310_v14 = vpack.c.bf16 %v5306_v15, %v5299_v49 }
 0x490   :  { %9259 = vmatprep.subr.bf16.mxu1 %v12318_v5 }
 0x493   :  { %9261 = vmatpush3.bf16.msra.mxu1 %v12318_v5  ;;  %v9298_v5 = vpack.c.bf16 %v14363_v4, %v14362_v34  ;;  %v14380_v34 = vmov 920167782  }
 0x494   :  { %9263 = vmatprep.subr.bf16.mxu1 %v12322_v1 }
 0x497   :  { %9265 = vmatpush3.bf16.msra.mxu1 %v12322_v1  ;;  %v9302_v1 = vpack.c.bf16 %v5278_v36, %v5271_v40  ;;  %v9314_v40 = vpack.c.bf16 %v14365_v42, %v14364_v9  ;;  %v14366_v36 = vand.u32 4294901760, %v12251_v43 }
 0x498   :  { %9267 = vmatprep.subr.bf16.mxu1 %v11929_v44 }
 0x499   :  { %v9318_v61 = vpack.c.bf16 %v14367_v21, %v14366_v36 }
 0x49a   :  { %8067 = vmatmul.mubr.f32.vlgmr.msra.gmra.mrb[8].mxu1 %v12397_v29  ;;  %v14369_v29 = vld [vmem:[#allocation43_spill] sm:$0xff] }
 0x49b   :  { %9269 = vmatpush3.bf16.msra.mxu1 %v11929_v44  ;;  %8101 = vmatprep.mubr.f32.mxu1 %v5236_v41  ;;  %v14370_v19 = vand.u32 4294901760, %v14369_v29 }
 0x49c   :  { %9271 = vmatprep.subr.bf16.mxu1 %v11937_v26 }
 0x49d   :  { %v9322_v51 = vpack.c.bf16 %v14370_v19, %v14368_v11 }
 0x49f   :  { %9273 = vmatpush3.bf16.msra.mxu1 %v11937_v26 }
 0x4a0   :  { %9275 = vmatprep.subr.bf16.mxu1 %v11952_v6 }
 0x4a3   :  { %9277 = vmatpush3.bf16.msra.mxu1 %v11952_v6 }
 0x4a4   :  { %9279 = vmatprep.subr.bf16.mxu1 %v11964_v10 }
 0x4a7   :  { %9281 = vmatpush3.bf16.msra.mxu1 %v11964_v10 }
 0x4a8   :  { %9283 = vmatprep.subr.bf16.mxu1 %v12167_v0 }
 0x4ab   :  { %9285 = vmatpush3.bf16.msra.mxu1 %v12167_v0 }
 0x4ac   :  { %9287 = vmatprep.subr.bf16.mxu1 %v12178_v13 }
 0x4af   :  { %9289 = vmatpush3.bf16.msra.mxu1 %v12178_v13 }
 0x4b0   :  { %9291 = vmatprep.subr.bf16.mxu1 %v12206_v27 }
 0x4b3   :  { %9293 = vmatpush3.bf16.msra.mxu1 %v12206_v27 }
 0x4b4   :  { %9295 = vmatprep.subr.bf16.mxu1 %v12228_v30 }
 0x4b7   :  { %9297 = vmatpush3.bf16.msra.mxu1 %v12228_v30 }
 0x4b8   :  { %9299 = vmatprep.subr.bf16.mxu1 %v9298_v5 }
 0x4ba   :  { %8102 = vmatmul.mubr.f32.vlgmr.msra.gmra.mrb[8].mxu1 %v5246_v38  ;;  %v9326_v38 = vpack.c.bf16 %v14374_v46, %v14372_v57 }
 0x4bb   :  { %9301 = vmatpush3.bf16.msra.mxu1 %v9298_v5  ;;  %8136 = vmatprep.mubr.f32.mxu1 %v12387_v16  ;;  %v14381_v5 = vmov 1326507024  }
 0x4bc   :  { %9303 = vmatprep.subr.bf16.mxu1 %v9302_v1 }
 0x4bf   :  { %9305 = vmatpush3.bf16.msra.mxu1 %v9302_v1 }
 0x4c0   :  { %9307 = vmatprep.subr.bf16.mxu1 %v9306_v55 }
 0x4c3   :  { %9309 = vmatpush3.bf16.msra.mxu1 %v9306_v55  ;;  %v14382_v55 = vmov 683565275  }
 0x4c4   :  { %9311 = vmatprep.subr.bf16.mxu1 %v9310_v14 }
 0x4c7   :  { %9313 = vmatpush3.bf16.msra.mxu1 %v9310_v14 }
 0x4c8   :  { %9315 = vmatprep.subr.bf16.mxu1 %v9314_v40 }
 0x4cb   :  { %9317 = vmatpush3.bf16.msra.mxu1 %v9314_v40 }
 0x4cc   :  { %9319 = vmatprep.subr.bf16.mxu1 %v9318_v61 }
 0x4cf   :  { %9321 = vmatpush3.bf16.msra.mxu1 %v9318_v61 }
 0x4d0   :  { %9323 = vmatprep.subr.bf16.mxu1 %v9322_v51 }
 0x4d3   :  { %9325 = vmatpush3.bf16.msra.mxu1 %v9322_v51 }
 0x4d4   :  { %9327 = vmatprep.subr.bf16.mxu1 %v9326_v38 }
 0x4d7   :  { %9329 = vmatpush3.bf16.msra.mxu1 %v9326_v38 }
 0x4d8   :  { %9331 = vmatprep.subr.bf16.mxu1 %v11929_v44 }
 0x4da   :  { %8137 = vmatmul.mubr.f32.vlgmr.msra.gmra.mrb[8].mxu1 %v12385_v62 }
 0x4db   :  { %9333 = vmatpush3.bf16.msra.mxu1 %v11929_v44  ;;  %8171 = vmatprep.mubr.f32.mxu1 %v12387_v16  ;;  %v14375_v44 = vld [vmem:[#allocation24_spill] sm:$0xff] }
 0x4dc   :  { %9335 = vmatprep.subr.bf16.mxu1 %v11937_v26  ;;  %vm3775_vm3 = vcmp.lt.s32.totalorder %v14375_v44, 0 }
 0x4df   :  { %9337 = vmatpush3.bf16.msra.mxu1 %v11937_v26  ;;  %v3776_v26 = vand.u32 2139095040, %v14375_v44 }
 0x4e0   :  { %9339 = vmatprep.subr.bf16.mxu1 %v11952_v6 }
 0x4e1   :  { %v3777_v43 = vshrl.u32 %v3776_v26, 23 }
 0x4e3   :  { %9341 = vmatpush3.bf16.msra.mxu1 %v11952_v6  ;;  %v14376_v6 = vld [vmem:[#allocation28_spill] sm:$0xff]  ;;  %v7294_v2 = vadd.s32 4294967169, %v3777_v43 }
 0x4e4   :  { %9343 = vmatprep.subr.bf16.mxu1 %v11964_v10  ;;  %v14009_v23 = vand.u32 2147483647, %v14376_v6  ;;  %vm4191_vm4 = vcmp.lt.s32.totalorder %v14376_v6, 0 }
 0x4e5   :  { %v3783_v16 = vadd.s32 1, %v7294_v2 }
 0x4e7   :  { %9345 = vmatpush3.bf16.msra.mxu1 %v11964_v10  ;;  %v4192_v10 = vand.u32 2139095040, %v14376_v6  ;;  %vm3784_vm5 = vcmp.gt.s32.totalorder %v3783_v16, 0 }
 0x4e8   :  { %9347 = vmatprep.subr.bf16.mxu1 %v12167_v0  ;;  %v3785_v41 = vsel %vm3784_vm5, %v3783_v16, 0 }
 0x4e9   :  { %v12615_v21 = vshrl.u32 %v3785_v41, 5 }
 0x4eb   :  { %9349 = vmatpush3.bf16.msra.mxu1 %v12167_v0  ;;  %v4193_v0 = vshrl.u32 %v4192_v10, 23  ;;  %vm3805_vm7 = vcmp.lt.s32.totalorder %v12615_v21, 1  ;;  %vm3808_vm8 = vcmp.lt.s32.totalorder %v12615_v21, 4  ;;  %vm3807_vm9 = vcmp.lt.s32.totalorder %v12615_v21, 3 }
 0x4ec   :  { %9351 = vmatprep.subr.bf16.mxu1 %v12178_v13  ;;  %vm3806_vm11 = vcmp.lt.s32.totalorder %v12615_v21, 2 }
 0x4ed   :  { %v7310_v47 = vadd.s32 4294967169, %v4193_v0 }
 0x4ef   :  { %9353 = vmatpush3.bf16.msra.mxu1 %v12178_v13  ;;  %v4199_v13 = vadd.s32 1, %v7310_v47 }
 0x4f0   :  { %9355 = vmatprep.subr.bf16.mxu1 %v12206_v27 }
 0x4f1   :  { %vm4200_vm6 = vcmp.gt.s32.totalorder %v4199_v13, 0 }
 0x4f2   :  { %v4201_v49 = vsel %vm4200_vm6, %v4199_v13, 0 }
 0x4f3   :  { %9357 = vmatpush3.bf16.msra.mxu1 %v12206_v27  ;;  %v3787_v27 = vand.u32 31, %v3785_v41  ;;  %v4203_v15 = vand.u32 31, %v4201_v49  ;;  %v12628_v26 = vshrl.u32 %v4201_v49, 5 }
 0x4f4   :  { %9359 = vmatprep.subr.bf16.mxu1 %v12228_v30 }
 0x4f5   :  { %v12594_v39 = vsub.s32 32, %v3787_v27  ;;  %v3790_v14 = vshll.u32 %v14382_v55, %v3787_v27  ;;  %v3793_v9 = vshll.u32 %v14377_v28, %v3787_v27  ;;  %v3796_v42 = vshll.u32 %v14378_v37, %v3787_v27 }
 0x4f6   :  { %v3799_v40 = vshll.u32 %v14379_v12, %v3787_v27  ;;  %v3802_v61 = vshll.u32 %v14380_v34, %v3787_v27  ;;  %v4215_v46 = vshll.u32 %v14379_v12, %v4203_v15  ;;  %v4218_v47 = vshll.u32 %v14380_v34, %v4203_v15 }
 0x4f7   :  { %9361 = vmatpush3.bf16.msra.mxu1 %v12228_v30  ;;  %v14010_v30 = vand.u32 2147483647, %v14375_v44  ;;  %v3791_v7 = vshrl.u32 %v14377_v28, %v12594_v39  ;;  %v3794_v50 = vshrl.u32 %v14378_v37, %v12594_v39  ;;  %v3797_v25 = vshrl.u32 %v14379_v12, %v12594_v39 }
 0x4f8   :  { %v3800_v4 = vshrl.u32 %v14380_v34, %v12594_v39  ;;  %v3803_v1 = vshrl.u32 %v14381_v5, %v12594_v39  ;;  %v4206_v13 = vshll.u32 %v14382_v55, %v4203_v15  ;;  %v4209_v41 = vshll.u32 %v14377_v28, %v4203_v15 }
 0x4f9   :  { %v3780_v36 = vand.u32 8388607, %v14010_v30  ;;  %v12620_v29 = vor.u32 %v3791_v7, %v3790_v14  ;;  %v12622_v19 = vor.u32 %v3794_v50, %v3793_v9  ;;  %v3798_v51 = vor.u32 %v3797_v25, %v3796_v42 }
 0x4fa   :  { %8172 = vmatmul.mubr.f32.vlgmr.msra.gmra.mrb[8].mxu1 %v12385_v62  ;;  %v12597_v62 = vsub.s32 32, %v4203_v15  ;;  %v3801_v53 = vor.u32 %v3800_v4, %v3799_v40  ;;  %v3804_v57 = vor.u32 %v3803_v1, %v3802_v61  ;;  %v4212_v27 = vshll.u32 %v14378_v37, %v4203_v15 }
 0x4fb   :  { %v4196_v7 = vand.u32 8388607, %v14009_v23  ;;  %vm4224_vm10 = vcmp.lt.s32.totalorder %v12628_v26, 4  ;;  %v3781_v14 = vor.u32 8388608, %v3780_v36  ;;  %v3813_v15 = vsel %vm3805_vm7, %v12620_v29, %v12622_v19 }
 0x4fc   :  { %v4216_v11 = vshrl.u32 %v14380_v34, %v12597_v62  ;;  %v4219_v38 = vshrl.u32 %v14381_v5, %v12597_v62  ;;  %v4207_v10 = vshrl.u32 %v14377_v28, %v12597_v62  ;;  %v4210_v43 = vshrl.u32 %v14378_v37, %v12597_v62 }
 0x4fd   :  { %v4213_v0 = vshrl.u32 %v14379_v12, %v12597_v62  ;;  %v3814_v16 = vsel %vm3808_vm8, %v3801_v53, 920167782  ;;  %v3818_v49 = vsel %vm3808_vm8, %v3804_v57, 1326507024  ;;  %v3817_v40 = vsel %vm3805_vm7, %v12622_v19, %v3798_v51 }
 0x4fe   :  { %v4217_v2 = vor.u32 %v4216_v11, %v4215_v46  ;;  %v4220_v50 = vor.u32 %v4219_v38, %v4218_v47  ;;  %v12649_v25 = vor.u32 %v4207_v10, %v4206_v13  ;;  %v12651_v4 = vor.u32 %v4210_v43, %v4209_v41 }
 0x4ff   :  { %v4214_v1 = vor.u32 %v4213_v0, %v4212_v27  ;;  %v3815_v9 = vsel %vm3807_vm9, %v3798_v51, %v3814_v16  ;;  %v3819_v61 = vsel %vm3807_vm9, %v3801_v53, %v3818_v49  ;;  %vm4221_vm12 = vcmp.lt.s32.totalorder %v12628_v26, 1 }
 0x500   :  { %v4230_v42 = vsel %vm4224_vm10, %v4217_v2, 920167782  ;;  %vm4223_vm13 = vcmp.lt.s32.totalorder %v12628_v26, 3  ;;  %v4234_v36 = vsel %vm4224_vm10, %v4220_v50, 1326507024  ;;  %v3816_v11 = vsel %vm3806_vm11, %v3813_v15, %v3815_v9  ;;  %v12705_v50 = vld [vmem:[#allocation6 + $0x48] sm:$0xff] }
 0x501   :  { %v4197_v57 = vor.u32 8388608, %v4196_v7  ;;  %v4229_v46 = vsel %vm4221_vm12, %v12649_v25, %v12651_v4  ;;  %v4231_v53 = vsel %vm4223_vm13, %v4214_v1, %v4230_v42  ;;  %v3820_v38 = vsel %vm3806_vm11, %v3817_v40, %v3819_v61  ;;  %v12703_v7 = vld [vmem:[#allocation6 + $0x40] sm:$0xff]  ;;  %v12713_v42 = vld [vmem:[#allocation6 + $0x58] sm:$0xff] }
 0x502   :  { %v12682_v10 = vshll.u32 %v3781_v14, 8  ;;  %vm4222_vm14 = vcmp.lt.s32.totalorder %v12628_v26, 2  ;;  %v4233_v43 = vsel %vm4221_vm12, %v12651_v4, %v4214_v1  ;;  %v4235_v0 = vsel %vm4223_vm13, %v4217_v2, %v4234_v36  ;;  %v12707_v14 = vld [vmem:[#allocation6 + $0x50] sm:$0xff]  ;;  %v12716_v61 = vld [vmem:[#allocation6 + $0x60] sm:$0xff]  ;;  %v12718_v36 = vld [vmem:[#allocation6 + $0x68] sm:$0xff] }
 0x503   :  { %v4232_v13 = vsel %vm4222_vm14, %v4229_v46, %v4231_v53  ;;  %v12701_v49 = vshll.u32 %v4197_v57, 8  ;;  %v4236_v2 = vsel %vm4222_vm14, %v4233_v43, %v4235_v0  ;;  %v5887_v15 = vand.u32 4294901760, %v12703_v7 }
 0x504   :  { %v12691_v47 = vmul.u32.u64.low %v12682_v10, %v3816_v11  ;;  %v12692_v16 = vmul.u32.u64.high %v12682_v10, %v3816_v11, %v12691_v47  ;;  %v12698_v41 = vmul.u32.u64.low %v12682_v10, %v3820_v38  ;;  %v12699_v27 = vmul.u32.u64.high %v12682_v10, %v3820_v38, %v12698_v41 }
 0x505   :  { %v5890_v9 = vand.u32 4294901760, %v12705_v50  ;;  %v5893_v40 = vand.u32 4294901760, %v12707_v14  ;;  %v12721_v11 = vmul.u32.u64.low %v12701_v49, %v4232_v13  ;;  %v12722_v57 = vmul.u32.u64.high %v12701_v49, %v4232_v13, %v12721_v11  ;;  %v12732_v41 = vld [vmem:[#allocation6 + $0x70] sm:$0xff] }
 0x506   :  { %v5896_v46 = vand.u32 4294901760, %v12713_v42  ;;  %v3810_v53 = vsel %vm3808_vm8, %v3798_v51, 2102212464  ;;  %v5899_v43 = vand.u32 4294901760, %v12716_v61  ;;  %v5902_v0 = vand.u32 4294901760, %v12718_v36 }
 0x507   :  { %v12728_v38 = vpack.c.bf16 %v5890_v9, %v5887_v15  ;;  %v3789_v32 = vshrl.u32 %v14382_v55, %v12594_v39  ;;  %v12737_v13 = vmul.u32.u64.low %v12701_v49, %v4236_v2  ;;  %v12738_v58 = vmul.u32.u64.high %v12701_v49, %v4236_v2, %v12737_v13 }
 0x508   :  { %v12744_v51 = vpack.c.bf16 %v5896_v46, %v5893_v40  ;;  %v3811_v39 = vsel %vm3807_vm9, %v12622_v19, %v3810_v53  ;;  %v4226_v2 = vsel %vm4224_vm10, %v4214_v1, 2102212464  ;;  %v14014_v13 = vand.u32 4294901760, %v12732_v41 }
 0x509   :  { %9379 = vmatprep.subr.bf16.mxu0 %v12728_v38  ;;  %v3809_v31 = vsel %vm3805_vm7, %v3789_v32, %v12620_v29  ;;  %v12764_v63 = vpack.c.bf16 %v5902_v0, %v5899_v43  ;;  %v14013_v32 = vand.u32 4294901760, %v12746_v20  ;;  %v12770_v29 = vsub.f32 %v12449_v8, %v5863_v33 }
 0x50a   :  { %9381 = vmatpush3.bf16.msra.mxu0 %v12728_v38  ;;  %v12775_v19 = vsub.f32 %v12451_v3, %v5866_v60  ;;  %v4205_v1 = vshrl.u32 %v14382_v55, %v12597_v62  ;;  %v3831_v53 = vadd.s32 1, %v12692_v16  ;;  %v3812_v30 = vsel %vm3806_vm11, %v3809_v31, %v3811_v39 }
 0x50b   :  { %9383 = vmatprep.subr.bf16.mxu0 %v12744_v51  ;;  %v14011_v45 = vand.u32 4294901760, %v12770_v29  ;;  %vm3830_vm15 = vc.u32 %v12699_v27, %v12691_v47  ;;  %v4227_v3 = vsel %vm4223_vm13, %v12651_v4, %v4226_v2  ;;  %v4247_v33 = vadd.s32 1, %v12722_v57 }
 0x50c   :  { %v14012_v23 = vand.u32 4294901760, %v12775_v19  ;;  %v4225_v8 = vsel %vm4221_vm12, %v4205_v1, %v12649_v25  ;;  %v12799_v60 = vpack.c.bf16 %v14013_v32, %v14014_v13  ;;  %vm4246_vm0 = vc.u32 %v12738_v58, %v12721_v11 }
 0x50d   :  { %v5967_v31 = vsub.f32 %v12770_v29, %v14011_v45  ;;  %v3832_v21 = vsel %vm3830_vm15, %v3831_v53, %v12692_v16  ;;  %v4228_v25 = vsel %vm4222_vm14, %v4225_v8, %v4227_v3  ;;  %v3828_v2 = vmul.u32 %v12682_v10, %v3812_v30 }
 0x50e   :  { %9385 = vmatpush3.bf16.msra.mxu0 %v12744_v51  ;;  %v5974_v62 = vsub.f32 %v12775_v19, %v14012_v23  ;;  %v4248_v1 = vsel %vm4246_vm0, %v4247_v33, %v12722_v57  ;;  %v4244_v32 = vmul.u32 %v12701_v49, %v4228_v25  ;;  %v12822_v16 = vsub.f32 %v12703_v7, %v5887_v15 }
 0x50f   :  { %9387 = vmatprep.subr.bf16.mxu0 %v12764_v63  ;;  %v5968_v4 = vand.u32 4294901760, %v5967_v31  ;;  %v3833_v23 = vadd.s32 %v3832_v21, %v3828_v2  ;;  %v12825_v30 = vsub.f32 %v12705_v50, %v5890_v9  ;;  %v12840_v7 = vsub.f32 %v12707_v14, %v5893_v40 }
 0x510   :  { %v5975_v39 = vand.u32 4294901760, %v5974_v62  ;;  %v4249_v13 = vadd.s32 %v4248_v1, %v4244_v32  ;;  %v14022_v57 = vand.u32 4294901760, %v12822_v16  ;;  %v12847_v15 = vsub.f32 %v12713_v42, %v5896_v46 }
 0x511   :  { %v3834_v26 = vadd.s32 536870912, %v3833_v23  ;;  %v14021_v53 = vand.u32 4294901760, %v12825_v30  ;;  %v14020_v33 = vand.u32 4294901760, %v12840_v7  ;;  %v12860_v40 = vsub.f32 %v12716_v61, %v5899_v43 }
 0x512   :  { %9389 = vmatpush3.bf16.msra.mxu0 %v12764_v63  ;;  %v12816_v45 = vpack.c.bf16 %v5975_v39, %v5968_v4  ;;  %v4250_v10 = vadd.s32 536870912, %v4249_v13  ;;  %v6023_v49 = vsub.f32 %v12822_v16, %v14022_v57  ;;  %v14019_v62 = vand.u32 4294901760, %v12847_v15 }
 0x513   :  { %9391 = vmatprep.subr.bf16.mxu0 %v12799_v60  ;;  %v12829_v8 = vshrl.u32 %v3834_v26, 30  ;;  %v6030_v32 = vsub.f32 %v12825_v30, %v14021_v53  ;;  %v6037_v14 = vsub.f32 %v12840_v7, %v14020_v33  ;;  %v12865_v42 = vsub.f32 %v12718_v36, %v5902_v0 }
 0x514   :  { %v12842_v50 = vshrl.u32 %v4250_v10, 30  ;;  %v6024_v9 = vand.u32 4294901760, %v6023_v49  ;;  %v6044_v25 = vsub.f32 %v12847_v15, %v14019_v62  ;;  %v14016_v39 = vand.u32 4294901760, %v12860_v40 }
 0x515   :  { %v6031_v3 = vand.u32 4294901760, %v6030_v32  ;;  %v3836_v31 = vshll.u32 %v12829_v8, 30  ;;  %14383 = vst [vmem:[#allocation9_spill] sm:$0xff] %v12865_v42  ;;  %v6038_v4 = vand.u32 4294901760, %v6037_v14  ;;  %v14015_v2 = vand.u32 4294901760, %v12865_v42 }
 0x516   :  { %9393 = vmatpush3.bf16.msra.mxu0 %v12799_v60  ;;  %v4252_v46 = vshll.u32 %v12842_v50, 30  ;;  %v6045_v26 = vand.u32 4294901760, %v6044_v25  ;;  %v6051_v61 = vsub.f32 %v12860_v40, %v14016_v39  ;;  %v14384_v43 = vand.u32 4294901760, %v12732_v41 }
 0x517   :  { %9395 = vmatprep.subr.bf16.mxu0 %v12816_v45  ;;  %v12852_v21 = vpack.c.bf16 %v6031_v3, %v6024_v9  ;;  %v3837_v1 = vsub.s32 %v3833_v23, %v3836_v31  ;;  %v6058_v36 = vsub.f32 %v12865_v42, %v14015_v2  ;;  %v14386_v10 = vand.u32 4294901760, %v12746_v20 }
 0x518   :  { %v12882_v0 = vsub.f32 %v12732_v41, %v14384_v43  ;;  %v4253_v23 = vsub.s32 %v4249_v13, %v4252_v46  ;;  %v12889_v32 = vpack.c.bf16 %v6045_v26, %v6038_v4  ;;  %v6052_v9 = vand.u32 4294901760, %v6051_v61 }
 0x519   :  { %v12887_v49 = vsub.f32 %v12746_v20, %v14386_v10  ;;  %v6059_v3 = vand.u32 4294901760, %v6058_v36  ;;  %v3839_v25 = vsub.s32 0, %v3837_v1  ;;  %v12903_v26 = vpack.c.bf16 %v12775_v19, %v12770_v29 }
 0x51a   :  { %14385 = vst [vmem:[#allocation12_spill] sm:$0xff] %v12882_v0  ;;  %v14017_v31 = vand.u32 4294901760, %v12882_v0  ;;  %v4255_v13 = vsub.s32 0, %v4253_v23  ;;  %vm4281_vm13 = vweird.f32 %v14376_v6  ;;  %vm3865_vm14 = vweird.f32 %v14375_v44 }
 0x51b   :  { %14387 = vst [vmem:[#allocation48_spill] sm:$0xff] %v12887_v49  ;;  %v14018_v14 = vand.u32 4294901760, %v12887_v49  ;;  %v12893_v2 = vpack.c.bf16 %v6059_v3, %v6052_v9  ;;  %v7295_v61 = vmin.u32 %v3839_v25, %v3837_v1 }
 0x51c   :  { %v6065_v41 = vsub.f32 %v12882_v0, %v14017_v31  ;;  %v7311_v43 = vmin.u32 %v4255_v13, %v4253_v23  ;;  %v12909_v31 = vpack.c.bf16 %v12825_v30, %v12822_v16  ;;  %v12917_v13 = vpack.c.bf16 %v12865_v42, %v12860_v40 }
 0x51d   :  { %v6072_v20 = vsub.f32 %v12887_v49, %v14018_v14  ;;  %v3841_v10 = vclz %v7295_v61 }
 0x51e   :  { %v6066_v46 = vand.u32 4294901760, %v6065_v41  ;;  %v4257_v9 = vclz %v7311_v43 }
 0x51f   :  { %v6073_v4 = vand.u32 4294901760, %v6072_v20  ;;  %v7296_v3 = vadd.s32 4294967294, %v3841_v10  ;;  %v12913_v20 = vpack.c.bf16 %v12847_v15, %v12840_v7  ;;  %v12921_v10 = vpack.c.bf16 %v12887_v49, %v12882_v0 }
 0x520   :  { %v7312_v39 = vadd.s32 4294967294, %v4257_v9  ;;  %v3829_v9 = vadd.s32 %v12691_v47, %v12699_v27 }
 0x521   :  { %v12905_v36 = vpack.c.bf16 %v6073_v4, %v6066_v46  ;;  %vm7297_vm1 = vcmp.lt.s32.totalorder %v7296_v3, 0 }
 0x522   :  { %vm7313_vm2 = vcmp.lt.s32.totalorder %v7312_v39, 0  ;;  %v3844_v41 = vsel %vm7297_vm1, 0, %v7296_v3 }
 0x523   :  { %v4260_v14 = vsel %vm7313_vm2, 0, %v7312_v39  ;;  %v3849_v25 = vsub.s32 4294967266, %v3844_v41  ;;  %v3845_v61 = vsub.s32 32, %v3844_v41  ;;  %v4245_v39 = vadd.s32 %v12721_v11, %v12738_v58 }
 0x524   :  { %v4265_v46 = vsub.s32 4294967266, %v4260_v14  ;;  %v4261_v62 = vsub.s32 32, %v4260_v14  ;;  %v3846_v57 = vshll.u32 %v3837_v1, %v3844_v41  ;;  %v4262_v5 = vshll.u32 %v4253_v23, %v4260_v14  ;;  %v14394_v1 = vld [vmem:[#allocation23_spill] sm:$0xff]  ;;  %v14395_v23 = vld [vmem:[#allocation40_spill] sm:$0xff] }
 0x525   :  { %v3850_v4 = vadd.s32 127, %v3849_v25  ;;  %v3847_v33 = vshrl.u32 %v3829_v9, %v3845_v61  ;;  %v14388_v58 = vand.u32 2147483647, %v14375_v44  ;;  %v4409_v14 = vmul.f32 1.442695, %v14395_v23 }
 0x526   :  { %v4266_v43 = vadd.s32 127, %v4265_v46  ;;  %v4263_v34 = vshrl.u32 %v4245_v39, %v4261_v62 }
 0x527   :  { %v3851_v3 = vshll.u32 %v3850_v4, 23  ;;  %v3848_v25 = vor.u32 %v3847_v33, %v3846_v57  ;;  %vm12931_vm5 = vcmp.le.f32.partialorder %v14388_v58, 0.7853982  ;;  %v3859_v57 = vsub.s32 4, %v12829_v8 }
 0x528   :  { %v4267_v53 = vshll.u32 %v4266_v43, 23  ;;  %v4264_v37 = vor.u32 %v4263_v34, %v4262_v5  ;;  %v4275_v5 = vsub.s32 4, %v12842_v50 }
 0x529   :  { %v3852_v55 = vor.u32 4788187, %v3851_v3  ;;  %v3855_v28 = vcvt.s32.f32 %v3848_v25  ;;  %v3860_v33 = vsel %vm3775_vm3, %v3859_v57, %v12829_v8 }
 0x52a   :  { %v4268_v46 = vor.u32 4788187, %v4267_v53  ;;  %v4271_v42 = vcvt.s32.f32 %v4264_v37  ;;  %v14391_v37 = vand.u32 2147483647, %v14376_v6  ;;  %v4276_v53 = vsel %vm4191_vm4, %v4275_v5, %v12842_v50 }
 0x52b   :  { %v3853_v12 = vand.u32 2147483647, %v3852_v55  ;;  %v14396_v5 = vand.u32 4294901760, %v12453_v35 }
 0x52c   :  { %v4269_v49 = vand.u32 2147483647, %v4268_v46  ;;  %vm12940_vm6 = vcmp.le.f32.partialorder %v14391_v37, 0.7853982 }
 0x52d   :  { %v3856_v0 = vmul.f32 %v3855_v28, %v3853_v12  ;;  %v4278_v62 = vsel %vm12940_vm6, 0, %v4276_v53  ;;  %v12963_v57 = vsub.f32 %v12453_v35, %v14396_v5  ;;  %v14397_v53 = vand.u32 4294901760, %v12459_v17 }
 0x52e   :  { %v4272_v47 = vmul.f32 %v4271_v42, %v4269_v49  ;;  %v3862_v42 = vsel %vm12931_vm5, 0, %v3860_v33  ;;  %v4282_v43 = vadd.s32 3, %v4278_v62 }
 0x52f   :  { %v3857_v27 = vxor.u32 2147483648, %v3856_v0  ;;  %v3866_v9 = vadd.s32 3, %v3862_v42  ;;  %v12968_v33 = vsub.f32 %v12459_v17, %v14397_v53  ;;  %v5980_v35 = vand.u32 4294901760, %v12963_v57 }
 0x530   :  { %v4273_v4 = vxor.u32 2147483648, %v4272_v47  ;;  %v4283_v50 = vand.u32 3, %v4282_v43 }
 0x531   :  { %v3858_v61 = vsel %vm3775_vm3, %v3857_v27, %v3856_v0  ;;  %v4401_v0 = vmul.f32 1.442695, %v14394_v1  ;;  %v3867_v8 = vand.u32 3, %v3866_v9  ;;  %v5987_v43 = vand.u32 4294901760, %v12968_v33 }
 0x532   :  { %v4274_v55 = vsel %vm4191_vm4, %v4273_v4, %v4272_v47  ;;  %v3861_v28 = vsel %vm12931_vm5, %v14375_v44, %v3858_v61  ;;  %vm4285_vm7 = vcmp.eq.s32.totalorder %v4283_v50, 0  ;;  %vm4288_vm8 = vcmp.eq.s32.totalorder %v4283_v50, 2 }
 0x533   :  { %v4277_v34 = vsel %vm12940_vm6, %v14376_v6, %v4274_v55  ;;  %9973 = vcosq.f32 %v3861_v28  ;;  %vm3869_vm9 = vcmp.eq.s32.totalorder %v3867_v8, 0  ;;  %vm3872_vm10 = vcmp.eq.s32.totalorder %v3867_v8, 2 }
 0x534   :  { %9975 = vsinq.f32 %v3861_v28  ;;  %vm4284_vm11 = vcmp.lt.s32.totalorder %v4283_v50, 2  ;;  %vm3868_vm12 = vcmp.lt.s32.totalorder %v3867_v8, 2  ;;  %v14398_v9 = vand.u32 4294901760, %v12462_v54 }
 0x535   :  { %9977 = vcosq.f32 %v4277_v34  ;;  %v14399_v44 = vand.u32 4294901760, %v12464_v48 }
 0x536   :  { %9979 = vsinq.f32 %v4277_v34  ;;  %v7319_v34 = vld [vmem:[%s13797_s10] ss:$0 sm:$0xff]  ;;  %v12977_v17 = vsub.f32 %v12462_v54, %v14398_v9  ;;  %v5988_v54 = vsub.f32 %v12968_v33, %v5987_v43 }
 0x537   :  { %9981 = vpow2.f32 %v4401_v0 }
 0x538   :  { %9983 = vpow2.f32 %v4409_v14 }
 0x53d   :  { %v9974_v49 = vpop.eup %9973 }
 0x53e   :  { %v9976_v41 = vpop.eup %9975  ;;  %v3873_v27 = vxor.u32 2147483648, %v9974_v49 }
 0x53f   :  { %v9978_v3 = vpop.eup %9977  ;;  %v3870_v47 = vxor.u32 2147483648, %v9976_v41 }
 0x540   :  { %v9980_v39 = vpop.eup %9979  ;;  %v4289_v46 = vxor.u32 2147483648, %v9978_v3  ;;  %v3874_v11 = vsel %vm3872_vm10, %v3873_v27, %v9976_v41  ;;  %v14400_v27 = vand.u32 4294901760, %v12483_v22 }
 0x541   :  { %v4286_v25 = vxor.u32 2147483648, %v9980_v39  ;;  %v3871_v58 = vsel %vm3869_vm9, %v9974_v49, %v3870_v47  ;;  %v9982_v55 = vpop.eup %9981 }
 0x542   :  { %v4290_v61 = vsel %vm4288_vm8, %v4289_v46, %v9980_v39  ;;  %v3875_v37 = vsel %vm3868_vm12, %v3871_v58, %v3874_v11  ;;  %v9984_v12 = vpop.eup %9983  ;;  %v5994_v46 = vand.u32 4294901760, %v12977_v17 }
 0x543   :  { %v4287_v4 = vsel %vm4285_vm7, %v9978_v3, %v4286_v25  ;;  %v3876_v1 = vsel %vm3865_vm14, nan, %v3875_v37  ;;  %v12982_v3 = vsub.f32 %v12464_v48, %v14399_v44  ;;  %v5981_v25 = vsub.f32 %v12963_v57, %v5980_v35 }
 0x544   :  { %v4291_v28 = vsel %vm4284_vm11, %v4287_v4, %v4290_v61  ;;  %v4415_v23 = vmul.f32 %v9982_v55, %v3876_v1  ;;  %v13002_v4 = vsub.f32 %v12483_v22, %v14400_v27  ;;  %v14401_v61 = vand.u32 4294901760, %v12485_v18 }
 0x545   :  { %v4292_v62 = vsel %vm4281_vm13, nan, %v4291_v28  ;;  %v6001_v48 = vand.u32 4294901760, %v12982_v3  ;;  %v5982_v37 = vand.u32 4294901760, %v5981_v25 }
 0x546   :  { %v4419_v0 = vmul.f32 %v9984_v12, %v4292_v62  ;;  %v13007_v58 = vsub.f32 %v12485_v18, %v14401_v61  ;;  %v5989_v12 = vand.u32 4294901760, %v5988_v54  ;;  %v6008_v5 = vand.u32 4294901760, %v13002_v4  ;;  %v13070_v54 = vld [vmem:[%s13799_s12 + $0x18] sm:$0xff]  ;;  %v13076_v61 = vld [vmem:[%s13799_s12 + $0x20] sm:$0xff] }
 0x547   :  { %v6002_v18 = vsub.f32 %v12982_v3, %v6001_v48 }
 0x548   :  { %v6015_v53 = vand.u32 4294901760, %v13007_v58  ;;  %v9398_v1 = vpack.c.bf16 %v5989_v12, %v5982_v37  ;;  %v9434_v37 = vpack.c.bf16 %v12982_v3, %v12977_v17  ;;  %v14046_v12 = vand.u32 4294901760, %v13070_v54 }
 0x5cd   :  { %v8173_v42 = vpop.f32.mrb[8].mxu1 }
 0x5ce   :  { %v9748_v49 = vadd.f32 %v8173_v42, %v7319_v34  ;;  %v5827_v14 = vpop.f32.mrb[9].mxu1 }
 0x5cf   :  { %v9749_v41 = vadd.f32 %v7319_v34, %v5827_v14  ;;  %v5995_v34 = vsub.f32 %v12977_v17, %v5994_v46  ;;  %v6009_v14 = vsub.f32 %v13002_v4, %v6008_v5  ;;  %v14407_v17 = vand.u32 4294901760, %v12847_v15 }
 0x5d0   :  { %v5838_v6 = vmul.f32 %v9748_v49, %v4419_v0 }
 0x5d1   :  { %v5837_v39 = vmul.f32 %v9749_v41, %v4415_v23  ;;  %v5996_v0 = vand.u32 4294901760, %v5995_v34  ;;  %v6003_v23 = vand.u32 4294901760, %v6002_v18  ;;  %v6016_v41 = vsub.f32 %v13007_v58, %v6015_v53 }
 0x5d2   :  { %v12984_v50 = vand.u32 4294901760, %v5838_v6 }
 0x5d3   :  { %v12986_v8 = vand.u32 4294901760, %v5837_v39  ;;  %v9402_v9 = vpack.c.bf16 %v6003_v23, %v5996_v0  ;;  %v6017_v44 = vand.u32 4294901760, %v6016_v41  ;;  %v9438_v0 = vpack.c.bf16 %v13007_v58, %v13002_v4 }
 0x5d4   :  { %v12996_v47 = vsub.f32 %v5838_v6, %v12984_v50  ;;  %v6010_v6 = vand.u32 4294901760, %v6009_v14 }
 0x5d5   :  { %v13010_v11 = vsub.f32 %v5837_v39, %v12986_v8 }
 0x5d6   :  { %v5955_v55 = vand.u32 4294901760, %v12996_v47  ;;  %v9406_v39 = vpack.c.bf16 %v6017_v44, %v6010_v6  ;;  %v14417_v6 = vmov 2475754826  }
 0x5d7   :  { %v5945_v28 = vand.u32 4294901760, %v13010_v11 }
 0x5d8   :  { %v5956_v22 = vsub.f32 %v12996_v47, %v5955_v55 }
 0x5d9   :  { %v5946_v62 = vsub.f32 %v13010_v11, %v5945_v28 }
 0x5da   :  { %v5957_v49 = vand.u32 4294901760, %v5956_v22  ;;  %v14037_v22 = vand.u32 4294901760, %v13076_v61 }
 0x5db   :  { %v5947_v42 = vand.u32 4294901760, %v5946_v62 }
 0x5dd   :  { %8206 = vmatprep.mubr.f32.mxu0 %v5947_v42  ;;  %v13103_v42 = vld [vmem:[%s13799_s12 + $0x30] sm:$0xff] }
 0x5de   :  { %8207 = vmatmul.mubr.f32.vlgmr.msra.gmra.mrb[10].mxu0 %v5957_v49  ;;  %v14033_v23 = vand.u32 4294901760, %v13103_v42 }
 0x5df   :  { %9397 = vmatpush3.bf16.msra.mxu0 %v12816_v45  ;;  %8241 = vmatprep.mubr.f32.mxu0 %v12986_v8  ;;  %v9430_v45 = vpack.c.bf16 %v12968_v33, %v12963_v57  ;;  %v14404_v57 = vand.u32 4294901760, %v12822_v16  ;;  %v14405_v33 = vand.u32 4294901760, %v12825_v30  ;;  %v14411_v16 = vld [vmem:[#allocation12_spill] sm:$0xff] }
 0x5e0   :  { %9399 = vmatprep.subr.bf16.mxu0 %v9398_v1  ;;  %v14412_v58 = vand.u32 4294901760, %v14411_v16  ;;  %v14413_v30 = vld [vmem:[#allocation48_spill] sm:$0xff] }
 0x5e3   :  { %9401 = vmatpush3.bf16.msra.mxu0 %v9398_v1  ;;  %v13108_v1 = vld [vmem:[%s13799_s12 + $0x38] sm:$0xff] }
 0x5e4   :  { %9403 = vmatprep.subr.bf16.mxu0 %v9402_v9  ;;  %v14032_v14 = vand.u32 4294901760, %v13108_v1 }
 0x5e6   :  { %v13129_v41 = vpack.c.bf16 %v14032_v14, %v14033_v23 }
 0x5e7   :  { %9405 = vmatpush3.bf16.msra.mxu0 %v9402_v9 }
 0x5e8   :  { %9407 = vmatprep.subr.bf16.mxu0 %v9406_v39 }
 0x5eb   :  { %9409 = vmatpush3.bf16.msra.mxu0 %v9406_v39  ;;  %v14418_v39 = vmov 2131351028  }
 0x5ec   :  { %9411 = vmatprep.subr.bf16.mxu0 %v12852_v21 }
 0x5ef   :  { %9413 = vmatpush3.bf16.msra.mxu0 %v12852_v21  ;;  %v13051_v21 = vld [vmem:[%s13799_s12] sm:$0xff] }
 0x5f0   :  { %9415 = vmatprep.subr.bf16.mxu0 %v12889_v32 }
 0x5f3   :  { %9417 = vmatpush3.bf16.msra.mxu0 %v12889_v32  ;;  %v13061_v32 = vld [vmem:[%s13799_s12 + $0x10] sm:$0xff] }
 0x5f4   :  { %9419 = vmatprep.subr.bf16.mxu0 %v12893_v2  ;;  %v14047_v27 = vand.u32 4294901760, %v13061_v32 }
 0x5f6   :  { %v13098_v62 = vpack.c.bf16 %v14046_v12, %v14047_v27 }
 0x5f7   :  { %9421 = vmatpush3.bf16.msra.mxu0 %v12893_v2  ;;  %v13056_v2 = vld [vmem:[%s13799_s12 + $0x8] sm:$0xff] }
 0x5f8   :  { %9423 = vmatprep.subr.bf16.mxu0 %v12905_v36  ;;  %v6575_v25 = vand.u32 4294901760, %v13056_v2 }
 0x5fb   :  { %9425 = vmatpush3.bf16.msra.mxu0 %v12905_v36  ;;  %v6572_v36 = vand.u32 4294901760, %v13051_v21 }
 0x5fc   :  { %9427 = vmatprep.subr.bf16.mxu0 %v12903_v26 }
 0x5fd   :  { %v13090_v34 = vpack.c.bf16 %v6575_v25, %v6572_v36 }
 0x5fe   :  { %8242 = vmatmul.mubr.f32.vlgmr.msra.gmra.mrb[10].mxu0 %v12984_v50 }
 0x5ff   :  { %9429 = vmatpush3.bf16.msra.mxu0 %v12903_v26  ;;  %8276 = vmatprep.mubr.f32.mxu0 %v13010_v11  ;;  %v13081_v26 = vld [vmem:[%s13799_s12 + $0x28] sm:$0xff]  ;;  %v14414_v11 = vand.u32 4294901760, %v14413_v30 }
 0x600   :  { %9431 = vmatprep.subr.bf16.mxu0 %v9430_v45  ;;  %v14034_v18 = vand.u32 4294901760, %v13081_v26  ;;  %9555 = vmatprep.subr.bf16.mxu1 %v13090_v34 }
 0x601   :  { %9557 = vmatpush3.bf16.msra.mxu1 %v13090_v34 }
 0x602   :  { %9559 = vmatprep.subr.bf16.mxu1 %v13098_v62  ;;  %v13119_v49 = vpack.c.bf16 %v14034_v18, %v14037_v22 }
 0x603   :  { %9433 = vmatpush3.bf16.msra.mxu0 %v9430_v45 }
 0x604   :  { %9435 = vmatprep.subr.bf16.mxu0 %v9434_v37 }
 0x605   :  { %9561 = vmatpush3.bf16.msra.mxu1 %v13098_v62 }
 0x606   :  { %9563 = vmatprep.subr.bf16.mxu1 %v13119_v49 }
 0x607   :  { %9437 = vmatpush3.bf16.msra.mxu0 %v9434_v37  ;;  %v14419_v37 = vmov 2102212464  }
 0x608   :  { %9439 = vmatprep.subr.bf16.mxu0 %v9438_v0 }
 0x609   :  { %9565 = vmatpush3.bf16.msra.mxu1 %v13119_v49 }
 0x60a   :  { %9567 = vmatprep.subr.bf16.mxu1 %v13129_v41 }
 0x60b   :  { %9441 = vmatpush3.bf16.msra.mxu0 %v9438_v0 }
 0x60c   :  { %9443 = vmatprep.subr.bf16.mxu0 %v12909_v31 }
 0x60d   :  { %9569 = vmatpush3.bf16.msra.mxu1 %v13129_v41 }
 0x60f   :  { %9445 = vmatpush3.bf16.msra.mxu0 %v12909_v31  ;;  %v14402_v31 = vand.u32 4294901760, %v12770_v29  ;;  %v9498_v29 = vpack.c.bf16 %v6001_v48, %v5994_v46  ;;  %v14408_v46 = vand.u32 4294901760, %v12860_v40 }
 0x610   :  { %9447 = vmatprep.subr.bf16.mxu0 %v12913_v20 }
 0x613   :  { %9449 = vmatpush3.bf16.msra.mxu0 %v12913_v20  ;;  %v14403_v20 = vand.u32 4294901760, %v12775_v19  ;;  %v9502_v19 = vpack.c.bf16 %v6015_v53, %v6008_v5 }
 0x614   :  { %9451 = vmatprep.subr.bf16.mxu0 %v12917_v13 }
 0x617   :  { %9453 = vmatpush3.bf16.msra.mxu0 %v12917_v13  ;;  %v9490_v13 = vpack.c.bf16 %v14403_v20, %v14402_v31  ;;  %v14420_v31 = vmov 1326507024  }
 0x618   :  { %9455 = vmatprep.subr.bf16.mxu0 %v12921_v10 }
 0x61b   :  { %9457 = vmatpush3.bf16.msra.mxu0 %v12921_v10  ;;  %v9494_v10 = vpack.c.bf16 %v5987_v43, %v5980_v35  ;;  %v9506_v35 = vpack.c.bf16 %v14405_v33, %v14404_v57  ;;  %v14406_v43 = vand.u32 4294901760, %v12840_v7 }
 0x61c   :  { %9459 = vmatprep.subr.bf16.mxu0 %v12473_v24 }
 0x61d   :  { %v9510_v3 = vpack.c.bf16 %v14407_v17, %v14406_v43 }
 0x61e   :  { %8277 = vmatmul.mubr.f32.vlgmr.msra.gmra.mrb[10].mxu0 %v12996_v47  ;;  %v14409_v47 = vld [vmem:[#allocation9_spill] sm:$0xff] }
 0x61f   :  { %9461 = vmatpush3.bf16.msra.mxu0 %v12473_v24  ;;  %8311 = vmatprep.mubr.f32.mxu0 %v5945_v28  ;;  %v14410_v48 = vand.u32 4294901760, %v14409_v47 }
 0x620   :  { %9463 = vmatprep.subr.bf16.mxu0 %v12481_v56 }
 0x621   :  { %v9514_v4 = vpack.c.bf16 %v14410_v48, %v14408_v46 }
 0x623   :  { %9465 = vmatpush3.bf16.msra.mxu0 %v12481_v56 }
 0x624   :  { %9467 = vmatprep.subr.bf16.mxu0 %v12496_v52 }
 0x627   :  { %9469 = vmatpush3.bf16.msra.mxu0 %v12496_v52 }
 0x628   :  { %9471 = vmatprep.subr.bf16.mxu0 %v12506_v59 }
 0x62b   :  { %9473 = vmatpush3.bf16.msra.mxu0 %v12506_v59 }
 0x62c   :  { %9475 = vmatprep.subr.bf16.mxu0 %v12728_v38 }
 0x62f   :  { %9477 = vmatpush3.bf16.msra.mxu0 %v12728_v38 }
 0x630   :  { %9479 = vmatprep.subr.bf16.mxu0 %v12744_v51 }
 0x633   :  { %9481 = vmatpush3.bf16.msra.mxu0 %v12744_v51 }
 0x634   :  { %9483 = vmatprep.subr.bf16.mxu0 %v12764_v63 }
 0x637   :  { %9485 = vmatpush3.bf16.msra.mxu0 %v12764_v63 }
 0x638   :  { %9487 = vmatprep.subr.bf16.mxu0 %v12799_v60 }
 0x63b   :  { %9489 = vmatpush3.bf16.msra.mxu0 %v12799_v60 }
 0x63c   :  { %9491 = vmatprep.subr.bf16.mxu0 %v9490_v13 }
 0x63e   :  { %8312 = vmatmul.mubr.f32.vlgmr.msra.gmra.mrb[10].mxu0 %v5955_v55  ;;  %v9518_v55 = vpack.c.bf16 %v14414_v11, %v14412_v58 }
 0x63f   :  { %9493 = vmatpush3.bf16.msra.mxu0 %v9490_v13  ;;  %8346 = vmatprep.mubr.f32.mxu0 %v12986_v8  ;;  %v14421_v13 = vmov 920167782  }
 0x640   :  { %9495 = vmatprep.subr.bf16.mxu0 %v9494_v10 }
 0x643   :  { %9497 = vmatpush3.bf16.msra.mxu0 %v9494_v10 }
 0x644   :  { %9499 = vmatprep.subr.bf16.mxu0 %v9498_v29 }
 0x647   :  { %9501 = vmatpush3.bf16.msra.mxu0 %v9498_v29  ;;  %v14422_v29 = vmov 683565275  }
 0x648   :  { %9503 = vmatprep.subr.bf16.mxu0 %v9502_v19 }
 0x64b   :  { %9505 = vmatpush3.bf16.msra.mxu0 %v9502_v19 }
 0x64c   :  { %9507 = vmatprep.subr.bf16.mxu0 %v9506_v35 }
 0x64f   :  { %9509 = vmatpush3.bf16.msra.mxu0 %v9506_v35 }
 0x650   :  { %9511 = vmatprep.subr.bf16.mxu0 %v9510_v3 }
 0x653   :  { %9513 = vmatpush3.bf16.msra.mxu0 %v9510_v3 }
 0x654   :  { %9515 = vmatprep.subr.bf16.mxu0 %v9514_v4 }
 0x657   :  { %9517 = vmatpush3.bf16.msra.mxu0 %v9514_v4 }
 0x658   :  { %9519 = vmatprep.subr.bf16.mxu0 %v9518_v55 }
 0x65b   :  { %9521 = vmatpush3.bf16.msra.mxu0 %v9518_v55 }
 0x65c   :  { %9523 = vmatprep.subr.bf16.mxu0 %v12473_v24 }
 0x65e   :  { %8347 = vmatmul.mubr.f32.vlgmr.msra.gmra.mrb[10].mxu0 %v12984_v50 }
 0x65f   :  { %9525 = vmatpush3.bf16.msra.mxu0 %v12473_v24  ;;  %8381 = vmatprep.mubr.f32.mxu0 %v12986_v8  ;;  %v14415_v24 = vld [vmem:[#allocation27_spill] sm:$0xff] }
 0x660   :  { %9527 = vmatprep.subr.bf16.mxu0 %v12481_v56  ;;  %vm3879_vm13 = vcmp.lt.s32.totalorder %v14415_v24, 0 }
 0x663   :  { %9529 = vmatpush3.bf16.msra.mxu0 %v12481_v56  ;;  %v3880_v56 = vand.u32 2139095040, %v14415_v24 }
 0x664   :  { %9531 = vmatprep.subr.bf16.mxu0 %v12496_v52 }
 0x665   :  { %v3881_v7 = vshrl.u32 %v3880_v56, 23 }
 0x667   :  { %9533 = vmatpush3.bf16.msra.mxu0 %v12496_v52  ;;  %v14416_v52 = vld [vmem:[#allocation29_spill] sm:$0xff]  ;;  %v7298_v15 = vadd.s32 4294967169, %v3881_v7 }
 0x668   :  { %9535 = vmatprep.subr.bf16.mxu0 %v12506_v59  ;;  %v14048_v30 = vand.u32 2147483647, %v14416_v52  ;;  %vm4295_vm14 = vcmp.lt.s32.totalorder %v14416_v52, 0 }
 0x669   :  { %v3887_v8 = vadd.s32 1, %v7298_v15 }
 0x66b   :  { %9537 = vmatpush3.bf16.msra.mxu0 %v12506_v59  ;;  %v4296_v59 = vand.u32 2139095040, %v14416_v52  ;;  %vm3888_vm15 = vcmp.gt.s32.totalorder %v3887_v8, 0 }
 0x66c   :  { %9539 = vmatprep.subr.bf16.mxu0 %v12728_v38  ;;  %v3889_v28 = vsel %vm3888_vm15, %v3887_v8, 0 }
 0x66d   :  { %v13238_v17 = vshrl.u32 %v3889_v28, 5 }
 0x66f   :  { %9541 = vmatpush3.bf16.msra.mxu0 %v12728_v38  ;;  %v4297_v38 = vshrl.u32 %v4296_v59, 23  ;;  %vm3909_vm1 = vcmp.lt.s32.totalorder %v13238_v17, 1  ;;  %vm3912_vm2 = vcmp.lt.s32.totalorder %v13238_v17, 4  ;;  %vm3911_vm3 = vcmp.lt.s32.totalorder %v13238_v17, 3 }
 0x670   :  { %9543 = vmatprep.subr.bf16.mxu0 %v12744_v51  ;;  %vm3910_vm5 = vcmp.lt.s32.totalorder %v13238_v17, 2 }
 0x671   :  { %v7314_v40 = vadd.s32 4294967169, %v4297_v38 }
 0x673   :  { %9545 = vmatpush3.bf16.msra.mxu0 %v12744_v51  ;;  %v4303_v51 = vadd.s32 1, %v7314_v40 }
 0x674   :  { %9547 = vmatprep.subr.bf16.mxu0 %v12764_v63 }
 0x675   :  { %vm4304_vm0 = vcmp.gt.s32.totalorder %v4303_v51, 0 }
 0x676   :  { %v4305_v5 = vsel %vm4304_vm0, %v4303_v51, 0 }
 0x677   :  { %9549 = vmatpush3.bf16.msra.mxu0 %v12764_v63  ;;  %v3891_v63 = vand.u32 31, %v3889_v28  ;;  %v4307_v53 = vand.u32 31, %v4305_v5  ;;  %v13251_v56 = vshrl.u32 %v4305_v5, 5 }
 0x678   :  { %9551 = vmatprep.subr.bf16.mxu0 %v12799_v60 }
 0x679   :  { %v13217_v9 = vsub.s32 32, %v3891_v63  ;;  %v3894_v19 = vshll.u32 %v14422_v29, %v3891_v63  ;;  %v3897_v57 = vshll.u32 %v14417_v6, %v3891_v63  ;;  %v3900_v33 = vshll.u32 %v14418_v39, %v3891_v63 }
 0x67a   :  { %v3906_v35 = vshll.u32 %v14421_v13, %v3891_v63  ;;  %v3903_v3 = vshll.u32 %v14419_v37, %v3891_v63  ;;  %v4319_v11 = vshll.u32 %v14419_v37, %v4307_v53  ;;  %v4322_v40 = vshll.u32 %v14421_v13, %v4307_v53 }
 0x67b   :  { %9553 = vmatpush3.bf16.msra.mxu0 %v12799_v60  ;;  %v14049_v60 = vand.u32 2147483647, %v14415_v24  ;;  %v3895_v44 = vshrl.u32 %v14417_v6, %v13217_v9  ;;  %v3898_v45 = vshrl.u32 %v14418_v39, %v13217_v9  ;;  %v3901_v0 = vshrl.u32 %v14419_v37, %v13217_v9 }
 0x67c   :  { %v3907_v20 = vshrl.u32 %v14420_v31, %v13217_v9  ;;  %v3904_v10 = vshrl.u32 %v14421_v13, %v13217_v9  ;;  %v4310_v51 = vshll.u32 %v14422_v29, %v4307_v53  ;;  %v4313_v28 = vshll.u32 %v14417_v6, %v4307_v53 }
 0x67d   :  { %v3884_v43 = vand.u32 8388607, %v14049_v60  ;;  %v13243_v47 = vor.u32 %v3895_v44, %v3894_v19  ;;  %v13245_v48 = vor.u32 %v3898_v45, %v3897_v57  ;;  %v3902_v4 = vor.u32 %v3901_v0, %v3900_v33 }
 0x67e   :  { %8382 = vmatmul.mubr.f32.vlgmr.msra.gmra.mrb[10].mxu0 %v12984_v50  ;;  %v13220_v50 = vsub.s32 32, %v4307_v53  ;;  %v3908_v16 = vor.u32 %v3907_v20, %v3906_v35  ;;  %v3905_v58 = vor.u32 %v3904_v10, %v3903_v3  ;;  %v4316_v63 = vshll.u32 %v14418_v39, %v4307_v53 }
 0x67f   :  { %v4300_v44 = vand.u32 8388607, %v14048_v30  ;;  %vm4328_vm4 = vcmp.lt.s32.totalorder %v13251_v56, 4  ;;  %v3885_v20 = vor.u32 8388608, %v3884_v43  ;;  %v3921_v53 = vsel %vm3909_vm1, %v13245_v48, %v3902_v4 }
 0x680   :  { %v4320_v46 = vshrl.u32 %v14421_v13, %v13220_v50  ;;  %v4323_v55 = vshrl.u32 %v14420_v31, %v13220_v50  ;;  %v4311_v59 = vshrl.u32 %v14417_v6, %v13220_v50  ;;  %v4314_v7 = vshrl.u32 %v14418_v39, %v13220_v50 }
 0x681   :  { %v4317_v38 = vshrl.u32 %v14419_v37, %v13220_v50  ;;  %v3922_v8 = vsel %vm3912_vm2, %v3908_v16, 1326507024  ;;  %v3918_v5 = vsel %vm3912_vm2, %v3905_v58, 920167782  ;;  %v3917_v13 = vsel %vm3909_vm1, %v13243_v47, %v13245_v48 }
 0x682   :  { %v4321_v15 = vor.u32 %v4320_v46, %v4319_v11  ;;  %v4324_v45 = vor.u32 %v4323_v55, %v4322_v40  ;;  %v13272_v37 = vor.u32 %v4311_v59, %v4310_v51  ;;  %v13274_v0 = vor.u32 %v4314_v7, %v4313_v28  ;;  %v13339_v51 = vld [vmem:[%s13799_s12 + $0x50] sm:$0xff] }
 0x683   :  { %v4318_v31 = vor.u32 %v4317_v38, %v4316_v63  ;;  %v3923_v6 = vsel %vm3911_vm3, %v3905_v58, %v3922_v8  ;;  %v3919_v10 = vsel %vm3911_vm3, %v3902_v4, %v3918_v5  ;;  %vm4325_vm6 = vcmp.lt.s32.totalorder %v13251_v56, 1  ;;  %v13329_v8 = vld [vmem:[%s13799_s12 + $0x40] sm:$0xff] }
 0x684   :  { %v4334_v39 = vsel %vm4328_vm4, %v4321_v15, 920167782  ;;  %vm4327_vm7 = vcmp.lt.s32.totalorder %v13251_v56, 3  ;;  %v4338_v19 = vsel %vm4328_vm4, %v4324_v45, 1326507024  ;;  %v3924_v57 = vsel %vm3910_vm5, %v3921_v53, %v3923_v6  ;;  %v13359_v53 = vld [vmem:[%s13799_s12 + $0x68] sm:$0xff] }
 0x685   :  { %v4301_v33 = vor.u32 8388608, %v4300_v44  ;;  %v4333_v35 = vsel %vm4325_vm6, %v13272_v37, %v13274_v0  ;;  %v4335_v43 = vsel %vm4327_vm7, %v4318_v31, %v4334_v39  ;;  %v3920_v3 = vsel %vm3910_vm5, %v3917_v13, %v3919_v10  ;;  %v13348_v44 = vld [vmem:[%s13799_s12 + $0x58] sm:$0xff] }
 0x686   :  { %v13305_v46 = vshll.u32 %v3885_v20, 8  ;;  %vm4326_vm8 = vcmp.lt.s32.totalorder %v13251_v56, 2  ;;  %v4337_v16 = vsel %vm4325_vm6, %v13274_v0, %v4318_v31  ;;  %v4339_v58 = vsel %vm4327_vm7, %v4321_v15, %v4338_v19  ;;  %v13334_v15 = vld [vmem:[%s13799_s12 + $0x48] sm:$0xff]  ;;  %v13354_v20 = vld [vmem:[%s13799_s12 + $0x60] sm:$0xff] }
 0x687   :  { %v4336_v59 = vsel %vm4326_vm8, %v4333_v35, %v4335_v43  ;;  %v13324_v40 = vshll.u32 %v4301_v33, 8  ;;  %v4340_v28 = vsel %vm4326_vm8, %v4337_v16, %v4339_v58  ;;  %v6596_v63 = vand.u32 4294901760, %v13329_v8  ;;  %v13376_v35 = vld [vmem:[%s13799_s12 + $0x70] sm:$0xff]  ;;  %v13393_v58 = vld [vmem:[%s13799_s12 + $0x78] sm:$0xff] }
 0x688   :  { %v13314_v11 = vmul.u32.u64.low %v13305_v46, %v3924_v57  ;;  %v13315_v55 = vmul.u32.u64.high %v13305_v46, %v3924_v57, %v13314_v11  ;;  %v13320_v7 = vmul.u32.u64.low %v13305_v46, %v3920_v3  ;;  %v13321_v38 = vmul.u32.u64.high %v13305_v46, %v3920_v3, %v13320_v7 }
 0x689   :  { %v6599_v5 = vand.u32 4294901760, %v13334_v15  ;;  %v6602_v45 = vand.u32 4294901760, %v13339_v51  ;;  %v13362_v6 = vmul.u32.u64.low %v13324_v40, %v4336_v59  ;;  %v13363_v39 = vmul.u32.u64.high %v13324_v40, %v4336_v59, %v13362_v6 }
 0x68a   :  { %v6605_v13 = vand.u32 4294901760, %v13348_v44  ;;  %v3914_v10 = vsel %vm3912_vm2, %v3902_v4, 2102212464  ;;  %v6608_v57 = vand.u32 4294901760, %v13354_v20  ;;  %v6611_v33 = vand.u32 4294901760, %v13359_v53 }
 0x68b   :  { %v13369_v19 = vpack.c.bf16 %v6599_v5, %v6596_v63  ;;  %v3893_v43 = vshrl.u32 %v14422_v29, %v13217_v9  ;;  %v13381_v3 = vmul.u32.u64.low %v13324_v40, %v4340_v28  ;;  %v13382_v16 = vmul.u32.u64.high %v13324_v40, %v4340_v28, %v13381_v3 }
 0x68c   :  { %v13388_v4 = vpack.c.bf16 %v6605_v13, %v6602_v45  ;;  %v3915_v11 = vsel %vm3911_vm3, %v13245_v48, %v3914_v10  ;;  %v4330_v59 = vsel %vm4328_vm4, %v4318_v31, 2102212464  ;;  %v6614_v28 = vand.u32 4294901760, %v13376_v35 }
 0x68d   :  { %9571 = vmatprep.subr.bf16.mxu1 %v13369_v19  ;;  %v3913_v9 = vsel %vm3909_vm1, %v3893_v43, %v13243_v47  ;;  %v13411_v3 = vpack.c.bf16 %v6611_v33, %v6608_v57  ;;  %v6617_v47 = vand.u32 4294901760, %v13393_v58  ;;  %v13417_v48 = vsub.f32 %v13051_v21, %v6572_v36 }
 0x68e   :  { %9573 = vmatpush3.bf16.msra.mxu1 %v13369_v19  ;;  %v13422_v31 = vsub.f32 %v13056_v2, %v6575_v25  ;;  %v4309_v10 = vshrl.u32 %v14422_v29, %v13220_v50  ;;  %v3935_v43 = vadd.s32 1, %v13321_v38  ;;  %v3916_v18 = vsel %vm3910_vm5, %v3913_v9, %v3915_v11 }
 0x68f   :  { %9575 = vmatprep.subr.bf16.mxu1 %v13388_v4  ;;  %v14036_v14 = vand.u32 4294901760, %v13417_v48  ;;  %vm3934_vm9 = vc.u32 %v13315_v55, %v13320_v7  ;;  %v4331_v2 = vsel %vm4327_vm7, %v13274_v0, %v4330_v59  ;;  %v4351_v36 = vadd.s32 1, %v13363_v39 }
 0x690   :  { %v14035_v23 = vand.u32 4294901760, %v13422_v31  ;;  %v4329_v21 = vsel %vm4325_vm6, %v4309_v10, %v13272_v37  ;;  %v13446_v25 = vpack.c.bf16 %v6617_v47, %v6614_v28  ;;  %vm4350_vm10 = vc.u32 %v13382_v16, %v13362_v6 }
 0x691   :  { %v6676_v50 = vsub.f32 %v13417_v48, %v14036_v14  ;;  %v3936_v17 = vsel %vm3934_vm9, %v3935_v43, %v13321_v38  ;;  %v4332_v37 = vsel %vm4326_vm8, %v4329_v21, %v4331_v2  ;;  %v3932_v11 = vmul.u32 %v13305_v46, %v3916_v18 }
 0x692   :  { %9577 = vmatpush3.bf16.msra.mxu1 %v13388_v4  ;;  %v6683_v29 = vsub.f32 %v13422_v31, %v14035_v23  ;;  %v4352_v59 = vsel %vm4350_vm10, %v4351_v36, %v13363_v39  ;;  %v4348_v14 = vmul.u32 %v13324_v40, %v4332_v37  ;;  %v13469_v38 = vsub.f32 %v13329_v8, %v6596_v63 }
 0x693   :  { %9579 = vmatprep.subr.bf16.mxu1 %v13411_v3  ;;  %v6677_v0 = vand.u32 4294901760, %v6676_v50  ;;  %v3937_v23 = vadd.s32 %v3936_v17, %v3932_v11  ;;  %v13472_v18 = vsub.f32 %v13334_v15, %v6599_v5  ;;  %v13487_v8 = vsub.f32 %v13339_v51, %v6602_v45 }
 0x694   :  { %v6684_v9 = vand.u32 4294901760, %v6683_v29  ;;  %v4353_v22 = vadd.s32 %v4352_v59, %v4348_v14  ;;  %v14045_v39 = vand.u32 4294901760, %v13469_v38  ;;  %v13494_v63 = vsub.f32 %v13348_v44, %v6605_v13 }
 0x695   :  { %v3938_v56 = vadd.s32 536870912, %v3937_v23  ;;  %v14044_v43 = vand.u32 4294901760, %v13472_v18  ;;  %v14043_v36 = vand.u32 4294901760, %v13487_v8  ;;  %v13507_v45 = vsub.f32 %v13354_v20, %v6608_v57 }
 0x696   :  { %9581 = vmatpush3.bf16.msra.mxu1 %v13411_v3  ;;  %v13463_v10 = vpack.c.bf16 %v6684_v9, %v6677_v0  ;;  %v4354_v46 = vadd.s32 536870912, %v4353_v22  ;;  %v6732_v14 = vsub.f32 %v13469_v38, %v14045_v39  ;;  %v14042_v29 = vand.u32 4294901760, %v13494_v63 }
 0x697   :  { %9583 = vmatprep.subr.bf16.mxu1 %v13446_v25  ;;  %v13476_v21 = vshrl.u32 %v3938_v56, 30  ;;  %v6739_v40 = vsub.f32 %v13472_v18, %v14044_v43  ;;  %v6746_v51 = vsub.f32 %v13487_v8, %v14043_v36  ;;  %v13512_v44 = vsub.f32 %v13359_v53, %v6611_v33 }
 0x698   :  { %v13489_v15 = vshrl.u32 %v4354_v46, 30  ;;  %v6733_v5 = vand.u32 4294901760, %v6732_v14  ;;  %v6753_v37 = vsub.f32 %v13494_v63, %v14042_v29  ;;  %v14041_v9 = vand.u32 4294901760, %v13507_v45 }
 0x699   :  { %v6740_v2 = vand.u32 4294901760, %v6739_v40  ;;  %v3940_v50 = vshll.u32 %v13476_v21, 30  ;;  %14423 = vst [vmem:[#allocation32_spill] sm:$0xff] %v13512_v44  ;;  %v6747_v0 = vand.u32 4294901760, %v6746_v51  ;;  %v14040_v11 = vand.u32 4294901760, %v13512_v44 }
 0x69a   :  { %9585 = vmatpush3.bf16.msra.mxu1 %v13446_v25  ;;  %v4356_v13 = vshll.u32 %v13489_v15, 30  ;;  %v6754_v56 = vand.u32 4294901760, %v6753_v37  ;;  %v6760_v20 = vsub.f32 %v13507_v45, %v14041_v9  ;;  %v13529_v57 = vsub.f32 %v13376_v35, %v6614_v28 }
 0x69b   :  { %9587 = vmatprep.subr.bf16.mxu1 %v13463_v10  ;;  %v13499_v17 = vpack.c.bf16 %v6740_v2, %v6733_v5  ;;  %v3941_v59 = vsub.s32 %v3937_v23, %v3940_v50  ;;  %v6767_v53 = vsub.f32 %v13512_v44, %v14040_v11  ;;  %v13534_v33 = vsub.f32 %v13393_v58, %v6617_v47 }
 0x69c   :  { %14424 = vst [vmem:[#allocation36_spill] sm:$0xff] %v13529_v57  ;;  %v4357_v23 = vsub.s32 %v4353_v22, %v4356_v13  ;;  %v13536_v46 = vpack.c.bf16 %v6754_v56, %v6747_v0  ;;  %v6761_v14 = vand.u32 4294901760, %v6760_v20  ;;  %v14038_v5 = vand.u32 4294901760, %v13529_v57 }
 0x69d   :  { %14425 = vst [vmem:[#allocation10_spill] sm:$0xff] %v13534_v33  ;;  %v6768_v40 = vand.u32 4294901760, %v6767_v53  ;;  %v14039_v2 = vand.u32 4294901760, %v13534_v33  ;;  %v3943_v50 = vsub.s32 0, %v3941_v59  ;;  %v13550_v13 = vpack.c.bf16 %v13422_v31, %v13417_v48 }
 0x69e   :  { %v6774_v35 = vsub.f32 %v13529_v57, %v14038_v5  ;;  %v4359_v22 = vsub.s32 0, %v4357_v23  ;;  %v13556_v5 = vpack.c.bf16 %v13472_v18, %v13469_v38  ;;  %vm4385_vm7 = vweird.f32 %v14416_v52 }
 0x69f   :  { %v13540_v51 = vpack.c.bf16 %v6768_v40, %v6761_v14  ;;  %v6781_v58 = vsub.f32 %v13534_v33, %v14039_v2  ;;  %v7299_v37 = vmin.u32 %v3943_v50, %v3941_v59  ;;  %vm3969_vm8 = vweird.f32 %v14415_v24 }
 0x6a0   :  { %v6775_v28 = vand.u32 4294901760, %v6774_v35  ;;  %v7315_v56 = vmin.u32 %v4359_v22, %v4357_v23  ;;  %v13564_v22 = vpack.c.bf16 %v13512_v44, %v13507_v45  ;;  %vm7255_vm9 = vcmask 31744  }
 0x6a1   :  { %v6782_v47 = vand.u32 4294901760, %v6781_v58  ;;  %v3945_v20 = vclz %v7299_v37  ;;  %v13560_v58 = vpack.c.bf16 %v13494_v63, %v13487_v8 }
 0x6a2   :  { %v4361_v53 = vclz %v7315_v56 }
 0x6a3   :  { %v13552_v0 = vpack.c.bf16 %v6782_v47, %v6775_v28  ;;  %v7300_v14 = vadd.s32 4294967294, %v3945_v20  ;;  %v13568_v20 = vpack.c.bf16 %v13534_v33, %v13529_v57 }
 0x6a4   :  { %v7316_v40 = vadd.s32 4294967294, %v4361_v53  ;;  %v3933_v53 = vadd.s32 %v13320_v7, %v13315_v55 }
 0x6a5   :  { %vm7301_vm11 = vcmp.lt.s32.totalorder %v7300_v14, 0 }
 0x6a6   :  { %vm7317_vm12 = vcmp.lt.s32.totalorder %v7316_v40, 0  ;;  %v3948_v35 = vsel %vm7301_vm11, 0, %v7300_v14 }
 0x6a7   :  { %v4364_v2 = vsel %vm7317_vm12, 0, %v7316_v40  ;;  %v3953_v50 = vsub.s32 4294967266, %v3948_v35  ;;  %v3949_v37 = vsub.s32 32, %v3948_v35  ;;  %v4349_v40 = vadd.s32 %v13362_v6, %v13382_v16 }
 0x6a8   :  { %v4369_v28 = vsub.s32 4294967266, %v4364_v2  ;;  %v4365_v11 = vsub.s32 32, %v4364_v2  ;;  %v3950_v36 = vshll.u32 %v3941_v59, %v3948_v35  ;;  %v4366_v12 = vshll.u32 %v4357_v23, %v4364_v2  ;;  %v14432_v59 = vld [vmem:[#allocation26_spill] sm:$0xff] }
 0x6a9   :  { %v3954_v47 = vadd.s32 127, %v3953_v50  ;;  %v3951_v9 = vshrl.u32 %v3933_v53, %v3949_v37  ;;  %v14426_v6 = vand.u32 2147483647, %v14415_v24  ;;  %v14433_v23 = vld [vmem:[#allocation42_spill] sm:$0xff] }
 0x6aa   :  { %v4370_v56 = vadd.s32 127, %v4369_v28  ;;  %v4367_v39 = vshrl.u32 %v4349_v40, %v4365_v11  ;;  %v4411_v2 = vmul.f32 1.442695, %v14433_v23 }
 0x6ab   :  { %v3955_v14 = vshll.u32 %v3954_v47, 23  ;;  %v3952_v50 = vor.u32 %v3951_v9, %v3950_v36  ;;  %vm13578_vm15 = vcmp.le.f32.partialorder %v14426_v6, 0.7853982  ;;  %v3963_v36 = vsub.s32 4, %v13476_v21 }
 0x6ac   :  { %v4371_v29 = vshll.u32 %v4370_v56, 23  ;;  %v4368_v30 = vor.u32 %v4367_v39, %v4366_v12  ;;  %v14429_v12 = vand.u32 2147483647, %v14416_v52  ;;  %v4379_v39 = vsub.s32 4, %v13489_v15 }
 0x6ad   :  { %v3956_v43 = vor.u32 4788187, %v3955_v14  ;;  %v3959_v60 = vcvt.s32.f32 %v3952_v50 }
 0x6ae   :  { %v4372_v28 = vor.u32 4788187, %v4371_v29  ;;  %v4375_v44 = vcvt.s32.f32 %v4368_v30  ;;  %vm13587_vm0 = vcmp.le.f32.partialorder %v14429_v12, 0.7853982  ;;  %v4380_v29 = vsel %vm4295_vm14, %v4379_v39, %v13489_v15 }
 0x6af   :  { %v3957_v27 = vand.u32 2147483647, %v3956_v43  ;;  %v4382_v9 = vsel %vm13587_vm0, 0, %v4380_v29  ;;  %v14434_v39 = vand.u32 4294901760, %v13061_v32  ;;  %v14435_v29 = vand.u32 4294901760, %v13070_v54 }
 0x6b0   :  { %v4373_v33 = vand.u32 2147483647, %v4372_v28  ;;  %v4386_v56 = vadd.s32 3, %v4382_v9 }
 0x6b1   :  { %v3960_v57 = vmul.f32 %v3959_v60, %v3957_v27 }
 0x6b2   :  { %v4376_v55 = vmul.f32 %v4375_v44, %v4373_v33  ;;  %v3964_v44 = vsel %vm3879_vm13, %v3963_v36, %v13476_v21  ;;  %v4387_v15 = vand.u32 3, %v4386_v56  ;;  %v13610_v36 = vsub.f32 %v13061_v32, %v14434_v39 }
 0x6b3   :  { %v3961_v7 = vxor.u32 2147483648, %v3960_v57  ;;  %v3966_v11 = vsel %vm13578_vm15, 0, %v3964_v44  ;;  %v13615_v44 = vsub.f32 %v13070_v54, %v14435_v29 }
 0x6b4   :  { %v4377_v47 = vxor.u32 2147483648, %v4376_v55  ;;  %v3970_v53 = vadd.s32 3, %v3966_v11  ;;  %vm4389_vm1 = vcmp.eq.s32.totalorder %v4387_v15, 0  ;;  %vm4392_vm2 = vcmp.eq.s32.totalorder %v4387_v15, 2 }
 0x6b5   :  { %v3962_v37 = vsel %vm3879_vm13, %v3961_v7, %v3960_v57  ;;  %v4403_v57 = vmul.f32 1.442695, %v14432_v59  ;;  %vm4388_vm5 = vcmp.lt.s32.totalorder %v4387_v15, 2  ;;  %v6689_v32 = vand.u32 4294901760, %v13610_v36 }
 0x6b6   :  { %v4378_v43 = vsel %vm4295_vm14, %v4377_v47, %v4376_v55  ;;  %v3965_v27 = vsel %vm13578_vm15, %v14415_v24, %v3962_v37  ;;  %v3971_v21 = vand.u32 3, %v3970_v53  ;;  %v6696_v56 = vand.u32 4294901760, %v13615_v44 }
 0x6b7   :  { %v4381_v30 = vsel %vm13587_vm0, %v14416_v52, %v4378_v43  ;;  %9985 = vcosq.f32 %v3965_v27  ;;  %v14436_v53 = vand.u32 4294901760, %v13076_v61  ;;  %v14437_v24 = vand.u32 4294901760, %v13081_v26 }
 0x6b8   :  { %9987 = vsinq.f32 %v3965_v27  ;;  %vm3973_vm3 = vcmp.eq.s32.totalorder %v3971_v21, 0  ;;  %vm3976_vm4 = vcmp.eq.s32.totalorder %v3971_v21, 2  ;;  %vm3972_vm6 = vcmp.lt.s32.totalorder %v3971_v21, 2 }
 0x6b9   :  { %9989 = vcosq.f32 %v4381_v30  ;;  %v13624_v54 = vsub.f32 %v13076_v61, %v14436_v53  ;;  %v6697_v61 = vsub.f32 %v13615_v44, %v6696_v56 }
 0x6ba   :  { %9991 = vsinq.f32 %v4381_v30  ;;  %v7320_v30 = vld [vmem:[%s13798_s11] ss:$0 sm:$0xff] }
 0x6bb   :  { %9993 = vpow2.f32 %v4403_v57 }
 0x6bc   :  { %9995 = vpow2.f32 %v4411_v2 }
 0x6c1   :  { %v9986_v33 = vpop.eup %9985 }
 0x6c2   :  { %v9988_v35 = vpop.eup %9987  ;;  %v3977_v7 = vxor.u32 2147483648, %v9986_v33 }
 0x6c3   :  { %v9990_v14 = vpop.eup %9989  ;;  %v3974_v55 = vxor.u32 2147483648, %v9988_v35 }
 0x6c4   :  { %v9992_v40 = vpop.eup %9991  ;;  %v4393_v28 = vxor.u32 2147483648, %v9990_v14  ;;  %v3978_v16 = vsel %vm3976_vm4, %v3977_v7, %v9988_v35  ;;  %v14438_v7 = vand.u32 4294901760, %v13103_v42 }
 0x6c5   :  { %v4390_v50 = vxor.u32 2147483648, %v9992_v40  ;;  %v3975_v6 = vsel %vm3973_vm3, %v9986_v33, %v3974_v55  ;;  %v9994_v43 = vpop.eup %9993 }
 0x6c6   :  { %v4394_v37 = vsel %vm4392_vm2, %v4393_v28, %v9992_v40  ;;  %v3979_v12 = vsel %vm3972_vm6, %v3975_v6, %v3978_v16  ;;  %v9996_v60 = vpop.eup %9995  ;;  %v6703_v28 = vand.u32 4294901760, %v13624_v54 }
 0x6c7   :  { %v4391_v47 = vsel %vm4389_vm1, %v9990_v14, %v4390_v50  ;;  %v3980_v59 = vsel %vm3969_vm8, nan, %v3979_v12  ;;  %v13629_v14 = vsub.f32 %v13081_v26, %v14437_v24  ;;  %v6690_v50 = vsub.f32 %v13610_v36, %v6689_v32 }
 0x6c8   :  { %v4395_v27 = vsel %vm4388_vm5, %v4391_v47, %v4394_v37  ;;  %v4416_v23 = vmul.f32 %v9994_v43, %v3980_v59  ;;  %v13649_v47 = vsub.f32 %v13103_v42, %v14438_v7  ;;  %v14439_v37 = vand.u32 4294901760, %v13108_v1 }
 0x6c9   :  { %v4396_v9 = vsel %vm4385_vm7, nan, %v4395_v27  ;;  %v6710_v26 = vand.u32 4294901760, %v13629_v14  ;;  %v6691_v12 = vand.u32 4294901760, %v6690_v50 }
 0x6ca   :  { %v4420_v57 = vmul.f32 %v9996_v60, %v4396_v9  ;;  %v13654_v6 = vsub.f32 %v13108_v1, %v14439_v37  ;;  %v6698_v60 = vand.u32 4294901760, %v6697_v61  ;;  %v6717_v39 = vand.u32 4294901760, %v13649_v47 }
 0x6cb   :  { %v6711_v1 = vsub.f32 %v13629_v14, %v6710_v26 }
 0x6cc   :  { %v6724_v29 = vand.u32 4294901760, %v13654_v6  ;;  %v9590_v59 = vpack.c.bf16 %v6698_v60, %v6691_v12 }
 0x751   :  { %v8383_v11 = vpop.f32.mrb[10].mxu0 }
 0x752   :  { %v9750_v33 = vadd.f32 %v8383_v11, %v7320_v30  ;;  %v6536_v2 = vpop.f32.mrb[11].mxu0 }
 0x753   :  { %v9751_v35 = vadd.f32 %v7320_v30, %v6536_v2  ;;  %v6704_v30 = vsub.f32 %v13624_v54, %v6703_v28  ;;  %v6718_v2 = vsub.f32 %v13649_v47, %v6717_v39 }
 0x754   :  { %v6547_v52 = vmul.f32 %v9750_v33, %v4420_v57 }
 0x755   :  { %v6546_v40 = vmul.f32 %v9751_v35, %v4416_v23  ;;  %v6705_v57 = vand.u32 4294901760, %v6704_v30  ;;  %v6712_v23 = vand.u32 4294901760, %v6711_v1  ;;  %v6725_v35 = vsub.f32 %v13654_v6, %v6724_v29 }
 0x756   :  { %v13631_v15 = vand.u32 4294901760, %v6547_v52 }
 0x757   :  { %v13633_v21 = vand.u32 4294901760, %v6546_v40  ;;  %v9594_v53 = vpack.c.bf16 %v6712_v23, %v6705_v57  ;;  %v6726_v24 = vand.u32 4294901760, %v6725_v35 }
 0x758   :  { %v13643_v55 = vsub.f32 %v6547_v52, %v13631_v15  ;;  %v6719_v52 = vand.u32 4294901760, %v6718_v2 }
 0x759   :  { %v13657_v16 = vsub.f32 %v6546_v40, %v13633_v21 }
 0x75a   :  { %v6664_v43 = vand.u32 4294901760, %v13643_v55  ;;  %v9598_v40 = vpack.c.bf16 %v6726_v24, %v6719_v52 }
 0x75b   :  { %v6654_v27 = vand.u32 4294901760, %v13657_v16 }
 0x75c   :  { %v6665_v42 = vsub.f32 %v13643_v55, %v6664_v43 }
 0x75d   :  { %v6655_v9 = vsub.f32 %v13657_v16, %v6654_v27 }
 0x75e   :  { %v6666_v33 = vand.u32 4294901760, %v6665_v42 }
 0x75f   :  { %v6656_v11 = vand.u32 4294901760, %v6655_v9 }
 0x761   :  { %8416 = vmatprep.mubr.f32.mxu1 %v6656_v11 }
 0x762   :  { %8417 = vmatmul.mubr.f32.vlgmr.msra.gmra.mrb[10].mxu1 %v6666_v33 }
 0x763   :  { %9589 = vmatpush3.bf16.msra.mxu1 %v13463_v10  ;;  %8451 = vmatprep.mubr.f32.mxu1 %v13633_v21  ;;  %v9622_v10 = vpack.c.bf16 %v13615_v44, %v13610_v36  ;;  %v14444_v36 = vand.u32 4294901760, %v13487_v8  ;;  %v14445_v44 = vand.u32 4294901760, %v13494_v63 }
 0x764   :  { %9591 = vmatprep.subr.bf16.mxu1 %v9590_v59 }
 0x767   :  { %9593 = vmatpush3.bf16.msra.mxu1 %v9590_v59 }
 0x768   :  { %9595 = vmatprep.subr.bf16.mxu1 %v9594_v53 }
 0x76b   :  { %9597 = vmatpush3.bf16.msra.mxu1 %v9594_v53 }
 0x76c   :  { %9599 = vmatprep.subr.bf16.mxu1 %v9598_v40 }
 0x76f   :  { %9601 = vmatpush3.bf16.msra.mxu1 %v9598_v40 }
 0x770   :  { %9603 = vmatprep.subr.bf16.mxu1 %v13499_v17 }
 0x773   :  { %9605 = vmatpush3.bf16.msra.mxu1 %v13499_v17  ;;  %v9626_v17 = vpack.c.bf16 %v13629_v14, %v13624_v54  ;;  %v14447_v54 = vld [vmem:[#allocation32_spill] sm:$0xff] }
 0x774   :  { %9607 = vmatprep.subr.bf16.mxu1 %v13536_v46  ;;  %v14448_v14 = vand.u32 4294901760, %v14447_v54 }
 0x777   :  { %9609 = vmatpush3.bf16.msra.mxu1 %v13536_v46  ;;  %v9630_v46 = vpack.c.bf16 %v13654_v6, %v13649_v47 }
 0x778   :  { %9611 = vmatprep.subr.bf16.mxu1 %v13540_v51 }
 0x77b   :  { %9613 = vmatpush3.bf16.msra.mxu1 %v13540_v51  ;;  %v14441_v51 = vand.u32 4294901760, %v13422_v31  ;;  %v9694_v31 = vpack.c.bf16 %v6724_v29, %v6717_v39 }
 0x77c   :  { %9615 = vmatprep.subr.bf16.mxu1 %v13552_v0 }
 0x77f   :  { %9617 = vmatpush3.bf16.msra.mxu1 %v13552_v0  ;;  %v9686_v0 = vpack.c.bf16 %v6696_v56, %v6689_v32  ;;  %v9702_v32 = vpack.c.bf16 %v14445_v44, %v14444_v36  ;;  %v14446_v56 = vand.u32 4294901760, %v13507_v45 }
 0x780   :  { %9619 = vmatprep.subr.bf16.mxu1 %v13550_v13 }
 0x781   :  { %v9706_v50 = vpack.c.bf16 %v14448_v14, %v14446_v56 }
 0x782   :  { %8452 = vmatmul.mubr.f32.vlgmr.msra.gmra.mrb[10].mxu1 %v13631_v15 }
 0x783   :  { %9621 = vmatpush3.bf16.msra.mxu1 %v13550_v13  ;;  %8486 = vmatprep.mubr.f32.mxu1 %v13657_v16 }
 0x784   :  { %9623 = vmatprep.subr.bf16.mxu1 %v9622_v10 }
 0x787   :  { %9625 = vmatpush3.bf16.msra.mxu1 %v9622_v10 }
 0x788   :  { %9627 = vmatprep.subr.bf16.mxu1 %v9626_v17 }
 0x78b   :  { %9629 = vmatpush3.bf16.msra.mxu1 %v9626_v17 }
 0x78c   :  { %9631 = vmatprep.subr.bf16.mxu1 %v9630_v46 }
 0x78f   :  { %9633 = vmatpush3.bf16.msra.mxu1 %v9630_v46 }
 0x790   :  { %9635 = vmatprep.subr.bf16.mxu1 %v13556_v5 }
 0x793   :  { %9637 = vmatpush3.bf16.msra.mxu1 %v13556_v5  ;;  %v14440_v5 = vand.u32 4294901760, %v13417_v48  ;;  %v9690_v48 = vpack.c.bf16 %v6710_v26, %v6703_v28 }
 0x794   :  { %9639 = vmatprep.subr.bf16.mxu1 %v13560_v58 }
 0x795   :  { %v9682_v13 = vpack.c.bf16 %v14441_v51, %v14440_v5 }
 0x797   :  { %9641 = vmatpush3.bf16.msra.mxu1 %v13560_v58  ;;  %v14442_v58 = vand.u32 4294901760, %v13469_v38  ;;  %v14449_v38 = vld [vmem:[#allocation36_spill] sm:$0xff] }
 0x798   :  { %9643 = vmatprep.subr.bf16.mxu1 %v13564_v22  ;;  %v14450_v61 = vand.u32 4294901760, %v14449_v38 }
 0x79b   :  { %9645 = vmatpush3.bf16.msra.mxu1 %v13564_v22  ;;  %v14443_v22 = vand.u32 4294901760, %v13472_v18  ;;  %v14451_v18 = vld [vmem:[#allocation10_spill] sm:$0xff] }
 0x79c   :  { %9647 = vmatprep.subr.bf16.mxu1 %v13568_v20  ;;  %v14452_v28 = vand.u32 4294901760, %v14451_v18 }
 0x79f   :  { %9649 = vmatpush3.bf16.msra.mxu1 %v13568_v20  ;;  %v9698_v20 = vpack.c.bf16 %v14443_v22, %v14442_v58 }
 0x7a0   :  { %9651 = vmatprep.subr.bf16.mxu1 %v13090_v34 }
 0x7a2   :  { %8487 = vmatmul.mubr.f32.vlgmr.msra.gmra.mrb[10].mxu1 %v13643_v55  ;;  %v9710_v55 = vpack.c.bf16 %v14452_v28, %v14450_v61 }
 0x7a3   :  { %9653 = vmatpush3.bf16.msra.mxu1 %v13090_v34  ;;  %8521 = vmatprep.mubr.f32.mxu1 %v6654_v27 }
 0x7a4   :  { %9655 = vmatprep.subr.bf16.mxu1 %v13098_v62 }
 0x7a7   :  { %9657 = vmatpush3.bf16.msra.mxu1 %v13098_v62 }
 0x7a8   :  { %9659 = vmatprep.subr.bf16.mxu1 %v13119_v49 }
 0x7ab   :  { %9661 = vmatpush3.bf16.msra.mxu1 %v13119_v49 }
 0x7ac   :  { %9663 = vmatprep.subr.bf16.mxu1 %v13129_v41 }
 0x7af   :  { %9665 = vmatpush3.bf16.msra.mxu1 %v13129_v41 }
 0x7b0   :  { %9667 = vmatprep.subr.bf16.mxu1 %v13369_v19 }
 0x7b3   :  { %9669 = vmatpush3.bf16.msra.mxu1 %v13369_v19 }
 0x7b4   :  { %9671 = vmatprep.subr.bf16.mxu1 %v13388_v4 }
 0x7b7   :  { %9673 = vmatpush3.bf16.msra.mxu1 %v13388_v4 }
 0x7b8   :  { %9675 = vmatprep.subr.bf16.mxu1 %v13411_v3 }
 0x7bb   :  { %9677 = vmatpush3.bf16.msra.mxu1 %v13411_v3 }
 0x7bc   :  { %9679 = vmatprep.subr.bf16.mxu1 %v13446_v25 }
 0x7bf   :  { %9681 = vmatpush3.bf16.msra.mxu1 %v13446_v25 }
 0x7c0   :  { %9683 = vmatprep.subr.bf16.mxu1 %v9682_v13 }
 0x7c2   :  { %8522 = vmatmul.mubr.f32.vlgmr.msra.gmra.mrb[10].mxu1 %v6664_v43 }
 0x7c3   :  { %9685 = vmatpush3.bf16.msra.mxu1 %v9682_v13  ;;  %8556 = vmatprep.mubr.f32.mxu1 %v13633_v21 }
 0x7c4   :  { %9687 = vmatprep.subr.bf16.mxu1 %v9686_v0 }
 0x7c7   :  { %9689 = vmatpush3.bf16.msra.mxu1 %v9686_v0 }
 0x7c8   :  { %9691 = vmatprep.subr.bf16.mxu1 %v9690_v48 }
 0x7cb   :  { %9693 = vmatpush3.bf16.msra.mxu1 %v9690_v48 }
 0x7cc   :  { %9695 = vmatprep.subr.bf16.mxu1 %v9694_v31 }
 0x7cf   :  { %9697 = vmatpush3.bf16.msra.mxu1 %v9694_v31 }
 0x7d0   :  { %9699 = vmatprep.subr.bf16.mxu1 %v9698_v20 }
 0x7d3   :  { %9701 = vmatpush3.bf16.msra.mxu1 %v9698_v20 }
 0x7d4   :  { %9703 = vmatprep.subr.bf16.mxu1 %v9702_v32 }
 0x7d7   :  { %9705 = vmatpush3.bf16.msra.mxu1 %v9702_v32 }
 0x7d8   :  { %9707 = vmatprep.subr.bf16.mxu1 %v9706_v50 }
 0x7db   :  { %9709 = vmatpush3.bf16.msra.mxu1 %v9706_v50 }
 0x7dc   :  { %9711 = vmatprep.subr.bf16.mxu1 %v9710_v55 }
 0x7df   :  { %9713 = vmatpush3.bf16.msra.mxu1 %v9710_v55 }
 0x7e0   :  { %9715 = vmatprep.subr.bf16.mxu1 %v13090_v34 }
 0x7e2   :  { %8557 = vmatmul.mubr.f32.vlgmr.msra.gmra.mrb[10].mxu1 %v13631_v15 }
 0x7e3   :  { %9717 = vmatpush3.bf16.msra.mxu1 %v13090_v34  ;;  %8591 = vmatprep.mubr.f32.mxu1 %v13633_v21  ;;  %v7321_v34 = vld [vmem:[%s13800_s13] ss:$0 sm:$0xff] }
 0x7e4   :  { %9719 = vmatprep.subr.bf16.mxu1 %v13098_v62 }
 0x7e7   :  { %9721 = vmatpush3.bf16.msra.mxu1 %v13098_v62 }
 0x7e8   :  { %9723 = vmatprep.subr.bf16.mxu1 %v13119_v49 }
 0x7eb   :  { %9725 = vmatpush3.bf16.msra.mxu1 %v13119_v49 }
 0x7ec   :  { %9727 = vmatprep.subr.bf16.mxu1 %v13129_v41 }
 0x7ef   :  { %9729 = vmatpush3.bf16.msra.mxu1 %v13129_v41 }
 0x7f0   :  { %9731 = vmatprep.subr.bf16.mxu1 %v13369_v19 }
 0x7f3   :  { %9733 = vmatpush3.bf16.msra.mxu1 %v13369_v19 }
 0x7f4   :  { %9735 = vmatprep.subr.bf16.mxu1 %v13388_v4 }
 0x7f7   :  { %9737 = vmatpush3.bf16.msra.mxu1 %v13388_v4 }
 0x7f8   :  { %9739 = vmatprep.subr.bf16.mxu1 %v13411_v3 }
 0x7fb   :  { %9741 = vmatpush3.bf16.msra.mxu1 %v13411_v3 }
 0x7fc   :  { %9743 = vmatprep.subr.bf16.mxu1 %v13446_v25 }
 0x7ff   :  { %9745 = vmatpush3.bf16.msra.mxu1 %v13446_v25 }
 0x802   :  { %8592 = vmatmul.mubr.f32.vlgmr.msra.gmra.mrb[10].mxu1 %v13631_v15 }
 0x8d5   :  { %v8593_v62 = vpop.f32.mrb[10].mxu1 }
 0x8d6   :  { %v9752_v49 = vadd.f32 %v8593_v62, %v7321_v34  ;;  %v7245_v41 = vpop.f32.mrb[11].mxu1 }
 0x8d7   :  { %v9753_v19 = vadd.f32 %v7321_v34, %v7245_v41 }
 0x8d8   :  { %7257 = vst.msk [vmem:[%s13801_s14 + $0x8] sm:$0xff] %vm7255_vm9, %v9752_v49 }
 0x8d9   :  { %7256 = vst.msk [vmem:[%s13801_s14] sm:$0xff] %vm7255_vm9, %v9753_v19 }
 0x8da   :  { %7262 = vsyncpa [#allocation3], 1 }
 0x8db   :  { %7263 = vsyncpa [#allocation5], 1 }

</bundles_post_ra>
